<compile_context>
chip_gen: v5e
topology: v5e:2x2
jax: 0.10.0
libtpu: 0.0.40
codegen_flags: <defaults>
</compile_context>

<pallas_src>
import jax
import jax.numpy as jnp
from jax.experimental import pallas as pl
from jax.experimental.pallas import tpu as pltpu

EDGE_FEATURES = 128          # edge_features (output hidden of both edge embeddings)
NUM_POS_EMB   = 16           # num_positional_embeddings
NUM_RBF       = 16           # num_rbf
NUM_RBF_SC    = 8            # num_rbf_sc
TOP_K         = 30           # top_k
MAX_REL       = 32           # max_relative_feature

_SIGMA_SC = (22.0 - 2.0) / NUM_RBF_SC                          # 2.5
_INV_SIGMA_SC = 1.0 / _SIGMA_SC
_MU_SC = tuple(2.0 + k * (22.0 - 2.0) / (NUM_RBF_SC - 1) for k in range(NUM_RBF_SC))


# -------------------- shared in-kernel LayerNorm (one-pass stats) -----------

def _layernorm(y, g, b, eps=1e-5):
    mu = jnp.mean(y, axis=-1, keepdims=True)
    var = jnp.maximum(jnp.mean(y * y, axis=-1, keepdims=True) - mu * mu, 0.0)
    return (y - mu) * jax.lax.rsqrt(var + eps) * g + b


# -------------------- Pallas kernels -----------------------------------------

def _edge_kernel(pos_ref, rbf_ref, wp_ref, wr_ref, g_ref, b_ref, o_ref):
    # pos: [TM,16] bf16, rbf: [TM,400] bf16, wp: [16,H] bf16, wr: [400,H] bf16
    y = jnp.dot(pos_ref[...], wp_ref[...], preferred_element_type=jnp.float32)
    y = y + jnp.dot(rbf_ref[...], wr_ref[...], preferred_element_type=jnp.float32)
    o_ref[...] = _layernorm(y, g_ref[...], b_ref[...]).astype(o_ref.dtype)


def _side_kernel(d_ref, m_ref, w_ref, g_ref, b_ref, o_ref):
    # d: [TM,160] f32 distances (anchor-major, atom-minor), m: [TM,160] bf16 mask
    # w: [8,160,H] bf16 (bin-sliced edge_embedding_s weight)
    t = d_ref[...] * _INV_SIGMA_SC                       # hoisted scale
    m = m_ref[...].astype(jnp.float32)
    y = jnp.zeros((t.shape[0], o_ref.shape[-1]), jnp.float32)
    for k in range(NUM_RBF_SC):                          # static unroll (8)
        z = t - (_MU_SC[k] * _INV_SIGMA_SC)
        rbf = jnp.exp(-(z * z)) * m                      # RBF bin + atom-mask multiply
        y = y + jnp.dot(rbf.astype(jnp.bfloat16), w_ref[k],
                        preferred_element_type=jnp.float32)
    o_ref[...] = _layernorm(y, g_ref[...], b_ref[...]).astype(o_ref.dtype)


def _choose_tm(M, tm_max=512):
    # big tile to amortize per-step overhead, but keep >=4 grid steps when
    # possible (v7x: 2 TCs share the "parallel" row axis); multiple of 8.
    quarter = -(-M // 4)
    t = max(128, min(tm_max, ((quarter + 7) // 8) * 8))
    rows = ((M + 7) // 8) * 8
    return max(8, min(t, rows))


def edge_embed_layernorm(pos, rbf, w_pos, w_rbf, gamma, beta, tm_max=512):
    """pos:[M,16]bf16, rbf:[M,400]bf16, w_pos:[16,H]bf16, w_rbf:[400,H]bf16 -> [M,H]f32."""
    M, Fp = pos.shape
    Fr = rbf.shape[1]
    H = w_pos.shape[1]
    tm = _choose_tm(M, tm_max)
    return pl.pallas_call(
        _edge_kernel,
        out_shape=jax.ShapeDtypeStruct((M, H), jnp.float32),
        grid_spec=pltpu.PrefetchScalarGridSpec(
            num_scalar_prefetch=0,
            grid=(pl.cdiv(M, tm),),
            in_specs=[
                pl.BlockSpec((tm, Fp), lambda i: (i, 0)),
                pl.BlockSpec((tm, Fr), lambda i: (i, 0)),
                pl.BlockSpec((Fp, H), lambda i: (0, 0)),
                pl.BlockSpec((Fr, H), lambda i: (0, 0)),
                pl.BlockSpec((1, H), lambda i: (0, 0)),
                pl.BlockSpec((1, H), lambda i: (0, 0)),
            ],
            out_specs=pl.BlockSpec((tm, H), lambda i: (i, 0)),
        ),
        compiler_params=pltpu.CompilerParams(dimension_semantics=("parallel",)),
    )(pos, rbf, w_pos, w_rbf, gamma.reshape(1, H), beta.reshape(1, H))


def side_embed_layernorm(dists, mask160, w_bins, gamma, beta, tm_max=512):
    """dists:[M,160]f32, mask160:[M,160]bf16, w_bins:[8,160,H]bf16 -> [M,H]f32."""
    M, F = dists.shape
    H = w_bins.shape[-1]
    nb = w_bins.shape[0]
    tm = _choose_tm(M, tm_max)
    return pl.pallas_call(
        _side_kernel,
        out_shape=jax.ShapeDtypeStruct((M, H), jnp.float32),
        grid_spec=pltpu.PrefetchScalarGridSpec(
            num_scalar_prefetch=0,
            grid=(pl.cdiv(M, tm),),
            in_specs=[
                pl.BlockSpec((tm, F), lambda i: (i, 0)),
                pl.BlockSpec((tm, F), lambda i: (i, 0)),
                pl.BlockSpec((nb, F, H), lambda i: (0, 0, 0)),
                pl.BlockSpec((1, H), lambda i: (0, 0)),
                pl.BlockSpec((1, H), lambda i: (0, 0)),
            ],
            out_specs=pl.BlockSpec((tm, H), lambda i: (i, 0)),
        ),
        compiler_params=pltpu.CompilerParams(dimension_semantics=("parallel",)),
    )(dists, mask160, w_bins, gamma.reshape(1, H), beta.reshape(1, H))


# -------------------- JAX glue (top-k / gathers / RBF construction) ---------

def gather_nodes(nodes, neighbor_idx):
    # nodes: [B, L, ...], neighbor_idx: [B, L, K] -> [B, L, K, ...]
    return jax.vmap(lambda n, i: n[i])(nodes, neighbor_idx)


def _rbf(D, count):
    mu = jnp.linspace(2.0, 22.0, count)
    sigma = (22.0 - 2.0) / count
    return jnp.exp(-(((D[..., None] - mu) / sigma) ** 2))


def protein_features_forward(params, X, mask, atom_mask, residue_idx, chain_labels):
    """X: [B, L, 37, 3] f32; mask: [B, L]; atom_mask: [B, L, 37];
    residue_idx / chain_labels: [B, L] int32. (eval mode: no noise, no dropout)"""
    Bsz, Lseq = mask.shape

    b = X[:, :, 1, :] - X[:, :, 0, :]
    c = X[:, :, 2, :] - X[:, :, 1, :]
    a = jnp.cross(b, c)
    Cb = -0.58273431 * a + 0.56802827 * b - 0.54067466 * c + X[:, :, 1, :]
    Ca = X[:, :, 1, :]
    N = X[:, :, 0, :]
    C = X[:, :, 2, :]
    O = X[:, :, 4, :]

    # ---- _dist: pairwise Ca distances + top-k nearest neighbors ----
    mask_2D = mask[:, None, :] * mask[:, :, None]
    dX = Ca[:, None, :, :] - Ca[:, :, None, :]
    D = mask_2D * jnp.sqrt(jnp.sum(dX ** 2, 3) + 1e-6)
    D_max = jnp.max(D, -1, keepdims=True)
    D_adjust = D + (1.0 - mask_2D) * D_max
    K = min(TOP_K, Lseq)
    # TODO(synk): torch.topk(largest=False) emulated via lax.top_k on negated
    # distances; tie-break order of equal distances may differ.
    neg_vals, E_idx = jax.lax.top_k(-D_adjust, K)
    D_neighbors = -neg_vals

    anchors = {"N": N, "Ca": Ca, "C": C, "O": O, "Cb": Cb}
    # O(B*L*K): gather each anchor's neighbor coordinates once (no [B,L,L] matrices)
    neigh = {nm: gather_nodes(v, E_idx) for nm, v in anchors.items()}   # [B,L,K,3]

    pair_names = [("N", "N"), ("C", "C"), ("O", "O"), ("Cb", "Cb"),
                  ("Ca", "N"), ("Ca", "C"), ("Ca", "O"), ("Ca", "Cb"),
                  ("N", "C"), ("N", "O"), ("N", "Cb"),
                  ("Cb", "C"), ("Cb", "O"), ("O", "C"),
                  ("N", "Ca"), ("C", "Ca"), ("O", "Ca"), ("Cb", "Ca"),
                  ("C", "N"), ("O", "N"), ("Cb", "N"),
                  ("C", "Cb"), ("O", "Cb"), ("C", "O")]

    RBF_all = [_rbf(D_neighbors, NUM_RBF).astype(jnp.bfloat16)]
    for an, bn in pair_names:
        Dab = jnp.sqrt(jnp.sum((anchors[an][:, :, None, :] - neigh[bn]) ** 2, -1) + 1e-6)
        RBF_all.append(_rbf(Dab, NUM_RBF).astype(jnp.bfloat16))
    RBF_all = jnp.concatenate(RBF_all, axis=-1)             # [B, L, K, 400] bf16

    # ---- positional encodings (gathered directly via E_idx, no [B,L,L]) ----
    res_g = gather_nodes(residue_idx[..., None], E_idx)[..., 0]        # [B,L,K]
    offset = residue_idx[:, :, None] - res_g
    chain_g = gather_nodes(chain_labels[..., None], E_idx)[..., 0]     # [B,L,K]
    E_chains = (chain_labels[:, :, None] - chain_g == 0).astype(jnp.int32)
    dpos = jnp.clip(offset + MAX_REL, 0, 2 * MAX_REL) * E_chains \
        + (1 - E_chains) * (2 * MAX_REL + 1)
    # one_hot(d, 66) @ W.T + b  ==  embedding lookup
    E_positional = (params["pos_w"][dpos] + params["pos_b"]).astype(jnp.bfloat16)

    # ---- edge path: fused (dot+dot) + LayerNorm, no 416-wide concat ----
    M_e = Bsz * Lseq * K
    pos_flat = E_positional.reshape(M_e, NUM_POS_EMB)
    rbf_flat = RBF_all.reshape(M_e, NUM_RBF * 25)
    w_pos = params["w_e"][:NUM_POS_EMB].astype(jnp.bfloat16)
    w_rbf = params["w_e"][NUM_POS_EMB:].astype(jnp.bfloat16)
    E_out = edge_embed_layernorm(pos_flat, rbf_flat, w_pos, w_rbf,
                                 params["g_e"], params["b_e"])
    E_out = E_out.reshape(Bsz, Lseq, K, EDGE_FEATURES)

    # ---- sidechain path: distances only; RBF expansion fused into the kernel ----
    Ks = min(K, 100)
    E_idx_sub = E_idx[:, :, :Ks]
    atom_mask_g = gather_nodes(atom_mask, E_idx_sub)         # [B, L, Ks, 37]
    side_mask = atom_mask_g[:, :, :, 5:37]                   # [B, L, Ks, 32]
    X_side = X[:, :, 5:37, :]                                # [B, L, 32, 3]
    Xn = gather_nodes(X_side, E_idx_sub)                     # [B, L, Ks, 32, 3]

    D_side = []
    for nm in ("N", "Ca", "C", "O", "Cb"):                   # anchor-major order
        A_ = anchors[nm]
        Dp = jnp.sqrt(jnp.sum((A_[:, :, None, None, :] - Xn) ** 2, -1) + 1e-6)
        D_side.append(Dp)                                    # [B, L, Ks, 32]
    D_side = jnp.stack(D_side, axis=3)                       # [B, L, Ks, 5, 32]

    M_s = Bsz * Lseq * Ks
    d_flat = D_side.reshape(M_s, 5 * 32)
    m_flat = jnp.broadcast_to(side_mask[:, :, :, None, :],
                              (Bsz, Lseq, Ks, 5, 32)).reshape(M_s, 5 * 32) \
                .astype(jnp.bfloat16)                        # 0/1 mask: exact in bf16
    # edge_embedding_s weight [1280,128] -> bin-sliced [8, 160, 128]
    w_s_r = params["w_s"].reshape(5 * 32, NUM_RBF_SC, EDGE_FEATURES) \
                         .transpose(1, 0, 2).astype(jnp.bfloat16)
    Es_out = side_embed_layernorm(d_flat, m_flat, w_s_r,
                                  params["g_s"], params["b_s"])
    Es_out = Es_out.reshape(Bsz, Lseq, Ks, EDGE_FEATURES)

    return E_out, E_idx, Es_out, E_idx_sub


# -------------------- deterministic parameter init --------------------------

def init_params(key):
    ks = jax.random.split(key, 4)
    s = 0.02
    edge_in = NUM_POS_EMB + NUM_RBF * 25          # 416
    side_in = NUM_RBF_SC * 32 * 5                 # 1280
    return dict(
        pos_w=s * jax.random.normal(ks[0], (2 * MAX_REL + 2, NUM_POS_EMB), jnp.float32),
        pos_b=s * jax.random.normal(ks[1], (NUM_POS_EMB,), jnp.float32),
        w_e=s * jax.random.normal(ks[2], (edge_in, EDGE_FEATURES), jnp.float32),
        g_e=jnp.ones((EDGE_FEATURES,), jnp.float32),
        b_e=jnp.zeros((EDGE_FEATURES,), jnp.float32),
        w_s=s * jax.random.normal(ks[3], (side_in, EDGE_FEATURES), jnp.float32),
        g_s=jnp.ones((EDGE_FEATURES,), jnp.float32),
        b_s=jnp.zeros((EDGE_FEATURES,), jnp.float32),
    )


if __name__ == "__main__":
    key = jax.random.PRNGKey(0)
    kx, km, kp = jax.random.split(key, 3)
    B, L, A = 2, 16, 37
    X = 3.0 * jax.random.normal(kx, (B, L, A, 3), jnp.float32)
    mask = jnp.ones((B, L), jnp.float32)
    atom_mask = (jax.random.uniform(km, (B, L, A)) > 0.2).astype(jnp.float32)
    residue_idx = jnp.broadcast_to(jnp.arange(L, dtype=jnp.int32), (B, L))
    chain_labels = jnp.concatenate(
        [jnp.zeros((B, L // 2), jnp.int32), jnp.ones((B, L - L // 2), jnp.int32)], axis=1)
    params = init_params(kp)

    fwd = jax.jit(protein_features_forward)
    E, E_idx, E_s, E_idx_sub = fwd(params, X, mask, atom_mask, residue_idx, chain_labels)
    jax.block_until_ready((E, E_idx, E_s, E_idx_sub))

    K = min(TOP_K, L)
    assert E.shape == (B, L, K, EDGE_FEATURES)
    assert E_idx.shape == (B, L, K)
    assert E_s.shape == (B, L, min(K, 100), EDGE_FEATURES)
    assert E_idx_sub.shape == (B, L, min(K, 100))
    assert bool(jnp.isfinite(E).all()) and bool(jnp.isfinite(E_s).all())
    print("KERNEL_OK")
</pallas_src>

<mosaic_0001>
module attributes {stable_mosaic.version = 11 : i64} {
  func.func @_edge_kernel(%arg0: i32, %arg1: memref<128x16xbf16, #tpu.memory_space<vmem>>, %arg2: memref<128x400xbf16, #tpu.memory_space<vmem>>, %arg3: memref<16x128xbf16, #tpu.memory_space<vmem>>, %arg4: memref<400x128xbf16, #tpu.memory_space<vmem>>, %arg5: memref<1x128xf32, #tpu.memory_space<vmem>>, %arg6: memref<1x128xf32, #tpu.memory_space<vmem>>, %arg7: memref<128x128xf32, #tpu.memory_space<vmem>>) attributes {dimension_semantics = [#tpu.dimension_semantics<parallel>], iteration_bounds = array<i64: 4>, scalar_prefetch = 0 : i64, scratch_operands = 0 : i64, tpu.core_type = #tpu.core_type<tc>, window_params = [{transform_indices = @transform_0, window_bounds = array<i64: 128, 16>}, {transform_indices = @transform_1, window_bounds = array<i64: 128, 400>}, {pipeline_mode = #tpu.pipeline_mode<synchronous>, transform_indices = @transform_2, window_bounds = array<i64: 16, 128>}, {pipeline_mode = #tpu.pipeline_mode<synchronous>, transform_indices = @transform_3, window_bounds = array<i64: 400, 128>}, {pipeline_mode = #tpu.pipeline_mode<synchronous>, transform_indices = @transform_4, window_bounds = array<i64: 1, 128>}, {pipeline_mode = #tpu.pipeline_mode<synchronous>, transform_indices = @transform_5, window_bounds = array<i64: 1, 128>}, {transform_indices = @transform_6, window_bounds = array<i64: 128, 128>}]} {
    %c0 = arith.constant 0 : index
    %c0_0 = arith.constant 0 : index
    %0 = vector.load %arg1[%c0, %c0_0] : memref<128x16xbf16, #tpu.memory_space<vmem>>, vector<128x16xbf16>
    %c0_1 = arith.constant 0 : index
    %c0_2 = arith.constant 0 : index
    %1 = vector.load %arg3[%c0_1, %c0_2] : memref<16x128xbf16, #tpu.memory_space<vmem>>, vector<16x128xbf16>
    %cst = arith.constant dense<0.000000e+00> : vector<128x128xf32>
    %2 = tpu.matmul %0, %1, %cst {dimension_numbers = #tpu.dot_dimension_numbers<[1], [0], [0], [1], [0, 0, 1, 1], [], []>} : vector<128x16xbf16>, vector<16x128xbf16>, vector<128x128xf32> -> vector<128x128xf32>
    %c0_3 = arith.constant 0 : index
    %c0_4 = arith.constant 0 : index
    %3 = vector.load %arg2[%c0_3, %c0_4] : memref<128x400xbf16, #tpu.memory_space<vmem>>, vector<128x400xbf16>
    %c0_5 = arith.constant 0 : index
    %c0_6 = arith.constant 0 : index
    %4 = vector.load %arg4[%c0_5, %c0_6] : memref<400x128xbf16, #tpu.memory_space<vmem>>, vector<400x128xbf16>
    %cst_7 = arith.constant dense<0.000000e+00> : vector<128x128xf32>
    %5 = tpu.matmul %3, %4, %cst_7 {dimension_numbers = #tpu.dot_dimension_numbers<[1], [0], [0], [1], [0, 0, 1, 1], [], []>} : vector<128x400xbf16>, vector<400x128xbf16>, vector<128x128xf32> -> vector<128x128xf32>
    %6 = arith.addf %2, %5 : vector<128x128xf32>
    %c0_8 = arith.constant 0 : index
    %c0_9 = arith.constant 0 : index
    %7 = vector.load %arg5[%c0_8, %c0_9] : memref<1x128xf32, #tpu.memory_space<vmem>>, vector<1x128xf32>
    %c0_10 = arith.constant 0 : index
    %c0_11 = arith.constant 0 : index
    %8 = vector.load %arg6[%c0_10, %c0_11] : memref<1x128xf32, #tpu.memory_space<vmem>>, vector<1x128xf32>
    %cst_12 = arith.constant dense<0.000000e+00> : vector<128xf32>
    %9 = vector.multi_reduction <add>, %6, %cst_12 [1] : vector<128x128xf32> to vector<128xf32>
    %10 = vector.shape_cast %9 : vector<128xf32> to vector<128x1xf32>
    %cst_13 = arith.constant 1.280000e+02 : f32
    %11 = vector.broadcast %cst_13 : f32 to vector<128x1xf32>
    %12 = arith.divf %10, %11 : vector<128x1xf32>
    %13 = arith.mulf %6, %6 : vector<128x128xf32>
    %cst_14 = arith.constant dense<0.000000e+00> : vector<128xf32>
    %14 = vector.multi_reduction <add>, %13, %cst_14 [1] : vector<128x128xf32> to vector<128xf32>
    %15 = vector.shape_cast %14 : vector<128xf32> to vector<128x1xf32>
    %cst_15 = arith.constant 1.280000e+02 : f32
    %16 = vector.broadcast %cst_15 : f32 to vector<128x1xf32>
    %17 = arith.divf %15, %16 : vector<128x1xf32>
    %18 = arith.mulf %12, %12 : vector<128x1xf32>
    %19 = arith.subf %17, %18 : vector<128x1xf32>
    %cst_16 = arith.constant 0.000000e+00 : f32
    %20 = vector.broadcast %cst_16 : f32 to vector<128x1xf32>
    %21 = arith.maximumf %19, %20 : vector<128x1xf32>
    %22 = vector.broadcast %12 : vector<128x1xf32> to vector<128x128xf32>
    %23 = arith.subf %6, %22 : vector<128x128xf32>
    %cst_17 = arith.constant 9.99999974E-6 : f32
    %24 = vector.broadcast %cst_17 : f32 to vector<128x1xf32>
    %25 = arith.addf %21, %24 : vector<128x1xf32>
    %26 = math.rsqrt %25 : vector<128x1xf32>
    %27 = vector.broadcast %26 : vector<128x1xf32> to vector<128x128xf32>
    %28 = arith.mulf %23, %27 : vector<128x128xf32>
    %29 = vector.broadcast %7 : vector<1x128xf32> to vector<128x128xf32>
    %30 = arith.mulf %28, %29 : vector<128x128xf32>
    %31 = vector.broadcast %8 : vector<1x128xf32> to vector<128x128xf32>
    %32 = arith.addf %30, %31 : vector<128x128xf32>
    %c0_18 = arith.constant 0 : index
    %c0_19 = arith.constant 0 : index
    %33 = vector.load %arg7[%c0_18, %c0_19] : memref<128x128xf32, #tpu.memory_space<vmem>>, vector<128x128xf32>
    tpu.vector_store %arg7[%c0_18, %c0_19], %32 {strides = array<i32>} : memref<128x128xf32, #tpu.memory_space<vmem>>, vector<128x128xf32>,
    return
  }
  func.func @transform_0(%arg0: i32) -> (i32, i32) {
    %c0_i32 = arith.constant 0 : i32
    %c0_i32_0 = arith.constant 0 : i32
    return %arg0, %c0_i32 : i32, i32
  }
  func.func @transform_1(%arg0: i32) -> (i32, i32) {
    %c0_i32 = arith.constant 0 : i32
    %c0_i32_0 = arith.constant 0 : i32
    return %arg0, %c0_i32 : i32, i32
  }
  func.func @transform_2(%arg0: i32) -> (i32, i32) {
    %c0_i32 = arith.constant 0 : i32
    %c0_i32_0 = arith.constant 0 : i32
    %c0_i32_1 = arith.constant 0 : i32
    return %c0_i32, %c0_i32_0 : i32, i32
  }
  func.func @transform_3(%arg0: i32) -> (i32, i32) {
    %c0_i32 = arith.constant 0 : i32
    %c0_i32_0 = arith.constant 0 : i32
    %c0_i32_1 = arith.constant 0 : i32
    return %c0_i32, %c0_i32_0 : i32, i32
  }
  func.func @transform_4(%arg0: i32) -> (i32, i32) {
    %c0_i32 = arith.constant 0 : i32
    %c0_i32_0 = arith.constant 0 : i32
    %c0_i32_1 = arith.constant 0 : i32
    return %c0_i32, %c0_i32_0 : i32, i32
  }
  func.func @transform_5(%arg0: i32) -> (i32, i32) {
    %c0_i32 = arith.constant 0 : i32
    %c0_i32_0 = arith.constant 0 : i32
    %c0_i32_1 = arith.constant 0 : i32
    return %c0_i32, %c0_i32_0 : i32, i32
  }
  func.func @transform_6(%arg0: i32) -> (i32, i32) {
    %c0_i32 = arith.constant 0 : i32
    %c0_i32_0 = arith.constant 0 : i32
    return %arg0, %c0_i32 : i32, i32
  }
}

module attributes {stable_mosaic.version = 11 : i64} {
  func.func @_side_kernel(%arg0: i32, %arg1: memref<128x160xf32, #tpu.memory_space<vmem>>, %arg2: memref<128x160xbf16, #tpu.memory_space<vmem>>, %arg3: memref<8x160x128xbf16, #tpu.memory_space<vmem>>, %arg4: memref<1x128xf32, #tpu.memory_space<vmem>>, %arg5: memref<1x128xf32, #tpu.memory_space<vmem>>, %arg6: memref<128x128xf32, #tpu.memory_space<vmem>>) attributes {dimension_semantics = [#tpu.dimension_semantics<parallel>], iteration_bounds = array<i64: 4>, scalar_prefetch = 0 : i64, scratch_operands = 0 : i64, tpu.core_type = #tpu.core_type<tc>, window_params = [{transform_indices = @transform_0, window_bounds = array<i64: 128, 160>}, {transform_indices = @transform_1, window_bounds = array<i64: 128, 160>}, {pipeline_mode = #tpu.pipeline_mode<synchronous>, transform_indices = @transform_2, window_bounds = array<i64: 8, 160, 128>}, {pipeline_mode = #tpu.pipeline_mode<synchronous>, transform_indices = @transform_3, window_bounds = array<i64: 1, 128>}, {pipeline_mode = #tpu.pipeline_mode<synchronous>, transform_indices = @transform_4, window_bounds = array<i64: 1, 128>}, {transform_indices = @transform_5, window_bounds = array<i64: 128, 128>}]} {
    %c0 = arith.constant 0 : index
    %c0_0 = arith.constant 0 : index
    %0 = vector.load %arg1[%c0, %c0_0] : memref<128x160xf32, #tpu.memory_space<vmem>>, vector<128x160xf32>
    %cst = arith.constant 4.000000e-01 : f32
    %1 = vector.broadcast %cst : f32 to vector<128x160xf32>
    %2 = arith.mulf %0, %1 : vector<128x160xf32>
    %c0_1 = arith.constant 0 : index
    %c0_2 = arith.constant 0 : index
    %3 = vector.load %arg2[%c0_1, %c0_2] : memref<128x160xbf16, #tpu.memory_space<vmem>>, vector<128x160xbf16>
    %4 = arith.extf %3 : vector<128x160xbf16> to vector<128x160xf32>
    %cst_3 = arith.constant 0.000000e+00 : f32
    %5 = vector.broadcast %cst_3 : f32 to vector<128x128xf32>
    %cst_4 = arith.constant 8.000000e-01 : f32
    %6 = vector.broadcast %cst_4 : f32 to vector<128x160xf32>
    %7 = arith.subf %2, %6 : vector<128x160xf32>
    %8 = arith.mulf %7, %7 : vector<128x160xf32>
    %cst_5 = arith.constant 0.000000e+00 : f32
    %9 = vector.broadcast %cst_5 : f32 to vector<128x160xf32>
    %10 = arith.subf %9, %8 : vector<128x160xf32>
    %11 = math.exp %10 : vector<128x160xf32>
    %12 = arith.mulf %11, %4 : vector<128x160xf32>
    %13 = arith.truncf %12 : vector<128x160xf32> to vector<128x160xbf16>
    %c0_6 = arith.constant 0 : index
    %c0_7 = arith.constant 0 : index
    %c0_8 = arith.constant 0 : index
    %14 = vector.load %arg3[%c0_6, %c0_7, %c0_8] : memref<8x160x128xbf16, #tpu.memory_space<vmem>>, vector<1x160x128xbf16>
    %15 = vector.shape_cast %14 : vector<1x160x128xbf16> to vector<160x128xbf16>
    %cst_9 = arith.constant dense<0.000000e+00> : vector<128x128xf32>
    %16 = tpu.matmul %13, %15, %cst_9 {dimension_numbers = #tpu.dot_dimension_numbers<[1], [0], [0], [1], [0, 0, 1, 1], [], []>} : vector<128x160xbf16>, vector<160x128xbf16>, vector<128x128xf32> -> vector<128x128xf32>
    %17 = arith.addf %5, %16 : vector<128x128xf32>
    %cst_10 = arith.constant 1.94285715 : f32
    %18 = vector.broadcast %cst_10 : f32 to vector<128x160xf32>
    %19 = arith.subf %2, %18 : vector<128x160xf32>
    %20 = arith.mulf %19, %19 : vector<128x160xf32>
    %cst_11 = arith.constant 0.000000e+00 : f32
    %21 = vector.broadcast %cst_11 : f32 to vector<128x160xf32>
    %22 = arith.subf %21, %20 : vector<128x160xf32>
    %23 = math.exp %22 : vector<128x160xf32>
    %24 = arith.mulf %23, %4 : vector<128x160xf32>
    %25 = arith.truncf %24 : vector<128x160xf32> to vector<128x160xbf16>
    %c1 = arith.constant 1 : index
    %c0_12 = arith.constant 0 : index
    %c0_13 = arith.constant 0 : index
    %26 = vector.load %arg3[%c1, %c0_12, %c0_13] : memref<8x160x128xbf16, #tpu.memory_space<vmem>>, vector<1x160x128xbf16>
    %27 = vector.shape_cast %26 : vector<1x160x128xbf16> to vector<160x128xbf16>
    %cst_14 = arith.constant dense<0.000000e+00> : vector<128x128xf32>
    %28 = tpu.matmul %25, %27, %cst_14 {dimension_numbers = #tpu.dot_dimension_numbers<[1], [0], [0], [1], [0, 0, 1, 1], [], []>} : vector<128x160xbf16>, vector<160x128xbf16>, vector<128x128xf32> -> vector<128x128xf32>
    %29 = arith.addf %17, %28 : vector<128x128xf32>
    %cst_15 = arith.constant 3.08571434 : f32
    %30 = vector.broadcast %cst_15 : f32 to vector<128x160xf32>
    %31 = arith.subf %2, %30 : vector<128x160xf32>
    %32 = arith.mulf %31, %31 : vector<128x160xf32>
    %cst_16 = arith.constant 0.000000e+00 : f32
    %33 = vector.broadcast %cst_16 : f32 to vector<128x160xf32>
    %34 = arith.subf %33, %32 : vector<128x160xf32>
    %35 = math.exp %34 : vector<128x160xf32>
    %36 = arith.mulf %35, %4 : vector<128x160xf32>
    %37 = arith.truncf %36 : vector<128x160xf32> to vector<128x160xbf16>
    %c2 = arith.constant 2 : index
    %c0_17 = arith.constant 0 : index
    %c0_18 = arith.constant 0 : index
    %38 = vector.load %arg3[%c2, %c0_17, %c0_18] : memref<8x160x128xbf16, #tpu.memory_space<vmem>>, vector<1x160x128xbf16>
    %39 = vector.shape_cast %38 : vector<1x160x128xbf16> to vector<160x128xbf16>
    %cst_19 = arith.constant dense<0.000000e+00> : vector<128x128xf32>
    %40 = tpu.matmul %37, %39, %cst_19 {dimension_numbers = #tpu.dot_dimension_numbers<[1], [0], [0], [1], [0, 0, 1, 1], [], []>} : vector<128x160xbf16>, vector<160x128xbf16>, vector<128x128xf32> -> vector<128x128xf32>
    %41 = arith.addf %29, %40 : vector<128x128xf32>
    %cst_20 = arith.constant 4.22857141 : f32
    %42 = vector.broadcast %cst_20 : f32 to vector<128x160xf32>
    %43 = arith.subf %2, %42 : vector<128x160xf32>
    %44 = arith.mulf %43, %43 : vector<128x160xf32>
    %cst_21 = arith.constant 0.000000e+00 : f32
    %45 = vector.broadcast %cst_21 : f32 to vector<128x160xf32>
    %46 = arith.subf %45, %44 : vector<128x160xf32>
    %47 = math.exp %46 : vector<128x160xf32>
    %48 = arith.mulf %47, %4 : vector<128x160xf32>
    %49 = arith.truncf %48 : vector<128x160xf32> to vector<128x160xbf16>
    %c3 = arith.constant 3 : index
    %c0_22 = arith.constant 0 : index
    %c0_23 = arith.constant 0 : index
    %50 = vector.load %arg3[%c3, %c0_22, %c0_23] : memref<8x160x128xbf16, #tpu.memory_space<vmem>>, vector<1x160x128xbf16>
    %51 = vector.shape_cast %50 : vector<1x160x128xbf16> to vector<160x128xbf16>
    %cst_24 = arith.constant dense<0.000000e+00> : vector<128x128xf32>
    %52 = tpu.matmul %49, %51, %cst_24 {dimension_numbers = #tpu.dot_dimension_numbers<[1], [0], [0], [1], [0, 0, 1, 1], [], []>} : vector<128x160xbf16>, vector<160x128xbf16>, vector<128x128xf32> -> vector<128x128xf32>
    %53 = arith.addf %41, %52 : vector<128x128xf32>
    %cst_25 = arith.constant 5.37142849 : f32
    %54 = vector.broadcast %cst_25 : f32 to vector<128x160xf32>
    %55 = arith.subf %2, %54 : vector<128x160xf32>
    %56 = arith.mulf %55, %55 : vector<128x160xf32>
    %cst_26 = arith.constant 0.000000e+00 : f32
    %57 = vector.broadcast %cst_26 : f32 to vector<128x160xf32>
    %58 = arith.subf %57, %56 : vector<128x160xf32>
    %59 = math.exp %58 : vector<128x160xf32>
    %60 = arith.mulf %59, %4 : vector<128x160xf32>
    %61 = arith.truncf %60 : vector<128x160xf32> to vector<128x160xbf16>
    %c4 = arith.constant 4 : index
    %c0_27 = arith.constant 0 : index
    %c0_28 = arith.constant 0 : index
    %62 = vector.load %arg3[%c4, %c0_27, %c0_28] : memref<8x160x128xbf16, #tpu.memory_space<vmem>>, vector<1x160x128xbf16>
    %63 = vector.shape_cast %62 : vector<1x160x128xbf16> to vector<160x128xbf16>
    %cst_29 = arith.constant dense<0.000000e+00> : vector<128x128xf32>
    %64 = tpu.matmul %61, %63, %cst_29 {dimension_numbers = #tpu.dot_dimension_numbers<[1], [0], [0], [1], [0, 0, 1, 1], [], []>} : vector<128x160xbf16>, vector<160x128xbf16>, vector<128x128xf32> -> vector<128x128xf32>
    %65 = arith.addf %53, %64 : vector<128x128xf32>
    %cst_30 = arith.constant 6.51428556 : f32
    %66 = vector.broadcast %cst_30 : f32 to vector<128x160xf32>
    %67 = arith.subf %2, %66 : vector<128x160xf32>
    %68 = arith.mulf %67, %67 : vector<128x160xf32>
    %cst_31 = arith.constant 0.000000e+00 : f32
    %69 = vector.broadcast %cst_31 : f32 to vector<128x160xf32>
    %70 = arith.subf %69, %68 : vector<128x160xf32>
    %71 = math.exp %70 : vector<128x160xf32>
    %72 = arith.mulf %71, %4 : vector<128x160xf32>
    %73 = arith.truncf %72 : vector<128x160xf32> to vector<128x160xbf16>
    %c5 = arith.constant 5 : index
    %c0_32 = arith.constant 0 : index
    %c0_33 = arith.constant 0 : index
    %74 = vector.load %arg3[%c5, %c0_32, %c0_33] : memref<8x160x128xbf16, #tpu.memory_space<vmem>>, vector<1x160x128xbf16>
    %75 = vector.shape_cast %74 : vector<1x160x128xbf16> to vector<160x128xbf16>
    %cst_34 = arith.constant dense<0.000000e+00> : vector<128x128xf32>
    %76 = tpu.matmul %73, %75, %cst_34 {dimension_numbers = #tpu.dot_dimension_numbers<[1], [0], [0], [1], [0, 0, 1, 1], [], []>} : vector<128x160xbf16>, vector<160x128xbf16>, vector<128x128xf32> -> vector<128x128xf32>
    %77 = arith.addf %65, %76 : vector<128x128xf32>
    %cst_35 = arith.constant 7.65714263 : f32
    %78 = vector.broadcast %cst_35 : f32 to vector<128x160xf32>
    %79 = arith.subf %2, %78 : vector<128x160xf32>
    %80 = arith.mulf %79, %79 : vector<128x160xf32>
    %cst_36 = arith.constant 0.000000e+00 : f32
    %81 = vector.broadcast %cst_36 : f32 to vector<128x160xf32>
    %82 = arith.subf %81, %80 : vector<128x160xf32>
    %83 = math.exp %82 : vector<128x160xf32>
    %84 = arith.mulf %83, %4 : vector<128x160xf32>
    %85 = arith.truncf %84 : vector<128x160xf32> to vector<128x160xbf16>
    %c6 = arith.constant 6 : index
    %c0_37 = arith.constant 0 : index
    %c0_38 = arith.constant 0 : index
    %86 = vector.load %arg3[%c6, %c0_37, %c0_38] : memref<8x160x128xbf16, #tpu.memory_space<vmem>>, vector<1x160x128xbf16>
    %87 = vector.shape_cast %86 : vector<1x160x128xbf16> to vector<160x128xbf16>
    %cst_39 = arith.constant dense<0.000000e+00> : vector<128x128xf32>
    %88 = tpu.matmul %85, %87, %cst_39 {dimension_numbers = #tpu.dot_dimension_numbers<[1], [0], [0], [1], [0, 0, 1, 1], [], []>} : vector<128x160xbf16>, vector<160x128xbf16>, vector<128x128xf32> -> vector<128x128xf32>
    %89 = arith.addf %77, %88 : vector<128x128xf32>
    %cst_40 = arith.constant 8.800000e+00 : f32
    %90 = vector.broadcast %cst_40 : f32 to vector<128x160xf32>
    %91 = arith.subf %2, %90 : vector<128x160xf32>
    %92 = arith.mulf %91, %91 : vector<128x160xf32>
    %cst_41 = arith.constant 0.000000e+00 : f32
    %93 = vector.broadcast %cst_41 : f32 to vector<128x160xf32>
    %94 = arith.subf %93, %92 : vector<128x160xf32>
    %95 = math.exp %94 : vector<128x160xf32>
    %96 = arith.mulf %95, %4 : vector<128x160xf32>
    %97 = arith.truncf %96 : vector<128x160xf32> to vector<128x160xbf16>
    %c7 = arith.constant 7 : index
    %c0_42 = arith.constant 0 : index
    %c0_43 = arith.constant 0 : index
    %98 = vector.load %arg3[%c7, %c0_42, %c0_43] : memref<8x160x128xbf16, #tpu.memory_space<vmem>>, vector<1x160x128xbf16>
    %99 = vector.shape_cast %98 : vector<1x160x128xbf16> to vector<160x128xbf16>
    %cst_44 = arith.constant dense<0.000000e+00> : vector<128x128xf32>
    %100 = tpu.matmul %97, %99, %cst_44 {dimension_numbers = #tpu.dot_dimension_numbers<[1], [0], [0], [1], [0, 0, 1, 1], [], []>} : vector<128x160xbf16>, vector<160x128xbf16>, vector<128x128xf32> -> vector<128x128xf32>
    %101 = arith.addf %89, %100 : vector<128x128xf32>
    %c0_45 = arith.constant 0 : index
    %c0_46 = arith.constant 0 : index
    %102 = vector.load %arg4[%c0_45, %c0_46] : memref<1x128xf32, #tpu.memory_space<vmem>>, vector<1x128xf32>
    %c0_47 = arith.constant 0 : index
    %c0_48 = arith.constant 0 : index
    %103 = vector.load %arg5[%c0_47, %c0_48] : memref<1x128xf32, #tpu.memory_space<vmem>>, vector<1x128xf32>
    %cst_49 = arith.constant dense<0.000000e+00> : vector<128xf32>
    %104 = vector.multi_reduction <add>, %101, %cst_49 [1] : vector<128x128xf32> to vector<128xf32>
    %105 = vector.shape_cast %104 : vector<128xf32> to vector<128x1xf32>
    %cst_50 = arith.constant 1.280000e+02 : f32
    %106 = vector.broadcast %cst_50 : f32 to vector<128x1xf32>
    %107 = arith.divf %105, %106 : vector<128x1xf32>
    %108 = arith.mulf %101, %101 : vector<128x128xf32>
    %cst_51 = arith.constant dense<0.000000e+00> : vector<128xf32>
    %109 = vector.multi_reduction <add>, %108, %cst_51 [1] : vector<128x128xf32> to vector<128xf32>
    %110 = vector.shape_cast %109 : vector<128xf32> to vector<128x1xf32>
    %cst_52 = arith.constant 1.280000e+02 : f32
    %111 = vector.broadcast %cst_52 : f32 to vector<128x1xf32>
    %112 = arith.divf %110, %111 : vector<128x1xf32>
    %113 = arith.mulf %107, %107 : vector<128x1xf32>
    %114 = arith.subf %112, %113 : vector<128x1xf32>
    %cst_53 = arith.constant 0.000000e+00 : f32
    %115 = vector.broadcast %cst_53 : f32 to vector<128x1xf32>
    %116 = arith.maximumf %114, %115 : vector<128x1xf32>
    %117 = vector.broadcast %107 : vector<128x1xf32> to vector<128x128xf32>
    %118 = arith.subf %101, %117 : vector<128x128xf32>
    %cst_54 = arith.constant 9.99999974E-6 : f32
    %119 = vector.broadcast %cst_54 : f32 to vector<128x1xf32>
    %120 = arith.addf %116, %119 : vector<128x1xf32>
    %121 = math.rsqrt %120 : vector<128x1xf32>
    %122 = vector.broadcast %121 : vector<128x1xf32> to vector<128x128xf32>
    %123 = arith.mulf %118, %122 : vector<128x128xf32>
    %124 = vector.broadcast %102 : vector<1x128xf32> to vector<128x128xf32>
    %125 = arith.mulf %123, %124 : vector<128x128xf32>
    %126 = vector.broadcast %103 : vector<1x128xf32> to vector<128x128xf32>
    %127 = arith.addf %125, %126 : vector<128x128xf32>
    %c0_55 = arith.constant 0 : index
    %c0_56 = arith.constant 0 : index
    %128 = vector.load %arg6[%c0_55, %c0_56] : memref<128x128xf32, #tpu.memory_space<vmem>>, vector<128x128xf32>
    tpu.vector_store %arg6[%c0_55, %c0_56], %127 {strides = array<i32>} : memref<128x128xf32, #tpu.memory_space<vmem>>, vector<128x128xf32>,
    return
  }
  func.func @transform_0(%arg0: i32) -> (i32, i32) {
    %c0_i32 = arith.constant 0 : i32
    %c0_i32_0 = arith.constant 0 : i32
    return %arg0, %c0_i32 : i32, i32
  }
  func.func @transform_1(%arg0: i32) -> (i32, i32) {
    %c0_i32 = arith.constant 0 : i32
    %c0_i32_0 = arith.constant 0 : i32
    return %arg0, %c0_i32 : i32, i32
  }
  func.func @transform_2(%arg0: i32) -> (i32, i32, i32) {
    %c0_i32 = arith.constant 0 : i32
    %c0_i32_0 = arith.constant 0 : i32
    %c0_i32_1 = arith.constant 0 : i32
    %c0_i32_2 = arith.constant 0 : i32
    return %c0_i32, %c0_i32_0, %c0_i32_1 : i32, i32, i32
  }
  func.func @transform_3(%arg0: i32) -> (i32, i32) {
    %c0_i32 = arith.constant 0 : i32
    %c0_i32_0 = arith.constant 0 : i32
    %c0_i32_1 = arith.constant 0 : i32
    return %c0_i32, %c0_i32_0 : i32, i32
  }
  func.func @transform_4(%arg0: i32) -> (i32, i32) {
    %c0_i32 = arith.constant 0 : i32
    %c0_i32_0 = arith.constant 0 : i32
    %c0_i32_1 = arith.constant 0 : i32
    return %c0_i32, %c0_i32_0 : i32, i32
  }
  func.func @transform_5(%arg0: i32) -> (i32, i32) {
    %c0_i32 = arith.constant 0 : i32
    %c0_i32_0 = arith.constant 0 : i32
    return %arg0, %c0_i32 : i32, i32
  }
}

</mosaic_0001>

<bundles_post_ra>
// kernel: neg.28
= control target key start
LH: loop header
LB: loop body
LE: loop exit
PB: predicated region body
PF: predicated region fallthrough
CT: control target
= control target key end

     0   :  { %s72_s0 = inlined_call_operand.vmem [shape: f32[2,16,16], index: 0, kind: input, shape index: {}]   ;;  %s73_s1 = inlined_call_operand.vmem [shape: f32[2,16,16], index: 1, kind: output, shape index: {}]  }
   0x1   :  { %v2_v0 = vld [vmem:[%s72_s0] sm:$0xff]  ;;  %v32_v1 = vld [vmem:[%s72_s0 + $0x10] sm:$0xff]  ;;  %v34_v2 = vld [vmem:[%s72_s0 + $0x8] sm:$0xff] }
   0x2   :  { %v5_v3 = vxor.u32 2147483648, %v2_v0  ;;  %v12_v4 = vxor.u32 2147483648, %v32_v1  ;;  %v20_v5 = vxor.u32 2147483648, %v34_v2  ;;  %v36_v6 = vld [vmem:[%s72_s0 + $0x18] sm:$0xff] }
   0x3   :  { %v28_v7 = vxor.u32 2147483648, %v36_v6 }
   0x4   :  { %7 = vst [vmem:[%s73_s1] sm:$0xff] %v5_v3 }
   0x5   :  { %33 = vst [vmem:[%s73_s1 + $0x10] sm:$0xff] %v12_v4 }
   0x6   :  { %35 = vst [vmem:[%s73_s1 + $0x8] sm:$0xff] %v20_v5 }
   0x7   :  { %37 = vst [vmem:[%s73_s1 + $0x18] sm:$0xff] %v28_v7 }

// kernel: protein_features_forward.2
= control target key start
LH: loop header
LB: loop body
LE: loop exit
PB: predicated region body
PF: predicated region fallthrough
CT: control target
= control target key end

     0   :  { %11 = vsyncpa [#allocation3], 0  ;;  %s2783_s0 = inlined_call_operand.vmem [shape: bf16[512,16], index: 0, kind: input, shape index: {}]   ;;  %s2784_s1 = inlined_call_operand.vmem [shape: bf16[512,400], index: 1, kind: input, shape index: {}]   ;;  %s2785_s2 = inlined_call_operand.vmem [shape: bf16[16,128], index: 2, kind: input, shape index: {}]   ;;  %s2786_s3 = inlined_call_operand.vmem [shape: bf16[400,128], index: 3, kind: input, shape index: {}]   ;;  %s2787_s4 = inlined_call_operand.vmem [shape: f32[1,128], index: 4, kind: input, shape index: {}]   ;;  %s2788_s5 = inlined_call_operand.vmem [shape: f32[1,128], index: 5, kind: input, shape index: {}]   ;;  %s2789_s6 = inlined_call_operand.hbm [shape: f32[512,128], index: 6, kind: output, shape index: {}]  }
   0x1   :  { %13 = vsyncpa [#allocation3 + $0x1], 0  ;;  %s2094_s21 = smov 0   ;;  %s2096_s22 = smov 0  }
   0x2   :  { %s2098_s23 = smov 0   ;;  %s2100_s24 = smov 0  }
   0x3 LB: > { %s2115_s25 = sadd.s32 4294967295, %s2054_s24   ;;  %s1542_s26 = sadd.s32 4294967294, %s2054_s24   ;;  %s2054_s24 = sphi %s2100_s24, %s2795_s24   ;;  %s2050_s23 = sphi %s2098_s23, %s2794_s23   ;;  %s2046_s22 = sphi %s2096_s22, %s2793_s22   ;;  %s2042_s21 = sphi %s2094_s21, %s2792_s21  }
   0x4   : > { %s2119_s27 = sadd.s32 1, %s2054_s24   ;;  %s162_s28 = sadd.s32 1, %s2050_s23 }
   0x5   : > { %s159_s29 = ssub.s32 %s2054_s24, %s2119_s27  ;;  %p172_p0 = scmp.ne.s32.totalorder %s2050_s23, %s2046_s22 }
   0x6   : > { %p160_p1 = scmp.eq.s32.totalorder %s159_s29, 0  ;;  %p173_p2 = scmp.eq.s32.totalorder %s2115_s25, 3 }
   0x7   : > { %p178_p3 = scmp.ne.s32.totalorder %s2046_s22, %s2042_s21  ;;  %p179_p4 = scmp.eq.s32.totalorder %s1542_s26, 3 }
   0x8   : > { %s2130_s30 = scalar_select %p160_p1, %s2050_s23, %s162_s28  }
   0x9   : > { %p2132_p5 = por %p173_p2, %p172_p0  ;;  %p2136_p6 = por %p179_p4, %p178_p3 }
   0xa   : > { %p1545_p7 = scmp.ge.s32.totalorder %s2054_s24, 1  ;;  %p228_p8 = scmp.lt.s32.totalorder %s2054_s24, 5 }
   0xc   : > { %p229_p9 = pnand %p1545_p7, %p228_p8 }
   0xd   : > { %s1547_s13 = sshll.u32 (!%p229_p9), %s2115_s25, 4  ;;  %s1904_s28 = sshll.u32 (!%p229_p9), %s2115_s25, 7 }
   0xe   : > { %232 = sbr.rel (%p229_p9) target bundleno = 517 (0x205), region = 44  ;;  %p265_p10 = scmp.lt.s32.totalorder (!%p229_p9), %s1547_s13, 63 }
   0xf   : > { %s1464_s9 = scalar_lea.hbm (!%p229_p9), %s2789_s6, %s1904_s28  ;;  %s2012_s18 = scalar_lea.hbm (!%p229_p9), %s2789_s6, 512 }
  0x13   : > { %v1886_v0 = vld [vmem:[%s2786_s3 + $0x38] sm:$0xff]  ;;  %v2148_v1 = vld [vmem:[%s2786_s3 + $0xc0] sm:$0xff]  ;;  %v1885_v3 = vld [vmem:[%s2786_s3 + $0x30] sm:$0xff]  ;;  %s2797_s13 = smov (!%p265_p10, %s1547_s13), 63  ;;  %vm681_vm0 = vcmask 130048  }
  0x14   : > { %v1846_v2 = vld [vmem:[%s2785_s2] sm:$0xff]  ;;  %706 = vmatpush.bf16.msra.mxu0 %v1886_v0  ;;  %1905 = vmatpush.bf16.msra.mxu1 %v1886_v0  ;;  %v1902_v4 = vld [vmem:[%s2786_s3 + $0xb8] sm:$0xff]  ;;  %s1837_s20 = sshll.u32 %s2797_s13, 4  ;;  %v1901_v5 = vld [vmem:[%s2786_s3 + $0xb0] sm:$0xff]  ;;  %s1548_s12 = sshll.u32 %s2797_s13, 2 }
  0x15   : > { %1913 = vmatpush.bf16.msra.mxu3 %v2148_v1  ;;  %804 = vmatpush.bf16.msra.mxu2 %v1902_v4  ;;  %s2170_s10 = scalar_lea.vmem %s2784_s1, %s1837_s20  ;;  %v1884_v6 = vld [vmem:[%s2786_s3 + $0x28] sm:$0xff]  ;;  %v1883_v11 = vld [vmem:[%s2786_s3 + $0x20] sm:$0xff]  ;;  %v1882_v13 = vld [vmem:[%s2786_s3 + $0x18] sm:$0xff]  ;;  %s2267_s16 = scalar_lea.vmem %s2783_s0, %s1548_s12 }
  0x16   : > { %v1864_v7 = vld [vmem:[%s2170_s10 + $0x8c] sm:$0xf]  ;;  %v1628_v8 = vld [vmem:[%s2170_s10 + $0x98] sm:$0xf0]  ;;  %v1899_v12 = vld [vmem:[%s2786_s3 + $0xa0] sm:$0xff]  ;;  %s261_s13 = sand.u32 1, %s2046_s22  }
  0x17   : > { %v1631_v9 = vor.u32 %v1864_v7, %v1628_v8  ;;  %v1900_v10 = vld [vmem:[%s2786_s3 + $0xa8] sm:$0xff]  ;;  %v1898_v14 = vld [vmem:[%s2786_s3 + $0x98] sm:$0xff]  ;;  %v1881_v15 = vld [vmem:[%s2786_s3 + $0x10] sm:$0xff]  ;;  %s1546_s20 = sshll.u32 %s261_s13, 7  ;;  %s1467_s12 = sshll.u32 %s1464_s9, 4  ;;  %s1468_s12 = int_to_ptr.hbm [resolvable:$true] %s1467_s12 }
  0x18   : > { %707 = vmatpush.bf16.msra.mxu0 %v1885_v3  ;;  %1906 = vmatpush.bf16.msra.mxu1 %v1885_v3  ;;  %v1868_v16 = vld [vmem:[%s2170_s10 + $0xac] sm:$0xf]  ;;  %v1644_v17 = vld [vmem:[%s2170_s10 + $0xb8] sm:$0xf0]  ;;  %v1897_v18 = vld [vmem:[%s2786_s3 + $0x90] sm:$0xff]  ;;  %s2543_s26 = scalar_lea.vmem [#allocation2], %s1546_s20 }
  0x19   : > { %979 = vmatpush.bf16.msrb.mxu3 %v1846_v2  ;;  %805 = vmatpush.bf16.msra.mxu2 %v1901_v5  ;;  %v1647_v19 = vor.u32 %v1868_v16, %v1644_v17  ;;  %v1880_v20 = vld [vmem:[%s2786_s3 + $0x8] sm:$0xff]  ;;  %v1879_v22 = vld [vmem:[%s2786_s3] sm:$0xff]  ;;  %v1849_v24 = vld [vmem:[%s2170_s10 + $0xc] sm:$0xf0]  ;;  %s1465_s11 = sshll.u32 %s2543_s26, 4  ;;  %s1453_s14 = scalar_lea.sflag [#allocation3], %s261_s13  ;;  %s1466_s11 = int_to_ptr.vmem [resolvable:$true] %s1465_s11 }
  0x1a   : > { %1784 = vmatmul.msk.bf16.vlgmr.msra.gmra.mxu3 %vm681_vm0, %v1631_v9  ;;  %v1896_v21 = vld [vmem:[%s2786_s3 + $0x88] sm:$0xff]  ;;  %v1554_v23 = vld [vmem:[%s2170_s10] sm:$0xf]  ;;  %v1873_v26 = vld [vmem:[%s2170_s10 + $0xcc] sm:$0xf0]  ;;  %s2006_s15 = sshra.s32 %s1468_s12, 4  ;;  %s2007_s15 = int_to_ptr.hbm [resolvable:$true] %s2006_s15 }
  0x1b   : > { %v1650_v25 = vld [vmem:[%s2170_s10 + $0xc0] sm:$0xf]  ;;  %v1894_v27 = vld [vmem:[%s2786_s3 + $0x78] sm:$0xff]  ;;  %v1555_v28 = vor.u32 %v1849_v24, %v1554_v23  ;;  %v1562_v30 = vld [vmem:[%s2170_s10 + $0x8] sm:$0xf]  ;;  %p2013_p0 = scmp.lt.s32.totalorder %s2007_s15, %s2789_s6 }
  0x1c   : > { %708 = vmatpush.bf16.msra.mxu0 %v1884_v6  ;;  %1907 = vmatpush.bf16.msra.mxu1 %v1884_v6  ;;  %v1895_v29 = vld [vmem:[%s2786_s3 + $0x80] sm:$0xff]  ;;  %v1850_v31 = vld [vmem:[%s2170_s10 + $0x14] sm:$0xf0]  ;;  %v1651_v32 = vor.u32 %v1873_v26, %v1650_v25  ;;  %v1893_v33 = vld [vmem:[%s2786_s3 + $0x70] sm:$0xff] }
  0x1d   : > { %806 = vmatpush.bf16.msra.mxu2 %v1900_v10  ;;  %v1563_v34 = vor.u32 %v1850_v31, %v1562_v30  ;;  %v1872_v35 = vld [vmem:[%s2170_s10 + $0xcc] sm:$0xf]  ;;  %v1660_v36 = vld [vmem:[%s2170_s10 + $0xd8] sm:$0xf0]  ;;  %v1891_v39 = vld [vmem:[%s2786_s3 + $0x60] sm:$0xff] }
  0x1e   : > { %v1892_v37 = vld [vmem:[%s2786_s3 + $0x68] sm:$0xff]  ;;  %v1663_v38 = vor.u32 %v1872_v35, %v1660_v36  ;;  %v1570_v40 = vld [vmem:[%s2170_s10 + $0x20] sm:$0xf]  ;;  %v1853_v41 = vld [vmem:[%s2170_s10 + $0x2c] sm:$0xf0] }
  0x1f   : > { %v1666_v42 = vld [vmem:[%s2170_s10 + $0xe0] sm:$0xf]  ;;  %v1877_v43 = vld [vmem:[%s2170_s10 + $0xec] sm:$0xf0]  ;;  %v1890_v44 = vld [vmem:[%s2786_s3 + $0x58] sm:$0xff]  ;;  %v1571_v45 = vor.u32 %v1853_v41, %v1570_v40 }
  0x20   : > { %709 = vmatpush.bf16.msra.mxu0 %v1883_v11  ;;  %1908 = vmatpush.bf16.msra.mxu1 %v1883_v11  ;;  %v1578_v46 = vld [vmem:[%s2170_s10 + $0x28] sm:$0xf]  ;;  %v1854_v47 = vld [vmem:[%s2170_s10 + $0x34] sm:$0xf0]  ;;  %v1667_v48 = vor.u32 %v1877_v43, %v1666_v42  ;;  %v1889_v49 = vld [vmem:[%s2786_s3 + $0x50] sm:$0xff] }
  0x21   : > { %807 = vmatpush.bf16.msra.mxu2 %v1899_v12  ;;  %v1579_v50 = vor.u32 %v1854_v47, %v1578_v46  ;;  %v1876_v51 = vld [vmem:[%s2170_s10 + $0xec] sm:$0xf]  ;;  %v1676_v52 = vld [vmem:[%s2170_s10 + $0xf8] sm:$0xf0]  ;;  %v1887_v55 = vld [vmem:[%s2786_s3 + $0x40] sm:$0xff] }
  0x22   : > { %v1888_v53 = vld [vmem:[%s2786_s3 + $0x48] sm:$0xff]  ;;  %v1679_v54 = vor.u32 %v1876_v51, %v1676_v52  ;;  %v1586_v56 = vld [vmem:[%s2170_s10 + $0x40] sm:$0xf]  ;;  %v1857_v57 = vld [vmem:[%s2170_s10 + $0x4c] sm:$0xf0] }
  0x23   : > { %v1847_v58 = vld [vmem:[%s2170_s10 + $0x4] sm:$0xf]  ;;  %v1556_v59 = vld [vmem:[%s2170_s10 + $0x10] sm:$0xf0]  ;;  %v1587_v60 = vor.u32 %v1857_v57, %v1586_v56  ;;  %v1594_v61 = vld [vmem:[%s2170_s10 + $0x48] sm:$0xf] }
  0x24   : > { %710 = vmatpush.bf16.msra.mxu0 %v1882_v13  ;;  %1909 = vmatpush.bf16.msra.mxu1 %v1882_v13  ;;  %v1858_v62 = vld [vmem:[%s2170_s10 + $0x54] sm:$0xf0]  ;;  %v1559_v63 = vor.u32 %v1847_v58, %v1556_v59  ;;  %v1602_v2 = vld [vmem:[%s2170_s10 + $0x60] sm:$0xf]  ;;  %v1861_v3 = vld [vmem:[%s2170_s10 + $0x6c] sm:$0xf0] }
  0x25   : > { %808 = vmatpush.bf16.msra.mxu2 %v1898_v14  ;;  %v1595_v0 = vor.u32 %v1858_v62, %v1594_v61  ;;  %v1851_v4 = vld [vmem:[%s2170_s10 + $0x24] sm:$0xf]  ;;  %v1572_v5 = vld [vmem:[%s2170_s10 + $0x30] sm:$0xf0]  ;;  %v1603_v6 = vor.u32 %v1861_v3, %v1602_v2  ;;  %v1610_v7 = vld [vmem:[%s2170_s10 + $0x68] sm:$0xf] }
  0x26   : > { %v1862_v8 = vld [vmem:[%s2170_s10 + $0x74] sm:$0xf0]  ;;  %v1575_v9 = vor.u32 %v1851_v4, %v1572_v5  ;;  %v1839_v11 = vld [vmem:[%s2267_s16 + $0x8] sm:$0xff]  ;;  %v1618_v12 = vld [vmem:[%s2170_s10 + $0x80] sm:$0xf] }
  0x27   : > { %v1611_v10 = vor.u32 %v1862_v8, %v1610_v7  ;;  %v1865_v13 = vld [vmem:[%s2170_s10 + $0x8c] sm:$0xf0]  ;;  %v1855_v14 = vld [vmem:[%s2170_s10 + $0x44] sm:$0xf]  ;;  %v1626_v17 = vld [vmem:[%s2170_s10 + $0x88] sm:$0xf] }
  0x28   : > { %711 = vmatpush.bf16.msra.mxu0 %v1881_v15  ;;  %1910 = vmatpush.bf16.msra.mxu1 %v1881_v15  ;;  %v1588_v15 = vld [vmem:[%s2170_s10 + $0x50] sm:$0xf0]  ;;  %v1619_v16 = vor.u32 %v1865_v13, %v1618_v12  ;;  %v1869_v23 = vld [vmem:[%s2170_s10 + $0xac] sm:$0xf0]  ;;  %v1859_v24 = vld [vmem:[%s2170_s10 + $0x64] sm:$0xf] }
  0x29   : > { %809 = vmatpush.bf16.msra.mxu2 %v1897_v18  ;;  %v1866_v18 = vld [vmem:[%s2170_s10 + $0x94] sm:$0xf0]  ;;  %v1604_v25 = vld [vmem:[%s2170_s10 + $0x70] sm:$0xf0]  ;;  %v1842_v41 = vld [vmem:[%s2267_s16 + $0x20] sm:$0xff] }
  0x2a   : > { %1785 = vmatmul.msk.bf16.gmra.mxu3 %vm681_vm0, %v1647_v19  ;;  %v1591_v19 = vor.u32 %v1855_v14, %v1588_v15  ;;  %v1841_v31 = vld [vmem:[%s2267_s16 + $0x18] sm:$0xff]  ;;  %v1620_v35 = vld [vmem:[%s2170_s10 + $0x90] sm:$0xf0]  ;;  %v1852_v42 = vld [vmem:[%s2170_s10 + $0x2c] sm:$0xf] }
  0x2b   : > { %v1580_v43 = vld [vmem:[%s2170_s10 + $0x38] sm:$0xf0]  ;;  %v1871_v56 = vld [vmem:[%s2170_s10 + $0xc4] sm:$0xf]  ;;  %v1652_v57 = vld [vmem:[%s2170_s10 + $0xd0] sm:$0xf0] }
  0x2c   : > { %712 = vmatpush.bf16.msra.mxu0 %v1880_v20  ;;  %1911 = vmatpush.bf16.msra.mxu1 %v1880_v20  ;;  %v1627_v20 = vor.u32 %v1866_v18, %v1626_v17  ;;  %v1583_v47 = vor.u32 %v1852_v42, %v1580_v43  ;;  %v1655_v61 = vor.u32 %v1871_v56, %v1652_v57  ;;  %v1860_v3 = vld [vmem:[%s2170_s10 + $0x6c] sm:$0xf]  ;;  %v1612_v4 = vld [vmem:[%s2170_s10 + $0x78] sm:$0xf0]  ;;  %v1668_v7 = vld [vmem:[%s2170_s10 + $0xf0] sm:$0xf0] }
  0x2d   : > { %810 = vmatpush.bf16.msra.mxu2 %v1896_v21  ;;  %v1840_v21 = vld [vmem:[%s2267_s16 + $0x10] sm:$0xff] }
  0x30   : > { %713 = vmatpush.bf16.msra.mxu0 %v1879_v22  ;;  %1912 = vmatpush.bf16.msra.mxu1 %v1879_v22  ;;  %v1634_v22 = vld [vmem:[%s2170_s10 + $0xa0] sm:$0xf] }
  0x31   : > { %811 = vmatpush.bf16.msra.mxu2 %v1895_v29  ;;  %v1635_v26 = vor.u32 %v1869_v23, %v1634_v22  ;;  %v1607_v29 = vor.u32 %v1859_v24, %v1604_v25 }
  0x33   : > { %714 = vmatmul.bf16.vlgmr.msra.gmra.mxu0 %v1555_v28  ;;  %744 = vmatmul.bf16.vlgmr.msra.gmra.mxu1 %v1651_v32  ;;  %v1870_v28 = vld [vmem:[%s2170_s10 + $0xb4] sm:$0xf0]  ;;  %v1848_v32 = vld [vmem:[%s2170_s10 + $0xc] sm:$0xf] }
  0x34   : > { %860 = vmatpush.bf16.msrb.mxu0 %v2148_v1  ;;  %755 = vmatpush.bf16.msrb.mxu1 %v1894_v27  ;;  %v1838_v1 = vld [vmem:[%s2267_s16] sm:$0xff]  ;;  %v1642_v27 = vld [vmem:[%s2170_s10 + $0xa8] sm:$0xf] }
  0x35   : > { %812 = vmatmul.bf16.vlgmr.msra.gmra.mxu2 %v1563_v34  ;;  %v1643_v30 = vor.u32 %v1870_v28, %v1642_v27  ;;  %v1863_v34 = vld [vmem:[%s2170_s10 + $0x84] sm:$0xf] }
  0x38   : > { %756 = vmatpush.bf16.msrb.mxu1 %v1893_v33  ;;  %v1564_v33 = vld [vmem:[%s2170_s10 + $0x18] sm:$0xf0] }
  0x39   : > { %v1567_v36 = vor.u32 %v1848_v32, %v1564_v33 }
  0x3a   : > { %1786 = vmatmul.msk.bf16.gmra.mxu3 %vm681_vm0, %v1663_v38  ;;  %v1874_v38 = vld [vmem:[%s2170_s10 + $0xd4] sm:$0xf0] }
  0x3c   : > { %757 = vmatpush.bf16.msrb.mxu1 %v1892_v37  ;;  %v1658_v37 = vld [vmem:[%s2170_s10 + $0xc8] sm:$0xf] }
  0x3d   : > { %v1659_v40 = vor.u32 %v1874_v38, %v1658_v37 }
  0x40   : > { %758 = vmatpush.bf16.msrb.mxu1 %v1891_v39  ;;  %v1623_v39 = vor.u32 %v1863_v34, %v1620_v35 }
  0x43   : > { %719 = vmatmul.bf16.gmra.mxu0 %v1571_v45  ;;  %749 = vmatmul.bf16.gmra.mxu1 %v1667_v48  ;;  %v1636_v45 = vld [vmem:[%s2170_s10 + $0xb0] sm:$0xf0]  ;;  %v1674_v48 = vld [vmem:[%s2170_s10 + $0xe8] sm:$0xf] }
  0x44   : > { %759 = vmatpush.bf16.msrb.mxu1 %v1890_v44  ;;  %v1867_v44 = vld [vmem:[%s2170_s10 + $0xa4] sm:$0xf] }
  0x45   : > { %817 = vmatmul.bf16.gmra.mxu2 %v1579_v50  ;;  %v1639_v50 = vor.u32 %v1867_v44, %v1636_v45 }
  0x48   : > { %760 = vmatpush.bf16.msrb.mxu1 %v1889_v49  ;;  %v1878_v49 = vld [vmem:[%s2170_s10 + $0xf4] sm:$0xf0] }
  0x49   : > { %v1675_v51 = vor.u32 %v1878_v49, %v1674_v48 }
  0x4a   : > { %1787 = vmatmul.msk.bf16.gmra.mxu3 %vm681_vm0, %v1679_v54  ;;  %v1856_v54 = vld [vmem:[%s2170_s10 + $0x4c] sm:$0xf] }
  0x4c   : > { %761 = vmatpush.bf16.msrb.mxu1 %v1888_v53  ;;  %v1843_v53 = vld [vmem:[%s2267_s16 + $0x28] sm:$0xff] }
  0x50   : > { %762 = vmatpush.bf16.msrb.mxu1 %v1887_v55  ;;  %v1596_v55 = vld [vmem:[%s2170_s10 + $0x58] sm:$0xf0] }
  0x51   : > { %v1599_v59 = vor.u32 %v1856_v54, %v1596_v55 }
  0x53   : > { %724 = vmatmul.bf16.gmra.mxu0 %v1587_v60  ;;  %763 = vmatmul.bf16.vlgmr.msrb.gmra.mxu1 %v1559_v63 }
  0x55   : > { %822 = vmatmul.bf16.gmra.mxu2 %v1595_v0 }
  0x5a   : > { %1824 = vmatmul.msk.bf16.vlgmr.msrb.gmra.mxu3 %vm681_vm0, %v1838_v1  ;;  %v1844_v1 = vld [vmem:[%s2267_s16 + $0x30] sm:$0xff] }
  0x63   : > { %729 = vmatmul.bf16.gmra.mxu0 %v1603_v6  ;;  %768 = vmatmul.bf16.gmra.mxu1 %v1575_v9  ;;  %v1875_v6 = vld [vmem:[%s2170_s10 + $0xe4] sm:$0xf]  ;;  %v1615_v9 = vor.u32 %v1860_v3, %v1612_v4 }
  0x65   : > { %827 = vmatmul.bf16.gmra.mxu2 %v1611_v10 }
  0x6a   : > { %1825 = vmatmul.msk.bf16.gmra.mxu3 %vm681_vm0, %v1839_v11  ;;  %v1671_v11 = vor.u32 %v1875_v6, %v1668_v7 }
  0x73   : > { %734 = vmatmul.bf16.gmra.mxu0 %v1619_v16  ;;  %773 = vmatmul.bf16.gmra.mxu1 %v1591_v19  ;;  %v1845_v16 = vld [vmem:[%s2267_s16 + $0x38] sm:$0xff]  ;;  %s2008_s16 = scalar_lea.hbm %s2007_s15, 128 }
  0x74   : > { %p2009_p11 = scmp.ne.s32.totalorder %s2007_s15, %s2008_s16  ;;  %p2014_p1 = scmp.lt.s32.totalorder %s2012_s18, %s2008_s16 }
  0x75   : > { %832 = vmatmul.bf16.gmra.mxu2 %v1627_v20 }
  0x76   : > { %p2010_p12 = pnand %p2009_p11, %p2132_p5  ;;  %p2015_p2 = por %p2014_p1, %p2013_p0 }
  0x78   : > { %p2011_p13 = pneg %p2010_p12 }
  0x7a   : > { %1826 = vmatmul.msk.bf16.gmra.mxu3 %vm681_vm0, %v1840_v21  ;;  %p2016_p3 = pnand %p2015_p2, %p2011_p13 }
  0x83   : > { %739 = vmatmul.bf16.gmra.mxu0 %v1635_v26  ;;  %778 = vmatmul.bf16.gmra.mxu1 %v1607_v29 }
  0x85   : > { %837 = vmatmul.bf16.gmra.mxu2 %v1643_v30 }
  0x8a   : > { %1827 = vmatmul.msk.bf16.gmra.mxu3 %vm681_vm0, %v1841_v31 }
  0x93   : > { %1780 = vmatmul.msk.bf16.vlgmr.msrb.gmra.mxu0 %vm681_vm0, %v1567_v36  ;;  %783 = vmatmul.bf16.gmra.mxu1 %v1623_v39 }
  0x95   : > { %842 = vmatmul.bf16.gmra.mxu2 %v1659_v40 }
  0x9a   : > { %1828 = vmatmul.msk.bf16.gmra.mxu3 %vm681_vm0, %v1842_v41 }
  0x9d   : > { %v2308_v46 = vpop.f32.mrf.mxu3 }
  0xa3   : > { %1781 = vmatmul.msk.bf16.gmra.mxu0 %vm681_vm0, %v1583_v47  ;;  %788 = vmatmul.bf16.gmra.mxu1 %v1639_v50 }
  0xa5   : > { %847 = vmatmul.bf16.gmra.mxu2 %v1675_v51  ;;  %v2313_v52 = vpop.f32.mrf.mxu3 }
  0xaa   : > { %1829 = vmatmul.msk.bf16.gmra.mxu3 %vm681_vm0, %v1843_v53 }
  0xad   : > { %v2321_v58 = vpop.f32.mrf.mxu3 }
  0xb0   : > { %v715_v60 = vpop.f32.mrf.mxu0  ;;  %v2323_v62 = vpop.f32.mrf.mxu1 }
  0xb3   : > { %1782 = vmatmul.msk.bf16.gmra.mxu0 %vm681_vm0, %v1599_v59  ;;  %793 = vmatmul.bf16.gmra.mxu1 %v1655_v61 }
  0xb5   : > { %v2326_v63 = vpop.f32.mrf.mxu3 }
  0xb8   : > { %v2328_v0 = vpop.f32.mrf.mxu0  ;;  %v2331_v2 = vpop.f32.mrf.mxu1 }
  0xb9   : > { %v813_v5 = vpop.f32.mrf.mxu2 }
  0xba   : > { %1830 = vmatmul.msk.bf16.gmra.mxu3 %vm681_vm0, %v1844_v1 }
  0xbd   : > { %v2338_v8 = vpop.f32.mrf.mxu3 }
  0xc0   : > { %v2340_v10 = vpop.f32.mrf.mxu0  ;;  %v2342_v12 = vpop.f32.mrf.mxu1 }
  0xc1   : > { %v815_v13 = vpop.f32.mrf.mxu2 }
  0xc3   : > { %1783 = vmatmul.msk.bf16.gmra.mxu0 %vm681_vm0, %v1615_v9  ;;  %798 = vmatmul.bf16.gmra.mxu1 %v1671_v11 }
  0xc5   : > { %v2345_v14 = vpop.f32.mrf.mxu3 }
  0xc8   : > { %v2347_v15 = vpop.f32.mrf.mxu0  ;;  %v2350_v17 = vpop.f32.mrf.mxu1 }
  0xc9   : > { %v818_v20 = vpop.f32.mrf.mxu2 }
  0xca   : > { %1831 = vmatmul.msk.bf16.gmra.mxu3 %vm681_vm0, %v1845_v16 }
  0xcd   : > { %v2353_v18 = vpop.f32.mrf.mxu3 }
  0xd0   : > { %v2355_v19 = vpop.f32.mrf.mxu0  ;;  %v764_v21 = vpop.f32.mrf.mxu1 }
  0xd1   : > { %v2361_v25 = vpop.f32.mrf.mxu2  ;;  %v765_v53 = vadd.f32 %v764_v21, %v715_v60 }
  0xd3   : > { %v814_v56 = vadd.f32 %v813_v5, %v765_v53 }
  0xd5   : > { %v2357_v22 = vpop.f32.mrf.mxu3 }
  0xd8   : > { %v2359_v23 = vpop.f32.mrf.mxu0  ;;  %v766_v24 = vpop.f32.mrf.mxu1 }
  0xd9   : > { %v2363_v29 = vpop.f32.mrf.mxu2  ;;  %v767_v3 = vadd.f32 %v766_v24, %v2328_v0 }
  0xdb   : > { %v816_v9 = vadd.f32 %v815_v13, %v767_v3 }
  0xdd   : > { %v981_v26 = vpop.f32.mrf.mxu3 }
  0xe0   : > { %v730_v27 = vpop.f32.mrf.mxu0  ;;  %v769_v28 = vpop.f32.mrf.mxu1 }
  0xe1   : > { %v2367_v33 = vpop.f32.mrf.mxu2 }
  0xe5   : > { %v983_v30 = vpop.f32.mrf.mxu3 }
  0xe8   : > { %v732_v31 = vpop.f32.mrf.mxu0  ;;  %v2365_v32 = vpop.f32.mrf.mxu1 }
  0xe9   : > { %v828_v39 = vpop.f32.mrf.mxu2 }
  0xed   : > { %v986_v34 = vpop.f32.mrf.mxu3 }
  0xf0   : > { %v735_v35 = vpop.f32.mrf.mxu0  ;;  %v2369_v36 = vpop.f32.mrf.mxu1 }
  0xf1   : > { %v830_v45 = vpop.f32.mrf.mxu2 }
  0xf5   : > { %v2371_v37 = vpop.f32.mrf.mxu3 }
  0xf8   : > { %v737_v38 = vpop.f32.mrf.mxu0  ;;  %v2373_v40 = vpop.f32.mrf.mxu1 }
  0xf9   : > { %v833_v55 = vpop.f32.mrf.mxu2 }
  0xfd   : > { %v2375_v41 = vpop.f32.mrf.mxu3 }
 0x100   : > { %v740_v42 = vpop.f32.mrf.mxu0  ;;  %v779_v43 = vpop.f32.mrf.mxu1 }
 0x101   : > { %v780_v44 = vadd.f32 %v779_v43, %v730_v27  ;;  %v835_v60 = vpop.f32.mrf.mxu2 }
 0x103   : > { %v2377_v47 = vadd.f32 %v828_v39, %v780_v44 }
 0x105   : > { %v2379_v48 = vpop.f32.mrf.mxu3 }
 0x108   : > { %v742_v49 = vpop.f32.mrf.mxu0  ;;  %v781_v50 = vpop.f32.mrf.mxu1 }
 0x109   : > { %v782_v51 = vadd.f32 %v781_v50, %v732_v31  ;;  %v770_v31 = vadd.f32 %v769_v28, %v2340_v10 }
 0x10b   : > { %v2381_v54 = vadd.f32 %v830_v45, %v782_v51  ;;  %v819_v13 = vadd.f32 %v818_v20, %v770_v31  ;;  %v838_v45 = vpop.f32.mrf.mxu2 }
 0x10d   : > { %v2383_v57 = vpop.f32.mrf.mxu3 }
 0x110   : > { %v862_v59 = vpop.f32.mrf.mxu0  ;;  %v784_v61 = vpop.f32.mrf.mxu1 }
 0x111   : > { %v863_v1 = vadd.f32 %v862_v59, %v814_v56  ;;  %v785_v7 = vadd.f32 %v784_v61, %v735_v35  ;;  %v772_v56 = vadd.f32 %v2365_v32, %v2347_v15  ;;  %v775_v15 = vadd.f32 %v2369_v36, %v2355_v19 }
 0x113   : > { %v2386_v4 = vadd.f32 %v981_v26, %v863_v1  ;;  %v834_v27 = vadd.f32 %v833_v55, %v785_v7  ;;  %v840_v1 = vpop.f32.mrf.mxu2 }
 0x115   : > { %1023 = vadd.xlane.f32.xlu0 %v2386_v4  ;;  %v1078_v6 = vmul.f32 %v2386_v4, %v2386_v4  ;;  %v2391_v11 = vpop.f32.mrf.mxu3  ;;  %v883_v35 = vadd.f32 %v2308_v46, %v834_v27 }
 0x117   : > { %1094 = vadd.xlane.f32.xlu1 %v1078_v6 }
 0x118   : > { %v864_v5 = vpop.f32.mrf.mxu0  ;;  %v786_v16 = vpop.f32.mrf.mxu1 }
 0x119   : > { %v865_v21 = vadd.f32 %v864_v5, %v816_v9  ;;  %v787_v26 = vadd.f32 %v786_v16, %v737_v38 }
 0x11b   : > { %v2394_v0 = vadd.f32 %v983_v30, %v865_v21  ;;  %v836_v10 = vadd.f32 %v835_v60, %v787_v26  ;;  %v843_v27 = vpop.f32.mrf.mxu2 }
 0x11d   : > { %1025 = vadd.xlane.f32.xlu0 %v2394_v0  ;;  %v1079_v24 = vmul.f32 %v2394_v0, %v2394_v0  ;;  %v1001_v39 = vpop.f32.mrf.mxu3  ;;  %v885_v46 = vadd.f32 %v2313_v52, %v836_v10  ;;  %v821_v52 = vadd.f32 %v2361_v25, %v772_v56 }
 0x11e   : > { %v2400_v43 = vadd.f32 %v1001_v39, %v883_v35 }
 0x11f   : > { %1096 = vadd.xlane.f32.xlu2 %v1079_v24 }
 0x120   : > { %v867_v44 = vpop.f32.mrf.mxu0  ;;  %v789_v50 = vpop.f32.mrf.mxu1  ;;  %v1086_v28 = vmul.f32 %v2400_v43, %v2400_v43 }
 0x121   : > { %v868_v51 = vadd.f32 %v867_v44, %v819_v13  ;;  %v790_v38 = vadd.f32 %v789_v50, %v740_v42 }
 0x123   : > { %v2404_v30 = vadd.f32 %v986_v34, %v868_v51  ;;  %v839_v61 = vadd.f32 %v838_v45, %v790_v38  ;;  %v845_v39 = vpop.f32.mrf.mxu2 }
 0x125   : > { %1110 = vadd.xlane.f32.xlu0 %v1086_v28  ;;  %1027 = vadd.xlane.f32.xlu1 %v2404_v30  ;;  %v1003_v20 = vpop.f32.mrf.mxu3  ;;  %v1080_v42 = vmul.f32 %v2404_v30, %v2404_v30  ;;  %v888_v6 = vadd.f32 %v2321_v58, %v839_v61  ;;  %v777_v58 = vadd.f32 %v2373_v40, %v2359_v23 }
 0x126   : > { %v2409_v53 = vadd.f32 %v1003_v20, %v885_v46 }
 0x127   : > { %1039 = vadd.xlane.f32.xlu2 %v2400_v43 }
 0x128   : > { %v869_v55 = vpop.f32.mrf.mxu0  ;;  %v791_v59 = vpop.f32.mrf.mxu1  ;;  %v1087_v34 = vmul.f32 %v2409_v53, %v2409_v53 }
 0x129   : > { %v792_v3 = vadd.f32 %v791_v59, %v742_v49  ;;  %v870_v7 = vadd.f32 %v869_v55, %v821_v52  ;;  %v824_v49 = vadd.f32 %v2363_v29, %v775_v15 }
 0x12b   : > { %v841_v16 = vadd.f32 %v840_v1, %v792_v3  ;;  %v2426_v25 = vadd.f32 %v2371_v37, %v870_v7  ;;  %v826_v37 = vadd.f32 %v2367_v33, %v777_v58 }
 0x12d   : > { %1098 = vadd.xlane.f32.xlu0 %v1080_v42  ;;  %1112 = vadd.xlane.f32.xlu1 %v1087_v34  ;;  %v1006_v60 = vpop.f32.mrf.mxu3  ;;  %v890_v36 = vadd.f32 %v2326_v63, %v841_v16  ;;  %v1081_v13 = vmul.f32 %v2426_v25, %v2426_v25 }
 0x12e   : > { %v2421_v32 = vadd.f32 %v1006_v60, %v888_v6 }
 0x130   : > { %v872_v9 = vpop.f32.mrf.mxu0  ;;  %v794_v5 = vpop.f32.mrf.mxu1  ;;  %v1088_v21 = vmul.f32 %v2421_v32, %v2421_v32 }
 0x131   : > { %v873_v19 = vadd.f32 %v872_v9, %v824_v49  ;;  %v795_v63 = vadd.f32 %v794_v5, %v2323_v62  ;;  %v2056_v5 = vmov 128.0  }
 0x132   : > { %1114 = vadd.xlane.f32.xlu2 %v1088_v21  ;;  %1958 = vrcp.f32 %v2056_v5 }
 0x133   : > { %v2438_v29 = vadd.f32 %v2375_v41, %v873_v19  ;;  %v844_v45 = vadd.f32 %v843_v27, %v795_v63 }
 0x135   : > { %1041 = vadd.xlane.f32.xlu0 %v2409_v53  ;;  %1029 = vadd.xlane.f32.xlu1 %v2426_v25  ;;  %v1008_v31 = vpop.f32.mrf.mxu3  ;;  %v1082_v51 = vmul.f32 %v2438_v29, %v2438_v29  ;;  %v893_v38 = vadd.f32 %v2338_v8, %v844_v45 }
 0x136   : > { %v2434_v24 = vadd.f32 %v1008_v31, %v890_v36 }
 0x138   : > { %v874_v26 = vpop.f32.mrf.mxu0  ;;  %v796_v35 = vpop.f32.mrf.mxu1  ;;  %v1089_v23 = vmul.f32 %v2434_v24, %v2434_v24 }
 0x139   : > { %v875_v40 = vadd.f32 %v874_v26, %v826_v37  ;;  %v797_v61 = vadd.f32 %v796_v35, %v2331_v2  ;;  %v1959_v16 = vpop.eup %1958 }
 0x13a   : > { %1031 = vadd.xlane.f32.xlu2 %v2438_v29  ;;  %v1056_v21 = vmul.f32 128.0, %v1959_v16  ;;  %vm1060_vm1 = vweird.f32 %v1959_v16 }
 0x13b   : > { %v2447_v33 = vadd.f32 %v2379_v48, %v875_v40 }
 0x13c   : > { %v1057_v49 = vsub.f32 1.0, %v1056_v21 }
 0x13d   : > { %1116 = vadd.xlane.f32.xlu0 %v1089_v23  ;;  %1100 = vadd.xlane.f32.xlu1 %v1081_v13  ;;  %v1011_v41 = vpop.f32.mrf.mxu3  ;;  %v1083_v62 = vmul.f32 %v2447_v33, %v2447_v33 }
 0x13e   : > { %v2459_v48 = vadd.f32 %v1011_v41, %v893_v38  ;;  %v1058_v27 = vmul.f32 %v1959_v16, %v1057_v49 }
 0x140   : > { %v877_v44 = vpop.f32.mrf.mxu0  ;;  %v799_v28 = vpop.f32.mrf.mxu1  ;;  %v1090_v56 = vmul.f32 %v2459_v48, %v2459_v48  ;;  %v1059_v58 = vadd.f32 %v1959_v16, %v1058_v27 }
 0x141   : > { %v878_v50 = vadd.f32 %v877_v44, %v2377_v47  ;;  %v848_v47 = vpop.f32.mrf.mxu2  ;;  %v800_v42 = vadd.f32 %v799_v28, %v2342_v12 }
 0x142   : > { %1102 = vadd.xlane.f32.xlu2 %v1082_v51  ;;  %v2497_v19 = vsel %vm1060_vm1, %v1959_v16, %v1059_v58  ;;  %v2529_v16 = vld [vmem:[%s2788_s5] ss:$0 sm:$0xff] }
 0x143   : > { %v2453_v10 = vadd.f32 %v2383_v57, %v878_v50  ;;  %v849_v6 = vadd.f32 %v848_v47, %v800_v42 }
 0x145   : > { %1104 = vadd.xlane.f32.xlu0 %v1083_v62  ;;  %1043 = vadd.xlane.f32.xlu1 %v2421_v32  ;;  %v1013_v46 = vpop.f32.mrf.mxu3  ;;  %v898_v12 = vadd.f32 %v2353_v18, %v849_v6 }
 0x148   : > { %v879_v20 = vpop.f32.mrf.mxu0  ;;  %v801_v8 = vpop.f32.mrf.mxu1 }
 0x149   : > { %v880_v55 = vadd.f32 %v879_v20, %v2381_v54  ;;  %v802_v1 = vadd.f32 %v801_v8, %v2350_v17  ;;  %v850_v34 = vpop.f32.mrf.mxu2  ;;  %v1084_v54 = vmul.f32 %v2453_v10, %v2453_v10 }
 0x14a   : > { %1045 = vadd.xlane.f32.xlu2 %v2434_v24 }
 0x14b   : > { %v2463_v57 = vadd.f32 %v2391_v11, %v880_v55  ;;  %v846_v11 = vadd.f32 %v845_v39, %v797_v61  ;;  %v851_v52 = vadd.f32 %v850_v34, %v802_v1 }
 0x14d   : > { %1047 = vadd.xlane.f32.xlu0 %v2459_v48  ;;  %1118 = vadd.xlane.f32.xlu1 %v1090_v56  ;;  %v1016_v59 = vpop.f32.mrf.mxu3  ;;  %v895_v7 = vadd.f32 %v2345_v14, %v846_v11  ;;  %v900_v2 = vadd.f32 %v2357_v22, %v851_v52  ;;  %v1085_v17 = vmul.f32 %v2463_v57, %v2463_v57 }
 0x14e   : > { %v2487_v9 = vadd.f32 %v1016_v59, %v898_v12  ;;  %v2524_v12 = vld [vmem:[%s2787_s4] ss:$0 sm:$0xff] }
 0x14f   : > { %v2480_v60 = vadd.f32 %v1013_v46, %v895_v7 }
 0x150   : > { %v1092_v14 = vmul.f32 %v2487_v9, %v2487_v9 }
 0x151   : > { %v1091_v22 = vmul.f32 %v2480_v60, %v2480_v60 }
 0x152   : > { %1033 = vadd.xlane.f32.xlu2 %v2447_v33 }
 0x155   : > { %1035 = vadd.xlane.f32.xlu0 %v2453_v10  ;;  %1106 = vadd.xlane.f32.xlu1 %v1084_v54  ;;  %v1018_v3 = vpop.f32.mrf.mxu3 }
 0x156   : > { %v2482_v15 = vadd.f32 %v1018_v3, %v900_v2 }
 0x158   : > { %v1093_v18 = vmul.f32 %v2482_v15, %v2482_v15 }
 0x15a   : > { %1108 = vadd.xlane.f32.xlu2 %v1085_v17 }
 0x15d   : > { %1053 = vadd.xlane.f32.xlu0 %v2482_v15  ;;  %1049 = vadd.xlane.f32.xlu1 %v2480_v60 }
 0x162   : > { %1051 = vadd.xlane.f32.xlu2 %v2487_v9 }
 0x165   : > { %1122 = vadd.xlane.f32.xlu0 %v1092_v14  ;;  %1037 = vadd.xlane.f32.xlu1 %v2463_v57 }
 0x16a   : > { %1120 = vadd.xlane.f32.xlu2 %v1091_v22 }
 0x16d   : > { %1124 = vadd.xlane.f32.xlu1 %v1093_v18 }
 0x188   : > { %v1024_v36 = vpop.xlane.xlu0 %1023 }
 0x189   : > { %v1062_v31 = vmul.f32 %v2497_v19, %v1024_v36 }
 0x18a   : > { %v1095_v26 = vpop.xlane.xlu1 %1094 }
 0x18b   : > { %v1142_v37 = vmul.f32 %v1062_v31, %v1062_v31  ;;  %v1126_v35 = vmul.f32 %v1095_v26, %v2497_v19  ;;  %v1190_v17 = vsub.f32 %v2386_v4, %v1062_v31 }
 0x18d   : > { %v1158_v23 = vsub.f32 %v1126_v35, %v1142_v37 }
 0x18f   : > { %v1174_v40 = vmax.f32 %v1158_v23, 0.0 }
 0x190   : > { %v1026_v13 = vpop.xlane.xlu0 %1025 }
 0x191   : > { %v1206_v63 = vadd.f32 1e-05, %v1174_v40  ;;  %v2502_v39 = vmul.f32 %v2497_v19, %v1026_v13 }
 0x192   : > { %v1097_v41 = vpop.xlane.xlu2 %1096 }
 0x193   : > { %1960 = vrsqrt.f32 %v1206_v63  ;;  %v1143_v44 = vmul.f32 %v2502_v39, %v2502_v39  ;;  %v1127_v45 = vmul.f32 %v1097_v41, %v2497_v19  ;;  %vm1228_vm3 = vweird.f32 %v1206_v63 }
 0x195   : > { %v1159_v50 = vsub.f32 %v1127_v45, %v1143_v44  ;;  %v1191_v45 = vsub.f32 %v2394_v0, %v2502_v39 }
 0x197   : > { %v1175_v51 = vmax.f32 %v1159_v50, 0.0 }
 0x198   : > { %v1111_v62 = vpop.xlane.xlu0 %1110  ;;  %v1028_v28 = vpop.xlane.xlu1 %1027 }
 0x199   : > { %v1961_v38 = vpop.eup %1960  ;;  %v1207_v47 = vadd.f32 1e-05, %v1175_v51  ;;  %v1134_v8 = vmul.f32 %v1111_v62, %v2497_v19  ;;  %v2512_v59 = vmul.f32 %v2497_v19, %v1028_v28 }
 0x19a   : > { %v1223_v46 = vmul.f32 %v1961_v38, %v1206_v63  ;;  %v1040_v20 = vpop.xlane.xlu2 %1039  ;;  %vm1229_vm2 = vweird.f32 %v1961_v38 }
 0x19b   : > { %v2508_v55 = vmul.f32 %v2497_v19, %v1040_v20  ;;  %1962 = vrsqrt.f32 %v1207_v47  ;;  %v1144_v52 = vmul.f32 %v2512_v59, %v2512_v59  ;;  %vm1230_vm4 = vmor %vm1228_vm3, %vm1229_vm2  ;;  %vm1238_vm6 = vweird.f32 %v1207_v47 }
 0x19c   : > { %v1224_v56 = vmul.f32 %v1961_v38, %v1223_v46 }
 0x19d   : > { %v1150_v61 = vmul.f32 %v2508_v55, %v2508_v55 }
 0x19e   : > { %v1225_v1 = vmul.f32 0.5, %v1224_v56 }
 0x19f   : > { %v1166_v34 = vsub.f32 %v1134_v8, %v1150_v61 }
 0x1a0   : > { %v1226_v54 = vsub.f32 1.5, %v1225_v1  ;;  %v1099_v11 = vpop.xlane.xlu0 %1098  ;;  %v1113_v42 = vpop.xlane.xlu1 %1112 }
 0x1a1   : > { %v1182_v3 = vmax.f32 %v1166_v34, 0.0  ;;  %v1128_v6 = vmul.f32 %v1099_v11, %v2497_v19  ;;  %v1963_v7 = vpop.eup %1962  ;;  %v1135_v41 = vmul.f32 %v1113_v42, %v2497_v19 }
 0x1a2   : > { %v1227_v2 = vmul.f32 %v1961_v38, %v1226_v54  ;;  %v1233_v14 = vmul.f32 %v1963_v7, %v1207_v47  ;;  %vm1239_vm5 = vweird.f32 %v1963_v7 }
 0x1a3   : > { %v1214_v22 = vadd.f32 1e-05, %v1182_v3  ;;  %v1160_v18 = vsub.f32 %v1128_v6, %v1144_v52  ;;  %vm1240_vm7 = vmor %vm1238_vm6, %vm1239_vm5 }
 0x1a4   : > { %v1231_v5 = vsel %vm1230_vm4, %v1961_v38, %v1227_v2  ;;  %v1234_v49 = vmul.f32 %v1963_v7, %v1233_v14  ;;  %v1198_v2 = vsub.f32 %v2400_v43, %v2508_v55 }
 0x1a5   : > { %v1382_v21 = vmul.f32 %v1231_v5, %v1190_v17  ;;  %1964 = vrsqrt.f32 %v1214_v22  ;;  %v1176_v4 = vmax.f32 %v1160_v18, 0.0  ;;  %v2534_v36 = vpop.xlane.xlu2 %1114  ;;  %vm1308_vm9 = vweird.f32 %v1214_v22 }
 0x1a6   : > { %v1235_v58 = vmul.f32 0.5, %v1234_v49 }
 0x1a7   : > { %v1401_v27 = vmul.f32 %v2524_v12, %v1382_v21  ;;  %v2536_v31 = vadd.f32 1e-05, %v1176_v4 }
 0x1a8   : > { %v1042_v26 = vpop.xlane.xlu0 %1041  ;;  %v1030_v37 = vpop.xlane.xlu1 %1029  ;;  %v1236_v23 = vsub.f32 1.5, %v1235_v58 }
 0x1a9   : > { %v1420_v35 = vadd.f32 %v2529_v16, %v1401_v27  ;;  %v2540_v40 = vmul.f32 %v2497_v19, %v1042_v26  ;;  %1966 = vrsqrt.f32 %v2536_v31  ;;  %v2552_v20 = vmul.f32 %v2497_v19, %v1030_v37 }
 0x1aa   : > { %v1237_v63 = vmul.f32 %v1963_v7, %v1236_v23  ;;  %vm1248_vm12 = vweird.f32 %v2536_v31  ;;  %v1192_v23 = vsub.f32 %v2404_v30, %v2512_v59 }
 0x1ab   : > { %v1965_v13 = vpop.eup %1964  ;;  %1436 = vst [vmem:[%s2543_s26] sm:$0xff] %v1420_v35  ;;  %v1151_v44 = vmul.f32 %v2540_v40, %v2540_v40  ;;  %v1145_v52 = vmul.f32 %v2552_v20, %v2552_v20 }
 0x1ac   : > { %v1303_v50 = vmul.f32 %v1965_v13, %v1214_v22  ;;  %v1241_v51 = vsel %vm1240_vm7, %v1963_v7, %v1237_v63  ;;  %vm1309_vm8 = vweird.f32 %v1965_v13 }
 0x1ad   : > { %v1167_v62 = vsub.f32 %v1135_v41, %v1151_v44  ;;  %v1383_v28 = vmul.f32 %v1241_v51, %v1191_v45  ;;  %v1032_v47 = vpop.xlane.xlu2 %1031  ;;  %vm1310_vm10 = vmor %vm1308_vm9, %vm1309_vm8 }
 0x1ae   : > { %v1304_v38 = vmul.f32 %v1965_v13, %v1303_v50  ;;  %v2567_v7 = vmul.f32 %v2497_v19, %v1032_v47  ;;  %v1136_v50 = vmul.f32 %v2534_v36, %v2497_v19 }
 0x1af   : > { %v1183_v46 = vmax.f32 %v1167_v62, 0.0  ;;  %v1967_v56 = vpop.eup %1966  ;;  %v1402_v8 = vmul.f32 %v2524_v12, %v1383_v28 }
 0x1b0   : > { %v1305_v61 = vmul.f32 0.5, %v1304_v38  ;;  %v2555_v1 = vpop.xlane.xlu0 %1116  ;;  %v1101_v34 = vpop.xlane.xlu1 %1100  ;;  %v1243_v0 = vmul.f32 %v1967_v56, %v2536_v31  ;;  %vm1249_vm11 = vweird.f32 %v1967_v56  ;;  %v1146_v27 = vmul.f32 %v2567_v7, %v2567_v7 }
 0x1b1   : > { %v2558_v39 = vadd.f32 1e-05, %v1183_v46  ;;  %v1421_v54 = vadd.f32 %v2529_v16, %v1402_v8  ;;  %v1129_v3 = vmul.f32 %v1101_v34, %v2497_v19  ;;  %vm1250_vm13 = vmor %vm1248_vm12, %vm1249_vm11 }
 0x1b2   : > { %v1306_v11 = vsub.f32 1.5, %v1305_v61  ;;  %v1244_v42 = vmul.f32 %v1967_v56, %v1243_v0 }
 0x1b3   : > { %1968 = vrsqrt.f32 %v2558_v39  ;;  %1437 = vst [vmem:[%s2543_s26 + $0x8] sm:$0xff] %v1421_v54  ;;  %v1161_v14 = vsub.f32 %v1129_v3, %v1145_v52  ;;  %vm1318_vm15 = vweird.f32 %v2558_v39 }
 0x1b4   : > { %v1307_v6 = vmul.f32 %v1965_v13, %v1306_v11  ;;  %v1245_v17 = vmul.f32 0.5, %v1244_v42  ;;  %v1199_v42 = vsub.f32 %v2409_v53, %v2540_v40 }
 0x1b5   : > { %v1177_v49 = vmax.f32 %v1161_v14, 0.0  ;;  %v1103_v4 = vpop.xlane.xlu2 %1102 }
 0x1b6   : > { %v1311_v18 = vsel %vm1310_vm10, %v1965_v13, %v1307_v6  ;;  %v1246_v21 = vsub.f32 1.5, %v1245_v17  ;;  %v1130_v22 = vmul.f32 %v1103_v4, %v2497_v19  ;;  %v1137_v6 = vmul.f32 %v2555_v1, %v2497_v19 }
 0x1b7   : > { %v1390_v5 = vmul.f32 %v1311_v18, %v1198_v2  ;;  %v2578_v35 = vadd.f32 1e-05, %v1177_v49 }
 0x1b8   : > { %v2574_v58 = vpop.xlane.xlu0 %1104  ;;  %v1044_v26 = vpop.xlane.xlu1 %1043  ;;  %v1247_v55 = vmul.f32 %v1967_v56, %v1246_v21  ;;  %v1162_v63 = vsub.f32 %v1130_v22, %v1146_v27 }
 0x1b9   : > { %v1969_v37 = vpop.eup %1968  ;;  %v1409_v43 = vmul.f32 %v2524_v12, %v1390_v5  ;;  %v2584_v41 = vmul.f32 %v2497_v19, %v1044_v26  ;;  %1970 = vrsqrt.f32 %v2578_v35  ;;  %vm1258_vm2 = vweird.f32 %v2578_v35 }
 0x1ba   : > { %v1313_v13 = vmul.f32 %v1969_v37, %v2558_v39  ;;  %v1251_v45 = vsel %vm1250_vm13, %v1967_v56, %v1247_v55  ;;  %v1178_v62 = vmax.f32 %v1162_v63, 0.0  ;;  %vm1319_vm14 = vweird.f32 %v1969_v37 }
 0x1bb   : > { %v1428_v44 = vadd.f32 %v2529_v16, %v1409_v43  ;;  %v1384_v31 = vmul.f32 %v1251_v45, %v1192_v23  ;;  %v1152_v30 = vmul.f32 %v2584_v41, %v2584_v41  ;;  %vm1320_vm0 = vmor %vm1318_vm15, %vm1319_vm14 }
 0x1bc   : > { %v1314_v51 = vmul.f32 %v1969_v37, %v1313_v13  ;;  %v2594_v38 = vadd.f32 1e-05, %v1178_v62 }
 0x1bd   : > { %1444 = vst [vmem:[%s2543_s26 + $0x40] sm:$0xff] %v1428_v44  ;;  %v1403_v59 = vmul.f32 %v2524_v12, %v1384_v31  ;;  %v1168_v46 = vsub.f32 %v1136_v50, %v1152_v30  ;;  %v1046_v47 = vpop.xlane.xlu2 %1045 }
 0x1be   : > { %v1315_v28 = vmul.f32 0.5, %v1314_v51  ;;  %1972 = vrsqrt.f32 %v2594_v38  ;;  %v2599_v54 = vmul.f32 %v2497_v19, %v1046_v47  ;;  %vm1268_vm5 = vweird.f32 %v2594_v38 }
 0x1bf   : > { %v1422_v56 = vadd.f32 %v2529_v16, %v1403_v59  ;;  %v1971_v34 = vpop.eup %1970  ;;  %v1184_v0 = vmax.f32 %v1168_v46, 0.0  ;;  %v1193_v59 = vsub.f32 %v2426_v25, %v2552_v20  ;;  %v1131_v46 = vmul.f32 %v2574_v58, %v2497_v19 }
 0x1c0   : > { %v1316_v36 = vsub.f32 1.5, %v1315_v28  ;;  %v1048_v8 = vpop.xlane.xlu0 %1047  ;;  %v1119_v61 = vpop.xlane.xlu1 %1118  ;;  %v1253_v3 = vmul.f32 %v1971_v34, %v2578_v35  ;;  %v1153_v17 = vmul.f32 %v2599_v54, %v2599_v54  ;;  %vm1259_vm1 = vweird.f32 %v1971_v34 }
 0x1c1   : > { %v2602_v11 = vmul.f32 %v2497_v19, %v1048_v8  ;;  %1438 = vst [vmem:[%s2543_s26 + $0x10] sm:$0xff] %v1422_v56  ;;  %v2611_v2 = vadd.f32 1e-05, %v1184_v0  ;;  %v1138_v53 = vmul.f32 %v1119_v61, %v2497_v19  ;;  %vm1260_vm3 = vmor %vm1258_vm2, %vm1259_vm1 }
 0x1c2   : > { %v1317_v52 = vmul.f32 %v1969_v37, %v1316_v36  ;;  %v1254_v5 = vmul.f32 %v1971_v34, %v1253_v3  ;;  %v1169_v39 = vsub.f32 %v1137_v6, %v1153_v17 }
 0x1c3   : > { %v1154_v14 = vmul.f32 %v2602_v11, %v2602_v11  ;;  %1974 = vrsqrt.f32 %v2611_v2  ;;  %vm1328_vm8 = vweird.f32 %v2611_v2 }
 0x1c4   : > { %v1321_v18 = vsel %vm1320_vm0, %v1969_v37, %v1317_v52  ;;  %v1973_v21 = vpop.eup %1972  ;;  %v1255_v49 = vmul.f32 0.5, %v1254_v5  ;;  %v1185_v22 = vmax.f32 %v1169_v39, 0.0  ;;  %v1194_v52 = vsub.f32 %v2438_v29, %v2567_v7 }
 0x1c5   : > { %v1391_v40 = vmul.f32 %v1321_v18, %v1199_v42  ;;  %v1170_v4 = vsub.f32 %v1138_v53, %v1154_v14  ;;  %v1263_v27 = vmul.f32 %v1973_v21, %v2594_v38  ;;  %v1034_v26 = vpop.xlane.xlu2 %1033  ;;  %vm1269_vm4 = vweird.f32 %v1973_v21 }
 0x1c6   : > { %v1256_v43 = vsub.f32 1.5, %v1255_v49  ;;  %v2622_v55 = vmul.f32 %v2497_v19, %v1034_v26  ;;  %v2625_v45 = vadd.f32 1e-05, %v1185_v22  ;;  %vm1270_vm6 = vmor %vm1268_vm5, %vm1269_vm4  ;;  %v1200_v29 = vsub.f32 %v2421_v32, %v2584_v41 }
 0x1c7   : > { %v1410_v1 = vmul.f32 %v2524_v12, %v1391_v40  ;;  %v1186_v37 = vmax.f32 %v1170_v4, 0.0  ;;  %v1264_v44 = vmul.f32 %v1973_v21, %v1263_v27  ;;  %v1201_v26 = vsub.f32 %v2434_v24, %v2599_v54 }
 0x1c8   : > { %v1036_v23 = vpop.xlane.xlu0 %1035  ;;  %v1107_v13 = vpop.xlane.xlu1 %1106  ;;  %v1257_v31 = vmul.f32 %v1971_v34, %v1256_v43  ;;  %v1147_v62 = vmul.f32 %v2622_v55, %v2622_v55  ;;  %1976 = vrsqrt.f32 %v2625_v45  ;;  %vm1338_vm10 = vweird.f32 %v2625_v45 }
 0x1c9   : > { %v1429_v63 = vadd.f32 %v2529_v16, %v1410_v1  ;;  %v2628_v50 = vmul.f32 %v2497_v19, %v1036_v23  ;;  %v2631_v51 = vadd.f32 1e-05, %v1186_v37  ;;  %v1975_v30 = vpop.eup %1974  ;;  %v1265_v28 = vmul.f32 0.5, %v1264_v44 }
 0x1ca   : > { %v1261_v47 = vsel %vm1260_vm3, %v1971_v34, %v1257_v31  ;;  %v1323_v35 = vmul.f32 %v1975_v30, %v2611_v2  ;;  %v1163_v25 = vsub.f32 %v1131_v46, %v1147_v62  ;;  %v1132_v61 = vmul.f32 %v1107_v13, %v2497_v19 }
 0x1cb   : > { %1445 = vst [vmem:[%s2543_s26 + $0x48] sm:$0xff] %v1429_v63  ;;  %1978 = vrsqrt.f32 %v2631_v51  ;;  %v1148_v56 = vmul.f32 %v2628_v50, %v2628_v50  ;;  %v1385_v36 = vmul.f32 %v1261_v47, %v1193_v59  ;;  %v1266_v8 = vsub.f32 1.5, %v1265_v28 }
 0x1cc   : > { %v1324_v20 = vmul.f32 %v1975_v30, %v1323_v35  ;;  %v1179_v34 = vmax.f32 %v1163_v25, 0.0  ;;  %vm1329_vm7 = vweird.f32 %v1975_v30  ;;  %v1202_v32 = vsub.f32 %v2459_v48, %v2602_v11 }
 0x1cd   : > { %v1404_v0 = vmul.f32 %v2524_v12, %v1385_v36  ;;  %v1267_v58 = vmul.f32 %v1973_v21, %v1266_v8  ;;  %v1109_v42 = vpop.xlane.xlu2 %1108  ;;  %v1164_v6 = vsub.f32 %v1132_v61, %v1148_v56  ;;  %vm1330_vm9 = vmor %vm1328_vm8, %vm1329_vm7  ;;  %vm1348_vm12 = vweird.f32 %v2631_v51 }
 0x1ce   : > { %v1325_v3 = vmul.f32 0.5, %v1324_v20  ;;  %v1977_v18 = vpop.eup %1976  ;;  %v2652_v40 = vadd.f32 1e-05, %v1179_v34  ;;  %v1133_v25 = vmul.f32 %v1109_v42, %v2497_v19 }
 0x1cf   : > { %v1423_v5 = vadd.f32 %v2529_v16, %v1404_v0  ;;  %v1271_v53 = vsel %vm1270_vm6, %v1973_v21, %v1267_v58  ;;  %v1333_v4 = vmul.f32 %v1977_v18, %v2625_v45  ;;  %v1180_v22 = vmax.f32 %v1164_v6, 0.0 }
 0x1d0   : > { %v1054_v17 = vpop.xlane.xlu0 %1053  ;;  %v1050_v14 = vpop.xlane.xlu1 %1049  ;;  %v1386_v49 = vmul.f32 %v1271_v53, %v1194_v52  ;;  %v1326_v38 = vsub.f32 1.5, %v1325_v3  ;;  %1980 = vrsqrt.f32 %v2652_v40  ;;  %vm1339_vm11 = vweird.f32 %v1977_v18 }
 0x1d1   : > { %v1979_v39 = vpop.eup %1978  ;;  %1439 = vst [vmem:[%s2543_s26 + $0x18] sm:$0xff] %v1423_v5  ;;  %v1334_v27 = vmul.f32 %v1977_v18, %v1333_v4  ;;  %v2668_v23 = vadd.f32 1e-05, %v1180_v22  ;;  %v2683_v35 = vmul.f32 %v2497_v19, %v1050_v14  ;;  %vm1340_vm14 = vmor %vm1338_vm10, %vm1339_vm11  ;;  %v2698_v58 = vmul.f32 %v2497_v19, %v1054_v17 }
 0x1d2   : > { %v1343_v7 = vmul.f32 %v1979_v39, %v2631_v51  ;;  %v1405_v21 = vmul.f32 %v2524_v12, %v1386_v49  ;;  %v1327_v1 = vmul.f32 %v1975_v30, %v1326_v38  ;;  %vm1349_vm13 = vweird.f32 %v1979_v39 }
 0x1d3   : > { %v1335_v37 = vmul.f32 0.5, %v1334_v27  ;;  %1982 = vrsqrt.f32 %v2668_v23  ;;  %vm1350_vm15 = vmor %vm1348_vm12, %vm1349_vm13  ;;  %vm1278_vm0 = vweird.f32 %v2652_v40  ;;  %vm1288_vm4 = vweird.f32 %v2668_v23 }
 0x1d4   : > { %v1344_v41 = vmul.f32 %v1979_v39, %v1343_v7  ;;  %v1424_v2 = vadd.f32 %v2529_v16, %v1405_v21  ;;  %v1331_v43 = vsel %vm1330_vm9, %v1975_v30, %v1327_v1 }
 0x1d5   : > { %v1392_v13 = vmul.f32 %v1331_v43, %v1200_v29  ;;  %v1052_v44 = vpop.xlane.xlu2 %1051  ;;  %v1336_v24 = vsub.f32 1.5, %v1335_v37 }
 0x1d6   : > { %v1345_v63 = vmul.f32 0.5, %v1344_v41  ;;  %1440 = vst [vmem:[%s2543_s26 + $0x20] sm:$0xff] %v1424_v2  ;;  %v2674_v48 = vmul.f32 %v2497_v19, %v1052_v44  ;;  %v1981_v31 = vpop.eup %1980  ;;  %v1157_v41 = vmul.f32 %v2698_v58, %v2698_v58  ;;  %v1195_v2 = vsub.f32 %v2447_v33, %v2622_v55 }
 0x1d7   : > { %v1411_v62 = vmul.f32 %v2524_v12, %v1392_v13  ;;  %v1337_v46 = vmul.f32 %v1977_v18, %v1336_v24  ;;  %v1273_v47 = vmul.f32 %v1981_v31, %v2652_v40  ;;  %vm1279_vm1 = vweird.f32 %v1981_v31 }
 0x1d8   : > { %v1123_v54 = vpop.xlane.xlu0 %1122  ;;  %v1038_v11 = vpop.xlane.xlu1 %1037  ;;  %v1346_v30 = vsub.f32 1.5, %v1345_v63  ;;  %v1156_v56 = vmul.f32 %v2674_v48, %v2674_v48  ;;  %vm1280_vm2 = vmor %vm1278_vm0, %vm1279_vm1  ;;  %v1196_v40 = vsub.f32 %v2453_v10, %v2628_v50 }
 0x1d9   : > { %v1140_v59 = vmul.f32 %v1123_v54, %v2497_v19  ;;  %v2679_v28 = vmul.f32 %v2497_v19, %v1038_v11  ;;  %v1430_v36 = vadd.f32 %v2529_v16, %v1411_v62  ;;  %v1341_v61 = vsel %vm1340_vm14, %v1977_v18, %v1337_v46  ;;  %v1983_v42 = vpop.eup %1982 }
 0x1da   : > { %v1347_v8 = vmul.f32 %v1979_v39, %v1346_v30  ;;  %v1274_v0 = vmul.f32 %v1981_v31, %v1273_v47  ;;  %v1393_v52 = vmul.f32 %v1341_v61, %v1201_v26  ;;  %v1155_v18 = vmul.f32 %v2683_v35, %v2683_v35 }
 0x1db   : > { %v1149_v20 = vmul.f32 %v2679_v28, %v2679_v28  ;;  %v1172_v34 = vsub.f32 %v1140_v59, %v1156_v56  ;;  %1446 = vst [vmem:[%s2543_s26 + $0x50] sm:$0xff] %v1430_v36  ;;  %v1283_v17 = vmul.f32 %v1983_v42, %v2668_v23  ;;  %vm1289_vm3 = vweird.f32 %v1983_v42 }
 0x1dc   : > { %v1351_v45 = vsel %vm1350_vm15, %v1979_v39, %v1347_v8  ;;  %v1275_v14 = vmul.f32 0.5, %v1274_v0  ;;  %v1412_v51 = vmul.f32 %v2524_v12, %v1393_v52  ;;  %vm1290_vm5 = vmor %vm1288_vm4, %vm1289_vm3 }
 0x1dd   : > { %v1165_v3 = vsub.f32 %v1133_v25, %v1149_v20  ;;  %v1394_v6 = vmul.f32 %v1351_v45, %v1202_v32  ;;  %v1188_v5 = vmax.f32 %v1172_v34, 0.0  ;;  %v1121_v49 = vpop.xlane.xlu2 %1120  ;;  %v1284_v1 = vmul.f32 %v1983_v42, %v1283_v17 }
 0x1de   : > { %v1276_v38 = vsub.f32 1.5, %v1275_v14  ;;  %v1139_v29 = vmul.f32 %v1121_v49, %v2497_v19  ;;  %v1431_v21 = vadd.f32 %v2529_v16, %v1412_v51 }
 0x1df   : > { %v1181_v53 = vmax.f32 %v1165_v3, 0.0  ;;  %v1413_v39 = vmul.f32 %v2524_v12, %v1394_v6  ;;  %v1220_v4 = vadd.f32 1e-05, %v1188_v5  ;;  %v1285_v43 = vmul.f32 0.5, %v1284_v1 }
 0x1e0   : > { %v1125_v7 = vpop.xlane.xlu1 %1124  ;;  %v1277_v32 = vmul.f32 %v1981_v31, %v1276_v38  ;;  %1447 = vst [vmem:[%s2543_s26 + $0x58] sm:$0xff] %v1431_v21  ;;  %v1171_v37 = vsub.f32 %v1139_v29, %v1155_v18  ;;  %v1197_v5 = vsub.f32 %v2463_v57, %v2679_v28  ;;  %v1203_v1 = vsub.f32 %v2480_v60, %v2683_v35 }
 0x1e1   : > { %v1213_v27 = vadd.f32 1e-05, %v1181_v53  ;;  %v1141_v22 = vmul.f32 %v1125_v7, %v2497_v19  ;;  %v1432_v26 = vadd.f32 %v2529_v16, %v1413_v39  ;;  %1984 = vrsqrt.f32 %v1220_v4 }
 0x1e2   : > { %v1281_v19 = vsel %vm1280_vm2, %v1981_v31, %v1277_v32  ;;  %v1286_v44 = vsub.f32 1.5, %v1285_v43  ;;  %v1187_v24 = vmax.f32 %v1171_v37, 0.0  ;;  %vm1368_vm8 = vweird.f32 %v1220_v4 }
 0x1e3   : > { %1986 = vrsqrt.f32 %v1213_v27  ;;  %1448 = vst [vmem:[%s2543_s26 + $0x60] sm:$0xff] %v1432_v26  ;;  %v1173_v13 = vsub.f32 %v1141_v22, %v1157_v41  ;;  %v1387_v63 = vmul.f32 %v1281_v19, %v1195_v2  ;;  %vm1298_vm10 = vweird.f32 %v1213_v27 }
 0x1e4   : > { %v1287_v62 = vmul.f32 %v1983_v42, %v1286_v44  ;;  %v1219_v33 = vadd.f32 1e-05, %v1187_v24  ;;  %v1205_v22 = vsub.f32 %v2482_v15, %v2698_v58 }
 0x1e5   : > { %v1189_v54 = vmax.f32 %v1173_v13, 0.0  ;;  %v1406_v11 = vmul.f32 %v2524_v12, %v1387_v63 }
 0x1e6   : > { %v1291_v46 = vsel %vm1290_vm5, %v1983_v42, %v1287_v62  ;;  %1988 = vrsqrt.f32 %v1219_v33  ;;  %v1204_v42 = vsub.f32 %v2487_v9, %v2674_v48  ;;  %vm1358_vm14 = vweird.f32 %v1219_v33 }
 0x1e7   : > { %v1985_v55 = vpop.eup %1984  ;;  %v1221_v30 = vadd.f32 1e-05, %v1189_v54  ;;  %v1425_v59 = vadd.f32 %v2529_v16, %v1406_v11  ;;  %v1388_v56 = vmul.f32 %v1291_v46, %v1196_v40 }
 0x1e8   : > { %v1363_v47 = vmul.f32 %v1985_v55, %v1220_v4  ;;  %vm1369_vm6 = vweird.f32 %v1985_v55 }
 0x1e9   : > { %v1987_v31 = vpop.eup %1986  ;;  %1441 = vst [vmem:[%s2543_s26 + $0x28] sm:$0xff] %v1425_v59  ;;  %1990 = vrsqrt.f32 %v1221_v30  ;;  %v1407_v23 = vmul.f32 %v2524_v12, %v1388_v56  ;;  %vm1370_vm9 = vmor %vm1368_vm8, %vm1369_vm6  ;;  %vm1378_vm0 = vweird.f32 %v1221_v30 }
 0x1ea   : > { %v1293_v36 = vmul.f32 %v1987_v31, %v1213_v27  ;;  %v1364_v8 = vmul.f32 %v1985_v55, %v1363_v47  ;;  %vm1299_vm7 = vweird.f32 %v1987_v31 }
 0x1eb   : > { %v1426_v10 = vadd.f32 %v2529_v16, %v1407_v23  ;;  %vm1300_vm11 = vmor %vm1298_vm10, %vm1299_vm7 }
 0x1ec   : > { %v1294_v25 = vmul.f32 %v1987_v31, %v1293_v36  ;;  %v1365_v20 = vmul.f32 0.5, %v1364_v8  ;;  %v1989_v0 = vpop.eup %1988 }
 0x1ed   : > { %1442 = vst [vmem:[%s2543_s26 + $0x30] sm:$0xff] %v1426_v10  ;;  %v1353_v3 = vmul.f32 %v1989_v0, %v1219_v33  ;;  %vm1359_vm12 = vweird.f32 %v1989_v0 }
 0x1ee   : > { %v1295_v50 = vmul.f32 0.5, %v1294_v25  ;;  %v1366_v61 = vsub.f32 1.5, %v1365_v20  ;;  %vm1360_vm15 = vmor %vm1358_vm14, %vm1359_vm12 }
 0x1ef   : > { %v1991_v52 = vpop.eup %1990  ;;  %v1354_v51 = vmul.f32 %v1989_v0, %v1353_v3 }
 0x1f0   : > { %v1296_v34 = vsub.f32 1.5, %v1295_v50  ;;  %v1367_v45 = vmul.f32 %v1985_v55, %v1366_v61  ;;  %v1373_v14 = vmul.f32 %v1991_v52, %v1221_v30  ;;  %vm1379_vm13 = vweird.f32 %v1991_v52 }
 0x1f1   : > { %v1355_v38 = vmul.f32 0.5, %v1354_v51  ;;  %vm1380_vm1 = vmor %vm1378_vm0, %vm1379_vm13 }
 0x1f2   : > { %v1297_v6 = vmul.f32 %v1987_v31, %v1296_v34  ;;  %v1371_v18 = vsel %vm1370_vm9, %v1985_v55, %v1367_v45  ;;  %v1374_v49 = vmul.f32 %v1991_v52, %v1373_v14 }
 0x1f3   : > { %v1396_v17 = vmul.f32 %v1371_v18, %v1204_v42  ;;  %v1356_v29 = vsub.f32 1.5, %v1355_v38 }
 0x1f4   : > { %v1301_v53 = vsel %vm1300_vm11, %v1987_v31, %v1297_v6  ;;  %v1375_v9 = vmul.f32 0.5, %v1374_v49 }
 0x1f5   : > { %v1389_v39 = vmul.f32 %v1301_v53, %v1197_v5  ;;  %v1415_v4 = vmul.f32 %v2524_v12, %v1396_v17  ;;  %v1357_v21 = vmul.f32 %v1989_v0, %v1356_v29 }
 0x1f6   : > { %v1376_v57 = vsub.f32 1.5, %v1375_v9 }
 0x1f7   : > { %v1408_v48 = vmul.f32 %v2524_v12, %v1389_v39  ;;  %v1434_v7 = vadd.f32 %v2529_v16, %v1415_v4  ;;  %v1361_v26 = vsel %vm1360_vm15, %v1989_v0, %v1357_v21 }
 0x1f8   : > { %v1377_v27 = vmul.f32 %v1991_v52, %v1376_v57  ;;  %v1395_v32 = vmul.f32 %v1361_v26, %v1203_v1 }
 0x1f9   : > { %v1427_v28 = vadd.f32 %v2529_v16, %v1408_v48  ;;  %1450 = vst [vmem:[%s2543_s26 + $0x70] sm:$0xff] %v1434_v7 }
 0x1fa   : > { %v1381_v41 = vsel %vm1380_vm1, %v1991_v52, %v1377_v27  ;;  %v1414_v35 = vmul.f32 %v2524_v12, %v1395_v32 }
 0x1fb   : > { %1443 = vst [vmem:[%s2543_s26 + $0x38] sm:$0xff] %v1427_v28  ;;  %v1397_v60 = vmul.f32 %v1381_v41, %v1205_v22 }
 0x1fc   : > { %v1433_v58 = vadd.f32 %v2529_v16, %v1414_v35 }
 0x1fd   : > { %v1416_v15 = vmul.f32 %v2524_v12, %v1397_v60 }
 0x1fe   : > { %1449 = vst [vmem:[%s2543_s26 + $0x68] sm:$0xff] %v1433_v58 }
 0x1ff   : > { %v1435_v2 = vadd.f32 %v2529_v16, %v1416_v15 }
 0x201   : > { %1451 = vst [vmem:[%s2543_s26 + $0x78] sm:$0xff] %v1435_v2 }
 0x202   : > { %2019 = shalt.err (!%p2016_p3)
}
 0x203   : > { %s2057_s13 = smov 128   ;;  %s2058_s26 = smov 8  }
 0x204   : > { %1914 = dma.vmem_to_hbm [thread:$0]  (%p2132_p5), %s1466_s11, 2048, %s1468_s12, %s1453_s14, %s2057_s13, %s2057_s13, %s2058_s26  }
 0x205 PF: > { %p1920_p4 = scmp.ge.s32.totalorder %s2054_s24, 2  ;;  %s1482_s28 = sand.u32 1, %s2042_s21  }
 0x206   : > { %s1483_s25 = scalar_lea.sflag [#allocation3], %s1482_s28 }
 0x207   : > { %p1917_p7 = pnand %p1920_p4, %p2136_p6 }
 0x209   : > { %p1918_p8 = pneg %p1917_p7 }
 0x20b   : > { %2037 = dma.done.wait (%p1918_p8), %s1483_s25, 2048  }
 0x20c   : > { %2039 = vsyncadd (%p1918_p8), %s1483_s25, 4294965248  ;;  %p16_p9 = scmp.ge.s32.totalorder %s2119_s27, 6   ;;  %s2792_s21 = smov %s2046_s22 }
 0x20d   : > { %s2793_s22 = smov %s2050_s23  ;;  %s2794_s23 = smov %s2130_s30 }
 0x20e   : > { %s2795_s24 = smov %s2119_s27  ;;  %18 = sbr.rel (!%p16_p9) target bundleno = 3 (0x3), region = 82 }
 0x213   :  { %1489 = vsyncpa [#allocation3], 1 }
 0x214   :  { %1491 = vsyncpa [#allocation3 + $0x1], 1 }

// kernel: protein_features_forward.3
= control target key start
LH: loop header
LB: loop body
LE: loop exit
PB: predicated region body
PF: predicated region fallthrough
CT: control target
= control target key end

     0   :  { %10 = vsyncpa [#allocation3], 0  ;;  %s7559_s0 = inlined_call_operand.vmem [shape: f32[512,160], index: 0, kind: input, shape index: {}]   ;;  %s7560_s1 = inlined_call_operand.vmem [shape: bf16[512,160], index: 1, kind: input, shape index: {}]   ;;  %s7561_s2 = inlined_call_operand.vmem [shape: bf16[8,160,128], index: 2, kind: input, shape index: {}]   ;;  %s7562_s3 = inlined_call_operand.vmem [shape: f32[1,128], index: 3, kind: input, shape index: {}]   ;;  %s7563_s4 = inlined_call_operand.vmem [shape: f32[1,128], index: 4, kind: input, shape index: {}]   ;;  %s7564_s5 = inlined_call_operand.hbm [shape: f32[512,128], index: 5, kind: output, shape index: {}]  }
   0x1   :  { %12 = vsyncpa [#allocation3 + $0x1], 0  ;;  %s5838_s18 = smov 0   ;;  %s5840_s19 = smov 0  }
   0x2   :  { %s5842_s20 = smov 0   ;;  %s5844_s21 = smov 0  }
   0x3 LB: > { %s5859_s22 = sadd.s32 4294967295, %s5803_s21   ;;  %s4272_s23 = sadd.s32 4294967294, %s5803_s21   ;;  %s5803_s21 = sphi %s5844_s21, %s7936_s21   ;;  %s5799_s20 = sphi %s5842_s20, %s7935_s20   ;;  %s5795_s19 = sphi %s5840_s19, %s7934_s19   ;;  %s5791_s18 = sphi %s5838_s18, %s7933_s18  }
   0x4   : > { %s5863_s24 = sadd.s32 1, %s5803_s21   ;;  %s140_s25 = sadd.s32 1, %s5799_s20 }
   0x5   : > { %s137_s26 = ssub.s32 %s5803_s21, %s5863_s24  ;;  %p150_p0 = scmp.ne.s32.totalorder %s5799_s20, %s5795_s19 }
   0x6   : > { %p138_p1 = scmp.eq.s32.totalorder %s137_s26, 0  ;;  %p151_p2 = scmp.eq.s32.totalorder %s5859_s22, 3 }
   0x7   : > { %p156_p3 = scmp.ne.s32.totalorder %s5795_s19, %s5791_s18  ;;  %p157_p4 = scmp.eq.s32.totalorder %s4272_s23, 3 }
   0x8   : > { %s5874_s27 = scalar_select %p138_p1, %s5799_s20, %s140_s25  }
   0x9   : > { %p5876_p5 = por %p151_p2, %p150_p0  ;;  %p5880_p6 = por %p157_p4, %p156_p3 }
   0xa   : > { %p4275_p7 = scmp.ge.s32.totalorder %s5803_s21, 1  ;;  %p204_p8 = scmp.lt.s32.totalorder %s5803_s21, 5 }
   0xc   : > { %p205_p9 = pnand %p4275_p7, %p204_p8 }
   0xe   : > { %208 = sbr.rel (%p205_p9) target bundleno = 854 (0x356), region = 40 }
  0x13   : > { %v5087_v0 = vld [vmem:[%s7561_s2 + $0x88] sm:$0xff]  ;;  %v5077_v1 = vld [vmem:[%s7561_s2 + $0x38] sm:$0xff]  ;;  %s4277_s9 = sshll.u32 %s5859_s22, 4  ;;  %v5086_v2 = vld [vmem:[%s7561_s2 + $0x80] sm:$0xff]  ;;  %vm884_vm0 = vcmask 261120   ;;  %s5150_s12 = sshll.u32 %s5859_s22, 7 }
  0x14   : > { %p240_p10 = scmp.lt.s32.totalorder %s4277_s9, 63  ;;  %909 = vmatpush.bf16.msra.mxu0 %v5087_v0  ;;  %1091 = vmatpush.bf16.msra.mxu2 %v5077_v1  ;;  %v5076_v3 = vld [vmem:[%s7561_s2 + $0x30] sm:$0xff]  ;;  %v5079_v4 = vld [vmem:[%s7561_s2 + $0x48] sm:$0xff]  ;;  %v5089_v5 = vld [vmem:[%s7561_s2 + $0x98] sm:$0xff]  ;;  %s4194_s16 = scalar_lea.hbm %s7564_s5, %s5150_s12 }
  0x15   : > { %v5085_v6 = vld [vmem:[%s7561_s2 + $0x78] sm:$0xff]  ;;  %1146 = vmatpush.bf16.msra.mxu3 %v5079_v4  ;;  %v5078_v7 = vld [vmem:[%s7561_s2 + $0x40] sm:$0xff]  ;;  %v5075_v8 = vld [vmem:[%s7561_s2 + $0x28] sm:$0xff]  ;;  %964 = vmatpush.bf16.msra.mxu1 %v5089_v5  ;;  %s4197_s17 = sshll.u32 %s4194_s16, 4  ;;  %s4198_s17 = int_to_ptr.hbm [resolvable:$true] %s4197_s17 }
  0x16   : > { %s7938_s9 = smov (!%p240_p10, %s4277_s9), 63  ;;  %v5088_v9 = vld [vmem:[%s7561_s2 + $0x90] sm:$0xff]  ;;  %v5099_v10 = vld [vmem:[%s7561_s2 + $0xe8] sm:$0xff]  ;;  %v5074_v18 = vld [vmem:[%s7561_s2 + $0x20] sm:$0xff]  ;;  %s5755_s23 = sshra.s32 %s4198_s17, 4  ;;  %s5756_s23 = int_to_ptr.hbm [resolvable:$true] %s5755_s23 }
  0x17   : > { %s5068_s6 = sshll.u32 %s7938_s9, 4  ;;  %s5069_s7 = sshll.u32 %s7938_s9, 3  ;;  %v5084_v14 = vld [vmem:[%s7561_s2 + $0x70] sm:$0xff]  ;;  %v5097_v21 = vld [vmem:[%s7561_s2 + $0xd8] sm:$0xff]  ;;  %v5083_v39 = vld [vmem:[%s7561_s2 + $0x68] sm:$0xff] }
  0x18   : > { %910 = vmatpush.bf16.msra.mxu0 %v5086_v2  ;;  %1092 = vmatpush.bf16.msra.mxu2 %v5076_v3  ;;  %s5920_s15 = scalar_lea.vmem %s7559_s0, %s5068_s6  ;;  %s5925_s9 = scalar_lea.vmem %s7560_s1, %s5069_s7  ;;  %v5073_v40 = vld [vmem:[%s7561_s2 + $0x18] sm:$0xff]  ;;  %v5082_v52 = vld [vmem:[%s7561_s2 + $0x60] sm:$0xff]  ;;  %v5072_v61 = vld [vmem:[%s7561_s2 + $0x10] sm:$0xff] }
  0x19   : > { %v256_v11 = vld [vmem:[%s5920_s15 + $0x8] sm:$0xff]  ;;  %v258_v12 = vld [vmem:[%s5920_s15 + $0x18] sm:$0xff]  ;;  %v319_v13 = vld [vmem:[%s5925_s9] sm:$0xff]  ;;  %1147 = vmatpush.bf16.msra.mxu3 %v5078_v7  ;;  %965 = vmatpush.bf16.msra.mxu1 %v5088_v9  ;;  %s5757_s25 = scalar_lea.hbm %s5756_s23, 128  ;;  %s5761_s6 = scalar_lea.hbm %s7564_s5, 512 }
  0x1a   : > { %v5936_v15 = vmul.f32 0.4, %v256_v11  ;;  %v5938_v16 = vmul.f32 0.4, %v258_v12  ;;  %v255_v17 = vld [vmem:[%s5920_s15] sm:$0xff]  ;;  %v257_v19 = vld [vmem:[%s5920_s15 + $0x10] sm:$0xff]  ;;  %v5950_v22 = vunpack.c.h.bf16 %v319_v13  ;;  %v5958_v28 = vunpack.c.l.bf16 %v319_v13  ;;  %p5758_p11 = scmp.ne.s32.totalorder %s5756_s23, %s5757_s25  ;;  %p5762_p0 = scmp.lt.s32.totalorder %s5756_s23, %s7564_s5 }
  0x1b   : > { %v5945_v20 = vmul.f32 0.4, %v255_v17  ;;  %v5956_v27 = vmul.f32 0.4, %v257_v19  ;;  %v320_v34 = vld [vmem:[%s5925_s9 + $0x8] sm:$0xff]  ;;  %v262_v50 = vld [vmem:[%s5920_s15 + $0x38] sm:$0xff]  ;;  %p5763_p1 = scmp.lt.s32.totalorder %s5761_s6, %s5757_s25 }
  0x1c   : > { %7729 = vst [vmem:[#allocation5_spill] sm:$0xff] %v5938_v16  ;;  %911 = vmatpush.bf16.msra.mxu0 %v5085_v6  ;;  %1093 = vmatpush.bf16.msra.mxu2 %v5075_v8  ;;  %v4284_v23 = vadd.f32 -0.8, %v5936_v15  ;;  %v4286_v24 = vadd.f32 -0.8, %v5938_v16  ;;  %v260_v49 = vld [vmem:[%s5920_s15 + $0x28] sm:$0xff]  ;;  %v5979_v53 = vunpack.c.h.bf16 %v320_v34  ;;  %v5988_v1 = vunpack.c.l.bf16 %v320_v34  ;;  %p5759_p12 = pnand %p5758_p11, %p5876_p5 }
  0x1d   : > { %7730 = vst [vmem:[#allocation6_spill] sm:$0xff] %v5945_v20  ;;  %v4316_v25 = vadd.f32 -1.9428571, %v5936_v15  ;;  %v4318_v26 = vadd.f32 -1.9428571, %v5938_v16  ;;  %1557 = vmatpush.bf16.msrb.mxu3 %v5099_v10  ;;  %1502 = vmatpush.bf16.msrb.mxu1 %v5097_v21  ;;  %v5974_v51 = vld [vmem:[%s5925_s9 + $0x10] sm:$0xff]  ;;  %p5764_p2 = por %p5763_p1, %p5762_p0 }
  0x1e   : > { %7731 = vst [vmem:[#allocation7_spill] sm:$0xff] %v5956_v27  ;;  %v4315_v29 = vadd.f32 -1.9428571, %v5945_v20  ;;  %v400_v30 = vmul.f32 %v4284_v23, %v4284_v23  ;;  %v402_v31 = vmul.f32 %v4286_v24, %v4286_v24  ;;  %v4283_v33 = vadd.f32 -0.8, %v5945_v20  ;;  %v5991_v3 = vld [vmem:[%s5925_s9 + $0x18] sm:$0xff]  ;;  %p5760_p13 = pneg %p5759_p12 }
  0x1f   : > { %7732 = vst [vmem:[#allocation8_spill] sm:$0xff] %v5958_v28  ;;  %v628_v32 = vmul.f32 %v4316_v25, %v4316_v25  ;;  %v630_v35 = vmul.f32 %v4318_v26, %v4318_v26  ;;  %v4317_v36 = vadd.f32 -1.9428571, %v5956_v27  ;;  %v4285_v38 = vadd.f32 -0.8, %v5956_v27  ;;  %v259_v5 = vld [vmem:[%s5920_s15 + $0x20] sm:$0xff] }
  0x20   : > { %v627_v37 = vmul.f32 %v4315_v29, %v4315_v29  ;;  %912 = vmatpush.bf16.msra.mxu0 %v5084_v14  ;;  %1094 = vmatpush.bf16.msra.mxu2 %v5074_v18  ;;  %v432_v41 = vsub.f32 0.0, %v400_v30  ;;  %v434_v42 = vsub.f32 0.0, %v402_v31  ;;  %v399_v44 = vmul.f32 %v4283_v33, %v4283_v33  ;;  %v261_v6 = vld [vmem:[%s5920_s15 + $0x30] sm:$0xff]  ;;  %v5081_v13 = vld [vmem:[%s7561_s2 + $0x58] sm:$0xff]  ;;  %v5071_v14 = vld [vmem:[%s7561_s2 + $0x8] sm:$0xff]  ;;  %p5765_p3 = pnand %p5764_p2, %p5760_p13 }
  0x21   : > { %v660_v43 = vsub.f32 0.0, %v628_v32  ;;  %v662_v45 = vsub.f32 0.0, %v630_v35  ;;  %v629_v46 = vmul.f32 %v4317_v36, %v4317_v36  ;;  %v401_v48 = vmul.f32 %v4285_v38, %v4285_v38  ;;  %v5096_v21 = vld [vmem:[%s7561_s2 + $0xd0] sm:$0xff]  ;;  %v5070_v35 = vld [vmem:[%s7561_s2] sm:$0xff]  ;;  %v5107_v36 = vld [vmem:[%s7561_s2 + $0x128] sm:$0xff] }
  0x22   : > { %v659_v47 = vsub.f32 0.0, %v627_v37  ;;  %v465_v54 = vmul.f32 1.442695, %v432_v41  ;;  %v469_v55 = vmul.f32 1.442695, %v434_v42  ;;  %v431_v60 = vsub.f32 0.0, %v399_v44  ;;  %1503 = vmatpush.bf16.msrb.mxu1 %v5096_v21 }
  0x23   : > { %v693_v56 = vmul.f32 1.442695, %v660_v43  ;;  %v697_v57 = vmul.f32 1.442695, %v662_v45  ;;  %v661_v58 = vsub.f32 0.0, %v629_v46  ;;  %v433_v62 = vsub.f32 0.0, %v401_v48 }
  0x24   : > { %v691_v59 = vmul.f32 1.442695, %v659_v47  ;;  %913 = vmatpush.bf16.msra.mxu0 %v5083_v39  ;;  %1095 = vmatpush.bf16.msra.mxu2 %v5073_v40  ;;  %5195 = vpow2.f32 %v465_v54  ;;  %v5984_v63 = vmul.f32 0.4, %v260_v49  ;;  %v5986_v0 = vmul.f32 0.4, %v262_v50 }
  0x25   : > { %5197 = vpow2.f32 %v469_v55  ;;  %v695_v2 = vmul.f32 1.442695, %v661_v58  ;;  %v5994_v4 = vunpack.c.h.bf16 %v5974_v51  ;;  %v463_v7 = vmul.f32 1.442695, %v431_v60  ;;  %v5080_v34 = vld [vmem:[%s7561_s2 + $0x50] sm:$0xff]  ;;  %v5109_v54 = vld [vmem:[%s7561_s2 + $0x138] sm:$0xff] }
  0x26   : > { %7733 = vst [vmem:[#allocation9_spill] sm:$0xff] %v5986_v0  ;;  %5199 = vpow2.f32 %v693_v56  ;;  %v4288_v8 = vadd.f32 -0.8, %v5984_v63  ;;  %v4290_v9 = vadd.f32 -0.8, %v5986_v0  ;;  %v6016_v29 = vunpack.c.h.bf16 %v5991_v3 }
  0x27   : > { %7734 = vst [vmem:[#allocation10_spill] sm:$0xff] %v5994_v4  ;;  %5201 = vpow2.f32 %v697_v57  ;;  %v467_v10 = vmul.f32 1.442695, %v433_v62  ;;  %v4320_v11 = vadd.f32 -1.9428571, %v5984_v63 }
  0x28   : > { %v4322_v12 = vadd.f32 -1.9428571, %v5986_v0  ;;  %914 = vmatpush.bf16.msra.mxu0 %v5082_v52  ;;  %1096 = vmatpush.bf16.msra.mxu2 %v5072_v61  ;;  %5203 = vpow2.f32 %v691_v59  ;;  %v404_v17 = vmul.f32 %v4288_v8, %v4288_v8  ;;  %v406_v18 = vmul.f32 %v4290_v9, %v4290_v9  ;;  %7737 = vst [vmem:[#allocation13_spill] sm:$0xff] %v6016_v29 }
  0x29   : > { %v6008_v19 = vmul.f32 0.4, %v259_v5  ;;  %5205 = vpow2.f32 %v695_v2  ;;  %v632_v23 = vmul.f32 %v4320_v11, %v4320_v11  ;;  %v6013_v25 = vmul.f32 0.4, %v261_v6  ;;  %v264_v5 = vld [vmem:[%s5920_s15 + $0x48] sm:$0xff]  ;;  %v266_v6 = vld [vmem:[%s5920_s15 + $0x58] sm:$0xff] }
  0x2a   : > { %v634_v24 = vmul.f32 %v4322_v12, %v4322_v12  ;;  %v5196_v26 = vpop.eup %5195  ;;  %5207 = vpow2.f32 %v463_v7  ;;  %v436_v30 = vsub.f32 0.0, %v404_v17  ;;  %v438_v31 = vsub.f32 0.0, %v406_v18  ;;  %v5106_v11 = vld [vmem:[%s7561_s2 + $0x120] sm:$0xff] }
  0x2b   : > { %7735 = vst [vmem:[#allocation11_spill] sm:$0xff] %v6008_v19  ;;  %v5198_v32 = vpop.eup %5197  ;;  %v528_v33 = vmul.f32 %v5196_v26, %v5950_v22  ;;  %5209 = vpow2.f32 %v467_v10  ;;  %v664_v37 = vsub.f32 0.0, %v632_v23  ;;  %v4319_v43 = vadd.f32 -1.9428571, %v6008_v19 }
  0x2c   : > { %7736 = vst [vmem:[#allocation12_spill] sm:$0xff] %v6013_v25  ;;  %v666_v38 = vsub.f32 0.0, %v634_v24  ;;  %v5200_v39 = vpop.eup %5199  ;;  %915 = vmatpush.bf16.msra.mxu0 %v5081_v13  ;;  %1097 = vmatpush.bf16.msra.mxu2 %v5071_v14  ;;  %v530_v40 = vmul.f32 %v5198_v32, %v5979_v53  ;;  %v473_v41 = vmul.f32 1.442695, %v436_v30  ;;  %v477_v42 = vmul.f32 1.442695, %v438_v31 }
  0x2d   : > { %v5202_v44 = vpop.eup %5201  ;;  %v756_v45 = vmul.f32 %v5200_v39, %v5950_v22  ;;  %v701_v46 = vmul.f32 1.442695, %v664_v37  ;;  %v4321_v48 = vadd.f32 -1.9428571, %v6013_v25  ;;  %v631_v55 = vmul.f32 %v4319_v43, %v4319_v43  ;;  %v263_v37 = vld [vmem:[%s5920_s15 + $0x40] sm:$0xff] }
  0x2e   : > { %v705_v47 = vmul.f32 1.442695, %v666_v38  ;;  %v5204_v49 = vpop.eup %5203  ;;  %v560_v50 = vpack.c.bf16 %v530_v40, %v528_v33  ;;  %v758_v52 = vmul.f32 %v5202_v44, %v5979_v53  ;;  %5211 = vpow2.f32 %v473_v41  ;;  %v265_v38 = vld [vmem:[%s5920_s15 + $0x50] sm:$0xff] }
  0x2f   : > { %v5206_v56 = vpop.eup %5205  ;;  %v755_v57 = vmul.f32 %v5204_v49, %v5958_v28  ;;  %5213 = vpow2.f32 %v477_v42  ;;  %v633_v58 = vmul.f32 %v4321_v48, %v4321_v48  ;;  %v4287_v59 = vadd.f32 -0.8, %v6008_v19 }
  0x30   : > { %v5208_v60 = vpop.eup %5207  ;;  %4455 = vmatmul.msk.bf16.vlgmr.msra.gmra.mxu3 %vm884_vm0, %v560_v50  ;;  %v788_v61 = vpack.c.bf16 %v758_v52, %v756_v45  ;;  %916 = vmatpush.bf16.msra.mxu0 %v5080_v34  ;;  %v757_v62 = vmul.f32 %v5206_v56, %v5988_v1  ;;  %5215 = vpow2.f32 %v701_v46  ;;  %v663_v2 = vsub.f32 0.0, %v631_v55  ;;  %v5095_v50 = vld [vmem:[%s7561_s2 + $0xc8] sm:$0xff]  ;;  %v5105_v52 = vld [vmem:[%s7561_s2 + $0x118] sm:$0xff] }
  0x31   : > { %v5210_v7 = vpop.eup %5209  ;;  %1098 = vmatpush.bf16.msra.mxu2 %v5070_v35  ;;  %v527_v8 = vmul.f32 %v5208_v60, %v5958_v28  ;;  %5217 = vpow2.f32 %v705_v47  ;;  %v665_v9 = vsub.f32 0.0, %v633_v58  ;;  %v4289_v10 = vadd.f32 -0.8, %v6013_v25  ;;  %1504 = vmatpush.bf16.msrb.mxu1 %v5095_v50 }
  0x32   : > { %4407 = vmatmul.msk.bf16.vlgmr.msra.gmra.mxu1 %vm884_vm0, %v788_v61  ;;  %v787_v12 = vpack.c.bf16 %v757_v62, %v755_v57  ;;  %v529_v13 = vmul.f32 %v5210_v7, %v5988_v1  ;;  %v699_v14 = vmul.f32 1.442695, %v663_v2  ;;  %v403_v17 = vmul.f32 %v4287_v59, %v4287_v59 }
  0x33   : > { %v703_v18 = vmul.f32 1.442695, %v665_v9  ;;  %v405_v21 = vmul.f32 %v4289_v10, %v4289_v10  ;;  %v6049_v23 = vmul.f32 0.4, %v264_v5  ;;  %v6051_v24 = vmul.f32 0.4, %v266_v6 }
  0x34   : > { %1929 = vmatpush.bf16.msrb.mxu0 %v5107_v36  ;;  %v5212_v26 = vpop.eup %5211  ;;  %v559_v30 = vpack.c.bf16 %v529_v13, %v527_v8  ;;  %5219 = vpow2.f32 %v699_v14  ;;  %v435_v31 = vsub.f32 0.0, %v403_v17  ;;  %v6054_v33 = vunpack.c.l.bf16 %v5974_v51  ;;  %v6060_v36 = vld [vmem:[%s5925_s9 + $0x20] sm:$0xff] }
  0x35   : > { %1984 = vmatpush.bf16.msrb.mxu2 %v5109_v54  ;;  %7738 = vst [vmem:[#allocation14_spill] sm:$0xff] %v6051_v24  ;;  %917 = vmatmul.bf16.vlgmr.msra.gmra.mxu0 %v787_v12  ;;  %v5214_v32 = vpop.eup %5213  ;;  %v6057_v34 = vunpack.c.l.bf16 %v5991_v3  ;;  %5221 = vpow2.f32 %v703_v18  ;;  %v437_v35 = vsub.f32 0.0, %v405_v21  ;;  %v532_v40 = vmul.f32 %v5212_v26, %v5994_v4  ;;  %v324_v54 = vld [vmem:[%s5925_s9 + $0x28] sm:$0xff] }
  0x36   : > { %7739 = vst [vmem:[#allocation15_spill] sm:$0xff] %v6054_v33  ;;  %v5216_v39 = vpop.eup %5215  ;;  %1099 = vmatmul.bf16.vlgmr.msra.gmra.mxu2 %v559_v30  ;;  %v471_v41 = vmul.f32 1.442695, %v435_v31  ;;  %v4292_v42 = vadd.f32 -0.8, %v6049_v23  ;;  %v534_v3 = vmul.f32 %v5214_v32, %v6016_v29  ;;  %v6080_v59 = vunpack.c.h.bf16 %v6060_v36  ;;  %v268_v32 = vld [vmem:[%s5920_s15 + $0x68] sm:$0xff] }
  0x37   : > { %7740 = vst [vmem:[#allocation16_spill] sm:$0xff] %v6057_v34  ;;  %v4294_v51 = vadd.f32 -0.8, %v6051_v24  ;;  %v5218_v43 = vpop.eup %5217  ;;  %v475_v44 = vmul.f32 1.442695, %v437_v35  ;;  %v760_v47 = vmul.f32 %v5216_v39, %v5994_v4 }
  0x38   : > { %1930 = vmatpush.bf16.msrb.mxu0 %v5106_v11  ;;  %v4324_v45 = vadd.f32 -1.9428571, %v6049_v23  ;;  %v4326_v46 = vadd.f32 -1.9428571, %v6051_v24  ;;  %v762_v48 = vmul.f32 %v5218_v43, %v6016_v29  ;;  %5223 = vpow2.f32 %v471_v41  ;;  %7741 = vst [vmem:[#allocation17_spill] sm:$0xff] %v6080_v59 }
  0x39   : > { %v408_v49 = vmul.f32 %v4292_v42, %v4292_v42  ;;  %5225 = vpow2.f32 %v475_v44  ;;  %v410_v55 = vmul.f32 %v4294_v51, %v4294_v51  ;;  %v6082_v61 = vmul.f32 0.4, %v263_v37 }
  0x3a   : > { %v636_v56 = vmul.f32 %v4324_v45, %v4324_v45  ;;  %v638_v57 = vmul.f32 %v4326_v46, %v4326_v46  ;;  %v5220_v58 = vpop.eup %5219  ;;  %v6084_v62 = vmul.f32 0.4, %v265_v38  ;;  %v562_v9 = vpack.c.bf16 %v534_v3, %v532_v40  ;;  %v270_v40 = vld [vmem:[%s5920_s15 + $0x78] sm:$0xff] }
  0x3b   : > { %v440_v60 = vsub.f32 0.0, %v408_v49  ;;  %7742 = vst [vmem:[#allocation18_spill] sm:$0xff] %v6082_v61  ;;  %v5222_v2 = vpop.eup %5221  ;;  %v759_v5 = vmul.f32 %v5220_v58, %v6054_v33  ;;  %v442_v6 = vsub.f32 0.0, %v410_v55  ;;  %v6088_v11 = vunpack.c.h.bf16 %v324_v54 }
  0x3c   : > { %7743 = vst [vmem:[#allocation19_spill] sm:$0xff] %v6084_v62  ;;  %1931 = vmatpush.bf16.msrb.mxu0 %v5105_v52  ;;  %v668_v7 = vsub.f32 0.0, %v636_v56  ;;  %v670_v8 = vsub.f32 0.0, %v638_v57  ;;  %v761_v10 = vmul.f32 %v5222_v2, %v6057_v34  ;;  %v790_v13 = vpack.c.bf16 %v762_v48, %v760_v47 }
  0x3d   : > { %7744 = vst [vmem:[#allocation20_spill] sm:$0xff] %v6088_v11  ;;  %v481_v12 = vmul.f32 1.442695, %v440_v60  ;;  %v485_v14 = vmul.f32 1.442695, %v442_v6  ;;  %v6105_v49 = vunpack.c.l.bf16 %v6060_v36  ;;  %v6108_v57 = vunpack.c.l.bf16 %v324_v54  ;;  %v6113_v36 = vld [vmem:[%s5925_s9 + $0x30] sm:$0xff] }
  0x3e   : > { %v709_v17 = vmul.f32 1.442695, %v668_v7  ;;  %v713_v18 = vmul.f32 1.442695, %v670_v8  ;;  %v5224_v21 = vpop.eup %5223  ;;  %v789_v26 = vpack.c.bf16 %v761_v10, %v759_v5  ;;  %v4323_v30 = vadd.f32 -1.9428571, %v6082_v61 }
  0x3f   : > { %5227 = vpow2.f32 %v481_v12  ;;  %v4325_v31 = vadd.f32 -1.9428571, %v6084_v62  ;;  %v5226_v35 = vpop.eup %5225  ;;  %v531_v37 = vmul.f32 %v5224_v21, %v6054_v33  ;;  %v4291_v38 = vadd.f32 -0.8, %v6082_v61  ;;  %7747 = vst [vmem:[#allocation23_spill] sm:$0xff] %v6105_v49 }
  0x40   : > { %5229 = vpow2.f32 %v485_v14  ;;  %v4293_v39 = vadd.f32 -0.8, %v6084_v62  ;;  %4456 = vmatmul.msk.bf16.gmra.mxu3 %vm884_vm0, %v562_v9  ;;  %v533_v41 = vmul.f32 %v5226_v35, %v6057_v34  ;;  %v635_v42 = vmul.f32 %v4323_v30, %v4323_v30  ;;  %7748 = vst [vmem:[#allocation24_spill] sm:$0xff] %v6108_v57  ;;  %v5094_v14 = vld [vmem:[%s7561_s2 + $0xc0] sm:$0xff] }
  0x41   : > { %5231 = vpow2.f32 %v709_v17  ;;  %v637_v51 = vmul.f32 %v4325_v31, %v4325_v31  ;;  %v407_v43 = vmul.f32 %v4291_v38, %v4291_v38  ;;  %v6099_v44 = vmul.f32 0.4, %v268_v32  ;;  %v5104_v17 = vld [vmem:[%s7561_s2 + $0x110] sm:$0xff]  ;;  %v267_v31 = vld [vmem:[%s5920_s15 + $0x60] sm:$0xff]  ;;  %1505 = vmatpush.bf16.msrb.mxu1 %v5094_v14 }
  0x42   : > { %5233 = vpow2.f32 %v713_v18  ;;  %v409_v3 = vmul.f32 %v4293_v39, %v4293_v39  ;;  %4408 = vmatmul.msk.bf16.gmra.mxu1 %vm884_vm0, %v790_v13  ;;  %v561_v45 = vpack.c.bf16 %v533_v41, %v531_v37  ;;  %v667_v46 = vsub.f32 0.0, %v635_v42  ;;  %v269_v32 = vld [vmem:[%s5920_s15 + $0x70] sm:$0xff]  ;;  %1932 = vmatpush.bf16.msrb.mxu0 %v5104_v17 }
  0x43   : > { %7745 = vst [vmem:[#allocation21_spill] sm:$0xff] %v6099_v44  ;;  %v669_v47 = vsub.f32 0.0, %v637_v51  ;;  %v6102_v48 = vmul.f32 0.4, %v270_v40  ;;  %v439_v50 = vsub.f32 0.0, %v407_v43  ;;  %v6129_v37 = vunpack.c.h.bf16 %v6113_v36 }
  0x44   : > { %v441_v52 = vsub.f32 0.0, %v409_v3  ;;  %v4296_v55 = vadd.f32 -0.8, %v6099_v44  ;;  %v707_v58 = vmul.f32 1.442695, %v667_v46 }
  0x45   : > { %7746 = vst [vmem:[#allocation22_spill] sm:$0xff] %v6102_v48  ;;  %v5228_v56 = vpop.eup %5227  ;;  %922 = vmatmul.bf16.gmra.mxu0 %v789_v26  ;;  %v711_v60 = vmul.f32 1.442695, %v669_v47  ;;  %v4298_v2 = vadd.f32 -0.8, %v6102_v48 }
  0x46   : > { %v5230_v5 = vpop.eup %5229  ;;  %v536_v6 = vmul.f32 %v5228_v56, %v6080_v59  ;;  %v479_v7 = vmul.f32 1.442695, %v439_v50  ;;  %v483_v8 = vmul.f32 1.442695, %v441_v52  ;;  %v412_v9 = vmul.f32 %v4296_v55, %v4296_v55  ;;  %1104 = vmatmul.bf16.gmra.mxu2 %v561_v45  ;;  %7749 = vst [vmem:[#allocation25_spill] sm:$0xff] %v6129_v37  ;;  %v272_v50 = vld [vmem:[%s5920_s15 + $0x88] sm:$0xff] }
  0x47   : > { %v5232_v10 = vpop.eup %5231  ;;  %v538_v12 = vmul.f32 %v5230_v5, %v6088_v11  ;;  %5235 = vpow2.f32 %v707_v58  ;;  %v414_v54 = vmul.f32 %v4298_v2, %v4298_v2  ;;  %v4328_v13 = vadd.f32 -1.9428571, %v6099_v44 }
  0x48   : > { %v5234_v18 = vpop.eup %5233  ;;  %v764_v21 = vmul.f32 %v5232_v10, %v6080_v59  ;;  %5237 = vpow2.f32 %v711_v60  ;;  %v444_v26 = vsub.f32 0.0, %v412_v9  ;;  %v4330_v30 = vadd.f32 -1.9428571, %v6102_v48 }
  0x49   : > { %v766_v35 = vmul.f32 %v5234_v18, %v6088_v11  ;;  %5239 = vpow2.f32 %v479_v7  ;;  %v446_v38 = vsub.f32 0.0, %v414_v54  ;;  %v640_v40 = vmul.f32 %v4328_v13, %v4328_v13  ;;  %v274_v13 = vld [vmem:[%s5920_s15 + $0x98] sm:$0xff] }
  0x4a   : > { %5241 = vpow2.f32 %v483_v8  ;;  %v489_v39 = vmul.f32 1.442695, %v444_v26  ;;  %v642_v41 = vmul.f32 %v4330_v30, %v4330_v30  ;;  %v564_v42 = vpack.c.bf16 %v538_v12, %v536_v6  ;;  %v326_v18 = vld [vmem:[%s5925_s9 + $0x38] sm:$0xff] }
  0x4b   : > { %v493_v51 = vmul.f32 1.442695, %v446_v38  ;;  %v6131_v43 = vmul.f32 0.4, %v267_v31  ;;  %v6133_v3 = vmul.f32 0.4, %v269_v32  ;;  %v792_v45 = vpack.c.bf16 %v766_v35, %v764_v21 }
  0x4c   : > { %5243 = vpow2.f32 %v489_v39  ;;  %v672_v46 = vsub.f32 0.0, %v640_v40  ;;  %v674_v47 = vsub.f32 0.0, %v642_v41  ;;  %v6145_v26 = vmul.f32 0.4, %v272_v50 }
  0x4d   : > { %7750 = vst [vmem:[#allocation26_spill] sm:$0xff] %v6131_v43  ;;  %v5236_v52 = vpop.eup %5235  ;;  %5245 = vpow2.f32 %v493_v51  ;;  %v4327_v55 = vadd.f32 -1.9428571, %v6131_v43  ;;  %v4329_v56 = vadd.f32 -1.9428571, %v6133_v3 }
  0x4e   : > { %7751 = vst [vmem:[#allocation27_spill] sm:$0xff] %v6133_v3  ;;  %v4295_v58 = vadd.f32 -0.8, %v6131_v43  ;;  %v5238_v60 = vpop.eup %5237  ;;  %v763_v2 = vmul.f32 %v5236_v52, %v6105_v49  ;;  %v717_v5 = vmul.f32 1.442695, %v672_v46  ;;  %v6158_v52 = vunpack.c.l.bf16 %v6113_v36 }
  0x4f   : > { %v721_v6 = vmul.f32 1.442695, %v674_v47  ;;  %v4297_v7 = vadd.f32 -0.8, %v6133_v3  ;;  %v5240_v8 = vpop.eup %5239  ;;  %v765_v9 = vmul.f32 %v5238_v60, %v6108_v57  ;;  %v639_v10 = vmul.f32 %v4327_v55, %v4327_v55  ;;  %7752 = vst [vmem:[#allocation28_spill] sm:$0xff] %v6145_v26 }
  0x50   : > { %v641_v12 = vmul.f32 %v4329_v56, %v4329_v56  ;;  %v411_v54 = vmul.f32 %v4295_v58, %v4295_v58  ;;  %v5242_v14 = vpop.eup %5241  ;;  %v535_v17 = vmul.f32 %v5240_v8, %v6105_v49  ;;  %5247 = vpow2.f32 %v717_v5  ;;  %4457 = vmatmul.msk.bf16.gmra.mxu3 %vm884_vm0, %v564_v42  ;;  %v5098_v42 = vld [vmem:[%s7561_s2 + $0xe0] sm:$0xff]  ;;  %7755 = vst [vmem:[#allocation31_spill] sm:$0xff] %v6158_v52 }
  0x51   : > { %v413_v21 = vmul.f32 %v4297_v7, %v4297_v7  ;;  %v791_v30 = vpack.c.bf16 %v765_v9, %v763_v2  ;;  %v537_v31 = vmul.f32 %v5242_v14, %v6108_v57  ;;  %5249 = vpow2.f32 %v721_v6  ;;  %1558 = vmatpush.bf16.msrb.mxu3 %v5098_v42  ;;  %v271_v9 = vld [vmem:[%s5920_s15 + $0x80] sm:$0xff] }
  0x52   : > { %v671_v32 = vsub.f32 0.0, %v639_v10  ;;  %v5244_v35 = vpop.eup %5243  ;;  %v673_v38 = vsub.f32 0.0, %v641_v12  ;;  %v443_v39 = vsub.f32 0.0, %v411_v54  ;;  %v6149_v41 = vmul.f32 0.4, %v274_v13  ;;  %4409 = vmatmul.msk.bf16.gmra.mxu1 %vm884_vm0, %v792_v45  ;;  %v6163_v45 = vld [vmem:[%s5925_s9 + $0x40] sm:$0xff] }
  0x53   : > { %v445_v40 = vsub.f32 0.0, %v413_v21  ;;  %v5246_v51 = vpop.eup %5245  ;;  %v563_v46 = vpack.c.bf16 %v537_v31, %v535_v17  ;;  %v6152_v47 = vunpack.c.h.bf16 %v326_v18  ;;  %v6160_v60 = vunpack.c.l.bf16 %v326_v18  ;;  %v273_v10 = vld [vmem:[%s5920_s15 + $0x90] sm:$0xff]  ;;  %v5093_v18 = vld [vmem:[%s7561_s2 + $0xb8] sm:$0xff]  ;;  %v5103_v21 = vld [vmem:[%s7561_s2 + $0x108] sm:$0xff] }
  0x54   : > { %7753 = vst [vmem:[#allocation29_spill] sm:$0xff] %v6149_v41  ;;  %v715_v50 = vmul.f32 1.442695, %v671_v32  ;;  %v719_v55 = vmul.f32 1.442695, %v673_v38  ;;  %v540_v36 = vmul.f32 %v5244_v35, %v6129_v37  ;;  %v5108_v17 = vld [vmem:[%s7561_s2 + $0x130] sm:$0xff]  ;;  %1506 = vmatpush.bf16.msrb.mxu1 %v5093_v18  ;;  %1933 = vmatpush.bf16.msrb.mxu0 %v5103_v21 }
  0x55   : > { %7754 = vst [vmem:[#allocation30_spill] sm:$0xff] %v6152_v47  ;;  %v487_v56 = vmul.f32 1.442695, %v443_v39  ;;  %v491_v58 = vmul.f32 1.442695, %v445_v40  ;;  %927 = vmatmul.bf16.gmra.mxu0 %v791_v30  ;;  %v542_v54 = vmul.f32 %v5246_v51, %v6152_v47  ;;  %v6183_v30 = vunpack.c.h.bf16 %v6163_v45  ;;  %1985 = vmatpush.bf16.msrb.mxu2 %v5108_v17 }
  0x56   : > { %7756 = vst [vmem:[#allocation32_spill] sm:$0xff] %v6160_v60  ;;  %5251 = vpow2.f32 %v715_v50  ;;  %v4300_v2 = vadd.f32 -0.8, %v6145_v26  ;;  %v4302_v5 = vadd.f32 -0.8, %v6149_v41  ;;  %v5248_v6 = vpop.eup %5247  ;;  %1109 = vmatmul.bf16.gmra.mxu2 %v563_v46 }
  0x57   : > { %5253 = vpow2.f32 %v719_v55  ;;  %v4332_v7 = vadd.f32 -1.9428571, %v6145_v26  ;;  %v4334_v8 = vadd.f32 -1.9428571, %v6149_v41  ;;  %v5250_v12 = vpop.eup %5249  ;;  %7757 = vst [vmem:[#allocation33_spill] sm:$0xff] %v6183_v30  ;;  %v768_v51 = vmul.f32 %v5248_v6, %v6129_v37  ;;  %v282_v37 = vld [vmem:[%s5920_s15 + $0xd8] sm:$0xff] }
  0x58   : > { %5255 = vpow2.f32 %v487_v56  ;;  %v416_v13 = vmul.f32 %v4300_v2, %v4300_v2  ;;  %v418_v14 = vmul.f32 %v4302_v5, %v4302_v5  ;;  %v6185_v39 = vmul.f32 0.4, %v271_v9 }
  0x59   : > { %5257 = vpow2.f32 %v491_v58  ;;  %v644_v31 = vmul.f32 %v4332_v7, %v4332_v7  ;;  %v646_v32 = vmul.f32 %v4334_v8, %v4334_v8  ;;  %v6187_v40 = vmul.f32 0.4, %v273_v10 }
  0x5a   : > { %v448_v35 = vsub.f32 0.0, %v416_v13  ;;  %v450_v38 = vsub.f32 0.0, %v418_v14  ;;  %7758 = vst [vmem:[#allocation34_spill] sm:$0xff] %v6185_v39  ;;  %v770_v46 = vmul.f32 %v5250_v12, %v6152_v47  ;;  %v566_v56 = vpack.c.bf16 %v542_v54, %v540_v36 }
  0x5b   : > { %7759 = vst [vmem:[#allocation35_spill] sm:$0xff] %v6187_v40  ;;  %v676_v50 = vsub.f32 0.0, %v644_v31  ;;  %v678_v42 = vsub.f32 0.0, %v646_v32  ;;  %v4331_v5 = vadd.f32 -1.9428571, %v6185_v39  ;;  %v276_v31 = vld [vmem:[%s5920_s15 + $0xa8] sm:$0xff] }
  0x5c   : > { %v5252_v55 = vpop.eup %5251  ;;  %v497_v58 = vmul.f32 1.442695, %v448_v35  ;;  %v501_v2 = vmul.f32 1.442695, %v450_v38  ;;  %v4333_v6 = vadd.f32 -1.9428571, %v6187_v40  ;;  %v794_v17 = vpack.c.bf16 %v770_v46, %v768_v51 }
  0x5d   : > { %v5254_v7 = vpop.eup %5253  ;;  %v767_v8 = vmul.f32 %v5252_v55, %v6158_v52  ;;  %v725_v9 = vmul.f32 1.442695, %v676_v50  ;;  %v729_v10 = vmul.f32 1.442695, %v678_v42  ;;  %v643_v14 = vmul.f32 %v4331_v5, %v4331_v5  ;;  %v278_v32 = vld [vmem:[%s5920_s15 + $0xb8] sm:$0xff]  ;;  %v328_v50 = vld [vmem:[%s5925_s9 + $0x48] sm:$0xff] }
  0x5e   : > { %v5256_v12 = vpop.eup %5255  ;;  %v769_v13 = vmul.f32 %v5254_v7, %v6160_v60  ;;  %5259 = vpow2.f32 %v497_v58  ;;  %v4299_v36 = vadd.f32 -0.8, %v6185_v39  ;;  %v645_v18 = vmul.f32 %v4333_v6, %v4333_v6 }
  0x5f   : > { %v5258_v54 = vpop.eup %5257  ;;  %5261 = vpow2.f32 %v501_v2  ;;  %v4301_v21 = vadd.f32 -0.8, %v6187_v40  ;;  %v539_v35 = vmul.f32 %v5256_v12, %v6158_v52  ;;  %v675_v42 = vsub.f32 0.0, %v643_v14 }
  0x60   : > { %v541_v38 = vmul.f32 %v5258_v54, %v6160_v60  ;;  %5263 = vpow2.f32 %v725_v9  ;;  %v677_v55 = vsub.f32 0.0, %v645_v18  ;;  %v415_v58 = vmul.f32 %v4299_v36, %v4299_v36  ;;  %4458 = vmatmul.msk.bf16.gmra.mxu3 %vm884_vm0, %v566_v56  ;;  %v6211_v36 = vld [vmem:[%s5925_s9 + $0x50] sm:$0xff]  ;;  %v6225_v60 = vld [vmem:[%s5925_s9 + $0x58] sm:$0xff] }
  0x61   : > { %5265 = vpow2.f32 %v729_v10  ;;  %v417_v5 = vmul.f32 %v4301_v21, %v4301_v21  ;;  %v793_v51 = vpack.c.bf16 %v769_v13, %v767_v8  ;;  %v723_v46 = vmul.f32 1.442695, %v675_v42 }
  0x62   : > { %v6203_v2 = vmul.f32 0.4, %v276_v31  ;;  %v6205_v7 = vmul.f32 0.4, %v278_v32  ;;  %v6207_v6 = vunpack.c.h.bf16 %v328_v50  ;;  %v727_v12 = vmul.f32 1.442695, %v677_v55  ;;  %4410 = vmatmul.msk.bf16.gmra.mxu1 %vm884_vm0, %v794_v17 }
  0x63   : > { %v447_v54 = vsub.f32 0.0, %v415_v58  ;;  %v449_v9 = vsub.f32 0.0, %v417_v5  ;;  %v565_v10 = vpack.c.bf16 %v541_v38, %v539_v35  ;;  %5267 = vpow2.f32 %v723_v46  ;;  %v275_v32 = vld [vmem:[%s5920_s15 + $0xa0] sm:$0xff]  ;;  %v277_v58 = vld [vmem:[%s5920_s15 + $0xb0] sm:$0xff] }
  0x64   : > { %7760 = vst [vmem:[#allocation36_spill] sm:$0xff] %v6203_v2  ;;  %v5260_v14 = vpop.eup %5259  ;;  %v4304_v56 = vadd.f32 -0.8, %v6203_v2  ;;  %v4306_v8 = vadd.f32 -0.8, %v6205_v7  ;;  %v6216_v18 = vunpack.c.l.bf16 %v6163_v45  ;;  %5269 = vpow2.f32 %v727_v12 }
  0x65   : > { %7761 = vst [vmem:[#allocation37_spill] sm:$0xff] %v6205_v7  ;;  %v5262_v13 = vpop.eup %5261  ;;  %v495_v21 = vmul.f32 1.442695, %v447_v54  ;;  %v499_v31 = vmul.f32 1.442695, %v449_v9  ;;  %932 = vmatmul.bf16.gmra.mxu0 %v793_v51  ;;  %v6219_v17 = vunpack.c.l.bf16 %v328_v50  ;;  %v544_v46 = vmul.f32 %v5260_v14, %v6183_v30  ;;  %v5092_v9 = vld [vmem:[%s7561_s2 + $0xb0] sm:$0xff] }
  0x66   : > { %7762 = vst [vmem:[#allocation38_spill] sm:$0xff] %v6207_v6  ;;  %v5264_v42 = vpop.eup %5263  ;;  %v420_v35 = vmul.f32 %v4304_v56, %v4304_v56  ;;  %v422_v38 = vmul.f32 %v4306_v8, %v4306_v8  ;;  %v4336_v55 = vadd.f32 -1.9428571, %v6203_v2  ;;  %v6228_v45 = vunpack.c.h.bf16 %v6211_v36  ;;  %1114 = vmatmul.bf16.gmra.mxu2 %v565_v10  ;;  %v5102_v14 = vld [vmem:[%s7561_s2 + $0x100] sm:$0xff]  ;;  %1507 = vmatpush.bf16.msrb.mxu1 %v5092_v9 }
  0x67   : > { %7763 = vst [vmem:[#allocation39_spill] sm:$0xff] %v6216_v18  ;;  %v5266_v5 = vpop.eup %5265  ;;  %5271 = vpow2.f32 %v495_v21  ;;  %v4338_v12 = vadd.f32 -1.9428571, %v6205_v7  ;;  %v546_v50 = vmul.f32 %v5262_v13, %v6207_v6  ;;  %v6232_v54 = vmul.f32 0.4, %v275_v32  ;;  %1934 = vmatpush.bf16.msrb.mxu0 %v5102_v14  ;;  %v280_v14 = vld [vmem:[%s5920_s15 + $0xc8] sm:$0xff] }
  0x68   : > { %7764 = vst [vmem:[#allocation40_spill] sm:$0xff] %v6219_v17  ;;  %5273 = vpow2.f32 %v499_v31  ;;  %v452_v51 = vsub.f32 0.0, %v420_v35  ;;  %v454_v56 = vsub.f32 0.0, %v422_v38  ;;  %v648_v8 = vmul.f32 %v4336_v55, %v4336_v55 }
  0x69   : > { %7765 = vst [vmem:[#allocation41_spill] sm:$0xff] %v6228_v45  ;;  %v650_v21 = vmul.f32 %v4338_v12, %v4338_v12  ;;  %v6240_v2 = vmul.f32 0.4, %v277_v58  ;;  %v5268_v10 = vpop.eup %5267  ;;  %v772_v13 = vmul.f32 %v5264_v42, %v6183_v30  ;;  %v774_v31 = vmul.f32 %v5266_v5, %v6207_v6 }
  0x6a   : > { %7766 = vst [vmem:[#allocation42_spill] sm:$0xff] %v6232_v54  ;;  %v6245_v32 = vunpack.c.h.bf16 %v6225_v60  ;;  %v505_v35 = vmul.f32 1.442695, %v452_v51  ;;  %v5270_v7 = vpop.eup %5269  ;;  %v771_v52 = vmul.f32 %v5268_v10, %v6216_v18  ;;  %v509_v38 = vmul.f32 1.442695, %v454_v56 }
  0x6b   : > { %7767 = vst [vmem:[#allocation43_spill] sm:$0xff] %v6240_v2  ;;  %v680_v55 = vsub.f32 0.0, %v648_v8  ;;  %v682_v12 = vsub.f32 0.0, %v650_v21  ;;  %v773_v58 = vmul.f32 %v5270_v7, %v6219_v17  ;;  %v4335_v42 = vadd.f32 -1.9428571, %v6232_v54 }
  0x6c   : > { %7768 = vst [vmem:[#allocation44_spill] sm:$0xff] %v6245_v32  ;;  %5275 = vpow2.f32 %v505_v35  ;;  %v4337_v5 = vadd.f32 -1.9428571, %v6240_v2  ;;  %v568_v30 = vpack.c.bf16 %v546_v50, %v544_v46  ;;  %v4303_v9 = vadd.f32 -0.8, %v6232_v54 }
  0x6d   : > { %v5272_v6 = vpop.eup %5271  ;;  %5277 = vpow2.f32 %v509_v38  ;;  %v733_v51 = vmul.f32 1.442695, %v680_v55  ;;  %v737_v8 = vmul.f32 1.442695, %v682_v12  ;;  %v647_v21 = vmul.f32 %v4335_v42, %v4335_v42 }
  0x6e   : > { %v5274_v47 = vpop.eup %5273  ;;  %v543_v56 = vmul.f32 %v5272_v6, %v6216_v18  ;;  %v649_v10 = vmul.f32 %v4337_v5, %v4337_v5  ;;  %v796_v7 = vpack.c.bf16 %v774_v31, %v772_v13  ;;  %v4305_v40 = vadd.f32 -0.8, %v6240_v2 }
  0x6f   : > { %v545_v35 = vmul.f32 %v5274_v47, %v6219_v17  ;;  %v419_v39 = vmul.f32 %v4303_v9, %v4303_v9  ;;  %v795_v41 = vpack.c.bf16 %v773_v58, %v771_v52  ;;  %v679_v46 = vsub.f32 0.0, %v647_v21 }
  0x70   : > { %v681_v50 = vsub.f32 0.0, %v649_v10  ;;  %v6257_v38 = vmul.f32 0.4, %v280_v14  ;;  %5279 = vpow2.f32 %v733_v51  ;;  %v421_v55 = vmul.f32 %v4305_v40, %v4305_v40  ;;  %4459 = vmatmul.msk.bf16.gmra.mxu3 %vm884_vm0, %v568_v30  ;;  %v279_v14 = vld [vmem:[%s5920_s15 + $0xc0] sm:$0xff] }
  0x71   : > { %v451_v54 = vsub.f32 0.0, %v419_v39  ;;  %v6259_v57 = vmul.f32 0.4, %v282_v37  ;;  %v567_v12 = vpack.c.bf16 %v545_v35, %v543_v56  ;;  %5281 = vpow2.f32 %v737_v8  ;;  %v6279_v8 = vld [vmem:[%s5925_s9 + $0x60] sm:$0xff] }
  0x72   : > { %7769 = vst [vmem:[#allocation45_spill] sm:$0xff] %v6257_v38  ;;  %v5276_v6 = vpop.eup %5275  ;;  %v731_v13 = vmul.f32 1.442695, %v679_v46  ;;  %v735_v47 = vmul.f32 1.442695, %v681_v50  ;;  %v453_v58 = vsub.f32 0.0, %v421_v55  ;;  %4411 = vmatmul.msk.bf16.gmra.mxu1 %vm884_vm0, %v796_v7  ;;  %v6276_v56 = vunpack.c.l.bf16 %v6211_v36 }
  0x73   : > { %7770 = vst [vmem:[#allocation46_spill] sm:$0xff] %v6259_v57  ;;  %v5278_v31 = vpop.eup %5277  ;;  %v6263_v52 = vmul.f32 %v5276_v6, %v6228_v45  ;;  %v503_v42 = vmul.f32 1.442695, %v451_v54  ;;  %v4308_v39 = vadd.f32 -0.8, %v6257_v38  ;;  %v281_v54 = vld [vmem:[%s5920_s15 + $0xd0] sm:$0xff]  ;;  %v6282_v7 = vunpack.c.l.bf16 %v6225_v60 }
  0x74   : > { %v6268_v37 = vmul.f32 %v5278_v31, %v6245_v32  ;;  %5283 = vpow2.f32 %v731_v13  ;;  %v4310_v30 = vadd.f32 -0.8, %v6259_v57  ;;  %v4340_v40 = vadd.f32 -1.9428571, %v6257_v38  ;;  %7771 = vst [vmem:[#allocation47_spill] sm:$0xff] %v6276_v56  ;;  %v5091_v36 = vld [vmem:[%s7561_s2 + $0xa8] sm:$0xff] }
  0x75   : > { %5285 = vpow2.f32 %v735_v47  ;;  %v507_v5 = vmul.f32 1.442695, %v453_v58  ;;  %v424_v51 = vmul.f32 %v4308_v39, %v4308_v39  ;;  %v4342_v9 = vadd.f32 -1.9428571, %v6259_v57  ;;  %937 = vmatmul.bf16.gmra.mxu0 %v795_v41  ;;  %7772 = vst [vmem:[#allocation48_spill] sm:$0xff] %v6282_v7  ;;  %1508 = vmatpush.bf16.msrb.mxu1 %v5091_v36  ;;  %v286_v36 = vld [vmem:[%s5920_s15 + $0xf8] sm:$0xff] }
  0x76   : > { %5287 = vpow2.f32 %v503_v42  ;;  %v426_v21 = vmul.f32 %v4310_v30, %v4310_v30  ;;  %v5280_v10 = vpop.eup %5279  ;;  %v652_v46 = vmul.f32 %v4340_v40, %v4340_v40  ;;  %1119 = vmatmul.bf16.gmra.mxu2 %v567_v12  ;;  %v6284_v13 = vmul.f32 0.4, %v279_v14  ;;  %v5101_v12 = vld [vmem:[%s7561_s2 + $0xf8] sm:$0xff] }
  0x77   : > { %5289 = vpow2.f32 %v507_v5  ;;  %v456_v35 = vsub.f32 0.0, %v424_v51  ;;  %v5282_v50 = vpop.eup %5281  ;;  %v654_v6 = vmul.f32 %v4342_v9, %v4342_v9  ;;  %v6286_v41 = vmul.f32 0.4, %v281_v54  ;;  %1935 = vmatpush.bf16.msrb.mxu0 %v5101_v12  ;;  %v332_v12 = vld [vmem:[%s5925_s9 + $0x68] sm:$0xff] }
  0x78   : > { %v458_v55 = vsub.f32 0.0, %v426_v21  ;;  %7773 = vst [vmem:[#allocation49_spill] sm:$0xff] %v6284_v13  ;;  %v570_v47 = vpack.c.bf16 %v6268_v37, %v6263_v52  ;;  %v6294_v60 = vunpack.c.h.bf16 %v6279_v8  ;;  %v684_v58 = vsub.f32 0.0, %v652_v46 }
  0x79   : > { %7774 = vst [vmem:[#allocation50_spill] sm:$0xff] %v6286_v41  ;;  %v513_v31 = vmul.f32 1.442695, %v456_v35  ;;  %v776_v39 = vmul.f32 %v5280_v10, %v6228_v45  ;;  %v686_v40 = vsub.f32 0.0, %v654_v6  ;;  %v4339_v5 = vadd.f32 -1.9428571, %v6284_v13 }
  0x7a   : > { %7775 = vst [vmem:[#allocation51_spill] sm:$0xff] %v6294_v60  ;;  %v5284_v42 = vpop.eup %5283  ;;  %v517_v30 = vmul.f32 1.442695, %v458_v55  ;;  %v778_v52 = vmul.f32 %v5282_v50, %v6245_v32  ;;  %v741_v37 = vmul.f32 1.442695, %v684_v58  ;;  %v284_v35 = vld [vmem:[%s5920_s15 + $0xe8] sm:$0xff] }
  0x7b   : > { %v5286_v51 = vpop.eup %5285  ;;  %5291 = vpow2.f32 %v513_v31  ;;  %v4341_v9 = vadd.f32 -1.9428571, %v6286_v41  ;;  %v775_v54 = vmul.f32 %v5284_v42, %v6276_v56  ;;  %v745_v21 = vmul.f32 1.442695, %v686_v40 }
  0x7c   : > { %v5288_v14 = vpop.eup %5287  ;;  %5293 = vpow2.f32 %v517_v30  ;;  %v651_v10 = vmul.f32 %v4339_v5, %v4339_v5  ;;  %v777_v55 = vmul.f32 %v5286_v51, %v6282_v7  ;;  %v4307_v50 = vadd.f32 -0.8, %v6284_v13 }
  0x7d   : > { %v5290_v46 = vpop.eup %5289  ;;  %5295 = vpow2.f32 %v741_v37  ;;  %v653_v6 = vmul.f32 %v4341_v9, %v4341_v9  ;;  %v547_v31 = vmul.f32 %v5288_v14, %v6276_v56  ;;  %v4309_v30 = vadd.f32 -0.8, %v6286_v41 }
  0x7e   : > { %v549_v58 = vmul.f32 %v5290_v46, %v6282_v7  ;;  %5297 = vpow2.f32 %v745_v21  ;;  %v683_v32 = vsub.f32 0.0, %v651_v10  ;;  %v423_v40 = vmul.f32 %v4307_v50, %v4307_v50 }
  0x7f   : > { %v685_v42 = vsub.f32 0.0, %v653_v6  ;;  %v6312_v5 = vmul.f32 0.4, %v284_v35  ;;  %v798_v45 = vpack.c.bf16 %v778_v52, %v776_v39  ;;  %v6314_v37 = vmul.f32 0.4, %v286_v36 }
  0x80   : > { %v739_v51 = vmul.f32 1.442695, %v683_v32  ;;  %v6316_v13 = vunpack.c.h.bf16 %v332_v12  ;;  %v425_v14 = vmul.f32 %v4309_v30, %v4309_v30  ;;  %v455_v56 = vsub.f32 0.0, %v423_v40  ;;  %4460 = vmatmul.msk.bf16.gmra.mxu3 %vm884_vm0, %v570_v47 }
  0x81   : > { %7776 = vst [vmem:[#allocation52_spill] sm:$0xff] %v6312_v5  ;;  %v5292_v9 = vpop.eup %5291  ;;  %v743_v57 = vmul.f32 1.442695, %v685_v42  ;;  %v797_v21 = vpack.c.bf16 %v777_v55, %v775_v54  ;;  %v569_v10 = vpack.c.bf16 %v549_v58, %v547_v31  ;;  %v4312_v35 = vadd.f32 -0.8, %v6312_v5  ;;  %v283_v55 = vld [vmem:[%s5920_s15 + $0xe0] sm:$0xff] }
  0x82   : > { %7777 = vst [vmem:[#allocation53_spill] sm:$0xff] %v6314_v37  ;;  %v5294_v46 = vpop.eup %5293  ;;  %v4314_v39 = vadd.f32 -0.8, %v6314_v37  ;;  %v6322_v52 = vmul.f32 %v5292_v9, %v6294_v60  ;;  %5299 = vpow2.f32 %v739_v51  ;;  %v457_v6 = vsub.f32 0.0, %v425_v14  ;;  %4412 = vmatmul.msk.bf16.gmra.mxu1 %vm884_vm0, %v798_v45  ;;  %v285_v31 = vld [vmem:[%s5920_s15 + $0xf0] sm:$0xff] }
  0x83   : > { %7778 = vst [vmem:[#allocation54_spill] sm:$0xff] %v6316_v13  ;;  %v5296_v32 = vpop.eup %5295  ;;  %v511_v50 = vmul.f32 1.442695, %v455_v56  ;;  %5301 = vpow2.f32 %v743_v57  ;;  %v428_v47 = vmul.f32 %v4312_v35, %v4312_v35  ;;  %v4344_v54 = vadd.f32 -1.9428571, %v6312_v5 }
  0x84   : > { %v5298_v36 = vpop.eup %5297  ;;  %v430_v42 = vmul.f32 %v4314_v39, %v4314_v39  ;;  %v6329_v58 = vmul.f32 %v5294_v46, %v6316_v13  ;;  %v6332_v30 = vmul.f32 %v5296_v32, %v6294_v60  ;;  %v515_v40 = vmul.f32 1.442695, %v457_v6  ;;  %v5090_v6 = vld [vmem:[%s7561_s2 + $0xa0] sm:$0xff] }
  0x85   : > { %5303 = vpow2.f32 %v511_v50  ;;  %942 = vmatmul.bf16.gmra.mxu0 %v797_v21  ;;  %v460_v56 = vsub.f32 0.0, %v428_v47  ;;  %v4346_v45 = vadd.f32 -1.9428571, %v6314_v37  ;;  %v656_v57 = vmul.f32 %v4344_v54, %v4344_v54  ;;  %v5100_v47 = vld [vmem:[%s7561_s2 + $0xf0] sm:$0xff]  ;;  %1509 = vmatpush.bf16.msrb.mxu1 %v5090_v6 }
  0x86   : > { %v462_v51 = vsub.f32 0.0, %v430_v42  ;;  %v6336_v9 = vmul.f32 %v5298_v36, %v6316_v13  ;;  %5305 = vpow2.f32 %v515_v40  ;;  %v6338_v14 = vmul.f32 0.4, %v283_v55  ;;  %1124 = vmatmul.bf16.gmra.mxu2 %v569_v10  ;;  %1936 = vmatpush.bf16.msrb.mxu0 %v5100_v47  ;;  %v334_v47 = vld [vmem:[%s5925_s9 + $0x78] sm:$0xff] }
  0x87   : > { %v6340_v35 = vmul.f32 0.4, %v285_v31  ;;  %v6343_v46 = vunpack.c.l.bf16 %v6279_v8  ;;  %v521_v39 = vmul.f32 1.442695, %v460_v56  ;;  %v658_v32 = vmul.f32 %v4346_v45, %v4346_v45 }
  0x88   : > { %7779 = vst [vmem:[#allocation55_spill] sm:$0xff] %v6338_v14  ;;  %v688_v21 = vsub.f32 0.0, %v656_v57  ;;  %v5300_v50 = vpop.eup %5299  ;;  %v4343_v36 = vadd.f32 -1.9428571, %v6338_v14  ;;  %v572_v10 = vpack.c.bf16 %v6329_v58, %v6322_v52  ;;  %v6354_v8 = vunpack.c.l.bf16 %v332_v12 }
  0x89   : > { %7780 = vst [vmem:[#allocation56_spill] sm:$0xff] %v6340_v35  ;;  %v5302_v42 = vpop.eup %5301  ;;  %v525_v54 = vmul.f32 1.442695, %v462_v51  ;;  %v690_v55 = vsub.f32 0.0, %v658_v32  ;;  %v800_v40 = vpack.c.bf16 %v6336_v9, %v6332_v30  ;;  %v4345_v56 = vadd.f32 -1.9428571, %v6340_v35 }
  0x8a   : > { %7781 = vst [vmem:[#allocation57_spill] sm:$0xff] %v6343_v46  ;;  %v655_v45 = vmul.f32 %v4343_v36, %v4343_v36  ;;  %v4311_v57 = vadd.f32 -0.8, %v6338_v14  ;;  %v779_v13 = vmul.f32 %v5300_v50, %v6343_v46  ;;  %5307 = vpow2.f32 %v521_v39  ;;  %v333_v14 = vld [vmem:[%s5925_s9 + $0x70] sm:$0xff]  ;;  %s236_s9 = sand.u32 1, %s5795_s19  }
  0x8b   : > { %7782 = vst [vmem:[#allocation58_spill] sm:$0xff] %v6354_v8  ;;  %v5304_v31 = vpop.eup %5303  ;;  %v749_v12 = vmul.f32 1.442695, %v688_v21  ;;  %v753_v52 = vmul.f32 1.442695, %v690_v55  ;;  %v657_v51 = vmul.f32 %v4345_v56, %v4345_v56  ;;  %v781_v30 = vmul.f32 %v5302_v42, %v6354_v8  ;;  %s4276_s10 = sshll.u32 %s236_s9, 7 }
  0x8c   : > { %v5306_v58 = vpop.eup %5305  ;;  %v687_v32 = vsub.f32 0.0, %v655_v45  ;;  %v4313_v6 = vadd.f32 -0.8, %v6340_v35  ;;  %v427_v60 = vmul.f32 %v4311_v57, %v4311_v57  ;;  %5309 = vpow2.f32 %v525_v54  ;;  %s7384_s11 = scalar_lea.vmem [#allocation2], %s4276_s10  ;;  %s4183_s15 = scalar_lea.sflag [#allocation3], %s236_s9 }
  0x8d   : > { %v4464_v9 = vadd.f32 -3.0857143, %v5936_v15  ;;  %v4466_v36 = vadd.f32 -3.0857143, %v5938_v16  ;;  %v689_v37 = vsub.f32 0.0, %v657_v51  ;;  %v551_v55 = vmul.f32 %v5304_v31, %v6343_v46  ;;  %s4195_s22 = sshll.u32 %s7384_s11, 4  ;;  %s4196_s22 = int_to_ptr.vmem [resolvable:$true] %s4195_s22 }
  0x8e   : > { %v747_v50 = vmul.f32 1.442695, %v687_v32  ;;  %v429_v39 = vmul.f32 %v4313_v6, %v4313_v6  ;;  %v459_v21 = vsub.f32 0.0, %v427_v60  ;;  %v553_v56 = vmul.f32 %v5306_v58, %v6354_v8 }
  0x8f   : > { %5311 = vpow2.f32 %v749_v12  ;;  %v1222_v45 = vmul.f32 %v4464_v9, %v4464_v9  ;;  %v751_v57 = vmul.f32 1.442695, %v689_v37  ;;  %v4463_v54 = vadd.f32 -3.0857143, %v5945_v20 }
  0x90   : > { %5313 = vpow2.f32 %v753_v52  ;;  %v461_v42 = vsub.f32 0.0, %v429_v39  ;;  %v5308_v35 = vpop.eup %5307  ;;  %4461 = vmatmul.msk.bf16.gmra.mxu3 %vm884_vm0, %v572_v10  ;;  %v799_v5 = vpack.c.bf16 %v781_v30, %v779_v13  ;;  %v6371_v7 = vunpack.c.h.bf16 %v333_v14  ;;  %v5119_v10 = vld [vmem:[%s7561_s2 + $0x188] sm:$0xff] }
  0x91   : > { %v6373_v51 = vunpack.c.h.bf16 %v334_v47  ;;  %v519_v60 = vmul.f32 1.442695, %v459_v21  ;;  %5315 = vpow2.f32 %v747_v50  ;;  %v1224_v32 = vmul.f32 %v4466_v36, %v4466_v36  ;;  %2411 = vmatpush.bf16.msra.mxu3 %v5119_v10 }
  0x92   : > { %7783 = vst [vmem:[#allocation59_spill] sm:$0xff] %v6371_v7  ;;  %v523_v31 = vmul.f32 1.442695, %v461_v42  ;;  %v4465_v12 = vadd.f32 -3.0857143, %v5956_v27  ;;  %v5310_v58 = vpop.eup %5309  ;;  %4413 = vmatmul.msk.bf16.gmra.mxu1 %vm884_vm0, %v800_v40  ;;  %v571_v37 = vpack.c.bf16 %v553_v56, %v551_v55  ;;  %5317 = vpow2.f32 %v751_v57  ;;  %v5129_v42 = vld [vmem:[%s7561_s2 + $0x1d8] sm:$0xff] }
  0x93   : > { %v1254_v52 = vsub.f32 0.0, %v1222_v45  ;;  %v6377_v6 = vunpack.c.l.bf16 %v333_v14  ;;  %5319 = vpow2.f32 %v519_v60  ;;  %v1221_v13 = vmul.f32 %v4463_v54, %v4463_v54  ;;  %2838 = vmatpush.bf16.msra.mxu2 %v5129_v42 }
  0x94   : > { %v1223_v9 = vmul.f32 %v4465_v12, %v4465_v12  ;;  %v4563_v36 = vadd.f32 -4.2285714, %v5945_v20  ;;  %v4565_v50 = vadd.f32 -4.2285714, %v5956_v27  ;;  %v4564_v40 = vadd.f32 -4.2285714, %v5936_v15 }
  0x95   : > { %7784 = vst [vmem:[#allocation60_spill] sm:$0xff] %v6377_v6  ;;  %v5312_v30 = vpop.eup %5311  ;;  %947 = vmatmul.bf16.gmra.mxu0 %v799_v5  ;;  %v556_v21 = vmul.f32 %v5308_v35, %v6371_v7  ;;  %v558_v14 = vmul.f32 %v5310_v58, %v6373_v51  ;;  %5321 = vpow2.f32 %v523_v31  ;;  %v1256_v55 = vsub.f32 0.0, %v1224_v32 }
  0x96   : > { %v5314_v39 = vpop.eup %5313  ;;  %1129 = vmatmul.bf16.gmra.mxu2 %v571_v37  ;;  %v1287_v56 = vmul.f32 1.442695, %v1254_v52  ;;  %v1648_v45 = vmul.f32 %v4563_v36, %v4563_v36  ;;  %v1650_v57 = vmul.f32 %v4565_v50, %v4565_v50  ;;  %v4566_v5 = vadd.f32 -4.2285714, %v5938_v16 }
  0x97   : > { %v5316_v54 = vpop.eup %5315  ;;  %v784_v60 = vmul.f32 %v5312_v30, %v6371_v7  ;;  %v6392_v12 = vunpack.c.l.bf16 %v334_v47  ;;  %v1253_v35 = vsub.f32 0.0, %v1221_v13  ;;  %v1649_v58 = vmul.f32 %v4564_v40, %v4564_v40 }
  0x98   : > { %v5318_v31 = vpop.eup %5317  ;;  %v786_v32 = vmul.f32 %v5314_v39, %v6373_v51  ;;  %v1255_v37 = vsub.f32 0.0, %v1223_v9  ;;  %v1651_v52 = vmul.f32 %v4566_v5, %v4566_v5  ;;  %v4468_v10 = vadd.f32 -3.0857143, %v5984_v63 }
  0x99   : > { %7785 = vst [vmem:[#allocation61_spill] sm:$0xff] %v6392_v12  ;;  %v5320_v36 = vpop.eup %5319  ;;  %v1291_v50 = vmul.f32 1.442695, %v1256_v55  ;;  %v1680_v27 = vsub.f32 0.0, %v1648_v45  ;;  %v4470_v20 = vadd.f32 -3.0857143, %v5986_v0  ;;  %v574_v16 = vpack.c.bf16 %v558_v14, %v556_v21 }
  0x9a   : > { %5323 = vpow2.f32 %v1287_v56  ;;  %v1682_v30 = vsub.f32 0.0, %v1650_v57  ;;  %v783_v13 = vmul.f32 %v5316_v54, %v6377_v6  ;;  %v785_v40 = vmul.f32 %v5318_v31, %v6392_v12  ;;  %v5117_v55 = vld [vmem:[%s7561_s2 + $0x178] sm:$0xff]  ;;  %v5127_v21 = vld [vmem:[%s7561_s2 + $0x1c8] sm:$0xff] }
  0x9b   : > { %v5322_v47 = vpop.eup %5321  ;;  %v1285_v7 = vmul.f32 1.442695, %v1253_v35  ;;  %v1681_v39 = vsub.f32 0.0, %v1649_v58  ;;  %v802_v9 = vpack.c.bf16 %v786_v32, %v784_v60  ;;  %v1289_v5 = vmul.f32 1.442695, %v1255_v37  ;;  %2356 = vmatpush.bf16.msra.mxu1 %v5117_v55  ;;  %2783 = vmatpush.bf16.msra.mxu0 %v5127_v21 }
  0x9c   : > { %v1683_v42 = vsub.f32 0.0, %v1651_v52  ;;  %v1226_v14 = vmul.f32 %v4468_v10, %v4468_v10  ;;  %5325 = vpow2.f32 %v1291_v50  ;;  %v1712_v56 = vmul.f32 1.442695, %v1680_v27 }
  0x9d   : > { %v1228_v45 = vmul.f32 %v4470_v20, %v4470_v20  ;;  %v4467_v57 = vadd.f32 -3.0857143, %v6008_v19  ;;  %v555_v54 = vmul.f32 %v5320_v36, %v6377_v6  ;;  %v557_v60 = vmul.f32 %v5322_v47, %v6392_v12 }
  0x9e   : > { %v1716_v35 = vmul.f32 1.442695, %v1682_v30  ;;  %v4469_v58 = vadd.f32 -3.0857143, %v6013_v25  ;;  %v801_v31 = vpack.c.bf16 %v785_v40, %v783_v13  ;;  %5327 = vpow2.f32 %v1285_v7 }
  0x9f   : > { %v1714_v32 = vmul.f32 1.442695, %v1681_v39  ;;  %v4567_v37 = vadd.f32 -4.2285714, %v6008_v19  ;;  %5329 = vpow2.f32 %v1289_v5  ;;  %v1718_v20 = vmul.f32 1.442695, %v1683_v42 }
  0xa0   : > { %v5324_v52 = vpop.eup %5323  ;;  %4462 = vmatmul.msk.bf16.gmra.mxu3 %vm884_vm0, %v574_v16  ;;  %v1258_v27 = vsub.f32 0.0, %v1226_v14  ;;  %v4569_v10 = vadd.f32 -4.2285714, %v6013_v25  ;;  %5331 = vpow2.f32 %v1712_v56  ;;  %v1260_v36 = vsub.f32 0.0, %v1228_v45 }
  0xa1   : > { %v1225_v50 = vmul.f32 %v4467_v57, %v4467_v57  ;;  %v573_v30 = vpack.c.bf16 %v557_v60, %v555_v54  ;;  %5333 = vpow2.f32 %v1716_v35  ;;  %v1227_v47 = vmul.f32 %v4469_v58, %v4469_v58 }
  0xa2   : > { %4414 = vmatmul.msk.bf16.gmra.mxu1 %vm884_vm0, %v802_v9  ;;  %v4568_v7 = vadd.f32 -4.2285714, %v5984_v63  ;;  %v5326_v13 = vpop.eup %5325  ;;  %5335 = vpow2.f32 %v1714_v32  ;;  %v1652_v40 = vmul.f32 %v4567_v37, %v4567_v37  ;;  %v1295_v16 = vmul.f32 1.442695, %v1258_v27 }
  0xa3   : > { %5337 = vpow2.f32 %v1718_v20  ;;  %v1654_v39 = vmul.f32 %v4569_v10, %v4569_v10  ;;  %v1299_v42 = vmul.f32 1.442695, %v1260_v36  ;;  %v1257_v55 = vsub.f32 0.0, %v1225_v50 }
  0xa4   : > { %v5328_v5 = vpop.eup %5327  ;;  %v4570_v21 = vadd.f32 -4.2285714, %v5986_v0  ;;  %v1259_v9 = vsub.f32 0.0, %v1227_v47  ;;  %v1653_v56 = vmul.f32 %v4568_v7, %v4568_v7  ;;  %v1350_v57 = vmul.f32 %v5324_v52, %v5950_v22 }
  0xa5   : > { %952 = vmatmul.bf16.gmra.mxu0 %v801_v31  ;;  %v5330_v14 = vpop.eup %5329  ;;  %v1352_v54 = vmul.f32 %v5326_v13, %v5979_v53  ;;  %v1684_v60 = vsub.f32 0.0, %v1652_v40  ;;  %5339 = vpow2.f32 %v1295_v16  ;;  %v1686_v31 = vsub.f32 0.0, %v1654_v39 }
  0xa6   : > { %1134 = vmatmul.bf16.gmra.mxu2 %v573_v30  ;;  %v5332_v45 = vpop.eup %5331  ;;  %v1655_v35 = vmul.f32 %v4570_v21, %v4570_v21  ;;  %v4472_v32 = vadd.f32 -3.0857143, %v6049_v23  ;;  %5341 = vpow2.f32 %v1299_v42  ;;  %v1293_v20 = vmul.f32 1.442695, %v1257_v55  ;;  %v5116_v42 = vld [vmem:[%s7561_s2 + $0x170] sm:$0xff] }
  0xa7   : > { %v5334_v58 = vpop.eup %5333  ;;  %v4474_v27 = vadd.f32 -3.0857143, %v6051_v24  ;;  %v1349_v36 = vmul.f32 %v5328_v5, %v5958_v28  ;;  %v1351_v50 = vmul.f32 %v5330_v14, %v5988_v1  ;;  %v1297_v52 = vmul.f32 1.442695, %v1259_v9  ;;  %v5126_v5 = vld [vmem:[%s7561_s2 + $0x1c0] sm:$0xff]  ;;  %2357 = vmatpush.bf16.msra.mxu1 %v5116_v42 }
  0xa8   : > { %v5336_v37 = vpop.eup %5335  ;;  %v1685_v30 = vsub.f32 0.0, %v1653_v56  ;;  %v1382_v47 = vpack.c.bf16 %v1352_v54, %v1350_v57  ;;  %v1776_v7 = vmul.f32 %v5332_v45, %v5958_v28  ;;  %v1720_v13 = vmul.f32 1.442695, %v1684_v60  ;;  %2784 = vmatpush.bf16.msra.mxu0 %v5126_v5 }
  0xa9   : > { %v5338_v10 = vpop.eup %5337  ;;  %v1687_v40 = vsub.f32 0.0, %v1655_v35  ;;  %v1778_v16 = vmul.f32 %v5334_v58, %v5988_v1  ;;  %v1724_v39 = vmul.f32 1.442695, %v1686_v31  ;;  %v1230_v55 = vmul.f32 %v4472_v32, %v4472_v32 }
  0xaa   : > { %v4471_v21 = vadd.f32 -3.0857143, %v6082_v61  ;;  %v1777_v14 = vmul.f32 %v5336_v37, %v5950_v22  ;;  %v1779_v9 = vmul.f32 %v5338_v10, %v5979_v53  ;;  %5343 = vpow2.f32 %v1293_v20 }
  0xab   : > { %v1232_v56 = vmul.f32 %v4474_v27, %v4474_v27  ;;  %v5340_v45 = vpop.eup %5339  ;;  %v1381_v57 = vpack.c.bf16 %v1351_v50, %v1349_v36  ;;  %5345 = vpow2.f32 %v1297_v52  ;;  %v1722_v54 = vmul.f32 1.442695, %v1685_v30 }
  0xac   : > { %v4473_v60 = vadd.f32 -3.0857143, %v6084_v62  ;;  %v5342_v35 = vpop.eup %5341  ;;  %5347 = vpow2.f32 %v1720_v13  ;;  %v1726_v31 = vmul.f32 1.442695, %v1687_v40  ;;  %v4571_v32 = vadd.f32 -4.2285714, %v6082_v61 }
  0xad   : > { %v1808_v37 = vpack.c.bf16 %v1778_v16, %v1776_v7  ;;  %5349 = vpow2.f32 %v1724_v39  ;;  %v1262_v20 = vsub.f32 0.0, %v1230_v55  ;;  %v1229_v27 = vmul.f32 %v4471_v21, %v4471_v21 }
  0xae   : > { %v1809_v36 = vpack.c.bf16 %v1779_v9, %v1777_v14  ;;  %v6436_v50 = vmul.f32 %v5340_v45, %v5994_v4  ;;  %v1264_v52 = vsub.f32 0.0, %v1232_v56  ;;  %v4573_v30 = vadd.f32 -4.2285714, %v6084_v62 }
  0xaf   : > { %v967_v58 = vpop.f32.mrf.mxu1  ;;  %v6440_v13 = vmul.f32 %v5342_v35, %v6016_v29  ;;  %5351 = vpow2.f32 %v1722_v54  ;;  %v1231_v40 = vmul.f32 %v4473_v60, %v4473_v60  ;;  %v1656_v16 = vmul.f32 %v4571_v32, %v4571_v32 }
  0xb0   : > { %4555 = vmatmul.msk.bf16.vlgmr.msrb.gmra.mxu3 %vm884_vm0, %v1382_v47  ;;  %v5344_v47 = vpop.eup %5343  ;;  %5353 = vpow2.f32 %v1726_v31  ;;  %v4572_v39 = vadd.f32 -4.2285714, %v6049_v23  ;;  %v1303_v55 = vmul.f32 1.442695, %v1262_v20  ;;  %v1261_v21 = vsub.f32 0.0, %v1229_v27 }
  0xb1   : > { %v5346_v5 = vpop.eup %5345  ;;  %v4574_v14 = vadd.f32 -4.2285714, %v6051_v24  ;;  %v1307_v56 = vmul.f32 1.442695, %v1264_v52  ;;  %v1658_v45 = vmul.f32 %v4573_v30, %v4573_v30  ;;  %v1384_v54 = vpack.c.bf16 %v6440_v13, %v6436_v50 }
  0xb2   : > { %v918_v10 = vpop.f32.mrf.mxu0  ;;  %1510 = vmatmul.bf16.vlgmr.msrb.gmra.mxu1 %v1381_v57  ;;  %v5348_v9 = vpop.eup %5347  ;;  %v1263_v60 = vsub.f32 0.0, %v1231_v40  ;;  %v1355_v31 = vmul.f32 %v5346_v5, %v6057_v34  ;;  %v1688_v32 = vsub.f32 0.0, %v1656_v16  ;;  %5355 = vpow2.f32 %v1303_v55 }
  0xb3   : > { %v968_v42 = vadd.f32 %v967_v58, %v918_v10  ;;  %v1149_v7 = vpop.f32.mrf.mxu3  ;;  %v5350_v57 = vpop.eup %5349  ;;  %v1353_v58 = vmul.f32 %v5344_v47, %v6054_v33  ;;  %v6450_v27 = vmul.f32 %v5348_v9, %v6054_v33  ;;  %v1301_v10 = vmul.f32 1.442695, %v1261_v21 }
  0xb4   : > { %v1659_v52 = vmul.f32 %v4574_v14, %v4574_v14  ;;  %v1782_v50 = vmul.f32 %v5350_v57, %v6057_v34  ;;  %5357 = vpow2.f32 %v1307_v56  ;;  %v1690_v13 = vsub.f32 0.0, %v1658_v45 }
  0xb5   : > { %1937 = vmatmul.bf16.vlgmr.msrb.gmra.mxu0 %v1808_v37  ;;  %v1657_v37 = vmul.f32 %v4572_v39, %v4572_v39  ;;  %v5352_v20 = vpop.eup %5351  ;;  %v4476_v40 = vadd.f32 -3.0857143, %v6099_v44  ;;  %v1305_v16 = vmul.f32 1.442695, %v1263_v60  ;;  %v4478_v39 = vadd.f32 -3.0857143, %v6102_v48 }
  0xb6   : > { %4655 = vmatmul.msk.bf16.vlgmr.msrb.gmra.mxu2 %vm884_vm0, %v1809_v36  ;;  %v5354_v30 = vpop.eup %5353  ;;  %v1781_v9 = vmul.f32 %v5352_v20, %v5994_v4  ;;  %v1728_v55 = vmul.f32 1.442695, %v1688_v32  ;;  %v4475_v14 = vadd.f32 -3.0857143, %v6131_v43  ;;  %v1691_v56 = vsub.f32 0.0, %v1659_v52 }
  0xb7   : > { %v969_v35 = vpop.f32.mrf.mxu1  ;;  %v1689_v21 = vsub.f32 0.0, %v1657_v37  ;;  %v1783_v57 = vmul.f32 %v5354_v30, %v6016_v29  ;;  %v4477_v45 = vadd.f32 -3.0857143, %v6133_v3  ;;  %v1383_v60 = vpack.c.bf16 %v1355_v31, %v1353_v58 }
  0xb8   : > { %5359 = vpow2.f32 %v1301_v10  ;;  %v1234_v32 = vmul.f32 %v4476_v40, %v4476_v40  ;;  %v5356_v37 = vpop.eup %5355  ;;  %v1236_v20 = vmul.f32 %v4478_v39, %v4478_v39  ;;  %v4575_v52 = vadd.f32 -4.2285714, %v6131_v43 }
  0xb9   : > { %v1100_v36 = vpop.f32.mrf.mxu2  ;;  %5361 = vpow2.f32 %v1305_v16  ;;  %v1233_v34 = vmul.f32 %v4475_v14, %v4475_v14  ;;  %v1811_v58 = vpack.c.bf16 %v1783_v57, %v1781_v9  ;;  %v1734_v31 = vmul.f32 1.442695, %v1691_v56 }
  0xba   : > { %v920_v62 = vpop.f32.mrf.mxu0  ;;  %v1101_v47 = vadd.f32 %v1100_v36, %v968_v42  ;;  %v5115_v42 = vld [vmem:[%s7561_s2 + $0x168] sm:$0xff]  ;;  %v5358_v30 = vpop.eup %5357  ;;  %5363 = vpow2.f32 %v1728_v55  ;;  %v1235_v10 = vmul.f32 %v4477_v45, %v4477_v45  ;;  %v6473_v40 = vmul.f32 %v5356_v37, %v6080_v59 }
  0xbb   : > { %v970_v5 = vadd.f32 %v969_v35, %v920_v62  ;;  %v1151_v61 = vpop.f32.mrf.mxu3  ;;  %v5125_v62 = vld [vmem:[%s7561_s2 + $0x1b8] sm:$0xff]  ;;  %v1732_v35 = vmul.f32 1.442695, %v1690_v13  ;;  %2358 = vmatpush.bf16.msra.mxu1 %v5115_v42  ;;  %v1266_v16 = vsub.f32 0.0, %v1234_v32  ;;  %v4578_v39 = vadd.f32 -4.2285714, %v6102_v48 }
  0xbc   : > { %v6457_v33 = vadd.f32 %v1149_v7, %v1101_v47  ;;  %v1810_v7 = vpack.c.bf16 %v1782_v50, %v6450_v27  ;;  %2785 = vmatpush.bf16.msra.mxu0 %v5125_v62  ;;  %v1730_v47 = vmul.f32 1.442695, %v1689_v21  ;;  %v4576_v27 = vadd.f32 -4.2285714, %v6099_v44 }
  0xbd   : > { %5365 = vpow2.f32 %v1732_v35  ;;  %v1268_v14 = vsub.f32 0.0, %v1236_v20  ;;  %v1660_v42 = vmul.f32 %v4575_v52, %v4575_v52  ;;  %v6477_v57 = vmul.f32 %v5358_v30, %v6088_v11 }
  0xbe   : > { %7786 = vst [vmem:[#allocation62_spill] sm:$0xff] %v6457_v33  ;;  %v4577_v33 = vadd.f32 -4.2285714, %v6133_v3  ;;  %5367 = vpow2.f32 %v1730_v47  ;;  %v1265_v56 = vsub.f32 0.0, %v1233_v34  ;;  %v1267_v35 = vsub.f32 0.0, %v1235_v10 }
  0xbf   : > { %v972_v36 = vpop.f32.mrf.mxu1  ;;  %5369 = vpow2.f32 %v1734_v31  ;;  %v1661_v32 = vmul.f32 %v4576_v27, %v4576_v27  ;;  %v1315_v20 = vmul.f32 1.442695, %v1268_v14  ;;  %v1692_v52 = vsub.f32 0.0, %v1660_v42  ;;  %v7788_v31 = vld [vmem:[#allocation24_spill] sm:$0xff]  ;;  %v7789_v42 = vld [vmem:[#allocation29_spill] sm:$0xff] }
  0xc0   : > { %4556 = vmatmul.msk.bf16.gmra.mxu3 %vm884_vm0, %v1384_v54  ;;  %v5360_v54 = vpop.eup %5359  ;;  %v1662_v62 = vmul.f32 %v4577_v33, %v4577_v33  ;;  %v1309_v34 = vmul.f32 1.442695, %v1265_v56  ;;  %v1313_v27 = vmul.f32 1.442695, %v1267_v35 }
  0xc1   : > { %v1102_v50 = vpop.f32.mrf.mxu2  ;;  %v5362_v45 = vpop.eup %5361  ;;  %v1357_v47 = vmul.f32 %v5360_v54, %v6105_v49  ;;  %v4482_v54 = vadd.f32 -3.0857143, %v7789_v42 }
  0xc2   : > { %v923_v13 = vpop.f32.mrf.mxu0  ;;  %v1103_v55 = vadd.f32 %v1102_v50, %v970_v5  ;;  %1515 = vmatmul.bf16.gmra.mxu1 %v1383_v60  ;;  %v5364_v5 = vpop.eup %5363  ;;  %v1311_v60 = vmul.f32 1.442695, %v1266_v16  ;;  %v1694_v33 = vsub.f32 0.0, %v1662_v62  ;;  %v1359_v10 = vmul.f32 %v5362_v45, %v7788_v31 }
  0xc3   : > { %v973_v21 = vadd.f32 %v972_v36, %v923_v13  ;;  %v1154_v9 = vpop.f32.mrf.mxu3  ;;  %v1663_v36 = vmul.f32 %v4578_v39, %v4578_v39  ;;  %v5366_v50 = vpop.eup %5365  ;;  %v1693_v13 = vsub.f32 0.0, %v1661_v32 }
  0xc4   : > { %v6479_v37 = vadd.f32 %v1151_v61, %v1103_v55  ;;  %v4480_v61 = vadd.f32 -3.0857143, %v6145_v26  ;;  %v5368_v16 = vpop.eup %5367  ;;  %v1784_v55 = vmul.f32 %v5364_v5, %v6105_v49  ;;  %5371 = vpow2.f32 %v1311_v60  ;;  %v5114_v60 = vld [vmem:[%s7561_s2 + $0x160] sm:$0xff] }
  0xc5   : > { %1942 = vmatmul.bf16.gmra.mxu0 %v1810_v7  ;;  %v1386_v7 = vpack.c.bf16 %v6477_v57, %v6473_v40  ;;  %v1695_v14 = vsub.f32 0.0, %v1663_v36  ;;  %v5370_v56 = vpop.eup %5369  ;;  %5373 = vpow2.f32 %v1315_v20  ;;  %v1786_v40 = vmul.f32 %v5366_v50, %v7788_v31  ;;  %v7791_v50 = vld [vmem:[#allocation34_spill] sm:$0xff]  ;;  %2359 = vmatpush.bf16.msra.mxu1 %v5114_v60  ;;  %v7799_v49 = vld [vmem:[#allocation37_spill] sm:$0xff] }
  0xc6   : > { %7787 = vst [vmem:[#allocation63_spill] sm:$0xff] %v6479_v37  ;;  %4656 = vmatmul.msk.bf16.gmra.mxu2 %vm884_vm0, %v1811_v58  ;;  %v1736_v37 = vmul.f32 1.442695, %v1692_v52  ;;  %5375 = vpow2.f32 %v1309_v34  ;;  %v1740_v57 = vmul.f32 1.442695, %v1694_v33  ;;  %v1238_v45 = vmul.f32 %v4480_v61, %v4480_v61  ;;  %v7792_v34 = vld [vmem:[#allocation35_spill] sm:$0xff] }
  0xc7   : > { %v974_v30 = vpop.f32.mrf.mxu1  ;;  %v1785_v32 = vmul.f32 %v5368_v16, %v6080_v59  ;;  %5377 = vpow2.f32 %v1313_v27  ;;  %v1738_v5 = vmul.f32 1.442695, %v1693_v13  ;;  %v1787_v36 = vmul.f32 %v5370_v56, %v6088_v11 }
  0xc8   : > { %v1742_v20 = vmul.f32 1.442695, %v1695_v14  ;;  %v1240_v52 = vmul.f32 %v4482_v54, %v4482_v54  ;;  %5379 = vpow2.f32 %v1736_v37  ;;  %v4481_v33 = vadd.f32 -3.0857143, %v7792_v34 }
  0xc9   : > { %v1105_v39 = vpop.f32.mrf.mxu2  ;;  %5381 = vpow2.f32 %v1740_v57  ;;  %v1270_v13 = vsub.f32 0.0, %v1238_v45  ;;  %v4581_v45 = vadd.f32 -4.2285714, %v7792_v34 }
  0xca   : > { %v925_v58 = vpop.f32.mrf.mxu0  ;;  %v1106_v62 = vadd.f32 %v1105_v39, %v973_v21  ;;  %v5124_v21 = vld [vmem:[%s7561_s2 + $0x1b0] sm:$0xff]  ;;  %v5372_v61 = vpop.eup %5371  ;;  %v1812_v39 = vpack.c.bf16 %v1786_v40, %v1784_v55  ;;  %5383 = vpow2.f32 %v1738_v5  ;;  %v1272_v37 = vsub.f32 0.0, %v1240_v52  ;;  %v7794_v40 = vld [vmem:[#allocation30_spill] sm:$0xff] }
  0xcb   : > { %v975_v3 = vadd.f32 %v974_v30, %v925_v58  ;;  %v1156_v43 = vpop.f32.mrf.mxu3  ;;  %v4479_v30 = vadd.f32 -3.0857143, %v7791_v50  ;;  %2786 = vmatpush.bf16.msra.mxu0 %v5124_v21  ;;  %v5374_v16 = vpop.eup %5373  ;;  %v4579_v58 = vadd.f32 -4.2285714, %v7791_v50  ;;  %5385 = vpow2.f32 %v1742_v20 }
  0xcc   : > { %v6490_v35 = vadd.f32 %v1154_v9, %v1106_v62  ;;  %v1385_v9 = vpack.c.bf16 %v1359_v10, %v1357_v47  ;;  %v5376_v14 = vpop.eup %5375  ;;  %v1813_v47 = vpack.c.bf16 %v1787_v36, %v1785_v32  ;;  %v1239_v57 = vmul.f32 %v4481_v33, %v4481_v33 }
  0xcd   : > { %v1237_v10 = vmul.f32 %v4479_v30, %v4479_v30  ;;  %v5378_v62 = vpop.eup %5377  ;;  %v6509_v5 = vmul.f32 %v5374_v16, %v7794_v40  ;;  %v1319_v50 = vmul.f32 1.442695, %v1270_v13  ;;  %v4580_v32 = vadd.f32 -4.2285714, %v6145_v26  ;;  %v7796_v13 = vld [vmem:[#allocation31_spill] sm:$0xff] }
  0xce   : > { %7790 = vst [vmem:[#allocation64_spill] sm:$0xff] %v6490_v35  ;;  %v5380_v36 = vpop.eup %5379  ;;  %v1664_v52 = vmul.f32 %v4579_v58, %v4579_v58  ;;  %v4582_v30 = vadd.f32 -4.2285714, %v7789_v42  ;;  %v1323_v33 = vmul.f32 1.442695, %v1272_v37  ;;  %v6520_v16 = vmul.f32 %v5376_v14, %v7796_v13  ;;  %v7797_v37 = vld [vmem:[#allocation32_spill] sm:$0xff] }
  0xcf   : > { %v977_v27 = vpop.f32.mrf.mxu1  ;;  %5387 = vpow2.f32 %v1319_v50 }
  0xd0   : > { %4557 = vmatmul.msk.bf16.gmra.mxu3 %vm884_vm0, %v1386_v7  ;;  %v7793_v7 = vld [vmem:[#allocation25_spill] sm:$0xff]  ;;  %v1696_v14 = vsub.f32 0.0, %v1664_v52  ;;  %5389 = vpow2.f32 %v1323_v33  ;;  %v5113_v33 = vld [vmem:[%s7561_s2 + $0x158] sm:$0xff] }
  0xd1   : > { %v1107_v54 = vpop.f32.mrf.mxu2  ;;  %v6506_v55 = vmul.f32 %v5372_v61, %v7793_v7  ;;  %v1269_v61 = vsub.f32 0.0, %v1237_v10  ;;  %v1363_v10 = vmul.f32 %v5378_v62, %v7797_v37  ;;  %2360 = vmatpush.bf16.msra.mxu1 %v5113_v33 }
  0xd2   : > { %v928_v56 = vpop.f32.mrf.mxu0  ;;  %v1108_v60 = vadd.f32 %v1107_v54, %v975_v3  ;;  %1520 = vmatmul.bf16.gmra.mxu1 %v1385_v9  ;;  %v5118_v3 = vld [vmem:[%s7561_s2 + $0x180] sm:$0xff]  ;;  %v5382_v9 = vpop.eup %5381  ;;  %v1271_v54 = vsub.f32 0.0, %v1239_v57  ;;  %v1667_v57 = vmul.f32 %v4582_v30, %v4582_v30  ;;  %v1744_v48 = vmul.f32 1.442695, %v1696_v14 }
  0xd3   : > { %v978_v21 = vadd.f32 %v977_v27, %v928_v56  ;;  %v1159_v35 = vpop.f32.mrf.mxu3  ;;  %v5384_v27 = vpop.eup %5383  ;;  %2412 = vmatpush.bf16.msra.mxu3 %v5118_v3  ;;  %v1790_v26 = vmul.f32 %v5382_v9, %v7797_v37  ;;  %v1317_v31 = vmul.f32 1.442695, %v1269_v61  ;;  %v1387_v61 = vpack.c.bf16 %v1363_v10, %v6520_v16 }
  0xd4   : > { %v6512_v20 = vadd.f32 %v1156_v43, %v1108_v60  ;;  %v1666_v43 = vmul.f32 %v4581_v45, %v4581_v45  ;;  %v5386_v56 = vpop.eup %5385  ;;  %v1388_v60 = vpack.c.bf16 %v6509_v5, %v6506_v55  ;;  %v7798_v45 = vld [vmem:[#allocation36_spill] sm:$0xff]  ;;  %v4486_v55 = vadd.f32 -3.0857143, %v7799_v49 }
  0xd5   : > { %1947 = vmatmul.bf16.gmra.mxu0 %v1812_v39  ;;  %v5128_v39 = vld [vmem:[%s7561_s2 + $0x1d0] sm:$0xff]  ;;  %v4484_v3 = vadd.f32 -3.0857143, %v7798_v45  ;;  %v1321_v50 = vmul.f32 1.442695, %v1271_v54  ;;  %v1791_v52 = vmul.f32 %v5386_v56, %v7794_v40  ;;  %v1699_v9 = vsub.f32 0.0, %v1667_v57 }
  0xd6   : > { %7795 = vst [vmem:[#allocation65_spill] sm:$0xff] %v6512_v20  ;;  %4657 = vmatmul.msk.bf16.gmra.mxu2 %vm884_vm0, %v1813_v47  ;;  %v1665_v20 = vmul.f32 %v4580_v32, %v4580_v32  ;;  %v6529_v47 = vmul.f32 %v5380_v36, %v7796_v13  ;;  %v1698_v32 = vsub.f32 0.0, %v1666_v43  ;;  %v1789_v36 = vmul.f32 %v5384_v27, %v7793_v7 }
  0xd7   : > { %v979_v58 = vpop.f32.mrf.mxu1  ;;  %2839 = vmatpush.bf16.msra.mxu2 %v5128_v39  ;;  %v7800_v39 = vld [vmem:[#allocation42_spill] sm:$0xff]  ;;  %5391 = vpow2.f32 %v1317_v31  ;;  %v4485_v27 = vadd.f32 -3.0857143, %v6240_v2  ;;  %v1750_v31 = vmul.f32 1.442695, %v1699_v9 }
  0xd8   : > { %v1697_v30 = vsub.f32 0.0, %v1665_v20  ;;  %v4483_v13 = vadd.f32 -3.0857143, %v7800_v39  ;;  %v1244_v20 = vmul.f32 %v4486_v55, %v4486_v55  ;;  %5393 = vpow2.f32 %v1321_v50  ;;  %v7801_v55 = vld [vmem:[#allocation33_spill] sm:$0xff]  ;;  %v7802_v9 = vld [vmem:[#allocation38_spill] sm:$0xff] }
  0xd9   : > { %v1110_v34 = vpop.f32.mrf.mxu2  ;;  %v1748_v54 = vmul.f32 1.442695, %v1698_v32  ;;  %v4583_v43 = vadd.f32 -4.2285714, %v7800_v39  ;;  %v1815_v14 = vpack.c.bf16 %v1791_v52, %v1789_v36  ;;  %5395 = vpow2.f32 %v1744_v48 }
  0xda   : > { %v930_v42 = vpop.f32.mrf.mxu0  ;;  %v1111_v5 = vadd.f32 %v1110_v34, %v978_v21  ;;  %v1242_v34 = vmul.f32 %v4484_v3, %v4484_v3  ;;  %v5388_v21 = vpop.eup %5387  ;;  %v1746_v57 = vmul.f32 1.442695, %v1697_v30  ;;  %v1241_v3 = vmul.f32 %v4483_v13, %v4483_v13 }
  0xdb   : > { %v980_v62 = vadd.f32 %v979_v58, %v930_v42  ;;  %v1161_v11 = vpop.f32.mrf.mxu3  ;;  %v5123_v42 = vld [vmem:[%s7561_s2 + $0x1a8] sm:$0xff]  ;;  %v5390_v56 = vpop.eup %5389  ;;  %v6553_v50 = vmul.f32 %v5388_v21, %v7801_v55  ;;  %v1276_v32 = vsub.f32 0.0, %v1244_v20  ;;  %v1243_v33 = vmul.f32 %v4485_v27, %v4485_v27 }
  0xdc   : > { %v6537_v59 = vadd.f32 %v1159_v35, %v1111_v5  ;;  %v1814_v35 = vpack.c.bf16 %v1790_v26, %v6529_v47  ;;  %2787 = vmatpush.bf16.msra.mxu0 %v5123_v42  ;;  %v4585_v5 = vadd.f32 -4.2285714, %v6240_v2  ;;  %v1274_v16 = vsub.f32 0.0, %v1242_v34 }
  0xdd   : > { %v4584_v26 = vadd.f32 -4.2285714, %v7798_v45  ;;  %v4586_v36 = vadd.f32 -4.2285714, %v7799_v49  ;;  %5397 = vpow2.f32 %v1748_v54  ;;  %v1668_v30 = vmul.f32 %v4583_v43, %v4583_v43 }
  0xde   : > { %v6557_v42 = vmul.f32 %v5390_v56, %v7802_v9  ;;  %5399 = vpow2.f32 %v1746_v57  ;;  %v1273_v34 = vsub.f32 0.0, %v1241_v3  ;;  %v1670_v2 = vmul.f32 %v4585_v5, %v4585_v5 }
  0xdf   : > { %v982_v58 = vpop.f32.mrf.mxu1  ;;  %5401 = vpow2.f32 %v1750_v31  ;;  %v1327_v20 = vmul.f32 1.442695, %v1274_v16  ;;  %v1669_v27 = vmul.f32 %v4584_v26, %v4584_v26  ;;  %v1700_v43 = vsub.f32 0.0, %v1668_v30  ;;  %v7804_v26 = vld [vmem:[#allocation46_spill] sm:$0xff] }
  0xe0   : > { %4558 = vmatmul.msk.bf16.gmra.mxu3 %vm884_vm0, %v1388_v60  ;;  %v5392_v60 = vpop.eup %5391  ;;  %v4488_v56 = vadd.f32 -3.0857143, %v6257_v38  ;;  %v1390_v57 = vpack.c.bf16 %v6557_v42, %v6553_v50  ;;  %v1325_v3 = vmul.f32 1.442695, %v1273_v34 }
  0xe1   : > { %v1112_v10 = vpop.f32.mrf.mxu2  ;;  %v5394_v39 = vpop.eup %5393  ;;  %5403 = vpow2.f32 %v1327_v20  ;;  %v1701_v16 = vsub.f32 0.0, %v1669_v27  ;;  %v1752_v34 = vmul.f32 1.442695, %v1700_v43  ;;  %v7805_v27 = vld [vmem:[#allocation49_spill] sm:$0xff] }
  0xe2   : > { %v933_v47 = vpop.f32.mrf.mxu0  ;;  %v1113_v52 = vadd.f32 %v1112_v10, %v980_v62  ;;  %1525 = vmatmul.bf16.gmra.mxu1 %v1387_v61  ;;  %v1331_v62 = vmul.f32 1.442695, %v1276_v32  ;;  %v1275_v61 = vsub.f32 0.0, %v1243_v33  ;;  %v5396_v54 = vpop.eup %5395  ;;  %v1367_v31 = vmul.f32 %v5394_v39, %v6219_v17 }
  0xe3   : > { %v983_v13 = vadd.f32 %v982_v58, %v933_v47  ;;  %v1164_v48 = vpop.f32.mrf.mxu3  ;;  %v1671_v58 = vmul.f32 %v4586_v36, %v4586_v36  ;;  %v5398_v5 = vpop.eup %5397  ;;  %v4490_v47 = vadd.f32 -3.0857143, %v7804_v26  ;;  %v1792_v36 = vmul.f32 %v5396_v54, %v6216_v18 }
  0xe4   : > { %v6559_v21 = vadd.f32 %v1161_v11, %v1113_v52  ;;  %v1365_v11 = vmul.f32 %v5392_v60, %v6216_v18  ;;  %v5400_v32 = vpop.eup %5399  ;;  %5405 = vpow2.f32 %v1331_v62  ;;  %v1329_v52 = vmul.f32 1.442695, %v1275_v61  ;;  %v5112_v62 = vld [vmem:[%s7561_s2 + $0x150] sm:$0xff] }
  0xe5   : > { %1952 = vmatmul.bf16.gmra.mxu0 %v1814_v35  ;;  %v1702_v35 = vsub.f32 0.0, %v1670_v2  ;;  %v1703_v30 = vsub.f32 0.0, %v1671_v58  ;;  %v5402_v50 = vpop.eup %5401  ;;  %v1246_v2 = vmul.f32 %v4488_v56, %v4488_v56  ;;  %v1794_v39 = vmul.f32 %v5398_v5, %v6219_v17  ;;  %2361 = vmatpush.bf16.msra.mxu1 %v5112_v62 }
  0xe6   : > { %7803 = vst [vmem:[#allocation66_spill] sm:$0xff] %v6559_v21  ;;  %4658 = vmatmul.msk.bf16.gmra.mxu2 %vm884_vm0, %v1815_v14  ;;  %5407 = vpow2.f32 %v1325_v3  ;;  %v4487_v49 = vadd.f32 -3.0857143, %v7805_v27  ;;  %v1793_v37 = vmul.f32 %v5400_v32, %v7801_v55  ;;  %v1754_v54 = vmul.f32 1.442695, %v1701_v16 }
  0xe7   : > { %v984_v10 = vpop.f32.mrf.mxu1  ;;  %v1756_v20 = vmul.f32 1.442695, %v1702_v35  ;;  %v1248_v61 = vmul.f32 %v4490_v47, %v4490_v47  ;;  %v1795_v58 = vmul.f32 %v5402_v50, %v7802_v9  ;;  %5409 = vpow2.f32 %v1329_v52 }
  0xe8   : > { %v1758_v43 = vmul.f32 1.442695, %v1703_v30  ;;  %v4489_v56 = vadd.f32 -3.0857143, %v6286_v41  ;;  %5411 = vpow2.f32 %v1752_v34  ;;  %v1278_v3 = vsub.f32 0.0, %v1246_v2 }
  0xe9   : > { %v1115_v14 = vpop.f32.mrf.mxu2  ;;  %v4587_v35 = vadd.f32 -4.2285714, %v7805_v27  ;;  %5413 = vpow2.f32 %v1756_v20  ;;  %v1245_v32 = vmul.f32 %v4487_v49, %v4487_v49  ;;  %v4589_v47 = vadd.f32 -4.2285714, %v6286_v41 }
  0xea   : > { %v935_v33 = vpop.f32.mrf.mxu0  ;;  %v1116_v42 = vadd.f32 %v1115_v14, %v983_v13  ;;  %v5122_v13 = vld [vmem:[%s7561_s2 + $0x1a0] sm:$0xff]  ;;  %v1816_v14 = vpack.c.bf16 %v1794_v39, %v1792_v36  ;;  %5415 = vpow2.f32 %v1754_v54  ;;  %v4588_v52 = vadd.f32 -4.2285714, %v6257_v38  ;;  %v7808_v54 = vld [vmem:[#allocation44_spill] sm:$0xff] }
  0xeb   : > { %v985_v60 = vadd.f32 %v984_v10, %v935_v33  ;;  %v1166_v21 = vpop.f32.mrf.mxu3  ;;  %v1389_v10 = vpack.c.bf16 %v1367_v31, %v1365_v11  ;;  %2788 = vmatpush.bf16.msra.mxu0 %v5122_v13  ;;  %v1280_v33 = vsub.f32 0.0, %v1248_v61  ;;  %v1817_v50 = vpack.c.bf16 %v1795_v58, %v1793_v37  ;;  %v7807_v36 = vld [vmem:[#allocation41_spill] sm:$0xff] }
  0xec   : > { %v6571_v45 = vadd.f32 %v1164_v48, %v1116_v42  ;;  %v5404_v48 = vpop.eup %5403  ;;  %5417 = vpow2.f32 %v1758_v43  ;;  %v1247_v42 = vmul.f32 %v4489_v56, %v4489_v56  ;;  %v4590_v34 = vadd.f32 -4.2285714, %v7804_v26 }
  0xed   : > { %v5406_v5 = vpop.eup %5405  ;;  %v1335_v20 = vmul.f32 1.442695, %v1278_v3  ;;  %v1672_v62 = vmul.f32 %v4587_v35, %v4587_v35  ;;  %v6588_v39 = vmul.f32 %v5404_v48, %v7807_v36  ;;  %v1277_v41 = vsub.f32 0.0, %v1245_v32  ;;  %v7810_v32 = vld [vmem:[#allocation47_spill] sm:$0xff] }
  0xee   : > { %7806 = vst [vmem:[#allocation67_spill] sm:$0xff] %v6571_v45  ;;  %v5408_v11 = vpop.eup %5407  ;;  %v6591_v61 = vmul.f32 %v5406_v5, %v7808_v54  ;;  %v1674_v27 = vmul.f32 %v4589_v47, %v4589_v47  ;;  %v1339_v43 = vmul.f32 1.442695, %v1280_v33  ;;  %v1675_v3 = vmul.f32 %v4590_v34, %v4590_v34 }
  0xef   : > { %v987_v16 = vpop.f32.mrf.mxu1  ;;  %v5410_v13 = vpop.eup %5409  ;;  %5419 = vpow2.f32 %v1335_v20  ;;  %v1704_v48 = vsub.f32 0.0, %v1672_v62  ;;  %v1369_v47 = vmul.f32 %v5408_v11, %v7810_v32  ;;  %v7813_v11 = vld [vmem:[#allocation53_spill] sm:$0xff] }
  0xf0   : > { %4559 = vmatmul.msk.bf16.gmra.mxu3 %vm884_vm0, %v1390_v57  ;;  %v5412_v37 = vpop.eup %5411  ;;  %v1392_v5 = vpack.c.bf16 %v6591_v61, %v6588_v39  ;;  %5421 = vpow2.f32 %v1339_v43  ;;  %v1707_v26 = vsub.f32 0.0, %v1675_v3 }
  0xf1   : > { %v1117_v31 = vpop.f32.mrf.mxu2  ;;  %v5414_v56 = vpop.eup %5413  ;;  %v1760_v61 = vmul.f32 1.442695, %v1704_v48 }
  0xf2   : > { %v938_v30 = vpop.f32.mrf.mxu0  ;;  %v1118_v2 = vadd.f32 %v1117_v31, %v985_v60  ;;  %1530 = vmatmul.bf16.gmra.mxu1 %v1389_v10  ;;  %v1673_v60 = vmul.f32 %v4588_v52, %v4588_v52  ;;  %v1279_v10 = vsub.f32 0.0, %v1247_v42  ;;  %v5416_v35 = vpop.eup %5415  ;;  %v7812_v42 = vld [vmem:[#allocation52_spill] sm:$0xff]  ;;  %v1766_v48 = vmul.f32 1.442695, %v1707_v26 }
  0xf3   : > { %v988_v49 = vadd.f32 %v987_v16, %v938_v30  ;;  %v1169_v57 = vpop.f32.mrf.mxu3  ;;  %v5418_v16 = vpop.eup %5417  ;;  %v1706_v30 = vsub.f32 0.0, %v1674_v27  ;;  %v4492_v34 = vadd.f32 -3.0857143, %v7812_v42 }
  0xf4   : > { %v6593_v58 = vadd.f32 %v1166_v21, %v1118_v2  ;;  %v1333_v21 = vmul.f32 1.442695, %v1277_v41  ;;  %v1705_v52 = vsub.f32 0.0, %v1673_v60  ;;  %v1337_v62 = vmul.f32 1.442695, %v1279_v10  ;;  %v7815_v10 = vld [vmem:[#allocation55_spill] sm:$0xff] }
  0xf5   : > { %1957 = vmatmul.bf16.gmra.mxu0 %v1816_v14  ;;  %v7811_v14 = vld [vmem:[#allocation48_spill] sm:$0xff]  ;;  %v4494_v41 = vadd.f32 -3.0857143, %v7813_v11  ;;  %v1799_v43 = vmul.f32 %v5418_v16, %v7808_v54  ;;  %v1764_v60 = vmul.f32 1.442695, %v1706_v30  ;;  %v5420_v45 = vpop.eup %5419 }
  0xf6   : > { %7809 = vst [vmem:[#allocation41_spill] sm:$0xff] %v6593_v58  ;;  %4659 = vmatmul.msk.bf16.gmra.mxu2 %vm884_vm0, %v1817_v50  ;;  %v1371_v33 = vmul.f32 %v5410_v13, %v7811_v14  ;;  %v1796_v50 = vmul.f32 %v5412_v37, %v7810_v32  ;;  %v1798_v20 = vmul.f32 %v5414_v56, %v7811_v14  ;;  %5423 = vpow2.f32 %v1333_v21  ;;  %v5111_v56 = vld [vmem:[%s7561_s2 + $0x148] sm:$0xff]  ;;  %v7816_v16 = vld [vmem:[#allocation56_spill] sm:$0xff]  ;;  %v5422_v21 = vpop.eup %5421  ;;  %v7817_v14 = vld [vmem:[#allocation51_spill] sm:$0xff] }
  0xf7   : > { %v989_v31 = vpop.f32.mrf.mxu1  ;;  %v1797_v13 = vmul.f32 %v5416_v35, %v7807_v36  ;;  %v1762_v37 = vmul.f32 1.442695, %v1705_v52  ;;  %v4491_v3 = vadd.f32 -3.0857143, %v7815_v10  ;;  %5425 = vpow2.f32 %v1337_v62  ;;  %2362 = vmatpush.bf16.msra.mxu1 %v5111_v56 }
  0xf8   : > { %v1391_v35 = vpack.c.bf16 %v1371_v33, %v1369_v47  ;;  %5427 = vpow2.f32 %v1760_v61  ;;  %v4591_v30 = vadd.f32 -4.2285714, %v7815_v10  ;;  %v6618_v32 = vmul.f32 %v5420_v45, %v7817_v14  ;;  %v7818_v61 = vld [vmem:[#allocation54_spill] sm:$0xff] }
  0xf9   : > { %v1120_v2 = vpop.f32.mrf.mxu2  ;;  %5429 = vpow2.f32 %v1764_v60  ;;  %v4593_v47 = vadd.f32 -4.2285714, %v7816_v16  ;;  %v1249_v33 = vmul.f32 %v4491_v3, %v4491_v3  ;;  %v4594_v45 = vadd.f32 -4.2285714, %v7813_v11 }
  0xfa   : > { %v940_v58 = vpop.f32.mrf.mxu0  ;;  %v1121_v38 = vadd.f32 %v1120_v2, %v988_v49  ;;  %v5121_v49 = vld [vmem:[%s7561_s2 + $0x198] sm:$0xff]  ;;  %v1819_v2 = vpack.c.bf16 %v1799_v43, %v1797_v13  ;;  %5431 = vpow2.f32 %v1762_v37  ;;  %v4664_v11 = vadd.f32 -5.3714285, %v5936_v15 }
  0xfb   : > { %v990_v39 = vadd.f32 %v989_v31, %v940_v58  ;;  %v1171_v27 = vpop.f32.mrf.mxu3  ;;  %v1250_v58 = vmul.f32 %v4492_v34, %v4492_v34  ;;  %v4493_v31 = vadd.f32 -3.0857143, %v7816_v16  ;;  %2789 = vmatpush.bf16.msra.mxu0 %v5121_v49  ;;  %v4592_v34 = vadd.f32 -4.2285714, %v7812_v42 }
  0xfc   : > { %v6606_v17 = vadd.f32 %v1169_v57, %v1121_v38  ;;  %v1818_v38 = vpack.c.bf16 %v1798_v20, %v1796_v50  ;;  %v1252_v57 = vmul.f32 %v4494_v41, %v4494_v41  ;;  %v5424_v50 = vpop.eup %5423  ;;  %v6624_v41 = vmul.f32 %v5422_v21, %v7818_v61 }
  0xfd   : > { %v1282_v26 = vsub.f32 0.0, %v1250_v58  ;;  %5433 = vpow2.f32 %v1766_v48  ;;  %v1251_v13 = vmul.f32 %v4493_v31, %v4493_v31  ;;  %v5426_v37 = vpop.eup %5425  ;;  %v1678_v58 = vmul.f32 %v4593_v47, %v4593_v47 }
  0xfe   : > { %7814 = vst [vmem:[#allocation68_spill] sm:$0xff] %v6606_v17  ;;  %v1284_v56 = vsub.f32 0.0, %v1252_v57  ;;  %v5428_v3 = vpop.eup %5427  ;;  %v1281_v42 = vsub.f32 0.0, %v1249_v33  ;;  %v1677_v21 = vmul.f32 %v4592_v34, %v4592_v34  ;;  %v1679_v31 = vmul.f32 %v4594_v45, %v4594_v45 }
  0xff   : > { %v992_v52 = vpop.f32.mrf.mxu1  ;;  %v1343_v10 = vmul.f32 1.442695, %v1282_v26  ;;  %v5430_v17 = vpop.eup %5429  ;;  %v1283_v48 = vsub.f32 0.0, %v1251_v13  ;;  %v1375_v47 = vmul.f32 %v5426_v37, %v6354_v8  ;;  %v6636_v26 = vmul.f32 %v5428_v3, %v6343_v46 }
 0x100   : > { %4560 = vmatmul.msk.bf16.gmra.mxu3 %vm884_vm0, %v1392_v5  ;;  %v1676_v5 = vmul.f32 %v4591_v30, %v4591_v30  ;;  %v1347_v57 = vmul.f32 1.442695, %v1284_v56  ;;  %v1710_v33 = vsub.f32 0.0, %v1678_v58  ;;  %v1341_v34 = vmul.f32 1.442695, %v1281_v42  ;;  %v7821_v58 = vld [vmem:[#allocation6_spill] sm:$0xff] }
 0x101   : > { %v1122_v20 = vpop.f32.mrf.mxu2  ;;  %5435 = vpow2.f32 %v1343_v10  ;;  %v2076_v56 = vmul.f32 %v4664_v11, %v4664_v11  ;;  %v5120_v11 = vld [vmem:[%s7561_s2 + $0x190] sm:$0xff] }
 0x102   : > { %v943_v62 = vpop.f32.mrf.mxu0  ;;  %v1123_v43 = vadd.f32 %v1122_v20, %v990_v39  ;;  %1535 = vmatmul.bf16.gmra.mxu1 %v1391_v35  ;;  %v5432_v39 = vpop.eup %5431  ;;  %v1394_v35 = vpack.c.bf16 %v6624_v41, %v6618_v32  ;;  %v1708_v30 = vsub.f32 0.0, %v1676_v5  ;;  %v1709_v20 = vsub.f32 0.0, %v1677_v21  ;;  %2790 = vmatpush.bf16.msra.mxu0 %v5120_v11 }
 0x103   : > { %v993_v60 = vadd.f32 %v992_v52, %v943_v62  ;;  %v1174_v49 = vpop.f32.mrf.mxu3  ;;  %v5434_v52 = vpop.eup %5433  ;;  %v7820_v62 = vld [vmem:[#allocation5_spill] sm:$0xff]  ;;  %v1802_v32 = vmul.f32 %v5430_v17, %v6354_v8  ;;  %v1345_v41 = vmul.f32 1.442695, %v1283_v48  ;;  %5437 = vpow2.f32 %v1347_v57 }
 0x104   : > { %v6627_v16 = vadd.f32 %v1171_v27, %v1123_v43  ;;  %v1711_v43 = vsub.f32 0.0, %v1679_v31  ;;  %v1768_v37 = vmul.f32 1.442695, %v1708_v30  ;;  %v1801_v3 = vmul.f32 %v5432_v39, %v7817_v14  ;;  %v5110_v17 = vld [vmem:[%s7561_s2 + $0x140] sm:$0xff]  ;;  %v7822_v39 = vld [vmem:[#allocation7_spill] sm:$0xff] }
 0x105   : > { %1962 = vmatmul.bf16.gmra.mxu0 %v1818_v38  ;;  %v1373_v38 = vmul.f32 %v5424_v50, %v6343_v46  ;;  %v1803_v10 = vmul.f32 %v5434_v52, %v7818_v61  ;;  %v1772_v42 = vmul.f32 1.442695, %v1710_v33  ;;  %v4663_v21 = vadd.f32 -5.3714285, %v7821_v58  ;;  %2363 = vmatpush.bf16.msra.mxu1 %v5110_v17 }
 0x106   : > { %7819 = vst [vmem:[#allocation51_spill] sm:$0xff] %v6627_v16  ;;  %4660 = vmatmul.msk.bf16.gmra.mxu2 %vm884_vm0, %v1819_v2  ;;  %v4666_v2 = vadd.f32 -5.3714285, %v7820_v62  ;;  %5439 = vpow2.f32 %v1341_v34  ;;  %v1770_v54 = vmul.f32 1.442695, %v1709_v20  ;;  %v2108_v31 = vsub.f32 0.0, %v2076_v56 }
 0x107   : > { %v994_v27 = vpop.f32.mrf.mxu1  ;;  %5441 = vpow2.f32 %v1345_v41  ;;  %v1774_v48 = vmul.f32 1.442695, %v1711_v43  ;;  %v4665_v57 = vadd.f32 -5.3714285, %v7822_v39  ;;  %v5436_v30 = vpop.eup %5435  ;;  %v1393_v52 = vpack.c.bf16 %v1375_v47, %v1373_v38 }
 0x108   : > { %5443 = vpow2.f32 %v1768_v37  ;;  %v2075_v33 = vmul.f32 %v4663_v21, %v4663_v21  ;;  %v1820_v20 = vpack.c.bf16 %v1802_v32, %v6636_v26  ;;  %v1821_v38 = vpack.c.bf16 %v1803_v10, %v1801_v3  ;;  %v7823_v26 = vld [vmem:[#allocation59_spill] sm:$0xff] }
 0x109   : > { %v1125_v13 = vpop.f32.mrf.mxu2  ;;  %5445 = vpow2.f32 %v1772_v42  ;;  %v5438_v34 = vpop.eup %5437  ;;  %v2141_v47 = vmul.f32 1.442695, %v2108_v31  ;;  %v2077_v43 = vmul.f32 %v4665_v57, %v4665_v57  ;;  %v4764_v21 = vadd.f32 -6.5142856, %v5936_v15 }
 0x10a   : > { %v945_v45 = vpop.f32.mrf.mxu0  ;;  %v1126_v5 = vadd.f32 %v1125_v13, %v993_v60  ;;  %v2078_v60 = vmul.f32 %v4666_v2, %v4666_v2  ;;  %5447 = vpow2.f32 %v1770_v54  ;;  %v4765_v13 = vadd.f32 -6.5142856, %v7822_v39 }
 0x10b   : > { %v995_v50 = vadd.f32 %v994_v27, %v945_v45  ;;  %v1176_v16 = vpop.f32.mrf.mxu3  ;;  %5449 = vpow2.f32 %v1774_v48  ;;  %v6658_v54 = vmul.f32 %v5436_v30, %v7823_v26  ;;  %v6661_v32 = vmul.f32 %v5438_v34, %v6373_v51  ;;  %v5139_v30 = vld [vmem:[%s7561_s2 + $0x228] sm:$0xff] }
 0x10c   : > { %v6643_v46 = vadd.f32 %v1174_v49, %v1126_v5  ;;  %v4763_v49 = vadd.f32 -6.5142856, %v7821_v58  ;;  %v2110_v2 = vsub.f32 0.0, %v2078_v60  ;;  %v5440_v56 = vpop.eup %5439  ;;  %v2107_v11 = vsub.f32 0.0, %v2075_v33  ;;  %3265 = vmatpush.bf16.msrb.mxu3 %v5139_v30 }
 0x10d   : > { %v4766_v3 = vadd.f32 -6.5142856, %v7820_v62  ;;  %v2504_v48 = vmul.f32 %v4765_v13, %v4765_v13  ;;  %v2109_v57 = vsub.f32 0.0, %v2077_v43  ;;  %5451 = vpow2.f32 %v2141_v47 }
 0x10e   : > { %v2502_v42 = vmul.f32 %v4763_v49, %v4763_v49  ;;  %v2139_v13 = vmul.f32 1.442695, %v2107_v11  ;;  %v4668_v47 = vadd.f32 -5.3714285, %v5984_v63 }
 0x10f   : > { %v997_v27 = vpop.f32.mrf.mxu1 }
 0x110   : > { %4561 = vmatmul.msk.bf16.gmra.mxu3 %vm884_vm0, %v1394_v35  ;;  %v5442_v35 = vpop.eup %5441  ;;  %v2534_v49 = vsub.f32 0.0, %v2502_v42 }
 0x111   : > { %v1127_v45 = vpop.f32.mrf.mxu2  ;;  %v5444_v10 = vpop.eup %5443 }
 0x112   : > { %v948_v41 = vpop.f32.mrf.mxu0  ;;  %v1128_v5 = vadd.f32 %v1127_v45, %v995_v50  ;;  %1540 = vmatmul.bf16.gmra.mxu1 %v1393_v52  ;;  %v2145_v50 = vmul.f32 1.442695, %v2110_v2  ;;  %v5446_v31 = vpop.eup %5445  ;;  %v1377_v2 = vmul.f32 %v5440_v56, %v6377_v6  ;;  %v2505_v45 = vmul.f32 %v4766_v3, %v4766_v3 }
 0x113   : > { %v998_v37 = vadd.f32 %v997_v27, %v948_v41  ;;  %v1179_v17 = vpop.f32.mrf.mxu3  ;;  %v5448_v52 = vpop.eup %5447  ;;  %v2503_v27 = vmul.f32 %v4764_v21, %v4764_v21  ;;  %v1379_v41 = vmul.f32 %v5442_v35, %v6392_v12  ;;  %v1804_v42 = vmul.f32 %v5444_v10, %v6377_v6 }
 0x114   : > { %v6664_v60 = vadd.f32 %v1176_v16, %v1128_v5  ;;  %v5149_v16 = vld [vmem:[%s7561_s2 + $0x278] sm:$0xff]  ;;  %v5450_v33 = vpop.eup %5449  ;;  %5453 = vpow2.f32 %v2145_v50  ;;  %v1806_v21 = vmul.f32 %v5446_v31, %v6392_v12  ;;  %v2566_v11 = vmul.f32 1.442695, %v2534_v49 }
 0x115   : > { %1967 = vmatmul.bf16.gmra.mxu0 %v1820_v20  ;;  %v1396_v20 = vpack.c.bf16 %v6661_v32, %v6658_v54  ;;  %3692 = vmatpush.bf16.msrb.mxu2 %v5149_v16  ;;  %v4670_v54 = vadd.f32 -5.3714285, %v5986_v0  ;;  %v2535_v3 = vsub.f32 0.0, %v2503_v27  ;;  %v1805_v50 = vmul.f32 %v5448_v52, %v7823_v26  ;;  %v5452_v16 = vpop.eup %5451  ;;  %v5137_v31 = vld [vmem:[%s7561_s2 + $0x218] sm:$0xff] }
 0x116   : > { %7824 = vst [vmem:[#allocation54_spill] sm:$0xff] %v6664_v60  ;;  %4661 = vmatmul.msk.bf16.gmra.mxu2 %vm884_vm0, %v1821_v38  ;;  %v2536_v38 = vsub.f32 0.0, %v2504_v48  ;;  %v2143_v60 = vmul.f32 1.442695, %v2109_v57  ;;  %v1807_v48 = vmul.f32 %v5450_v33, %v6373_v51  ;;  %5455 = vpow2.f32 %v2139_v13  ;;  %3210 = vmatpush.bf16.msrb.mxu1 %v5137_v31 }
 0x117   : > { %v999_v34 = vpop.f32.mrf.mxu1  ;;  %v2537_v30 = vsub.f32 0.0, %v2505_v45  ;;  %v2080_v57 = vmul.f32 %v4668_v47, %v4668_v47  ;;  %v2082_v49 = vmul.f32 %v4670_v54, %v4670_v54  ;;  %v4669_v27 = vadd.f32 -5.3714285, %v6013_v25 }
 0x118   : > { %v2570_v10 = vmul.f32 1.442695, %v2536_v38  ;;  %5457 = vpow2.f32 %v2143_v60  ;;  %v1822_v33 = vpack.c.bf16 %v1806_v21, %v1804_v42  ;;  %v2568_v13 = vmul.f32 1.442695, %v2535_v3 }
 0x119   : > { %v1130_v43 = vpop.f32.mrf.mxu2  ;;  %5459 = vpow2.f32 %v2566_v11  ;;  %v1823_v38 = vpack.c.bf16 %v1807_v48, %v1805_v50  ;;  %v6694_v47 = vmul.f32 %v5452_v16, %v5950_v22  ;;  %v4767_v60 = vadd.f32 -6.5142856, %v6008_v19 }
 0x11a   : > { %v950_v5 = vpop.f32.mrf.mxu0  ;;  %v1131_v56 = vadd.f32 %v1130_v43, %v998_v37  ;;  %v4667_v37 = vadd.f32 -5.3714285, %v6008_v19  ;;  %v5454_v52 = vpop.eup %5453  ;;  %v2572_v43 = vmul.f32 1.442695, %v2537_v30  ;;  %5461 = vpow2.f32 %v2570_v10 }
 0x11b   : > { %v1000_v32 = vadd.f32 %v999_v34, %v950_v5  ;;  %v1181_v35 = vpop.f32.mrf.mxu3  ;;  %v1395_v34 = vpack.c.bf16 %v1379_v41, %v1377_v2  ;;  %v2112_v2 = vsub.f32 0.0, %v2080_v57  ;;  %v4769_v5 = vadd.f32 -6.5142856, %v6013_v25 }
 0x11c   : > { %v6683_v39 = vadd.f32 %v1179_v17, %v1131_v56  ;;  %v5147_v17 = vld [vmem:[%s7561_s2 + $0x268] sm:$0xff]  ;;  %v2079_v41 = vmul.f32 %v4667_v37, %v4667_v37  ;;  %v5456_v42 = vpop.eup %5455  ;;  %v6700_v56 = vmul.f32 %v5454_v52, %v5979_v53  ;;  %v2114_v11 = vsub.f32 0.0, %v2082_v49 }
 0x11d   : > { %3637 = vmatpush.bf16.msrb.mxu0 %v5147_v17  ;;  %v2081_v3 = vmul.f32 %v4669_v27, %v4669_v27  ;;  %v4768_v50 = vadd.f32 -6.5142856, %v5984_v63  ;;  %5463 = vpow2.f32 %v2568_v13  ;;  %v2506_v31 = vmul.f32 %v4767_v60, %v4767_v60 }
 0x11e   : > { %v5458_v16 = vpop.eup %5457  ;;  %5465 = vpow2.f32 %v2572_v43  ;;  %v2149_v52 = vmul.f32 1.442695, %v2112_v2  ;;  %v2111_v17 = vsub.f32 0.0, %v2079_v41  ;;  %v2508_v49 = vmul.f32 %v4769_v5, %v4769_v5 }
 0x11f   : > { %v1002_v45 = vpop.f32.mrf.mxu1  ;;  %v5460_v57 = vpop.eup %5459  ;;  %v2153_v27 = vmul.f32 1.442695, %v2114_v11  ;;  %v2113_v25 = vsub.f32 0.0, %v2081_v3  ;;  %v2507_v19 = vmul.f32 %v4768_v50, %v4768_v50  ;;  %v6710_v13 = vmul.f32 %v5456_v42, %v5958_v28  ;;  %v7826_v3 = vld [vmem:[#allocation18_spill] sm:$0xff] }
 0x120   : > { %4562 = vmatmul.msk.bf16.gmra.mxu3 %vm884_vm0, %v1396_v20  ;;  %v4770_v20 = vadd.f32 -6.5142856, %v5986_v0  ;;  %v2538_v60 = vsub.f32 0.0, %v2506_v31  ;;  %v4672_v2 = vadd.f32 -5.3714285, %v6049_v23  ;;  %5467 = vpow2.f32 %v2149_v52  ;;  %v7827_v31 = vld [vmem:[#allocation19_spill] sm:$0xff] }
 0x121   : > { %v1132_v21 = vpop.f32.mrf.mxu2  ;;  %v2147_v5 = vmul.f32 1.442695, %v2111_v17  ;;  %5469 = vpow2.f32 %v2153_v27  ;;  %v2539_v11 = vsub.f32 0.0, %v2507_v19  ;;  %v4671_v50 = vadd.f32 -5.3714285, %v7826_v3  ;;  %v5136_v19 = vld [vmem:[%s7561_s2 + $0x210] sm:$0xff] }
 0x122   : > { %v953_v54 = vpop.f32.mrf.mxu0  ;;  %v1133_v48 = vadd.f32 %v1132_v21, %v1000_v32  ;;  %1545 = vmatmul.bf16.gmra.mxu1 %v1395_v34  ;;  %v5462_v32 = vpop.eup %5461  ;;  %v2236_v34 = vpack.c.bf16 %v6700_v56, %v6694_v47  ;;  %v4674_v21 = vadd.f32 -5.3714285, %v6051_v24  ;;  %v2151_v56 = vmul.f32 1.442695, %v2113_v25 }
 0x123   : > { %v1003_v30 = vadd.f32 %v1002_v45, %v953_v54  ;;  %v1184_v10 = vpop.f32.mrf.mxu3  ;;  %v2509_v45 = vmul.f32 %v4770_v20, %v4770_v20  ;;  %v5464_v41 = vpop.eup %5463  ;;  %v2632_v52 = vmul.f32 %v5462_v32, %v5988_v1  ;;  %5471 = vpow2.f32 %v2147_v5  ;;  %3211 = vmatpush.bf16.msrb.mxu1 %v5136_v19 }
 0x124   : > { %v6704_v37 = vadd.f32 %v1181_v35, %v1133_v48  ;;  %v2205_v35 = vmul.f32 %v5458_v16, %v5988_v1  ;;  %v5466_v47 = vpop.eup %5465  ;;  %v2631_v17 = vmul.f32 %v5464_v41, %v5950_v22  ;;  %v2086_v25 = vmul.f32 %v4674_v21, %v4674_v21 }
 0x125   : > { %1972 = vmatmul.bf16.gmra.mxu0 %v1822_v33  ;;  %v6714_v33 = vmul.f32 %v5460_v57, %v5958_v28  ;;  %v2541_v16 = vsub.f32 0.0, %v2509_v45  ;;  %v4673_v57 = vadd.f32 -5.3714285, %v7827_v31  ;;  %v2576_v45 = vmul.f32 1.442695, %v2539_v11 }
 0x126   : > { %7825 = vst [vmem:[#allocation5_spill] sm:$0xff] %v6704_v37  ;;  %4662 = vmatmul.msk.bf16.gmra.mxu2 %vm884_vm0, %v1823_v38  ;;  %v2540_v38 = vsub.f32 0.0, %v2508_v49  ;;  %v2574_v49 = vmul.f32 1.442695, %v2538_v60  ;;  %v2084_v37 = vmul.f32 %v4672_v2, %v4672_v2  ;;  %v5468_v32 = vpop.eup %5467  ;;  %v2235_v41 = vpack.c.bf16 %v2205_v35, %v6710_v13 }
 0x127   : > { %v1004_v43 = vpop.f32.mrf.mxu1  ;;  %5473 = vpow2.f32 %v2151_v56  ;;  %v2580_v60 = vmul.f32 1.442695, %v2541_v16  ;;  %v2085_v2 = vmul.f32 %v4673_v57, %v4673_v57  ;;  %v5470_v5 = vpop.eup %5469  ;;  %v2118_v13 = vsub.f32 0.0, %v2086_v25 }
 0x128   : > { %v2578_v27 = vmul.f32 1.442695, %v2540_v38  ;;  %5475 = vpow2.f32 %v2574_v49  ;;  %v2116_v21 = vsub.f32 0.0, %v2084_v37  ;;  %v4772_v35 = vadd.f32 -6.5142856, %v6049_v23 }
 0x129   : > { %v1135_v54 = vpop.f32.mrf.mxu2  ;;  %v5472_v57 = vpop.eup %5471  ;;  %v6738_v37 = vmul.f32 %v5468_v32, %v5994_v4  ;;  %v4774_v25 = vadd.f32 -6.5142856, %v6051_v24 }
 0x12a   : > { %v955_v42 = vpop.f32.mrf.mxu0  ;;  %v1136_v48 = vadd.f32 %v1135_v54, %v1003_v30  ;;  %v2633_v30 = vmul.f32 %v5466_v47, %v5979_v53  ;;  %v4771_v54 = vadd.f32 -6.5142856, %v7826_v3  ;;  %v4773_v47 = vadd.f32 -6.5142856, %v7827_v31 }
 0x12b   : > { %v1005_v20 = vadd.f32 %v1004_v43, %v955_v42  ;;  %v1186_v28 = vpop.f32.mrf.mxu3  ;;  %v2083_v43 = vmul.f32 %v4671_v50, %v4671_v50  ;;  %v2662_v42 = vpack.c.bf16 %v2632_v52, %v6714_v33  ;;  %5477 = vpow2.f32 %v2578_v27 }
 0x12c   : > { %v6722_v0 = vadd.f32 %v1184_v10, %v1136_v48  ;;  %v5146_v10 = vld [vmem:[%s7561_s2 + $0x260] sm:$0xff]  ;;  %v2663_v50 = vpack.c.bf16 %v2633_v30, %v2631_v17  ;;  %5479 = vpow2.f32 %v2576_v45  ;;  %v2510_v16 = vmul.f32 %v4771_v54, %v4771_v54 }
 0x12d   : > { %3638 = vmatpush.bf16.msrb.mxu0 %v5146_v10  ;;  %v2115_v48 = vsub.f32 0.0, %v2083_v43  ;;  %5481 = vpow2.f32 %v2580_v60  ;;  %v6741_v52 = vmul.f32 %v5470_v5, %v6016_v29  ;;  %v2157_v27 = vmul.f32 1.442695, %v2116_v21  ;;  %v5474_v17 = vpop.eup %5473  ;;  %v7829_v10 = vld [vmem:[#allocation62_spill] sm:$0xff]  ;;  %v7830_v5 = vld [vmem:[#allocation15_spill] sm:$0xff] }
 0x12e   : > { %v2512_v19 = vmul.f32 %v4773_v47, %v4773_v47  ;;  %v2511_v43 = vmul.f32 %v4772_v35, %v4772_v35  ;;  %v5476_v54 = vpop.eup %5475  ;;  %v6749_v21 = vmul.f32 %v5472_v57, %v7830_v5  ;;  %v7832_v57 = vld [vmem:[#allocation16_spill] sm:$0xff] }
 0x12f   : > { %v1511_v38 = vpop.f32.mrf.mxu1  ;;  %v2155_v32 = vmul.f32 1.442695, %v2115_v48  ;;  %5483 = vpow2.f32 %v2157_v27  ;;  %v2238_v35 = vpack.c.bf16 %v6741_v52, %v6738_v37 }
 0x130   : > { %4755 = vmatmul.msk.bf16.vlgmr.msra.gmra.mxu3 %vm884_vm0, %v2236_v34  ;;  %v2117_v34 = vsub.f32 0.0, %v2085_v2  ;;  %v2543_v48 = vsub.f32 0.0, %v2511_v43 }
 0x131   : > { %v1137_v56 = vpop.f32.mrf.mxu2  ;;  %v5478_v60 = vpop.eup %5477 }
 0x132   : > { %v1938_v11 = vpop.f32.mrf.mxu0  ;;  %v1138_v49 = vadd.f32 %v1137_v56, %v1005_v20  ;;  %2364 = vmatmul.bf16.vlgmr.msra.gmra.mxu1 %v2235_v41  ;;  %v2161_v20 = vmul.f32 1.442695, %v2118_v13  ;;  %v2542_v41 = vsub.f32 0.0, %v2510_v16  ;;  %v2159_v47 = vmul.f32 1.442695, %v2117_v34  ;;  %v5480_v56 = vpop.eup %5479  ;;  %v7831_v16 = vld [vmem:[#allocation22_spill] sm:$0xff] }
 0x133   : > { %v1560_v33 = vpop.f32.mrf.mxu3  ;;  %v5482_v13 = vpop.eup %5481  ;;  %v2634_v34 = vmul.f32 %v5476_v54, %v7830_v5  ;;  %v2584_v24 = vmul.f32 1.442695, %v2543_v48 }
 0x134   : > { %v6744_v30 = vadd.f32 %v1186_v28, %v1138_v49  ;;  %v1561_v45 = vadd.f32 %v1560_v33, %v1511_v38  ;;  %v2544_v28 = vsub.f32 0.0, %v2512_v19  ;;  %v2513_v38 = vmul.f32 %v4774_v25, %v4774_v25 }
 0x135   : > { %2791 = vmatmul.bf16.vlgmr.msra.gmra.mxu0 %v2662_v42  ;;  %v4676_v42 = vadd.f32 -5.3714285, %v6099_v44  ;;  %5485 = vpow2.f32 %v2161_v20  ;;  %v4678_v49 = vadd.f32 -5.3714285, %v7831_v16  ;;  %v2582_v27 = vmul.f32 1.442695, %v2542_v41 }
 0x136   : > { %7828 = vst [vmem:[#allocation6_spill] sm:$0xff] %v6744_v30  ;;  %v1600_v2 = vadd.f32 %v1561_v45, %v7829_v10  ;;  %4855 = vmatmul.msk.bf16.vlgmr.msra.gmra.mxu2 %vm884_vm0, %v2663_v50  ;;  %v2209_v45 = vmul.f32 %v5474_v17, %v7832_v57  ;;  %5487 = vpow2.f32 %v2155_v32  ;;  %v2636_v25 = vmul.f32 %v5478_v60, %v7832_v57  ;;  %v5484_v32 = vpop.eup %5483  ;;  %v7834_v41 = vld [vmem:[#allocation26_spill] sm:$0xff] }
 0x137   : > { %v1513_v31 = vpop.f32.mrf.mxu1  ;;  %v6759_v10 = vmul.f32 %v5480_v56, %v5994_v4  ;;  %5489 = vpow2.f32 %v2159_v47  ;;  %v2637_v52 = vmul.f32 %v5482_v13, %v6016_v29  ;;  %v2586_v20 = vmul.f32 1.442695, %v2544_v28  ;;  %v7835_v56 = vld [vmem:[#allocation63_spill] sm:$0xff] }
 0x138   : > { %v2545_v43 = vsub.f32 0.0, %v2513_v38  ;;  %v2088_v30 = vmul.f32 %v4676_v42, %v4676_v42  ;;  %v2090_v54 = vmul.f32 %v4678_v49, %v4678_v49  ;;  %5491 = vpow2.f32 %v2582_v27 }
 0x139   : > { %v1987_v50 = vpop.f32.mrf.mxu2  ;;  %v4675_v60 = vadd.f32 -5.3714285, %v7834_v41  ;;  %v2237_v28 = vpack.c.bf16 %v2209_v45, %v6749_v21  ;;  %v2664_v38 = vpack.c.bf16 %v2636_v25, %v2634_v34  ;;  %5493 = vpow2.f32 %v2586_v20  ;;  %v7838_v20 = vld [vmem:[#allocation20_spill] sm:$0xff] }
 0x13a   : > { %v1940_v33 = vpop.f32.mrf.mxu0  ;;  %v1988_v19 = vadd.f32 %v1987_v50, %v1938_v11  ;;  %v5135_v11 = vld [vmem:[%s7561_s2 + $0x208] sm:$0xff]  ;;  %v2120_v49 = vsub.f32 0.0, %v2088_v30  ;;  %v4775_v27 = vadd.f32 -6.5142856, %v7834_v41  ;;  %v2665_v21 = vpack.c.bf16 %v2637_v52, %v6759_v10 }
 0x13b   : > { %v1562_v37 = vpop.f32.mrf.mxu3  ;;  %v5486_v47 = vpop.eup %5485  ;;  %3212 = vmatpush.bf16.msrb.mxu1 %v5135_v11  ;;  %5495 = vpow2.f32 %v2584_v24  ;;  %v2588_v45 = vmul.f32 1.442695, %v2545_v43  ;;  %v2122_v34 = vsub.f32 0.0, %v2090_v54  ;;  %v7837_v11 = vld [vmem:[#allocation17_spill] sm:$0xff]  ;;  %v2087_v41 = vmul.f32 %v4675_v60, %v4675_v60  ;;  %v7840_v54 = vld [vmem:[#allocation24_spill] sm:$0xff] }
 0x13c   : > { %v6762_v3 = vadd.f32 %v1988_v19, %v1600_v2  ;;  %v1563_v17 = vadd.f32 %v1562_v37, %v1513_v31  ;;  %v5145_v31 = vld [vmem:[%s7561_s2 + $0x258] sm:$0xff]  ;;  %v7836_v2 = vld [vmem:[#allocation27_spill] sm:$0xff]  ;;  %v5488_v13 = vpop.eup %5487  ;;  %v6782_v30 = vmul.f32 %v5486_v47, %v7838_v20  ;;  %v4778_v10 = vadd.f32 -6.5142856, %v7831_v16 }
 0x13d   : > { %v4677_v42 = vadd.f32 -5.3714285, %v7836_v2  ;;  %v4777_v19 = vadd.f32 -6.5142856, %v7836_v2  ;;  %v5490_v37 = vpop.eup %5489  ;;  %3639 = vmatpush.bf16.msrb.mxu0 %v5145_v31  ;;  %v4776_v2 = vadd.f32 -6.5142856, %v6099_v44  ;;  %v2514_v5 = vmul.f32 %v4775_v27, %v4775_v27 }
 0x13e   : > { %7833 = vst [vmem:[#allocation59_spill] sm:$0xff] %v6762_v3  ;;  %v1601_v50 = vadd.f32 %v1563_v17, %v7835_v56  ;;  %v6779_v56 = vmul.f32 %v5484_v32, %v7837_v11  ;;  %v5492_v52 = vpop.eup %5491  ;;  %v6790_v31 = vmul.f32 %v5490_v37, %v7840_v54  ;;  %v2165_v32 = vmul.f32 1.442695, %v2120_v49  ;;  %v7842_v44 = vld [vmem:[#allocation64_spill] sm:$0xff] }
 0x13f   : > { %v1516_v48 = vpop.f32.mrf.mxu1  ;;  %v2089_v24 = vmul.f32 %v4677_v42, %v4677_v42  ;;  %v2516_v47 = vmul.f32 %v4777_v19, %v4777_v19  ;;  %5497 = vpow2.f32 %v2588_v45  ;;  %v7843_v19 = vld [vmem:[#allocation28_spill] sm:$0xff] }
 0x140   : > { %4756 = vmatmul.msk.bf16.gmra.mxu3 %vm884_vm0, %v2238_v35  ;;  %v7839_v35 = vld [vmem:[#allocation23_spill] sm:$0xff]  ;;  %v2240_v42 = vpack.c.bf16 %v6782_v30, %v6779_v56  ;;  %5499 = vpow2.f32 %v2165_v32  ;;  %v4680_v37 = vadd.f32 -5.3714285, %v7843_v19 }
 0x141   : > { %v1989_v25 = vpop.f32.mrf.mxu2  ;;  %v6786_v57 = vmul.f32 %v5488_v13, %v7839_v35  ;;  %v2119_v13 = vsub.f32 0.0, %v2087_v41  ;;  %v6799_v49 = vmul.f32 %v5492_v52, %v7839_v35  ;;  %v2548_v27 = vsub.f32 0.0, %v2516_v47 }
 0x142   : > { %v1943_v17 = vpop.f32.mrf.mxu0  ;;  %v1990_v3 = vadd.f32 %v1989_v25, %v1940_v33  ;;  %2369 = vmatmul.bf16.gmra.mxu1 %v2237_v28  ;;  %v2169_v33 = vmul.f32 1.442695, %v2122_v34  ;;  %v5494_v28 = vpop.eup %5493  ;;  %v2515_v25 = vmul.f32 %v4776_v2, %v4776_v2 }
 0x143   : > { %v1565_v43 = vpop.f32.mrf.mxu3  ;;  %v5496_v16 = vpop.eup %5495  ;;  %v2239_v41 = vpack.c.bf16 %v6790_v31, %v6786_v57  ;;  %v6805_v2 = vmul.f32 %v5494_v28, %v7840_v54  ;;  %v2163_v30 = vmul.f32 1.442695, %v2119_v13  ;;  %v7846_v57 = vld [vmem:[#allocation35_spill] sm:$0xff]  ;;  %v2092_v54 = vmul.f32 %v4680_v37, %v4680_v37  ;;  %v5134_v13 = vld [vmem:[%s7561_s2 + $0x200] sm:$0xff] }
 0x144   : > { %v6792_v29 = vadd.f32 %v1990_v3, %v1601_v50  ;;  %v1566_v60 = vadd.f32 %v1565_v43, %v1516_v48  ;;  %v2121_v3 = vsub.f32 0.0, %v2089_v24  ;;  %v2517_v50 = vmul.f32 %v4778_v10, %v4778_v10  ;;  %v7847_v37 = vld [vmem:[#allocation65_spill] sm:$0xff]  ;;  %3213 = vmatpush.bf16.msrb.mxu1 %v5134_v13 }
 0x145   : > { %2796 = vmatmul.bf16.gmra.mxu0 %v2664_v38  ;;  %v2546_v38 = vsub.f32 0.0, %v2514_v5  ;;  %5501 = vpow2.f32 %v2169_v33  ;;  %v6809_v56 = vmul.f32 %v5496_v16, %v7837_v11  ;;  %v2547_v24 = vsub.f32 0.0, %v2515_v25  ;;  %v7845_v5 = vld [vmem:[#allocation34_spill] sm:$0xff]  ;;  %v5498_v52 = vpop.eup %5497 }
 0x146   : > { %7841 = vst [vmem:[#allocation62_spill] sm:$0xff] %v6792_v29  ;;  %v1602_v4 = vadd.f32 %v1566_v60, %v7842_v44  ;;  %4856 = vmatmul.msk.bf16.gmra.mxu2 %vm884_vm0, %v2665_v21  ;;  %v7844_v44 = vld [vmem:[#allocation29_spill] sm:$0xff]  ;;  %v4679_v10 = vadd.f32 -5.3714285, %v7845_v5  ;;  %v2167_v32 = vmul.f32 1.442695, %v2121_v3  ;;  %v5500_v3 = vpop.eup %5499  ;;  %5503 = vpow2.f32 %v2163_v30 }
 0x147   : > { %v1518_v48 = vpop.f32.mrf.mxu1  ;;  %v4682_v21 = vadd.f32 -5.3714285, %v7844_v44  ;;  %v2549_v47 = vsub.f32 0.0, %v2517_v50  ;;  %v4681_v31 = vadd.f32 -5.3714285, %v7846_v57  ;;  %v2641_v50 = vmul.f32 %v5498_v52, %v7838_v20 }
 0x148   : > { %v2590_v28 = vmul.f32 1.442695, %v2546_v38  ;;  %v2594_v33 = vmul.f32 1.442695, %v2548_v27  ;;  %v4779_v35 = vadd.f32 -6.5142856, %v7845_v5  ;;  %v2091_v38 = vmul.f32 %v4679_v10, %v4679_v10 }
 0x149   : > { %v1992_v45 = vpop.f32.mrf.mxu2  ;;  %v2094_v25 = vmul.f32 %v4682_v21, %v4682_v21  ;;  %5505 = vpow2.f32 %v2167_v32  ;;  %v2666_v30 = vpack.c.bf16 %v6805_v2, %v6799_v49  ;;  %v6832_v2 = vmul.f32 %v5500_v3, %v7793_v7 }
 0x14a   : > { %v1945_v34 = vpop.f32.mrf.mxu0  ;;  %v1993_v43 = vadd.f32 %v1992_v45, %v1943_v17  ;;  %v4781_v17 = vadd.f32 -6.5142856, %v7846_v57  ;;  %v2592_v45 = vmul.f32 1.442695, %v2547_v24  ;;  %5507 = vpow2.f32 %v2590_v28 }
 0x14b   : > { %v1567_v60 = vpop.f32.mrf.mxu3  ;;  %v5502_v27 = vpop.eup %5501  ;;  %v2518_v57 = vmul.f32 %v4779_v35, %v4779_v35  ;;  %5509 = vpow2.f32 %v2594_v33  ;;  %v2126_v24 = vsub.f32 0.0, %v2094_v25 }
 0x14c   : > { %v6814_v29 = vadd.f32 %v1993_v43, %v1602_v4  ;;  %v1568_v16 = vadd.f32 %v1567_v60, %v1518_v48  ;;  %v2596_v4 = vmul.f32 1.442695, %v2549_v47  ;;  %v5144_v48 = vld [vmem:[%s7561_s2 + $0x250] sm:$0xff]  ;;  %v2093_v43 = vmul.f32 %v4681_v31, %v4681_v31 }
 0x14d   : > { %v2124_v60 = vsub.f32 0.0, %v2092_v54  ;;  %3640 = vmatpush.bf16.msrb.mxu0 %v5144_v48  ;;  %v2520_v10 = vmul.f32 %v4781_v17, %v4781_v17  ;;  %v2667_v47 = vpack.c.bf16 %v2641_v50, %v6809_v56  ;;  %5511 = vpow2.f32 %v2592_v45 }
 0x14e   : > { %v1603_v11 = vadd.f32 %v1568_v16, %v7847_v37  ;;  %v2123_v16 = vsub.f32 0.0, %v2091_v38  ;;  %v4780_v31 = vadd.f32 -6.5142856, %v7843_v19  ;;  %5513 = vpow2.f32 %v2596_v4 }
 0x14f   : > { %v1521_v21 = vpop.f32.mrf.mxu1  ;;  %v2125_v35 = vsub.f32 0.0, %v2093_v43  ;;  %v4782_v54 = vadd.f32 -6.5142856, %v7844_v44  ;;  %v6835_v33 = vmul.f32 %v5502_v27, %v7794_v40  ;;  %v2173_v13 = vmul.f32 1.442695, %v2124_v60 }
 0x150   : > { %4757 = vmatmul.msk.bf16.gmra.mxu3 %vm884_vm0, %v2240_v42  ;;  %v5504_v42 = vpop.eup %5503  ;;  %v2550_v56 = vsub.f32 0.0, %v2518_v57  ;;  %v2171_v38 = vmul.f32 1.442695, %v2123_v16  ;;  %v2519_v37 = vmul.f32 %v4780_v31, %v4780_v31  ;;  %v5138_v57 = vld [vmem:[%s7561_s2 + $0x220] sm:$0xff]  ;;  %v7851_v31 = vld [vmem:[#allocation36_spill] sm:$0xff] }
 0x151   : > { %v1994_v52 = vpop.f32.mrf.mxu2  ;;  %v5506_v25 = vpop.eup %5505  ;;  %v2175_v3 = vmul.f32 1.442695, %v2125_v35  ;;  %v2521_v27 = vmul.f32 %v4782_v54, %v4782_v54  ;;  %v2242_v60 = vpack.c.bf16 %v6835_v33, %v6832_v2  ;;  %5515 = vpow2.f32 %v2173_v13  ;;  %3266 = vmatpush.bf16.msrb.mxu3 %v5138_v57  ;;  %v7852_v2 = vld [vmem:[#allocation37_spill] sm:$0xff]  ;;  %v7853_v57 = vld [vmem:[#allocation42_spill] sm:$0xff] }
 0x152   : > { %v1948_v32 = vpop.f32.mrf.mxu0  ;;  %v1995_v28 = vadd.f32 %v1994_v52, %v1945_v34  ;;  %2374 = vmatmul.bf16.gmra.mxu1 %v2239_v41  ;;  %v2177_v41 = vmul.f32 1.442695, %v2126_v24  ;;  %v2552_v34 = vsub.f32 0.0, %v2520_v10  ;;  %v5508_v45 = vpop.eup %5507  ;;  %v7850_v52 = vld [vmem:[#allocation32_spill] sm:$0xff]  ;;  %v4686_v33 = vadd.f32 -5.3714285, %v7852_v2 }
 0x153   : > { %v1570_v49 = vpop.f32.mrf.mxu3  ;;  %v5510_v4 = vpop.eup %5509 }
 0x154   : > { %v6837_v17 = vadd.f32 %v1995_v28, %v1603_v11  ;;  %v1571_v50 = vadd.f32 %v1570_v49, %v1521_v21  ;;  %v5148_v11 = vld [vmem:[%s7561_s2 + $0x270] sm:$0xff]  ;;  %v5512_v43 = vpop.eup %5511  ;;  %5517 = vpow2.f32 %v2177_v41  ;;  %v2602_v16 = vmul.f32 1.442695, %v2552_v34 }
 0x155   : > { %2801 = vmatmul.bf16.gmra.mxu0 %v2666_v30  ;;  %v7849_v30 = vld [vmem:[#allocation31_spill] sm:$0xff]  ;;  %v5514_v10 = vpop.eup %5513  ;;  %3693 = vmatpush.bf16.msrb.mxu2 %v5148_v11  ;;  %v4684_v28 = vadd.f32 -5.3714285, %v7851_v31  ;;  %5519 = vpow2.f32 %v2171_v38  ;;  %v2644_v13 = vmul.f32 %v5510_v4, %v7850_v52  ;;  %v2643_v41 = vmul.f32 %v5512_v43, %v7793_v7 }
 0x156   : > { %7848 = vst [vmem:[#allocation63_spill] sm:$0xff] %v6837_v17  ;;  %v1604_v48 = vadd.f32 %v1571_v50, %v6537_v59  ;;  %4857 = vmatmul.msk.bf16.gmra.mxu2 %vm884_vm0, %v2667_v47  ;;  %v2215_v24 = vmul.f32 %v5504_v42, %v7849_v30  ;;  %v2598_v59 = vmul.f32 1.442695, %v2550_v56  ;;  %v2217_v47 = vmul.f32 %v5506_v25, %v7850_v52 }
 0x157   : > { %v1523_v21 = vpop.f32.mrf.mxu1  ;;  %v2642_v49 = vmul.f32 %v5508_v45, %v7849_v30  ;;  %v2551_v50 = vsub.f32 0.0, %v2519_v37  ;;  %5521 = vpow2.f32 %v2175_v3  ;;  %v2553_v56 = vsub.f32 0.0, %v2521_v27  ;;  %v5516_v37 = vpop.eup %5515 }
 0x158   : > { %v2645_v34 = vmul.f32 %v5514_v10, %v7794_v40  ;;  %5523 = vpow2.f32 %v2598_v59  ;;  %v4683_v11 = vadd.f32 -5.3714285, %v7853_v57  ;;  %v2096_v38 = vmul.f32 %v4684_v28, %v4684_v28 }
 0x159   : > { %v1997_v35 = vpop.f32.mrf.mxu2  ;;  %5525 = vpow2.f32 %v2602_v16  ;;  %v2600_v4 = vmul.f32 1.442695, %v2551_v50  ;;  %v2098_v3 = vmul.f32 %v4686_v33, %v4686_v33  ;;  %v2241_v52 = vpack.c.bf16 %v2217_v47, %v2215_v24 }
 0x15a   : > { %v1950_v54 = vpop.f32.mrf.mxu0  ;;  %v1998_v42 = vadd.f32 %v1997_v35, %v1948_v32  ;;  %v5133_v32 = vld [vmem:[%s7561_s2 + $0x1f8] sm:$0xff]  ;;  %v5518_v27 = vpop.eup %5517  ;;  %v7855_v35 = vld [vmem:[#allocation66_spill] sm:$0xff]  ;;  %v2604_v10 = vmul.f32 1.442695, %v2553_v56  ;;  %v2669_v50 = vpack.c.bf16 %v2645_v34, %v2643_v41  ;;  %v6870_v33 = vmul.f32 %v5516_v37, %v7801_v55 }
 0x15b   : > { %v1572_v25 = vpop.f32.mrf.mxu3  ;;  %3214 = vmatpush.bf16.msrb.mxu1 %v5133_v32  ;;  %v5520_v16 = vpop.eup %5519  ;;  %v2128_v24 = vsub.f32 0.0, %v2096_v38  ;;  %v4783_v47 = vadd.f32 -6.5142856, %v7853_v57  ;;  %5527 = vpow2.f32 %v2600_v4  ;;  %v4784_v34 = vadd.f32 -6.5142856, %v7851_v31  ;;  %v7859_v31 = vld [vmem:[#allocation67_spill] sm:$0xff] }
 0x15c   : > { %v6858_v5 = vadd.f32 %v1998_v42, %v1604_v48  ;;  %v1573_v45 = vadd.f32 %v1572_v25, %v1523_v21  ;;  %v5143_v48 = vld [vmem:[%s7561_s2 + $0x248] sm:$0xff]  ;;  %v7856_v21 = vld [vmem:[#allocation43_spill] sm:$0xff]  ;;  %v2668_v25 = vpack.c.bf16 %v2644_v13, %v2642_v49  ;;  %v2130_v49 = vsub.f32 0.0, %v2098_v3 }
 0x15d   : > { %v4685_v59 = vadd.f32 -5.3714285, %v7856_v21  ;;  %v5522_v28 = vpop.eup %5521  ;;  %3641 = vmatpush.bf16.msrb.mxu0 %v5143_v48  ;;  %v4785_v13 = vadd.f32 -6.5142856, %v7856_v21  ;;  %5529 = vpow2.f32 %v2604_v10  ;;  %v6879_v37 = vmul.f32 %v5520_v16, %v6216_v18  ;;  %v7857_v48 = vld [vmem:[#allocation40_spill] sm:$0xff] }
 0x15e   : > { %7854 = vst [vmem:[#allocation20_spill] sm:$0xff] %v6858_v5  ;;  %v1605_v43 = vadd.f32 %v1573_v45, %v7855_v35  ;;  %v2095_v5 = vmul.f32 %v4683_v11, %v4683_v11  ;;  %v5524_v56 = vpop.eup %5523  ;;  %v6874_v35 = vmul.f32 %v5518_v27, %v7802_v9  ;;  %v6882_v57 = vmul.f32 %v5522_v28, %v7857_v48 }
 0x15f   : > { %v1526_v42 = vpop.f32.mrf.mxu1  ;;  %v5526_v11 = vpop.eup %5525  ;;  %v2097_v41 = vmul.f32 %v4685_v59, %v4685_v59  ;;  %v4786_v4 = vadd.f32 -6.5142856, %v7852_v2  ;;  %v6888_v10 = vmul.f32 %v5524_v56, %v6216_v18  ;;  %v2185_v16 = vmul.f32 1.442695, %v2130_v49 }
 0x160   : > { %4758 = vmatmul.msk.bf16.gmra.mxu3 %vm884_vm0, %v2242_v60  ;;  %v2127_v27 = vsub.f32 0.0, %v2095_v5  ;;  %v6891_v59 = vmul.f32 %v5526_v11, %v7857_v48  ;;  %v2523_v2 = vmul.f32 %v4784_v34, %v4784_v34 }
 0x161   : > { %v1999_v45 = vpop.f32.mrf.mxu2  ;;  %v2129_v5 = vsub.f32 0.0, %v2097_v41 }
 0x162   : > { %v1953_v32 = vpop.f32.mrf.mxu0  ;;  %v2000_v60 = vadd.f32 %v1999_v45, %v1950_v54  ;;  %2379 = vmatmul.bf16.gmra.mxu1 %v2241_v52  ;;  %v2181_v54 = vmul.f32 1.442695, %v2128_v24  ;;  %v2522_v52 = vmul.f32 %v4783_v47, %v4783_v47  ;;  %v2524_v45 = vmul.f32 %v4785_v13, %v4785_v13  ;;  %v7860_v47 = vld [vmem:[#allocation45_spill] sm:$0xff] }
 0x163   : > { %v1575_v38 = vpop.f32.mrf.mxu3  ;;  %v2525_v24 = vmul.f32 %v4786_v4, %v4786_v4  ;;  %v4688_v56 = vadd.f32 -5.3714285, %v7860_v47  ;;  %v2179_v49 = vmul.f32 1.442695, %v2127_v27  ;;  %v2670_v34 = vpack.c.bf16 %v6891_v59, %v6888_v10 }
 0x164   : > { %v6885_v3 = vadd.f32 %v2000_v60, %v1605_v43  ;;  %v1576_v21 = vadd.f32 %v1575_v38, %v1526_v42  ;;  %v5528_v43 = vpop.eup %5527  ;;  %v2244_v42 = vpack.c.bf16 %v6874_v35, %v6870_v33  ;;  %5531 = vpow2.f32 %v2181_v54  ;;  %v7862_v33 = vld [vmem:[#allocation49_spill] sm:$0xff] }
 0x165   : > { %2806 = vmatmul.bf16.gmra.mxu0 %v2668_v25  ;;  %v2243_v25 = vpack.c.bf16 %v6882_v57, %v6879_v37  ;;  %v5530_v11 = vpop.eup %5529  ;;  %v2554_v13 = vsub.f32 0.0, %v2522_v52  ;;  %5533 = vpow2.f32 %v2185_v16  ;;  %v2556_v38 = vsub.f32 0.0, %v2524_v45 }
 0x166   : > { %7858 = vst [vmem:[#allocation64_spill] sm:$0xff] %v6885_v3  ;;  %v1606_v28 = vadd.f32 %v1576_v21, %v7859_v31  ;;  %4858 = vmatmul.msk.bf16.gmra.mxu2 %vm884_vm0, %v2669_v50  ;;  %v7861_v31 = vld [vmem:[#allocation46_spill] sm:$0xff]  ;;  %v4687_v35 = vadd.f32 -5.3714285, %v7862_v33  ;;  %v6905_v57 = vmul.f32 %v5528_v43, %v7801_v55  ;;  %v2183_v37 = vmul.f32 1.442695, %v2129_v5 }
 0x167   : > { %v1528_v60 = vpop.f32.mrf.mxu1  ;;  %v4690_v21 = vadd.f32 -5.3714285, %v7861_v31  ;;  %v2555_v4 = vsub.f32 0.0, %v2523_v2  ;;  %v2649_v27 = vmul.f32 %v5530_v11, %v7802_v9  ;;  %v2557_v52 = vsub.f32 0.0, %v2525_v24  ;;  %v7863_v3 = vld [vmem:[#allocation50_spill] sm:$0xff]  ;;  %v7865_v11 = vld [vmem:[#allocation41_spill] sm:$0xff] }
 0x168   : > { %v2100_v18 = vmul.f32 %v4688_v56, %v4688_v56  ;;  %v4689_v30 = vadd.f32 -5.3714285, %v7863_v3  ;;  %v2606_v59 = vmul.f32 1.442695, %v2554_v13  ;;  %5535 = vpow2.f32 %v2179_v49  ;;  %v7874_v9 = vld [vmem:[#allocation56_spill] sm:$0xff] }
 0x169   : > { %v2002_v50 = vpop.f32.mrf.mxu2  ;;  %v2102_v16 = vmul.f32 %v4690_v21, %v4690_v21  ;;  %v2610_v45 = vmul.f32 1.442695, %v2556_v38  ;;  %v2099_v5 = vmul.f32 %v4687_v35, %v4687_v35  ;;  %v4787_v2 = vadd.f32 -6.5142856, %v7862_v33 }
 0x16a   : > { %v1955_v41 = vpop.f32.mrf.mxu0  ;;  %v2003_v48 = vadd.f32 %v2002_v50, %v1953_v32  ;;  %v5132_v32 = vld [vmem:[%s7561_s2 + $0x1f0] sm:$0xff]  ;;  %v5532_v43 = vpop.eup %5531  ;;  %5537 = vpow2.f32 %v2183_v37  ;;  %v2608_v56 = vmul.f32 1.442695, %v2555_v4  ;;  %v2612_v21 = vmul.f32 1.442695, %v2557_v52 }
 0x16b   : > { %v1577_v54 = vpop.f32.mrf.mxu3  ;;  %3215 = vmatpush.bf16.msrb.mxu1 %v5132_v32  ;;  %v2132_v49 = vsub.f32 0.0, %v2100_v18  ;;  %v2101_v50 = vmul.f32 %v4689_v30, %v4689_v30  ;;  %v4788_v38 = vadd.f32 -6.5142856, %v7860_v47  ;;  %v2671_v35 = vpack.c.bf16 %v2649_v27, %v6905_v57 }
 0x16c   : > { %v6909_v40 = vadd.f32 %v2003_v48, %v1606_v28  ;;  %v1578_v10 = vadd.f32 %v1577_v54, %v1528_v60  ;;  %v5142_v48 = vld [vmem:[%s7561_s2 + $0x240] sm:$0xff]  ;;  %v4789_v28 = vadd.f32 -6.5142856, %v7863_v3  ;;  %v5534_v60 = vpop.eup %5533  ;;  %5539 = vpow2.f32 %v2606_v59 }
 0x16d   : > { %3642 = vmatpush.bf16.msrb.mxu0 %v5142_v48  ;;  %v2134_v37 = vsub.f32 0.0, %v2102_v16  ;;  %v4790_v4 = vadd.f32 -6.5142856, %v7861_v31  ;;  %v6925_v32 = vmul.f32 %v5532_v43, %v7807_v36  ;;  %5541 = vpow2.f32 %v2610_v45 }
 0x16e   : > { %7864 = vst [vmem:[#allocation28_spill] sm:$0xff] %v6909_v40  ;;  %v1607_v24 = vadd.f32 %v1578_v10, %v7865_v11  ;;  %v2131_v52 = vsub.f32 0.0, %v2099_v5  ;;  %v2526_v18 = vmul.f32 %v4787_v2, %v4787_v2  ;;  %v7866_v11 = vld [vmem:[#allocation44_spill] sm:$0xff]  ;;  %5543 = vpow2.f32 %v2608_v56  ;;  %v5536_v57 = vpop.eup %5535  ;;  %v7869_v56 = vld [vmem:[#allocation47_spill] sm:$0xff] }
 0x16f   : > { %v1531_v13 = vpop.f32.mrf.mxu1  ;;  %v6928_v3 = vmul.f32 %v5534_v60, %v7866_v11  ;;  %5545 = vpow2.f32 %v2612_v21  ;;  %v2189_v59 = vmul.f32 1.442695, %v2132_v49  ;;  %v2133_v16 = vsub.f32 0.0, %v2101_v50  ;;  %v7868_v60 = vld [vmem:[#allocation68_spill] sm:$0xff] }
 0x170   : > { %4759 = vmatmul.msk.bf16.gmra.mxu3 %vm884_vm0, %v2244_v42  ;;  %v2528_v42 = vmul.f32 %v4789_v28, %v4789_v28  ;;  %v2527_v48 = vmul.f32 %v4788_v38, %v4788_v38  ;;  %v5538_v33 = vpop.eup %5537  ;;  %v2193_v45 = vmul.f32 1.442695, %v2134_v37  ;;  %v2529_v5 = vmul.f32 %v4790_v4, %v4790_v4  ;;  %v7870_v49 = vld [vmem:[#allocation52_spill] sm:$0xff]  ;;  %v7871_v37 = vld [vmem:[#allocation53_spill] sm:$0xff] }
 0x171   : > { %v2004_v54 = vpop.f32.mrf.mxu2  ;;  %v6935_v28 = vmul.f32 %v5536_v57, %v7869_v56  ;;  %v4692_v50 = vadd.f32 -5.3714285, %v7870_v49  ;;  %5547 = vpow2.f32 %v2189_v59  ;;  %v4694_v4 = vadd.f32 -5.3714285, %v7871_v37 }
 0x172   : > { %v1958_v10 = vpop.f32.mrf.mxu0  ;;  %v2005_v30 = vadd.f32 %v2004_v54, %v1955_v41  ;;  %2384 = vmatmul.bf16.gmra.mxu1 %v2243_v25  ;;  %v2187_v41 = vmul.f32 1.442695, %v2131_v52  ;;  %v2558_v25 = vsub.f32 0.0, %v2526_v18  ;;  %v5540_v2 = vpop.eup %5539  ;;  %v2560_v21 = vsub.f32 0.0, %v2528_v42 }
 0x173   : > { %v1580_v27 = vpop.f32.mrf.mxu3  ;;  %v5542_v38 = vpop.eup %5541  ;;  %v2246_v18 = vpack.c.bf16 %v6928_v3, %v6925_v32  ;;  %5549 = vpow2.f32 %v2193_v45  ;;  %v2650_v47 = vmul.f32 %v5540_v2, %v7869_v56  ;;  %v2104_v40 = vmul.f32 %v4692_v50, %v4692_v50 }
 0x174   : > { %v6930_v31 = vadd.f32 %v2005_v30, %v1607_v24  ;;  %v1581_v43 = vadd.f32 %v1580_v27, %v1531_v13  ;;  %v2191_v13 = vmul.f32 1.442695, %v2133_v16  ;;  %v5544_v52 = vpop.eup %5543  ;;  %v2561_v30 = vsub.f32 0.0, %v2529_v5 }
 0x175   : > { %2811 = vmatmul.bf16.gmra.mxu0 %v2670_v34  ;;  %v2559_v34 = vsub.f32 0.0, %v2527_v48  ;;  %v5546_v57 = vpop.eup %5545  ;;  %5551 = vpow2.f32 %v2187_v41  ;;  %v2614_v59 = vmul.f32 1.442695, %v2558_v25  ;;  %v2618_v48 = vmul.f32 1.442695, %v2560_v21 }
 0x176   : > { %7867 = vst [vmem:[#allocation65_spill] sm:$0xff] %v6930_v31  ;;  %v1608_v54 = vadd.f32 %v1581_v43, %v7868_v60  ;;  %4859 = vmatmul.msk.bf16.gmra.mxu2 %vm884_vm0, %v2671_v35  ;;  %v7872_v35 = vld [vmem:[#allocation55_spill] sm:$0xff]  ;;  %v7873_v60 = vld [vmem:[#allocation48_spill] sm:$0xff]  ;;  %v4693_v55 = vadd.f32 -5.3714285, %v7874_v9  ;;  %5553 = vpow2.f32 %v2191_v13  ;;  %v2106_v45 = vmul.f32 %v4694_v4, %v4694_v4 }
 0x177   : > { %v1533_v24 = vpop.f32.mrf.mxu1  ;;  %v4691_v27 = vadd.f32 -5.3714285, %v7872_v35  ;;  %v2225_v31 = vmul.f32 %v5538_v33, %v7873_v60  ;;  %v2652_v3 = vmul.f32 %v5542_v38, %v7873_v60  ;;  %v2616_v32 = vmul.f32 1.442695, %v2559_v34  ;;  %v5131_v33 = vld [vmem:[%s7561_s2 + $0x1e8] sm:$0xff]  ;;  %v7875_v38 = vld [vmem:[#allocation51_spill] sm:$0xff] }
 0x178   : > { %v2620_v44 = vmul.f32 1.442695, %v2561_v30  ;;  %v2651_v2 = vmul.f32 %v5544_v52, %v7807_v36  ;;  %v2653_v21 = vmul.f32 %v5546_v57, %v7866_v11  ;;  %5555 = vpow2.f32 %v2614_v59  ;;  %3216 = vmatpush.bf16.msrb.mxu1 %v5131_v33 }
 0x179   : > { %v2007_v43 = vpop.f32.mrf.mxu2  ;;  %v2103_v41 = vmul.f32 %v4691_v27, %v4691_v27  ;;  %v2245_v25 = vpack.c.bf16 %v2225_v31, %v6935_v28  ;;  %5557 = vpow2.f32 %v2618_v48  ;;  %v2138_v31 = vsub.f32 0.0, %v2106_v45 }
 0x17a   : > { %v1960_v42 = vpop.f32.mrf.mxu0  ;;  %v2008_v16 = vadd.f32 %v2007_v43, %v1958_v10  ;;  %v5548_v10 = vpop.eup %5547  ;;  %5559 = vpow2.f32 %v2616_v32  ;;  %v4791_v28 = vadd.f32 -6.5142856, %v7872_v35  ;;  %v2672_v52 = vpack.c.bf16 %v2652_v3, %v2650_v47 }
 0x17b   : > { %v1582_v7 = vpop.f32.mrf.mxu3  ;;  %v5550_v50 = vpop.eup %5549  ;;  %5561 = vpow2.f32 %v2620_v44  ;;  %v4793_v30 = vadd.f32 -6.5142856, %v7874_v9  ;;  %v2673_v59 = vpack.c.bf16 %v2653_v21, %v2651_v2  ;;  %v4792_v48 = vadd.f32 -6.5142856, %v7870_v49 }
 0x17c   : > { %v6946_v5 = vadd.f32 %v2008_v16, %v1608_v54  ;;  %v1583_v17 = vadd.f32 %v1582_v7, %v1533_v24  ;;  %v5141_v7 = vld [vmem:[%s7561_s2 + $0x238] sm:$0xff]  ;;  %v2136_v54 = vsub.f32 0.0, %v2104_v40  ;;  %v2105_v24 = vmul.f32 %v4693_v55, %v4693_v55  ;;  %v5552_v34 = vpop.eup %5551 }
 0x17d   : > { %3643 = vmatpush.bf16.msrb.mxu0 %v5141_v7  ;;  %v5554_v27 = vpop.eup %5553  ;;  %v2201_v33 = vmul.f32 1.442695, %v2138_v31  ;;  %v4794_v44 = vadd.f32 -6.5142856, %v7871_v37  ;;  %v2532_v7 = vmul.f32 %v4793_v30, %v4793_v30  ;;  %v2531_v31 = vmul.f32 %v4792_v48, %v4792_v48 }
 0x17e   : > { %v1609_v13 = vadd.f32 %v1583_v17, %v7875_v38  ;;  %v2135_v17 = vsub.f32 0.0, %v2103_v41  ;;  %v2197_v55 = vmul.f32 1.442695, %v2136_v54  ;;  %v2137_v16 = vsub.f32 0.0, %v2105_v24  ;;  %v5556_v32 = vpop.eup %5555 }
 0x17f   : > { %v1536_v4 = vpop.f32.mrf.mxu1  ;;  %v5558_v47 = vpop.eup %5557 }
 0x180   : > { %4760 = vmatmul.msk.bf16.gmra.mxu3 %vm884_vm0, %v2246_v18  ;;  %v2530_v18 = vmul.f32 %v4791_v28, %v4791_v28  ;;  %v2195_v38 = vmul.f32 1.442695, %v2135_v17  ;;  %v5560_v2 = vpop.eup %5559  ;;  %5563 = vpow2.f32 %v2197_v55  ;;  %v2199_v24 = vmul.f32 1.442695, %v2137_v16  ;;  %v7876_v17 = vld [vmem:[#allocation57_spill] sm:$0xff] }
 0x181   : > { %v2009_v57 = vpop.f32.mrf.mxu2  ;;  %v5562_v21 = vpop.eup %5561  ;;  %5565 = vpow2.f32 %v2201_v33  ;;  %v2227_v30 = vmul.f32 %v5552_v34, %v7876_v17  ;;  %v6975_v55 = vmul.f32 %v5560_v2, %v7817_v14  ;;  %v4866_v34 = vadd.f32 -7.6571426, %v7820_v62  ;;  %v5130_v2 = vld [vmem:[%s7561_s2 + $0x1e0] sm:$0xff] }
 0x182   : > { %v1963_v43 = vpop.f32.mrf.mxu0  ;;  %v2010_v40 = vadd.f32 %v2009_v57, %v1960_v42  ;;  %2389 = vmatmul.bf16.gmra.mxu1 %v2245_v25  ;;  %v2228_v42 = vmul.f32 %v5548_v10, %v7817_v14  ;;  %v2230_v25 = vmul.f32 %v5550_v50, %v7818_v61  ;;  %v2229_v10 = vmul.f32 %v5554_v27, %v6354_v8 }
 0x183   : > { %v1585_v45 = vpop.f32.mrf.mxu3  ;;  %5567 = vpow2.f32 %v2195_v38  ;;  %v2564_v50 = vsub.f32 0.0, %v2532_v7  ;;  %v6978_v16 = vmul.f32 %v5562_v21, %v7818_v61  ;;  %3217 = vmatpush.bf16.msrb.mxu1 %v5130_v2 }
 0x184   : > { %v6963_v3 = vadd.f32 %v2010_v40, %v1609_v13  ;;  %v1586_v41 = vadd.f32 %v1585_v45, %v1536_v4  ;;  %v2562_v13 = vsub.f32 0.0, %v2530_v18  ;;  %v2533_v4 = vmul.f32 %v4794_v44, %v4794_v44 }
 0x185   : > { %2816 = vmatmul.bf16.gmra.mxu0 %v2672_v52  ;;  %v4864_v52 = vadd.f32 -7.6571426, %v5936_v15  ;;  %5569 = vpow2.f32 %v2199_v24  ;;  %v2563_v45 = vsub.f32 0.0, %v2531_v31  ;;  %v2248_v33 = vpack.c.bf16 %v2230_v25, %v2228_v42  ;;  %v7878_v25 = vld [vmem:[#allocation54_spill] sm:$0xff] }
 0x186   : > { %v1610_v54 = vadd.f32 %v1586_v41, %v6643_v46  ;;  %4860 = vmatmul.msk.bf16.gmra.mxu2 %vm884_vm0, %v2673_v59  ;;  %v2654_v46 = vmul.f32 %v5556_v32, %v7876_v17  ;;  %v2656_v59 = vmul.f32 %v5558_v47, %v6354_v8  ;;  %v2622_v18 = vmul.f32 1.442695, %v2562_v13  ;;  %v5564_v38 = vpop.eup %5563 }
 0x187   : > { %v1538_v28 = vpop.f32.mrf.mxu1  ;;  %v2565_v44 = vsub.f32 0.0, %v2533_v4  ;;  %v2930_v41 = vmul.f32 %v4864_v52, %v4864_v52  ;;  %v2626_v7 = vmul.f32 1.442695, %v2564_v50  ;;  %v5566_v21 = vpop.eup %5565  ;;  %v2247_v24 = vpack.c.bf16 %v2229_v10, %v2227_v30 }
 0x188   : > { %v2674_v31 = vpack.c.bf16 %v2656_v59, %v2654_v46  ;;  %v2624_v4 = vmul.f32 1.442695, %v2563_v45  ;;  %v2932_v52 = vmul.f32 %v4866_v34, %v4866_v34  ;;  %5571 = vpow2.f32 %v2622_v18 }
 0x189   : > { %v2012_v57 = vpop.f32.mrf.mxu2  ;;  %v5568_v42 = vpop.eup %5567  ;;  %v2962_v30 = vsub.f32 0.0, %v2930_v41  ;;  %v4963_v10 = vadd.f32 -8.8, %v7821_v58  ;;  %v6997_v59 = vmul.f32 %v5564_v38, %v7823_v26  ;;  %5573 = vpow2.f32 %v2626_v7 }
 0x18a   : > { %v1965_v40 = vpop.f32.mrf.mxu0  ;;  %v2013_v48 = vadd.f32 %v2012_v57, %v1963_v43  ;;  %v4863_v43 = vadd.f32 -7.6571426, %v7821_v58  ;;  %v7877_v57 = vld [vmem:[#allocation7_spill] sm:$0xff]  ;;  %v7001_v34 = vmul.f32 %v5566_v21, %v6373_v51  ;;  %v7004_v18 = vmul.f32 %v5568_v42, %v6377_v6 }
 0x18b   : > { %v1587_v27 = vpop.f32.mrf.mxu3  ;;  %v4865_v8 = vadd.f32 -7.6571426, %v7877_v57  ;;  %v5570_v46 = vpop.eup %5569  ;;  %5575 = vpow2.f32 %v2624_v4  ;;  %v2964_v41 = vsub.f32 0.0, %v2932_v52  ;;  %v4966_v38 = vadd.f32 -8.8, %v7820_v62 }
 0x18c   : > { %v6981_v32 = vadd.f32 %v2013_v48, %v1610_v54  ;;  %v1588_v47 = vadd.f32 %v1587_v27, %v1538_v28  ;;  %v2675_v54 = vpack.c.bf16 %v6978_v16, %v6975_v55  ;;  %v5140_v28 = vld [vmem:[%s7561_s2 + $0x230] sm:$0xff]  ;;  %v2628_v48 = vmul.f32 1.442695, %v2565_v44 }
 0x18d   : > { %3644 = vmatpush.bf16.msrb.mxu0 %v5140_v28  ;;  %v2929_v55 = vmul.f32 %v4863_v43, %v4863_v43  ;;  %v4965_v16 = vadd.f32 -8.8, %v7877_v57  ;;  %v2931_v58 = vmul.f32 %v4865_v8, %v4865_v8  ;;  %v4964_v44 = vadd.f32 -8.8, %v5936_v15 }
 0x18e   : > { %v1611_v13 = vadd.f32 %v1588_v47, %v7878_v25  ;;  %v7009_v7 = vmul.f32 %v5570_v46, %v6392_v12  ;;  %5577 = vpow2.f32 %v2628_v48  ;;  %v2995_v2 = vmul.f32 1.442695, %v2962_v30  ;;  %v5572_v15 = vpop.eup %5571 }
 0x18f   : > { %v1541_v50 = vpop.f32.mrf.mxu1  ;;  %v3356_v43 = vmul.f32 %v4963_v10, %v4963_v10  ;;  %v2961_v8 = vsub.f32 0.0, %v2929_v55  ;;  %v3358_v42 = vmul.f32 %v4965_v16, %v4965_v16  ;;  %v5574_v25 = vpop.eup %5573  ;;  %v2999_v62 = vmul.f32 1.442695, %v2964_v41  ;;  %v7880_v55 = vld [vmem:[#allocation9_spill] sm:$0xff] }
 0x190   : > { %4761 = vmatmul.msk.bf16.gmra.mxu3 %vm884_vm0, %v2248_v33  ;;  %v3359_v28 = vmul.f32 %v4966_v38, %v4966_v38  ;;  %v2250_v48 = vpack.c.bf16 %v7001_v34, %v6997_v59  ;;  %5579 = vpow2.f32 %v2995_v2  ;;  %v7881_v59 = vld [vmem:[#allocation11_spill] sm:$0xff]  ;;  %v7882_v38 = vld [vmem:[#allocation12_spill] sm:$0xff]  ;;  %v2660_v2 = vmul.f32 %v5574_v25, %v6392_v12 }
 0x191   : > { %v2014_v45 = vpop.f32.mrf.mxu2  ;;  %v5576_v30 = vpop.eup %5575  ;;  %v2993_v10 = vmul.f32 1.442695, %v2961_v8  ;;  %v3390_v46 = vsub.f32 0.0, %v3358_v42  ;;  %v4867_v34 = vadd.f32 -7.6571426, %v7881_v59  ;;  %5581 = vpow2.f32 %v2999_v62 }
 0x192   : > { %v1968_v27 = vpop.f32.mrf.mxu0  ;;  %v2015_v33 = vadd.f32 %v2014_v45, %v1965_v40  ;;  %2394 = vmatmul.bf16.gmra.mxu1 %v2247_v24  ;;  %v2963_v40 = vsub.f32 0.0, %v2931_v58  ;;  %v3357_v24 = vmul.f32 %v4964_v44, %v4964_v44  ;;  %v2658_v58 = vmul.f32 %v5572_v15, %v6377_v6 }
 0x193   : > { %v1590_v47 = vpop.f32.mrf.mxu3  ;;  %v3424_v15 = vmul.f32 1.442695, %v3390_v46  ;;  %5583 = vpow2.f32 %v2993_v10  ;;  %v2933_v62 = vmul.f32 %v4867_v34, %v4867_v34  ;;  %v4969_v10 = vadd.f32 -8.8, %v7882_v38 }
 0x194   : > { %v7011_v21 = vadd.f32 %v2015_v33, %v1611_v13  ;;  %v1591_v57 = vadd.f32 %v1590_v47, %v1541_v50  ;;  %v2249_v13 = vpack.c.bf16 %v7009_v7, %v7004_v18  ;;  %v4868_v50 = vadd.f32 -7.6571426, %v5984_v63  ;;  %v5578_v16 = vpop.eup %5577 }
 0x195   : > { %2821 = vmatmul.bf16.gmra.mxu0 %v2674_v31  ;;  %v3388_v31 = vsub.f32 0.0, %v3356_v43  ;;  %v2997_v44 = vmul.f32 1.442695, %v2963_v40  ;;  %v3389_v33 = vsub.f32 0.0, %v3357_v24  ;;  %v3391_v18 = vsub.f32 0.0, %v3359_v28 }
 0x196   : > { %7879 = vst [vmem:[#allocation66_spill] sm:$0xff] %v7011_v21  ;;  %v1612_v4 = vadd.f32 %v1591_v57, %v6683_v39  ;;  %4861 = vmatmul.msk.bf16.gmra.mxu2 %vm884_vm0, %v2675_v54  ;;  %v4870_v39 = vadd.f32 -7.6571426, %v7880_v55  ;;  %v4869_v47 = vadd.f32 -7.6571426, %v7882_v38  ;;  %v2659_v43 = vmul.f32 %v5576_v30, %v7823_v26  ;;  %v5580_v28 = vpop.eup %5579 }
 0x197   : > { %v1543_v52 = vpop.f32.mrf.mxu1  ;;  %v3420_v57 = vmul.f32 1.442695, %v3388_v31  ;;  %v2934_v8 = vmul.f32 %v4868_v50, %v4868_v50  ;;  %v2661_v24 = vmul.f32 %v5578_v16, %v6373_v51  ;;  %5585 = vpow2.f32 %v2997_v44  ;;  %v5582_v50 = vpop.eup %5581 }
 0x198   : > { %v2936_v40 = vmul.f32 %v4870_v39, %v4870_v39  ;;  %v3426_v17 = vmul.f32 1.442695, %v3391_v18  ;;  %v2935_v25 = vmul.f32 %v4869_v47, %v4869_v47  ;;  %v2965_v44 = vsub.f32 0.0, %v2933_v62  ;;  %v7884_v62 = vld [vmem:[#allocation8_spill] sm:$0xff] }
 0x199   : > { %v2017_v54 = vpop.f32.mrf.mxu2  ;;  %5587 = vpow2.f32 %v3420_v57  ;;  %v2966_v31 = vsub.f32 0.0, %v2934_v8  ;;  %v2677_v16 = vpack.c.bf16 %v2661_v24, %v2659_v43  ;;  %v4968_v34 = vadd.f32 -8.8, %v5984_v63 }
 0x19a   : > { %v1970_v45 = vpop.f32.mrf.mxu0  ;;  %v2018_v41 = vadd.f32 %v2017_v54, %v1968_v27  ;;  %v3422_v27 = vmul.f32 1.442695, %v3389_v33  ;;  %v7883_v54 = vld [vmem:[#allocation5_spill] sm:$0xff]  ;;  %5589 = vpow2.f32 %v3424_v15  ;;  %v2968_v30 = vsub.f32 0.0, %v2936_v40 }
 0x19b   : > { %v1592_v7 = vpop.f32.mrf.mxu3  ;;  %v3003_v18 = vmul.f32 1.442695, %v2966_v31  ;;  %v4970_v47 = vadd.f32 -8.8, %v7880_v55  ;;  %v3001_v57 = vmul.f32 1.442695, %v2965_v44  ;;  %v3361_v40 = vmul.f32 %v4968_v34, %v4968_v34 }
 0x19c   : > { %v7026_v42 = vadd.f32 %v2018_v41, %v1612_v4  ;;  %v1593_v21 = vadd.f32 %v1592_v7, %v1543_v52  ;;  %v4967_v4 = vadd.f32 -8.8, %v7881_v59  ;;  %v2676_v52 = vpack.c.bf16 %v2660_v2, %v2658_v58 }
 0x19d   : > { %5591 = vpow2.f32 %v3422_v27  ;;  %v2967_v59 = vsub.f32 0.0, %v2935_v25  ;;  %v7038_v41 = vmul.f32 %v5582_v50, %v5979_v53 }
 0x19e   : > { %v1613_v6 = vadd.f32 %v1593_v21, %v7883_v54  ;;  %v7034_v21 = vmul.f32 %v5580_v28, %v5950_v22  ;;  %5593 = vpow2.f32 %v3426_v17  ;;  %v3360_v38 = vmul.f32 %v4967_v4, %v4967_v4 }
 0x19f   : > { %v1546_v12 = vpop.f32.mrf.mxu1  ;;  %v3005_v15 = vmul.f32 1.442695, %v2967_v59  ;;  %5595 = vpow2.f32 %v3003_v18  ;;  %v3363_v28 = vmul.f32 %v4970_v47, %v4970_v47 }
 0x1a0   : > { %4762 = vmatmul.msk.bf16.gmra.mxu3 %vm884_vm0, %v2250_v48  ;;  %v5584_v48 = vpop.eup %5583  ;;  %v3090_v54 = vpack.c.bf16 %v7038_v41, %v7034_v21 }
 0x1a1   : > { %v2019_v46 = vpop.f32.mrf.mxu2  ;;  %v5586_v7 = vpop.eup %5585  ;;  %v3057_v55 = vmul.f32 %v5584_v48, %v7884_v62  ;;  %v3395_v48 = vsub.f32 0.0, %v3363_v28 }
 0x1a2   : > { %v1973_v39 = vpop.f32.mrf.mxu0  ;;  %v2020_v33 = vadd.f32 %v2019_v46, %v1970_v45  ;;  %2399 = vmatmul.bf16.gmra.mxu1 %v2249_v13  ;;  %v3007_v45 = vmul.f32 1.442695, %v2968_v30  ;;  %v3362_v13 = vmul.f32 %v4969_v10, %v4969_v10  ;;  %v5588_v17 = vpop.eup %5587  ;;  %v3059_v25 = vmul.f32 %v5586_v7, %v5988_v1 }
 0x1a3   : > { %v1595_v58 = vpop.f32.mrf.mxu3  ;;  %v5590_v8 = vpop.eup %5589  ;;  %v3484_v50 = vmul.f32 %v5588_v17, %v7884_v62  ;;  %v4872_v30 = vadd.f32 -7.6571426, %v6049_v23  ;;  %v3393_v46 = vsub.f32 0.0, %v3361_v40 }
 0x1a4   : > { %v7041_v2 = vadd.f32 %v2020_v33, %v1613_v6  ;;  %v1596_v43 = vadd.f32 %v1595_v58, %v1546_v12  ;;  %v5592_v24 = vpop.eup %5591  ;;  %v3392_v6 = vsub.f32 0.0, %v3360_v38  ;;  %5597 = vpow2.f32 %v3007_v45  ;;  %v7887_v45 = vld [vmem:[#allocation19_spill] sm:$0xff] }
 0x1a5   : > { %2826 = vmatmul.bf16.gmra.mxu0 %v2676_v52  ;;  %v5594_v12 = vpop.eup %5593  ;;  %v3394_v31 = vsub.f32 0.0, %v3362_v13  ;;  %v3486_v52 = vmul.f32 %v5590_v8, %v5988_v1  ;;  %5599 = vpow2.f32 %v3001_v57  ;;  %v3485_v21 = vmul.f32 %v5592_v24, %v5950_v22  ;;  %v7886_v1 = vld [vmem:[#allocation18_spill] sm:$0xff] }
 0x1a6   : > { %v1614_v63 = vadd.f32 %v1596_v43, %v6722_v0  ;;  %4862 = vmatmul.msk.bf16.gmra.mxu2 %vm884_vm0, %v2677_v16  ;;  %5601 = vpow2.f32 %v3005_v15  ;;  %v7885_v16 = vld [vmem:[#allocation14_spill] sm:$0xff]  ;;  %v3487_v59 = vmul.f32 %v5594_v12, %v5979_v53  ;;  %v3428_v34 = vmul.f32 1.442695, %v3392_v6  ;;  %v5596_v47 = vpop.eup %5595 }
 0x1a7   : > { %v1548_v27 = vpop.f32.mrf.mxu1  ;;  %v4874_v44 = vadd.f32 -7.6571426, %v7885_v16  ;;  %v3432_v18 = vmul.f32 1.442695, %v3394_v31  ;;  %v4871_v38 = vadd.f32 -7.6571426, %v7886_v1  ;;  %v3089_v7 = vpack.c.bf16 %v3059_v25, %v3057_v55 }
 0x1a8   : > { %v2938_v43 = vmul.f32 %v4872_v30, %v4872_v30  ;;  %v4873_v13 = vadd.f32 -7.6571426, %v7887_v45  ;;  %v7888_v57 = vld [vmem:[#allocation6_spill] sm:$0xff]  ;;  %v3430_v22 = vmul.f32 1.442695, %v3393_v46  ;;  %v3517_v24 = vpack.c.bf16 %v3487_v59, %v3485_v21  ;;  %v7891_v59 = vld [vmem:[#allocation15_spill] sm:$0xff] }
 0x1a9   : > { %v2022_v0 = vpop.f32.mrf.mxu2  ;;  %v2940_v15 = vmul.f32 %v4874_v44, %v4874_v44  ;;  %v4971_v53 = vadd.f32 -8.8, %v7886_v1  ;;  %5603 = vpow2.f32 %v3428_v34  ;;  %v4973_v62 = vadd.f32 -8.8, %v7887_v45  ;;  %v7889_v55 = vld [vmem:[#allocation10_spill] sm:$0xff] }
 0x1aa   : > { %v1975_v4 = vpop.f32.mrf.mxu0  ;;  %v2023_v10 = vadd.f32 %v2022_v0, %v1973_v39  ;;  %v3516_v39 = vpack.c.bf16 %v3486_v52, %v3484_v50  ;;  %v5598_v17 = vpop.eup %5597  ;;  %v7064_v28 = vmul.f32 %v5596_v47, %v7889_v55  ;;  %5605 = vpow2.f32 %v3432_v18  ;;  %v7890_v50 = vld [vmem:[#allocation13_spill] sm:$0xff] }
 0x1ab   : > { %v1597_v33 = vpop.f32.mrf.mxu3  ;;  %v5600_v40 = vpop.eup %5599  ;;  %v2937_v12 = vmul.f32 %v4871_v38, %v4871_v38  ;;  %v4972_v25 = vadd.f32 -8.8, %v6049_v23  ;;  %v7068_v52 = vmul.f32 %v5598_v17, %v7890_v50  ;;  %v2970_v30 = vsub.f32 0.0, %v2938_v43 }
 0x1ac   : > { %v7055_v58 = vadd.f32 %v2023_v10, %v1614_v63  ;;  %v1598_v41 = vadd.f32 %v1597_v33, %v1548_v27  ;;  %v3434_v27 = vmul.f32 1.442695, %v3395_v48  ;;  %v5602_v6 = vpop.eup %5601  ;;  %v2939_v10 = vmul.f32 %v4873_v13, %v4873_v13  ;;  %v7892_v48 = vld [vmem:[#allocation16_spill] sm:$0xff]  ;;  %v7894_v13 = vld [vmem:[#allocation59_spill] sm:$0xff] }
 0x1ad   : > { %v4974_v46 = vadd.f32 -8.8, %v7885_v16  ;;  %5607 = vpow2.f32 %v3430_v22  ;;  %v3364_v33 = vmul.f32 %v4971_v53, %v4971_v53  ;;  %v7072_v34 = vmul.f32 %v5600_v40, %v7891_v59 }
 0x1ae   : > { %v1615_v8 = vadd.f32 %v1598_v41, %v7888_v57  ;;  %v7075_v23 = vmul.f32 %v5602_v6, %v7892_v48  ;;  %5609 = vpow2.f32 %v3434_v27  ;;  %v3366_v41 = vmul.f32 %v4973_v62, %v4973_v62  ;;  %v7897_v62 = vld [vmem:[#allocation26_spill] sm:$0xff] }
 0x1af   : > { %v2365_v63 = vpop.f32.mrf.mxu1  ;;  %v2969_v38 = vsub.f32 0.0, %v2937_v12  ;;  %v3365_v16 = vmul.f32 %v4972_v25, %v4972_v25  ;;  %v3011_v47 = vmul.f32 1.442695, %v2970_v30  ;;  %v3367_v43 = vmul.f32 %v4974_v46, %v4974_v46 }
 0x1b0   : > { %4955 = vmatmul.msk.bf16.vlgmr.msrb.gmra.mxu3 %vm884_vm0, %v3090_v54  ;;  %v2972_v54 = vsub.f32 0.0, %v2940_v15  ;;  %v3396_v22 = vsub.f32 0.0, %v3364_v33  ;;  %v7895_v15 = vld [vmem:[#allocation21_spill] sm:$0xff]  ;;  %v4875_v6 = vadd.f32 -7.6571426, %v7897_v62  ;;  %v3091_v25 = vpack.c.bf16 %v7075_v23, %v7072_v34 }
 0x1b1   : > { %v2024_v31 = vpop.f32.mrf.mxu2  ;;  %v4876_v53 = vadd.f32 -7.6571426, %v7895_v15  ;;  %v3397_v30 = vsub.f32 0.0, %v3365_v16  ;;  %5611 = vpow2.f32 %v3011_v47 }
 0x1b2   : > { %v2792_v0 = vpop.f32.mrf.mxu0  ;;  %v2025_v44 = vadd.f32 %v2024_v31, %v1975_v4  ;;  %3218 = vmatmul.bf16.vlgmr.msrb.gmra.mxu1 %v3089_v7  ;;  %v5604_v4 = vpop.eup %5603  ;;  %v2971_v7 = vsub.f32 0.0, %v2939_v10  ;;  %v3015_v57 = vmul.f32 1.442695, %v2972_v54 }
 0x1b3   : > { %v2414_v21 = vpop.f32.mrf.mxu3  ;;  %v5606_v45 = vpop.eup %5605  ;;  %v3488_v31 = vmul.f32 %v5604_v4, %v7891_v59  ;;  %v2941_v59 = vmul.f32 %v4875_v6, %v4875_v6  ;;  %v3438_v4 = vmul.f32 1.442695, %v3397_v30 }
 0x1b4   : > { %v7077_v18 = vadd.f32 %v2025_v44, %v1615_v8  ;;  %v2415_v1 = vadd.f32 %v2414_v21, %v2365_v63  ;;  %v3092_v8 = vpack.c.bf16 %v7068_v52, %v7064_v28  ;;  %v7896_v63 = vld [vmem:[#allocation22_spill] sm:$0xff]  ;;  %v5608_v12 = vpop.eup %5607  ;;  %v3490_v54 = vmul.f32 %v5606_v45, %v7892_v48 }
 0x1b5   : > { %3645 = vmatmul.bf16.vlgmr.msrb.gmra.mxu0 %v3516_v39  ;;  %v3398_v39 = vsub.f32 0.0, %v3366_v41  ;;  %v4878_v27 = vadd.f32 -7.6571426, %v7896_v63  ;;  %v5610_v10 = vpop.eup %5609  ;;  %v3013_v28 = vmul.f32 1.442695, %v2971_v7  ;;  %v3399_v52 = vsub.f32 0.0, %v3367_v43 }
 0x1b6   : > { %7893 = vst [vmem:[#allocation67_spill] sm:$0xff] %v7077_v18  ;;  %v2454_v17 = vadd.f32 %v2415_v1, %v7894_v13  ;;  %5055 = vmatmul.msk.bf16.vlgmr.msrb.gmra.mxu2 %vm884_vm0, %v3517_v24  ;;  %v3009_v24 = vmul.f32 1.442695, %v2969_v38  ;;  %v3436_v21 = vmul.f32 1.442695, %v3396_v22  ;;  %v2942_v41 = vmul.f32 %v4876_v53, %v4876_v53  ;;  %v7898_v1 = vld [vmem:[#allocation27_spill] sm:$0xff] }
 0x1b7   : > { %v2367_v40 = vpop.f32.mrf.mxu1  ;;  %v4877_v13 = vadd.f32 -7.6571426, %v7898_v1  ;;  %5613 = vpow2.f32 %v3015_v57  ;;  %v3440_v34 = vmul.f32 1.442695, %v3398_v39  ;;  %v2944_v23 = vmul.f32 %v4878_v27, %v4878_v27  ;;  %v7899_v7 = vld [vmem:[#allocation62_spill] sm:$0xff]  ;;  %v5612_v57 = vpop.eup %5611 }
 0x1b8   : > { %5615 = vpow2.f32 %v3009_v24  ;;  %v3489_v48 = vmul.f32 %v5608_v12, %v7889_v55  ;;  %v3491_v47 = vmul.f32 %v5610_v10, %v7890_v50  ;;  %v2974_v45 = vsub.f32 0.0, %v2942_v41 }
 0x1b9   : > { %v2841_v46 = vpop.f32.mrf.mxu2  ;;  %5617 = vpow2.f32 %v3013_v28  ;;  %v2943_v22 = vmul.f32 %v4877_v13, %v4877_v13  ;;  %v2976_v39 = vsub.f32 0.0, %v2944_v23  ;;  %v4977_v55 = vadd.f32 -8.8, %v7898_v1 }
 0x1ba   : > { %v2794_v44 = vpop.f32.mrf.mxu0  ;;  %v2842_v33 = vadd.f32 %v2841_v46, %v2792_v0  ;;  %v3442_v0 = vmul.f32 1.442695, %v3399_v52  ;;  %5619 = vpow2.f32 %v3436_v21  ;;  %v3519_v12 = vpack.c.bf16 %v3491_v47, %v3489_v48 }
 0x1bb   : > { %v2416_v18 = vpop.f32.mrf.mxu3  ;;  %5621 = vpow2.f32 %v3440_v34  ;;  %v3019_v10 = vmul.f32 1.442695, %v2974_v45  ;;  %v2975_v46 = vsub.f32 0.0, %v2943_v22  ;;  %v4976_v28 = vadd.f32 -8.8, %v7895_v15 }
 0x1bc   : > { %v7091_v38 = vadd.f32 %v2842_v33, %v2454_v17  ;;  %v2417_v16 = vadd.f32 %v2416_v18, %v2367_v40  ;;  %v2973_v17 = vsub.f32 0.0, %v2941_v59  ;;  %v4975_v18 = vadd.f32 -8.8, %v7897_v62 }
 0x1bd   : > { %v3518_v40 = vpack.c.bf16 %v3490_v54, %v3488_v31  ;;  %5623 = vpow2.f32 %v3438_v4  ;;  %v5614_v50 = vpop.eup %5613  ;;  %v3023_v33 = vmul.f32 1.442695, %v2976_v39  ;;  %v3370_v1 = vmul.f32 %v4977_v55, %v4977_v55  ;;  %v7902_v39 = vld [vmem:[#allocation24_spill] sm:$0xff] }
 0x1be   : > { %v2455_v43 = vadd.f32 %v2417_v16, %v7899_v7  ;;  %5625 = vpow2.f32 %v3442_v0  ;;  %v5616_v24 = vpop.eup %5615  ;;  %v3368_v31 = vmul.f32 %v4975_v18, %v4975_v18  ;;  %v4978_v13 = vadd.f32 -8.8, %v7896_v63  ;;  %v7901_v7 = vld [vmem:[#allocation23_spill] sm:$0xff] }
 0x1bf   : > { %v2370_v53 = vpop.f32.mrf.mxu1  ;;  %v5618_v52 = vpop.eup %5617  ;;  %v3068_v23 = vmul.f32 %v5614_v50, %v7838_v20  ;;  %5627 = vpow2.f32 %v3019_v10  ;;  %v3021_v16 = vmul.f32 1.442695, %v2975_v46  ;;  %v3369_v4 = vmul.f32 %v4976_v28, %v4976_v28  ;;  %v7903_v10 = vld [vmem:[#allocation29_spill] sm:$0xff] }
 0x1c0   : > { %4956 = vmatmul.msk.bf16.gmra.mxu3 %vm884_vm0, %v3092_v8  ;;  %v3017_v8 = vmul.f32 1.442695, %v2973_v17  ;;  %v5620_v54 = vpop.eup %5619  ;;  %5629 = vpow2.f32 %v3023_v33  ;;  %v3400_v0 = vsub.f32 0.0, %v3368_v31  ;;  %v3402_v63 = vsub.f32 0.0, %v3370_v1  ;;  %v7904_v1 = vld [vmem:[#allocation63_spill] sm:$0xff] }
 0x1c1   : > { %v2843_v27 = vpop.f32.mrf.mxu2  ;;  %v5622_v34 = vpop.eup %5621  ;;  %v3371_v45 = vmul.f32 %v4978_v13, %v4978_v13  ;;  %v3067_v17 = vmul.f32 %v5618_v52, %v7902_v39  ;;  %v4880_v18 = vadd.f32 -7.6571426, %v7843_v19  ;;  %v3401_v50 = vsub.f32 0.0, %v3369_v4  ;;  %v7906_v4 = vld [vmem:[#allocation35_spill] sm:$0xff] }
 0x1c2   : > { %v2797_v6 = vpop.f32.mrf.mxu0  ;;  %v2844_v30 = vadd.f32 %v2843_v27, %v2794_v44  ;;  %3223 = vmatmul.bf16.gmra.mxu1 %v3091_v25  ;;  %v7900_v44 = vld [vmem:[#allocation17_spill] sm:$0xff]  ;;  %5631 = vpow2.f32 %v3017_v8  ;;  %v3494_v55 = vmul.f32 %v5622_v34, %v7902_v39  ;;  %v4882_v46 = vadd.f32 -7.6571426, %v7903_v10 }
 0x1c3   : > { %v2419_v62 = vpop.f32.mrf.mxu3  ;;  %v3066_v25 = vmul.f32 %v5612_v57, %v7900_v44  ;;  %v5624_v59 = vpop.eup %5623  ;;  %5633 = vpow2.f32 %v3021_v16  ;;  %v3448_v33 = vmul.f32 1.442695, %v3402_v63  ;;  %v3403_v8 = vsub.f32 0.0, %v3371_v45 }
 0x1c4   : > { %v7100_v21 = vadd.f32 %v2844_v30, %v2455_v43  ;;  %v2420_v41 = vadd.f32 %v2419_v62, %v2370_v53  ;;  %v5626_v48 = vpop.eup %5625  ;;  %v3065_v43 = vmul.f32 %v5616_v24, %v7901_v7  ;;  %v3444_v30 = vmul.f32 1.442695, %v3400_v0 }
 0x1c5   : > { %3650 = vmatmul.bf16.gmra.mxu0 %v3518_v40  ;;  %v3094_v53 = vpack.c.bf16 %v3068_v23, %v3066_v25  ;;  %v3495_v24 = vmul.f32 %v5626_v48, %v7838_v20  ;;  %v5628_v28 = vpop.eup %5627  ;;  %v3446_v25 = vmul.f32 1.442695, %v3401_v50  ;;  %v2948_v16 = vmul.f32 %v4882_v46, %v4882_v46 }
 0x1c6   : > { %v2456_v15 = vadd.f32 %v2420_v41, %v6814_v29  ;;  %5056 = vmatmul.msk.bf16.gmra.mxu2 %vm884_vm0, %v3519_v12  ;;  %v3492_v29 = vmul.f32 %v5620_v54, %v7901_v7  ;;  %v3493_v12 = vmul.f32 %v5624_v59, %v7900_v44  ;;  %v5630_v31 = vpop.eup %5629  ;;  %v2946_v54 = vmul.f32 %v4880_v18, %v4880_v18  ;;  %v7905_v44 = vld [vmem:[#allocation34_spill] sm:$0xff] }
 0x1c7   : > { %v2372_v47 = vpop.f32.mrf.mxu1  ;;  %v4879_v23 = vadd.f32 -7.6571426, %v7905_v44  ;;  %5635 = vpow2.f32 %v3444_v30  ;;  %v3450_v7 = vmul.f32 1.442695, %v3403_v8  ;;  %v4980_v50 = vadd.f32 -8.8, %v7843_v19 }
 0x1c8   : > { %v5632_v41 = vpop.eup %5631  ;;  %v3520_v34 = vpack.c.bf16 %v3494_v55, %v3492_v29  ;;  %v3521_v59 = vpack.c.bf16 %v3495_v24, %v3493_v12  ;;  %5637 = vpow2.f32 %v3448_v33  ;;  %v2978_v18 = vsub.f32 0.0, %v2946_v54  ;;  %v7910_v12 = vld [vmem:[#allocation32_spill] sm:$0xff] }
 0x1c9   : > { %v2846_v22 = vpop.f32.mrf.mxu2  ;;  %v5634_v48 = vpop.eup %5633  ;;  %5639 = vpow2.f32 %v3446_v25  ;;  %v2980_v30 = vsub.f32 0.0, %v2948_v16  ;;  %v3373_v25 = vmul.f32 %v4980_v50, %v4980_v50 }
 0x1ca   : > { %v2799_v57 = vpop.f32.mrf.mxu0  ;;  %v2847_v40 = vadd.f32 %v2846_v22, %v2797_v6  ;;  %v3093_v6 = vpack.c.bf16 %v3067_v17, %v3065_v43  ;;  %v4979_v43 = vadd.f32 -8.8, %v7905_v44  ;;  %v7908_v22 = vld [vmem:[#allocation30_spill] sm:$0xff]  ;;  %v7909_v17 = vld [vmem:[#allocation31_spill] sm:$0xff]  ;;  %v7134_v24 = vmul.f32 %v5634_v48, %v7910_v12  ;;  %v7912_v48 = vld [vmem:[#allocation36_spill] sm:$0xff] }
 0x1cb   : > { %v2421_v27 = vpop.f32.mrf.mxu3  ;;  %v7126_v39 = vmul.f32 %v5630_v31, %v7908_v22  ;;  %v7129_v29 = vmul.f32 %v5632_v41, %v7909_v17  ;;  %5641 = vpow2.f32 %v3450_v7  ;;  %v3027_v31 = vmul.f32 1.442695, %v2978_v18  ;;  %v7911_v41 = vld [vmem:[#allocation20_spill] sm:$0xff] }
 0x1cc   : > { %v7115_v62 = vadd.f32 %v2847_v40, %v2456_v15  ;;  %v2422_v52 = vadd.f32 %v2421_v27, %v2372_v47  ;;  %v4881_v15 = vadd.f32 -7.6571426, %v7906_v4  ;;  %v7907_v47 = vld [vmem:[#allocation25_spill] sm:$0xff]  ;;  %v4981_v40 = vadd.f32 -8.8, %v7906_v4 }
 0x1cd   : > { %v7122_v0 = vmul.f32 %v5628_v28, %v7907_v47  ;;  %v4982_v28 = vadd.f32 -8.8, %v7903_v10  ;;  %v3372_v8 = vmul.f32 %v4979_v43, %v4979_v43  ;;  %v3095_v16 = vpack.c.bf16 %v7134_v24, %v7129_v29 }
 0x1ce   : > { %v2457_v13 = vadd.f32 %v2422_v52, %v7904_v1  ;;  %v2947_v46 = vmul.f32 %v4881_v15, %v4881_v15  ;;  %v4884_v7 = vadd.f32 -7.6571426, %v7912_v48  ;;  %5643 = vpow2.f32 %v3027_v31 }
 0x1cf   : > { %v2375_v20 = vpop.f32.mrf.mxu1  ;;  %v3096_v10 = vpack.c.bf16 %v7126_v39, %v7122_v0  ;;  %v3404_v15 = vsub.f32 0.0, %v3372_v8  ;;  %v3405_v50 = vsub.f32 0.0, %v3373_v25 }
 0x1d0   : > { %4957 = vmatmul.msk.bf16.gmra.mxu3 %vm884_vm0, %v3094_v53  ;;  %v2945_v53 = vmul.f32 %v4879_v23, %v4879_v23  ;;  %v2979_v23 = vsub.f32 0.0, %v2947_v46  ;;  %v7915_v46 = vld [vmem:[#allocation43_spill] sm:$0xff] }
 0x1d1   : > { %v2848_v63 = vpop.f32.mrf.mxu2  ;;  %v3454_v25 = vmul.f32 1.442695, %v3405_v50 }
 0x1d2   : > { %v2802_v45 = vpop.f32.mrf.mxu0  ;;  %v2849_v55 = vadd.f32 %v2848_v63, %v2799_v57  ;;  %3228 = vmatmul.bf16.gmra.mxu1 %v3093_v6  ;;  %v5636_v57 = vpop.eup %5635  ;;  %v3374_v6 = vmul.f32 %v4981_v40, %v4981_v40  ;;  %v2977_v1 = vsub.f32 0.0, %v2945_v53  ;;  %v7913_v40 = vld [vmem:[#allocation37_spill] sm:$0xff] }
 0x1d3   : > { %v2424_v27 = vpop.f32.mrf.mxu3  ;;  %v5638_v54 = vpop.eup %5637  ;;  %v3496_v4 = vmul.f32 %v5636_v57, %v7909_v17  ;;  %v4886_v0 = vadd.f32 -7.6571426, %v7913_v40  ;;  %v3029_v17 = vmul.f32 1.442695, %v2979_v23  ;;  %v2950_v57 = vmul.f32 %v4884_v7, %v4884_v7 }
 0x1d4   : > { %v7137_v52 = vadd.f32 %v2849_v55, %v2457_v13  ;;  %v2425_v33 = vadd.f32 %v2424_v27, %v2375_v20  ;;  %v3031_v13 = vmul.f32 1.442695, %v2980_v30  ;;  %v3375_v20 = vmul.f32 %v4982_v28, %v4982_v28  ;;  %v7914_v27 = vld [vmem:[#allocation42_spill] sm:$0xff] }
 0x1d5   : > { %3655 = vmatmul.bf16.gmra.mxu0 %v3520_v34  ;;  %v5640_v34 = vpop.eup %5639  ;;  %v3498_v63 = vmul.f32 %v5638_v54, %v7910_v12  ;;  %v3406_v18 = vsub.f32 0.0, %v3374_v6  ;;  %v3025_v53 = vmul.f32 1.442695, %v2977_v1  ;;  %v4883_v30 = vadd.f32 -7.6571426, %v7914_v27 }
 0x1d6   : > { %v2458_v19 = vadd.f32 %v2425_v33, %v7911_v41  ;;  %5057 = vmatmul.msk.bf16.gmra.mxu2 %vm884_vm0, %v3521_v59  ;;  %v5642_v39 = vpop.eup %5641  ;;  %5645 = vpow2.f32 %v3031_v13  ;;  %v3407_v24 = vsub.f32 0.0, %v3375_v20  ;;  %v4885_v28 = vadd.f32 -7.6571426, %v7915_v46  ;;  %v7916_v41 = vld [vmem:[#allocation64_spill] sm:$0xff] }
 0x1d7   : > { %v2377_v44 = vpop.f32.mrf.mxu1  ;;  %v3452_v12 = vmul.f32 1.442695, %v3404_v15  ;;  %v3497_v31 = vmul.f32 %v5640_v34, %v7907_v47  ;;  %v3499_v6 = vmul.f32 %v5642_v39, %v7908_v22  ;;  %v2952_v54 = vmul.f32 %v4886_v0, %v4886_v0  ;;  %v5644_v23 = vpop.eup %5643 }
 0x1d8   : > { %5647 = vpow2.f32 %v3025_v53  ;;  %v2949_v13 = vmul.f32 %v4883_v30, %v4883_v30  ;;  %v3522_v15 = vpack.c.bf16 %v3498_v63, %v3496_v4  ;;  %v2982_v47 = vsub.f32 0.0, %v2950_v57 }
 0x1d9   : > { %v2851_v43 = vpop.f32.mrf.mxu2  ;;  %5649 = vpow2.f32 %v3029_v17  ;;  %v4985_v22 = vadd.f32 -8.8, %v7915_v46  ;;  %v2984_v0 = vsub.f32 0.0, %v2952_v54  ;;  %v4984_v39 = vadd.f32 -8.8, %v7912_v48  ;;  %v7917_v48 = vld [vmem:[#allocation33_spill] sm:$0xff] }
 0x1da   : > { %v2804_v59 = vpop.f32.mrf.mxu0  ;;  %v2852_v55 = vadd.f32 %v2851_v43, %v2802_v45  ;;  %v3456_v45 = vmul.f32 1.442695, %v3406_v18  ;;  %v3458_v43 = vmul.f32 1.442695, %v3407_v24  ;;  %5651 = vpow2.f32 %v3452_v12 }
 0x1db   : > { %v2426_v29 = vpop.f32.mrf.mxu3  ;;  %v3523_v53 = vpack.c.bf16 %v3499_v6, %v3497_v31  ;;  %v2981_v50 = vsub.f32 0.0, %v2949_v13  ;;  %v4986_v63 = vadd.f32 -8.8, %v7913_v40  ;;  %v3035_v24 = vmul.f32 1.442695, %v2982_v47  ;;  %v7919_v6 = vld [vmem:[#allocation28_spill] sm:$0xff] }
 0x1dc   : > { %v7151_v33 = vadd.f32 %v2852_v55, %v2458_v19  ;;  %v2427_v8 = vadd.f32 %v2426_v29, %v2377_v44  ;;  %v2951_v19 = vmul.f32 %v4885_v28, %v4885_v28  ;;  %v4983_v44 = vadd.f32 -8.8, %v7914_v27  ;;  %v5646_v34 = vpop.eup %5645 }
 0x1dd   : > { %5653 = vpow2.f32 %v3456_v45  ;;  %v3378_v46 = vmul.f32 %v4985_v22, %v4985_v22  ;;  %v3039_v12 = vmul.f32 1.442695, %v2984_v0  ;;  %v3377_v57 = vmul.f32 %v4984_v39, %v4984_v39 }
 0x1de   : > { %v2459_v1 = vadd.f32 %v2427_v8, %v7916_v41  ;;  %5655 = vpow2.f32 %v3454_v25  ;;  %v3376_v4 = vmul.f32 %v4983_v44, %v4983_v44  ;;  %v5648_v30 = vpop.eup %5647  ;;  %v3033_v40 = vmul.f32 1.442695, %v2981_v50 }
 0x1df   : > { %v2380_v20 = vpop.f32.mrf.mxu1  ;;  %5657 = vpow2.f32 %v3458_v43  ;;  %v5650_v28 = vpop.eup %5649  ;;  %v3379_v13 = vmul.f32 %v4986_v63, %v4986_v63  ;;  %v7920_v43 = vld [vmem:[#allocation39_spill] sm:$0xff]  ;;  %v3409_v0 = vsub.f32 0.0, %v3377_v57 }
 0x1e0   : > { %4958 = vmatmul.msk.bf16.gmra.mxu3 %vm884_vm0, %v3096_v10  ;;  %v2983_v10 = vsub.f32 0.0, %v2951_v19  ;;  %v5652_v31 = vpop.eup %5651  ;;  %v3408_v25 = vsub.f32 0.0, %v3376_v4  ;;  %v3073_v19 = vmul.f32 %v5648_v30, %v7920_v43  ;;  %5659 = vpow2.f32 %v3035_v24 }
 0x1e1   : > { %v2853_v7 = vpop.f32.mrf.mxu2  ;;  %5661 = vpow2.f32 %v3039_v12  ;;  %v3411_v63 = vsub.f32 0.0, %v3379_v13  ;;  %v7924_v12 = vld [vmem:[#allocation49_spill] sm:$0xff] }
 0x1e2   : > { %v2807_v18 = vpop.f32.mrf.mxu0  ;;  %v2854_v55 = vadd.f32 %v2853_v7, %v2804_v59  ;;  %3233 = vmatmul.bf16.gmra.mxu1 %v3095_v16  ;;  %v3074_v59 = vmul.f32 %v5644_v23, %v7917_v48  ;;  %v7918_v16 = vld [vmem:[#allocation38_spill] sm:$0xff]  ;;  %v3410_v23 = vsub.f32 0.0, %v3378_v46  ;;  %5663 = vpow2.f32 %v3033_v40 }
 0x1e3   : > { %v2429_v27 = vpop.f32.mrf.mxu3  ;;  %v3076_v8 = vmul.f32 %v5646_v34, %v7918_v16  ;;  %v5654_v54 = vpop.eup %5653  ;;  %v7921_v34 = vld [vmem:[#allocation40_spill] sm:$0xff]  ;;  %v3460_v4 = vmul.f32 1.442695, %v3408_v25  ;;  %v7923_v46 = vld [vmem:[#allocation46_spill] sm:$0xff]  ;;  %v4887_v57 = vadd.f32 -7.6571426, %v7924_v12 }
 0x1e4   : > { %v7161_v29 = vadd.f32 %v2854_v55, %v2459_v1  ;;  %v2430_v17 = vadd.f32 %v2429_v27, %v2380_v20  ;;  %v3037_v1 = vmul.f32 1.442695, %v2983_v10  ;;  %v5656_v20 = vpop.eup %5655  ;;  %v3075_v7 = vmul.f32 %v5650_v28, %v7921_v34  ;;  %v7926_v25 = vld [vmem:[#allocation50_spill] sm:$0xff] }
 0x1e5   : > { %3660 = vmatmul.bf16.gmra.mxu0 %v3522_v15  ;;  %v5658_v44 = vpop.eup %5657  ;;  %v3098_v22 = vpack.c.bf16 %v3076_v8, %v3074_v59  ;;  %v3500_v55 = vmul.f32 %v5652_v31, %v7920_v43  ;;  %v3502_v10 = vmul.f32 %v5654_v54, %v7921_v34  ;;  %v3464_v24 = vmul.f32 1.442695, %v3410_v23 }
 0x1e6   : > { %v2460_v45 = vadd.f32 %v2430_v17, %v7919_v6  ;;  %5058 = vmatmul.msk.bf16.gmra.mxu2 %vm884_vm0, %v3523_v53  ;;  %v7922_v53 = vld [vmem:[#allocation45_spill] sm:$0xff]  ;;  %5665 = vpow2.f32 %v3037_v1  ;;  %v4890_v28 = vadd.f32 -7.6571426, %v7923_v46  ;;  %v3501_v59 = vmul.f32 %v5656_v20, %v7917_v48  ;;  %v5660_v31 = vpop.eup %5659 }
 0x1e7   : > { %v2382_v41 = vpop.f32.mrf.mxu1  ;;  %v4888_v50 = vadd.f32 -7.6571426, %v7922_v53  ;;  %v3462_v8 = vmul.f32 1.442695, %v3409_v0  ;;  %v7925_v6 = vld [vmem:[#allocation65_spill] sm:$0xff]  ;;  %v3097_v54 = vpack.c.bf16 %v3075_v7, %v3073_v19  ;;  %5667 = vpow2.f32 %v3460_v4 }
 0x1e8   : > { %v4889_v13 = vadd.f32 -7.6571426, %v7926_v25  ;;  %v3524_v48 = vpack.c.bf16 %v3502_v10, %v3500_v55  ;;  %5669 = vpow2.f32 %v3464_v24  ;;  %v2953_v0 = vmul.f32 %v4887_v57, %v4887_v57 }
 0x1e9   : > { %v2856_v15 = vpop.f32.mrf.mxu2  ;;  %v2954_v1 = vmul.f32 %v4888_v50, %v4888_v50  ;;  %5671 = vpow2.f32 %v3462_v8  ;;  %v4987_v19 = vadd.f32 -8.8, %v7924_v12  ;;  %v4988_v10 = vadd.f32 -8.8, %v7922_v53 }
 0x1ea   : > { %v2809_v47 = vpop.f32.mrf.mxu0  ;;  %v2857_v39 = vadd.f32 %v2856_v15, %v2807_v18  ;;  %v3503_v18 = vmul.f32 %v5658_v44, %v7918_v16  ;;  %v2956_v16 = vmul.f32 %v4890_v28, %v4890_v28  ;;  %v2955_v50 = vmul.f32 %v4889_v13, %v4889_v13 }
 0x1eb   : > { %v2431_v27 = vpop.f32.mrf.mxu3  ;;  %v3380_v8 = vmul.f32 %v4987_v19, %v4987_v19  ;;  %v4990_v12 = vadd.f32 -8.8, %v7923_v46 }
 0x1ec   : > { %v7172_v30 = vadd.f32 %v2857_v39, %v2460_v45  ;;  %v2432_v17 = vadd.f32 %v2431_v27, %v2382_v41  ;;  %v5662_v45 = vpop.eup %5661  ;;  %v3466_v41 = vmul.f32 1.442695, %v3411_v63  ;;  %v3525_v34 = vpack.c.bf16 %v3503_v18, %v3501_v59 }
 0x1ed   : > { %v5664_v23 = vpop.eup %5663  ;;  %v2986_v39 = vsub.f32 0.0, %v2954_v1  ;;  %v4989_v27 = vadd.f32 -8.8, %v7926_v25  ;;  %v3080_v55 = vmul.f32 %v5662_v45, %v7866_v11  ;;  %v2985_v18 = vsub.f32 0.0, %v2953_v0 }
 0x1ee   : > { %v2461_v40 = vadd.f32 %v2432_v17, %v7925_v6  ;;  %v5666_v20 = vpop.eup %5665  ;;  %5673 = vpow2.f32 %v3466_v41  ;;  %v3077_v24 = vmul.f32 %v5664_v23, %v7869_v56  ;;  %v2987_v6 = vsub.f32 0.0, %v2955_v50 }
 0x1ef   : > { %v2385_v43 = vpop.f32.mrf.mxu1  ;;  %v5668_v28 = vpop.eup %5667  ;;  %v3079_v59 = vmul.f32 %v5666_v20, %v7873_v60  ;;  %v3043_v53 = vmul.f32 1.442695, %v2986_v39  ;;  %v3381_v25 = vmul.f32 %v4988_v10, %v4988_v10  ;;  %v3412_v20 = vsub.f32 0.0, %v3380_v8 }
 0x1f0   : > { %4959 = vmatmul.msk.bf16.gmra.mxu3 %vm884_vm0, %v3098_v22  ;;  %v3078_v22 = vmul.f32 %v5660_v31, %v7807_v36  ;;  %v5670_v57 = vpop.eup %5669  ;;  %v3383_v46 = vmul.f32 %v4990_v12, %v4990_v12  ;;  %v3504_v19 = vmul.f32 %v5668_v28, %v7869_v56  ;;  %v4892_v10 = vadd.f32 -7.6571426, %v7870_v49 }
 0x1f1   : > { %v2858_v44 = vpop.f32.mrf.mxu2  ;;  %5675 = vpow2.f32 %v3043_v53  ;;  %v3413_v50 = vsub.f32 0.0, %v3381_v25 }
 0x1f2   : > { %v2812_v15 = vpop.f32.mrf.mxu0  ;;  %v2859_v7 = vadd.f32 %v2858_v44, %v2809_v47  ;;  %3238 = vmatmul.bf16.gmra.mxu1 %v3097_v54  ;;  %v2988_v47 = vsub.f32 0.0, %v2956_v16  ;;  %v5672_v54 = vpop.eup %5671  ;;  %v3100_v13 = vpack.c.bf16 %v3080_v55, %v3078_v22  ;;  %v3041_v16 = vmul.f32 1.442695, %v2985_v18 }
 0x1f3   : > { %v2434_v4 = vpop.f32.mrf.mxu3  ;;  %v3505_v39 = vmul.f32 %v5672_v54, %v7807_v36  ;;  %v3468_v55 = vmul.f32 1.442695, %v3412_v20  ;;  %v3470_v36 = vmul.f32 1.442695, %v3413_v50 }
 0x1f4   : > { %v7186_v63 = vadd.f32 %v2859_v7, %v2461_v40  ;;  %v2435_v17 = vadd.f32 %v2434_v4, %v2385_v43  ;;  %v3382_v40 = vmul.f32 %v4989_v27, %v4989_v27  ;;  %v3047_v45 = vmul.f32 1.442695, %v2988_v47  ;;  %v5674_v43 = vpop.eup %5673 }
 0x1f5   : > { %3665 = vmatmul.bf16.gmra.mxu0 %v3524_v48  ;;  %v3099_v48 = vpack.c.bf16 %v3079_v59, %v3077_v24  ;;  %v3506_v7 = vmul.f32 %v5670_v57, %v7873_v60  ;;  %v3507_v22 = vmul.f32 %v5674_v43, %v7866_v11  ;;  %v4894_v60 = vadd.f32 -7.6571426, %v7871_v37 }
 0x1f6   : > { %v2462_v31 = vadd.f32 %v2435_v17, %v6946_v5  ;;  %5059 = vmatmul.msk.bf16.gmra.mxu2 %vm884_vm0, %v3525_v34  ;;  %v3045_v5 = vmul.f32 1.442695, %v2987_v6  ;;  %v3414_v0 = vsub.f32 0.0, %v3382_v40  ;;  %5677 = vpow2.f32 %v3047_v45 }
 0x1f7   : > { %v2387_v1 = vpop.f32.mrf.mxu1  ;;  %5679 = vpow2.f32 %v3041_v16  ;;  %v5676_v47 = vpop.eup %5675  ;;  %v3526_v28 = vpack.c.bf16 %v3506_v7, %v3504_v19  ;;  %v3527_v59 = vpack.c.bf16 %v3507_v22, %v3505_v39  ;;  %v4891_v11 = vadd.f32 -7.6571426, %v7872_v35  ;;  %v7927_v19 = vld [vmem:[#allocation57_spill] sm:$0xff]  ;;  %v7928_v39 = vld [vmem:[#allocation58_spill] sm:$0xff] }
 0x1f8   : > { %5681 = vpow2.f32 %v3045_v5  ;;  %v3472_v56 = vmul.f32 1.442695, %v3414_v0  ;;  %v2958_v57 = vmul.f32 %v4892_v10, %v4892_v10  ;;  %v2960_v6 = vmul.f32 %v4894_v60, %v4894_v60 }
 0x1f9   : > { %v2861_v41 = vpop.f32.mrf.mxu2  ;;  %5683 = vpow2.f32 %v3468_v55  ;;  %v4991_v40 = vadd.f32 -8.8, %v7872_v35  ;;  %v3082_v25 = vmul.f32 %v5676_v47, %v7817_v14  ;;  %v2957_v16 = vmul.f32 %v4891_v11, %v4891_v11 }
 0x1fa   : > { %v2814_v23 = vpop.f32.mrf.mxu0  ;;  %v2862_v44 = vadd.f32 %v2861_v41, %v2812_v15  ;;  %v3415_v15 = vsub.f32 0.0, %v3383_v46  ;;  %5685 = vpow2.f32 %v3472_v56  ;;  %v4994_v35 = vadd.f32 -8.8, %v7871_v37 }
 0x1fb   : > { %v2436_v34 = vpop.f32.mrf.mxu3  ;;  %5687 = vpow2.f32 %v3470_v36  ;;  %v3384_v5 = vmul.f32 %v4991_v40, %v4991_v40  ;;  %v2989_v22 = vsub.f32 0.0, %v2957_v16 }
 0x1fc   : > { %v7196_v27 = vadd.f32 %v2862_v44, %v2462_v31  ;;  %v2437_v4 = vadd.f32 %v2436_v34, %v2387_v1  ;;  %v3474_v12 = vmul.f32 1.442695, %v3415_v15  ;;  %v5678_v31 = vpop.eup %5677  ;;  %v3387_v56 = vmul.f32 %v4994_v35, %v4994_v35 }
 0x1fd   : > { %v5680_v54 = vpop.eup %5679  ;;  %v3084_v44 = vmul.f32 %v5678_v31, %v7818_v61  ;;  %v3416_v47 = vsub.f32 0.0, %v3384_v5 }
 0x1fe   : > { %v2463_v17 = vadd.f32 %v2437_v4, %v6963_v3  ;;  %v4893_v3 = vadd.f32 -7.6571426, %v7874_v9  ;;  %v5682_v45 = vpop.eup %5681  ;;  %5689 = vpow2.f32 %v3474_v12  ;;  %v3081_v7 = vmul.f32 %v5680_v54, %v7927_v19 }
 0x1ff   : > { %v2390_v24 = vpop.f32.mrf.mxu1  ;;  %v5684_v0 = vpop.eup %5683  ;;  %v3083_v50 = vmul.f32 %v5682_v45, %v7928_v39  ;;  %v3419_v54 = vsub.f32 0.0, %v3387_v56  ;;  %v3476_v45 = vmul.f32 1.442695, %v3416_v47 }
 0x200   : > { %4960 = vmatmul.msk.bf16.gmra.mxu3 %vm884_vm0, %v3100_v13  ;;  %v4993_v13 = vadd.f32 -8.8, %v7874_v9  ;;  %v2959_v20 = vmul.f32 %v4893_v3, %v4893_v3  ;;  %v2992_v9 = vsub.f32 0.0, %v2960_v6  ;;  %v5686_v4 = vpop.eup %5685 }
 0x201   : > { %v2863_v18 = vpop.f32.mrf.mxu2  ;;  %v5688_v15 = vpop.eup %5687  ;;  %v3101_v11 = vpack.c.bf16 %v3083_v50, %v3081_v7  ;;  %v3510_v12 = vmul.f32 %v5686_v4, %v7928_v39 }
 0x202   : > { %v2817_v8 = vpop.f32.mrf.mxu0  ;;  %v2864_v53 = vadd.f32 %v2863_v18, %v2814_v23  ;;  %3243 = vmatmul.bf16.gmra.mxu1 %v3099_v48  ;;  %v4992_v23 = vadd.f32 -8.8, %v7870_v49  ;;  %v2990_v48 = vsub.f32 0.0, %v2958_v57  ;;  %v3386_v49 = vmul.f32 %v4993_v13, %v4993_v13 }
 0x203   : > { %v2439_v1 = vpop.f32.mrf.mxu3  ;;  %v3055_v36 = vmul.f32 1.442695, %v2992_v9  ;;  %v3508_v18 = vmul.f32 %v5684_v0, %v7927_v19  ;;  %v3509_v40 = vmul.f32 %v5688_v15, %v7817_v14  ;;  %v3482_v14 = vmul.f32 1.442695, %v3419_v54 }
 0x204   : > { %v7208_v43 = vadd.f32 %v2864_v53, %v2463_v17  ;;  %v2440_v41 = vadd.f32 %v2439_v1, %v2390_v24  ;;  %v3385_v55 = vmul.f32 %v4992_v23, %v4992_v23  ;;  %v2991_v17 = vsub.f32 0.0, %v2959_v20  ;;  %v7929_v1 = vld [vmem:[#allocation66_spill] sm:$0xff] }
 0x205   : > { %3670 = vmatmul.bf16.gmra.mxu0 %v3526_v28  ;;  %v3102_v24 = vpack.c.bf16 %v3084_v44, %v3082_v25  ;;  %v5690_v28 = vpop.eup %5689  ;;  %v3418_v57 = vsub.f32 0.0, %v3386_v49  ;;  %v3049_v53 = vmul.f32 1.442695, %v2989_v22  ;;  %v3528_v23 = vpack.c.bf16 %v3510_v12, %v3508_v18 }
 0x206   : > { %v2464_v46 = vadd.f32 %v2440_v41, %v6981_v32  ;;  %5060 = vmatmul.msk.bf16.gmra.mxu2 %vm884_vm0, %v3527_v59  ;;  %v3051_v32 = vmul.f32 1.442695, %v2990_v48  ;;  %v3417_v6 = vsub.f32 0.0, %v3385_v55  ;;  %v3511_v13 = vmul.f32 %v5690_v28, %v7818_v61 }
 0x207   : > { %v2392_v34 = vpop.f32.mrf.mxu1  ;;  %v3480_v16 = vmul.f32 1.442695, %v3418_v57 }
 0x208   : > { %5691 = vpow2.f32 %v3051_v32  ;;  %v3478_v48 = vmul.f32 1.442695, %v3417_v6  ;;  %v3529_v44 = vpack.c.bf16 %v3511_v13, %v3509_v40 }
 0x209   : > { %v2866_v37 = vpop.f32.mrf.mxu2  ;;  %5693 = vpow2.f32 %v3055_v36 }
 0x20a   : > { %v2819_v10 = vpop.f32.mrf.mxu0  ;;  %v2867_v60 = vadd.f32 %v2866_v37, %v2817_v8  ;;  %v3053_v8 = vmul.f32 1.442695, %v2991_v17  ;;  %5695 = vpow2.f32 %v3049_v53  ;;  %v7930_v17 = vld [vmem:[#allocation60_spill] sm:$0xff] }
 0x20b   : > { %v2441_v59 = vpop.f32.mrf.mxu3 }
 0x20c   : > { %v7219_v3 = vadd.f32 %v2867_v60, %v2464_v46  ;;  %v2442_v31 = vadd.f32 %v2441_v59, %v2392_v34  ;;  %5697 = vpow2.f32 %v3053_v8  ;;  %v7931_v60 = vld [vmem:[#allocation61_spill] sm:$0xff] }
 0x20d   : > { %5699 = vpow2.f32 %v3476_v45 }
 0x20e   : > { %v2465_v25 = vadd.f32 %v2442_v31, %v7929_v1  ;;  %v5692_v9 = vpop.eup %5691  ;;  %5701 = vpow2.f32 %v3480_v16 }
 0x20f   : > { %v2395_v41 = vpop.f32.mrf.mxu1  ;;  %v5694_v61 = vpop.eup %5693  ;;  %5703 = vpow2.f32 %v3478_v48  ;;  %v3086_v49 = vmul.f32 %v5692_v9, %v7823_v26 }
 0x210   : > { %4961 = vmatmul.msk.bf16.gmra.mxu3 %vm884_vm0, %v3102_v24  ;;  %5705 = vpow2.f32 %v3482_v14  ;;  %v5696_v19 = vpop.eup %5695  ;;  %v3088_v4 = vmul.f32 %v5694_v61, %v6373_v51  ;;  %v7932_v14 = vld [vmem:[#allocation67_spill] sm:$0xff] }
 0x211   : > { %v2868_v20 = vpop.f32.mrf.mxu2  ;;  %v3085_v56 = vmul.f32 %v5696_v19, %v7930_v17 }
 0x212   : > { %v2822_v35 = vpop.f32.mrf.mxu0  ;;  %v2869_v46 = vadd.f32 %v2868_v20, %v2819_v10  ;;  %3248 = vmatmul.bf16.gmra.mxu1 %v3101_v11  ;;  %v5698_v39 = vpop.eup %5697  ;;  %v3104_v47 = vpack.c.bf16 %v3088_v4, %v3086_v49 }
 0x213   : > { %v2444_v5 = vpop.f32.mrf.mxu3  ;;  %v5700_v22 = vpop.eup %5699  ;;  %v3087_v24 = vmul.f32 %v5698_v39, %v7931_v60 }
 0x214   : > { %v7225_v0 = vadd.f32 %v2869_v46, %v2465_v25  ;;  %v2445_v34 = vadd.f32 %v2444_v5, %v2395_v41  ;;  %v5702_v55 = vpop.eup %5701  ;;  %v3512_v11 = vmul.f32 %v5700_v22, %v7930_v17 }
 0x215   : > { %3675 = vmatmul.bf16.gmra.mxu0 %v3528_v23  ;;  %v5704_v10 = vpop.eup %5703  ;;  %v3514_v18 = vmul.f32 %v5702_v55, %v7931_v60  ;;  %v3103_v57 = vpack.c.bf16 %v3087_v24, %v3085_v56 }
 0x216   : > { %v2466_v7 = vadd.f32 %v2445_v34, %v7026_v42  ;;  %5061 = vmatmul.msk.bf16.gmra.mxu2 %vm884_vm0, %v3529_v44  ;;  %v5706_v36 = vpop.eup %5705  ;;  %v3513_v31 = vmul.f32 %v5704_v10, %v7823_v26 }
 0x217   : > { %v2397_v50 = vpop.f32.mrf.mxu1  ;;  %v3515_v53 = vmul.f32 %v5706_v36, %v6373_v51  ;;  %v3530_v40 = vpack.c.bf16 %v3514_v18, %v3512_v11 }
 0x219   : > { %v2871_v15 = vpop.f32.mrf.mxu2  ;;  %v3531_v25 = vpack.c.bf16 %v3515_v53, %v3513_v31 }
 0x21a   : > { %v2824_v37 = vpop.f32.mrf.mxu0  ;;  %v2872_v32 = vadd.f32 %v2871_v15, %v2822_v35 }
 0x21b   : > { %v2446_v42 = vpop.f32.mrf.mxu3 }
 0x21c   : > { %v7233_v28 = vadd.f32 %v2872_v32, %v2466_v7  ;;  %v2447_v59 = vadd.f32 %v2446_v42, %v2397_v50 }
 0x21e   : > { %v2467_v12 = vadd.f32 %v2447_v59, %v7041_v2 }
 0x21f   : > { %v2400_v6 = vpop.f32.mrf.mxu1 }
 0x220   : > { %4962 = vmatmul.msk.bf16.gmra.mxu3 %vm884_vm0, %v3104_v47 }
 0x221   : > { %v2873_v8 = vpop.f32.mrf.mxu2 }
 0x222   : > { %v2827_v54 = vpop.f32.mrf.mxu0  ;;  %v2874_v1 = vadd.f32 %v2873_v8, %v2824_v37  ;;  %3253 = vmatmul.bf16.gmra.mxu1 %v3103_v57 }
 0x223   : > { %v2449_v13 = vpop.f32.mrf.mxu3 }
 0x224   : > { %v7241_v45 = vadd.f32 %v2874_v1, %v2467_v12  ;;  %v2450_v41 = vadd.f32 %v2449_v13, %v2400_v6 }
 0x225   : > { %3680 = vmatmul.bf16.gmra.mxu0 %v3530_v40 }
 0x226   : > { %v2468_v2 = vadd.f32 %v2450_v41, %v7055_v58  ;;  %5062 = vmatmul.msk.bf16.gmra.mxu2 %vm884_vm0, %v3531_v25 }
 0x227   : > { %v2402_v26 = vpop.f32.mrf.mxu1 }
 0x229   : > { %v2876_v51 = vpop.f32.mrf.mxu2 }
 0x22a   : > { %v2829_v16 = vpop.f32.mrf.mxu0  ;;  %v2877_v23 = vadd.f32 %v2876_v51, %v2827_v54 }
 0x22b   : > { %v2451_v48 = vpop.f32.mrf.mxu3 }
 0x22c   : > { %v7245_v20 = vadd.f32 %v2877_v23, %v2468_v2  ;;  %v2452_v35 = vadd.f32 %v2451_v48, %v2402_v26 }
 0x22e   : > { %v2469_v46 = vadd.f32 %v2452_v35, %v7932_v14 }
 0x22f   : > { %v3219_v44 = vpop.f32.mrf.mxu1 }
 0x231   : > { %v2878_v9 = vpop.f32.mrf.mxu2 }
 0x232   : > { %v3646_v5 = vpop.f32.mrf.mxu0  ;;  %v2879_v61 = vadd.f32 %v2878_v9, %v2829_v16 }
 0x233   : > { %v3268_v34 = vpop.f32.mrf.mxu3 }
 0x234   : > { %v7248_v19 = vadd.f32 %v2879_v61, %v2469_v46  ;;  %v3269_v58 = vadd.f32 %v3268_v34, %v3219_v44 }
 0x236   : > { %v3308_v49 = vadd.f32 %v3269_v58, %v7091_v38 }
 0x237   : > { %v3221_v7 = vpop.f32.mrf.mxu1 }
 0x239   : > { %v3695_v39 = vpop.f32.mrf.mxu2 }
 0x23a   : > { %v3648_v50 = vpop.f32.mrf.mxu0  ;;  %v3696_v4 = vadd.f32 %v3695_v39, %v3646_v5 }
 0x23b   : > { %v3270_v22 = vpop.f32.mrf.mxu3 }
 0x23c   : > { %v7251_v55 = vadd.f32 %v3696_v4, %v3308_v49  ;;  %v3271_v15 = vadd.f32 %v3270_v22, %v3221_v7 }
 0x23e   : > { %3753 = vadd.xlane.f32.xlu0 %v7251_v55  ;;  %v3808_v37 = vmul.f32 %v7251_v55, %v7251_v55  ;;  %v3309_v56 = vadd.f32 %v3271_v15, %v7100_v21 }
 0x23f   : > { %v3224_v10 = vpop.f32.mrf.mxu1 }
 0x240   : > { %3824 = vadd.xlane.f32.xlu1 %v3808_v37 }
 0x241   : > { %v3697_v32 = vpop.f32.mrf.mxu2 }
 0x242   : > { %v3651_v17 = vpop.f32.mrf.mxu0  ;;  %v3698_v60 = vadd.f32 %v3697_v32, %v3648_v50 }
 0x243   : > { %v3273_v24 = vpop.f32.mrf.mxu3 }
 0x244   : > { %v7257_v36 = vadd.f32 %v3698_v60, %v3309_v56  ;;  %v3274_v38 = vadd.f32 %v3273_v24, %v3224_v10 }
 0x246   : > { %3755 = vadd.xlane.f32.xlu0 %v7257_v36  ;;  %v3809_v42 = vmul.f32 %v7257_v36, %v7257_v36  ;;  %v3310_v18 = vadd.f32 %v3274_v38, %v7115_v62 }
 0x247   : > { %v3226_v47 = vpop.f32.mrf.mxu1 }
 0x248   : > { %3826 = vadd.xlane.f32.xlu2 %v3809_v42 }
 0x249   : > { %v3700_v59 = vpop.f32.mrf.mxu2 }
 0x24a   : > { %v3653_v11 = vpop.f32.mrf.mxu0  ;;  %v3701_v12 = vadd.f32 %v3700_v59, %v3651_v17 }
 0x24b   : > { %v3275_v57 = vpop.f32.mrf.mxu3 }
 0x24c   : > { %v7263_v31 = vadd.f32 %v3701_v12, %v3310_v18  ;;  %v3276_v21 = vadd.f32 %v3275_v57, %v3226_v47 }
 0x24e   : > { %3757 = vadd.xlane.f32.xlu1 %v7263_v31  ;;  %v3810_v53 = vmul.f32 %v7263_v31, %v7263_v31  ;;  %v3311_v54 = vadd.f32 %v3276_v21, %v7137_v52 }
 0x24f   : > { %v3229_v6 = vpop.f32.mrf.mxu1 }
 0x250   : > { %3828 = vadd.xlane.f32.xlu0 %v3810_v53 }
 0x251   : > { %v3702_v40 = vpop.f32.mrf.mxu2 }
 0x252   : > { %v3656_v8 = vpop.f32.mrf.mxu0  ;;  %v3703_v1 = vadd.f32 %v3702_v40, %v3653_v11 }
 0x253   : > { %v3278_v25 = vpop.f32.mrf.mxu3 }
 0x254   : > { %v7269_v13 = vadd.f32 %v3703_v1, %v3311_v54  ;;  %v3279_v62 = vadd.f32 %v3278_v25, %v3229_v6 }
 0x256   : > { %3759 = vadd.xlane.f32.xlu1 %v7269_v13  ;;  %v3312_v51 = vadd.f32 %v3279_v62, %v7151_v33  ;;  %v3811_v35 = vmul.f32 %v7269_v13, %v7269_v13 }
 0x257   : > { %v3231_v41 = vpop.f32.mrf.mxu1 }
 0x259   : > { %v3705_v2 = vpop.f32.mrf.mxu2 }
 0x25a   : > { %v3658_v26 = vpop.f32.mrf.mxu0  ;;  %v3706_v16 = vadd.f32 %v3705_v2, %v3656_v8 }
 0x25b   : > { %v3280_v23 = vpop.f32.mrf.mxu3 }
 0x25c   : > { %v7273_v48 = vadd.f32 %v3706_v16, %v3312_v51  ;;  %v3281_v52 = vadd.f32 %v3280_v23, %v3231_v41 }
 0x25e   : > { %3761 = vadd.xlane.f32.xlu2 %v7273_v48  ;;  %3830 = vadd.xlane.f32.xlu1 %v3811_v35  ;;  %v3313_v9 = vadd.f32 %v3281_v52, %v7161_v29  ;;  %v3812_v33 = vmul.f32 %v7273_v48, %v7273_v48 }
 0x25f   : > { %v3234_v14 = vpop.f32.mrf.mxu1 }
 0x261   : > { %v3707_v46 = vpop.f32.mrf.mxu2 }
 0x262   : > { %v3661_v44 = vpop.f32.mrf.mxu0  ;;  %v3708_v5 = vadd.f32 %v3707_v46, %v3658_v26 }
 0x263   : > { %v3283_v61 = vpop.f32.mrf.mxu3 }
 0x264   : > { %v7279_v34 = vadd.f32 %v3708_v5, %v3313_v9  ;;  %v3284_v58 = vadd.f32 %v3283_v61, %v3234_v14 }
 0x266   : > { %3832 = vadd.xlane.f32.xlu2 %v3812_v33  ;;  %v3813_v7 = vmul.f32 %v7279_v34, %v7279_v34  ;;  %v3314_v4 = vadd.f32 %v3284_v58, %v7172_v30 }
 0x267   : > { %v3236_v39 = vpop.f32.mrf.mxu1 }
 0x268   : > { %3834 = vadd.xlane.f32.xlu0 %v3813_v7 }
 0x269   : > { %v3710_v50 = vpop.f32.mrf.mxu2 }
 0x26a   : > { %v3663_v49 = vpop.f32.mrf.mxu0  ;;  %v3711_v22 = vadd.f32 %v3710_v50, %v3661_v44  ;;  %v5805_v50 = vmov 128.0  }
 0x26b   : > { %v3285_v29 = vpop.f32.mrf.mxu3  ;;  %5707 = vrcp.f32 %v5805_v50 }
 0x26c   : > { %v7286_v15 = vadd.f32 %v3711_v22, %v3314_v4  ;;  %v3286_v37 = vadd.f32 %v3285_v29, %v3236_v39 }
 0x26e   : > { %3763 = vadd.xlane.f32.xlu2 %v7279_v34  ;;  %v3814_v10 = vmul.f32 %v7286_v15, %v7286_v15  ;;  %v3315_v60 = vadd.f32 %v3286_v37, %v7186_v63 }
 0x26f   : > { %v3239_v32 = vpop.f32.mrf.mxu1 }
 0x270   : > { %3765 = vadd.xlane.f32.xlu0 %v7286_v15  ;;  %3836 = vadd.xlane.f32.xlu1 %v3814_v10 }
 0x271   : > { %v3712_v17 = vpop.f32.mrf.mxu2  ;;  %v5708_v37 = vpop.eup %5707 }
 0x272   : > { %v3666_v56 = vpop.f32.mrf.mxu0  ;;  %v3713_v24 = vadd.f32 %v3712_v17, %v3663_v49  ;;  %vm3790_vm1 = vweird.f32 %v5708_v37 }
 0x273   : > { %v3288_v30 = vpop.f32.mrf.mxu3 }
 0x274   : > { %v7293_v38 = vadd.f32 %v3713_v24, %v3315_v60  ;;  %v3289_v42 = vadd.f32 %v3288_v30, %v3239_v32 }
 0x276   : > { %v3815_v47 = vmul.f32 %v7293_v38, %v7293_v38  ;;  %v3316_v12 = vadd.f32 %v3289_v42, %v7196_v27 }
 0x277   : > { %v3241_v59 = vpop.f32.mrf.mxu1 }
 0x278   : > { %3838 = vadd.xlane.f32.xlu2 %v3815_v47  ;;  %3767 = vadd.xlane.f32.xlu1 %v7293_v38 }
 0x279   : > { %v3715_v11 = vpop.f32.mrf.mxu2 }
 0x27a   : > { %v3668_v18 = vpop.f32.mrf.mxu0  ;;  %v3716_v57 = vadd.f32 %v3715_v11, %v3666_v56  ;;  %v3786_v56 = vmul.f32 128.0, %v5708_v37 }
 0x27b   : > { %v3290_v21 = vpop.f32.mrf.mxu3 }
 0x27c   : > { %v7299_v53 = vadd.f32 %v3716_v57, %v3316_v12  ;;  %v3291_v63 = vadd.f32 %v3290_v21, %v3241_v59  ;;  %v3787_v59 = vsub.f32 1.0, %v3786_v56 }
 0x27e   : > { %v3816_v6 = vmul.f32 %v7299_v53, %v7299_v53  ;;  %v3317_v1 = vadd.f32 %v3291_v63, %v7208_v43  ;;  %v3788_v57 = vmul.f32 %v5708_v37, %v3787_v59 }
 0x27f   : > { %v3244_v40 = vpop.f32.mrf.mxu1 }
 0x280   : > { %3769 = vadd.xlane.f32.xlu2 %v7299_v53  ;;  %3840 = vadd.xlane.f32.xlu0 %v3816_v6 }
 0x281   : > { %v3717_v8 = vpop.f32.mrf.mxu2 }
 0x282   : > { %v3671_v54 = vpop.f32.mrf.mxu0  ;;  %v3718_v25 = vadd.f32 %v3717_v8, %v3668_v18  ;;  %v3789_v8 = vadd.f32 %v5708_v37, %v3788_v57 }
 0x283   : > { %v3293_v62 = vpop.f32.mrf.mxu3 }
 0x284   : > { %v7305_v41 = vadd.f32 %v3718_v25, %v3317_v1  ;;  %v3294_v27 = vadd.f32 %v3293_v62, %v3244_v40 }
 0x286   : > { %v3817_v2 = vmul.f32 %v7305_v41, %v7305_v41  ;;  %v3318_v23 = vadd.f32 %v3294_v27, %v7219_v3 }
 0x287   : > { %v3246_v26 = vpop.f32.mrf.mxu1 }
 0x288   : > { %3771 = vadd.xlane.f32.xlu0 %v7305_v41  ;;  %3842 = vadd.xlane.f32.xlu1 %v3817_v2 }
 0x289   : > { %v3720_v51 = vpop.f32.mrf.mxu2 }
 0x28a   : > { %v3673_v16 = vpop.f32.mrf.mxu0  ;;  %v3721_v35 = vadd.f32 %v3720_v51, %v3671_v54 }
 0x28b   : > { %v3295_v52 = vpop.f32.mrf.mxu3 }
 0x28c   : > { %v7311_v14 = vadd.f32 %v3721_v35, %v3318_v23  ;;  %v3296_v43 = vadd.f32 %v3295_v52, %v3246_v26 }
 0x28e   : > { %v3818_v46 = vmul.f32 %v7311_v14, %v7311_v14  ;;  %v3319_v5 = vadd.f32 %v3296_v43, %v7225_v0 }
 0x28f   : > { %v3249_v44 = vpop.f32.mrf.mxu1 }
 0x290   : > { %3844 = vadd.xlane.f32.xlu2 %v3818_v46  ;;  %3773 = vadd.xlane.f32.xlu1 %v7311_v14 }
 0x291   : > { %v3722_v9 = vpop.f32.mrf.mxu2 }
 0x292   : > { %v3723_v61 = vadd.f32 %v3722_v9, %v3673_v16  ;;  %v3676_v33 = vpop.f32.mrf.mxu0 }
 0x293   : > { %v3298_v58 = vpop.f32.mrf.mxu3 }
 0x294   : > { %v7317_v7 = vadd.f32 %v3723_v61, %v3319_v5  ;;  %v3299_v3 = vadd.f32 %v3298_v58, %v3249_v44 }
 0x296   : > { %v3819_v39 = vmul.f32 %v7317_v7, %v7317_v7  ;;  %v3320_v22 = vadd.f32 %v3299_v3, %v7233_v28 }
 0x297   : > { %v3251_v49 = vpop.f32.mrf.mxu1 }
 0x298   : > { %3775 = vadd.xlane.f32.xlu2 %v7317_v7  ;;  %3846 = vadd.xlane.f32.xlu0 %v3819_v39 }
 0x299   : > { %v3725_v4 = vpop.f32.mrf.mxu2 }
 0x29a   : > { %v3726_v29 = vadd.f32 %v3725_v4, %v3676_v33  ;;  %v3678_v32 = vpop.f32.mrf.mxu0 }
 0x29b   : > { %v3300_v0 = vpop.f32.mrf.mxu3 }
 0x29c   : > { %v7323_v10 = vadd.f32 %v3726_v29, %v3320_v22  ;;  %v3301_v60 = vadd.f32 %v3300_v0, %v3251_v49 }
 0x29e   : > { %v3820_v17 = vmul.f32 %v7323_v10, %v7323_v10  ;;  %v3321_v28 = vadd.f32 %v3301_v60, %v7241_v45  ;;  %v7336_v45 = vsel %vm3790_vm1, %v5708_v37, %v3789_v8 }
 0x29f   : > { %v3254_v42 = vpop.f32.mrf.mxu1 }
 0x2a0   : > { %3777 = vadd.xlane.f32.xlu0 %v7323_v10  ;;  %3848 = vadd.xlane.f32.xlu1 %v3820_v17 }
 0x2a1   : > { %v3727_v24 = vpop.f32.mrf.mxu2 }
 0x2a2   : > { %v3728_v30 = vadd.f32 %v3727_v24, %v3678_v32  ;;  %v3681_v18 = vpop.f32.mrf.mxu0 }
 0x2a3   : > { %v3303_v47 = vpop.f32.mrf.mxu3 }
 0x2a4   : > { %v7329_v11 = vadd.f32 %v3728_v30, %v3321_v28  ;;  %v3304_v12 = vadd.f32 %v3303_v47, %v3254_v42 }
 0x2a6   : > { %v3322_v63 = vadd.f32 %v3304_v12, %v7245_v20  ;;  %v3821_v43 = vmul.f32 %v7329_v11, %v7329_v11 }
 0x2a7   : > { %v3256_v1 = vpop.f32.mrf.mxu1 }
 0x2a8   : > { %3779 = vadd.xlane.f32.xlu1 %v7329_v11 }
 0x2a9   : > { %v3730_v21 = vpop.f32.mrf.mxu2 }
 0x2aa   : > { %v3731_v6 = vadd.f32 %v3730_v21, %v3681_v18  ;;  %v3683_v62 = vpop.f32.mrf.mxu0  ;;  %v7367_v21 = vld [vmem:[%s7562_s3] ss:$0 sm:$0xff] }
 0x2ab   : > { %v3305_v40 = vpop.f32.mrf.mxu3 }
 0x2ac   : > { %v7333_v54 = vadd.f32 %v3731_v6, %v3322_v63  ;;  %v3306_v25 = vadd.f32 %v3305_v40, %v3256_v1  ;;  %v7372_v40 = vld [vmem:[%s7563_s4] ss:$0 sm:$0xff] }
 0x2ae   : > { %3781 = vadd.xlane.f32.xlu2 %v7333_v54  ;;  %v3323_v26 = vadd.f32 %v3306_v25, %v7248_v19  ;;  %v3822_v3 = vmul.f32 %v7333_v54, %v7333_v54 }
 0x2b1   : > { %v3732_v27 = vpop.f32.mrf.mxu2  ;;  %v3754_v2 = vpop.xlane.xlu0 %3753 }
 0x2b2   : > { %v3733_v51 = vadd.f32 %v3732_v27, %v3683_v62  ;;  %v3792_v20 = vmul.f32 %v7336_v45, %v3754_v2 }
 0x2b3   : > { %v3825_v16 = vpop.xlane.xlu1 %3824 }
 0x2b4   : > { %v7340_v23 = vadd.f32 %v3733_v51, %v3323_v26  ;;  %v3872_v35 = vmul.f32 %v3792_v20, %v3792_v20  ;;  %v3856_v52 = vmul.f32 %v3825_v16, %v7336_v45  ;;  %v3920_v57 = vsub.f32 %v7251_v55, %v3792_v20 }
 0x2b6   : > { %v3888_v46 = vsub.f32 %v3856_v52, %v3872_v35  ;;  %3850 = vadd.xlane.f32.xlu2 %v3821_v43  ;;  %3783 = vadd.xlane.f32.xlu0 %v7340_v23  ;;  %v3823_v44 = vmul.f32 %v7340_v23, %v7340_v23 }
 0x2b8   : > { %v3904_v19 = vmax.f32 %v3888_v46, 0.0  ;;  %3854 = vadd.xlane.f32.xlu1 %v3823_v44 }
 0x2b9   : > { %v3756_v9 = vpop.xlane.xlu0 %3755 }
 0x2ba   : > { %v3936_v5 = vadd.f32 1e-05, %v3904_v19  ;;  %v7349_v61 = vmul.f32 %v7336_v45, %v3756_v9 }
 0x2bb   : > { %v3827_v33 = vpop.xlane.xlu2 %3826 }
 0x2bc   : > { %5709 = vrsqrt.f32 %v3936_v5  ;;  %v3873_v58 = vmul.f32 %v7349_v61, %v7349_v61  ;;  %v3857_v39 = vmul.f32 %v3827_v33, %v7336_v45  ;;  %vm3958_vm3 = vweird.f32 %v3936_v5 }
 0x2bd   : > { %v3921_v44 = vsub.f32 %v7257_v36, %v7349_v61 }
 0x2be   : > { %3852 = vadd.xlane.f32.xlu0 %v3822_v3  ;;  %v3889_v50 = vsub.f32 %v3857_v39, %v3873_v58 }
 0x2c0   : > { %v3905_v49 = vmax.f32 %v3889_v50, 0.0 }
 0x2c1   : > { %v3758_v4 = vpop.xlane.xlu1 %3757 }
 0x2c2   : > { %v5710_v22 = vpop.eup %5709  ;;  %v7357_v29 = vmul.f32 %v7336_v45, %v3758_v4  ;;  %v3937_v37 = vadd.f32 1e-05, %v3905_v49 }
 0x2c3   : > { %v3953_v0 = vmul.f32 %v5710_v22, %v3936_v5  ;;  %v3829_v32 = vpop.xlane.xlu0 %3828  ;;  %vm3959_vm2 = vweird.f32 %v5710_v22 }
 0x2c4   : > { %v3874_v17 = vmul.f32 %v7357_v29, %v7357_v29  ;;  %v3858_v56 = vmul.f32 %v3829_v32, %v7336_v45  ;;  %5711 = vrsqrt.f32 %v3937_v37  ;;  %vm3960_vm4 = vmor %vm3958_vm3, %vm3959_vm2  ;;  %vm3968_vm6 = vweird.f32 %v3937_v37 }
 0x2c5   : > { %v3954_v60 = vmul.f32 %v5710_v22, %v3953_v0  ;;  %v3922_v32 = vsub.f32 %v7263_v31, %v7357_v29 }
 0x2c6   : > { %v3890_v24 = vsub.f32 %v3858_v56, %v3874_v17 }
 0x2c7   : > { %v3955_v30 = vmul.f32 0.5, %v3954_v60 }
 0x2c8   : > { %v3906_v42 = vmax.f32 %v3890_v24, 0.0 }
 0x2c9   : > { %v3956_v47 = vsub.f32 1.5, %v3955_v30  ;;  %v3760_v59 = vpop.xlane.xlu1 %3759 }
 0x2ca   : > { %v3938_v28 = vadd.f32 1e-05, %v3906_v42  ;;  %v5712_v18 = vpop.eup %5711  ;;  %v7377_v55 = vmul.f32 %v7336_v45, %v3760_v59 }
 0x2cb   : > { %v3957_v12 = vmul.f32 %v5710_v22, %v3956_v47  ;;  %v3963_v63 = vmul.f32 %v5712_v18, %v3937_v37  ;;  %vm3969_vm5 = vweird.f32 %v5712_v18 }
 0x2cc   : > { %5713 = vrsqrt.f32 %v3938_v28  ;;  %v3875_v16 = vmul.f32 %v7377_v55, %v7377_v55  ;;  %vm3970_vm7 = vmor %vm3968_vm6, %vm3969_vm5  ;;  %vm3978_vm9 = vweird.f32 %v3938_v28 }
 0x2cd   : > { %v3961_v6 = vsel %vm3960_vm4, %v5710_v22, %v3957_v12  ;;  %v3964_v1 = vmul.f32 %v5712_v18, %v3963_v63 }
 0x2ce   : > { %v4112_v8 = vmul.f32 %v3961_v6, %v3920_v57 }
 0x2cf   : > { %v3965_v62 = vmul.f32 0.5, %v3964_v1 }
 0x2d0   : > { %v4131_v25 = vmul.f32 %v7367_v21, %v4112_v8 }
 0x2d1   : > { %v3762_v27 = vpop.xlane.xlu2 %3761  ;;  %v3831_v2 = vpop.xlane.xlu1 %3830  ;;  %v3966_v20 = vsub.f32 1.5, %v3965_v62 }
 0x2d2   : > { %v5714_v26 = vpop.eup %5713  ;;  %v4150_v51 = vadd.f32 %v7372_v40, %v4131_v25  ;;  %v3859_v35 = vmul.f32 %v3831_v2, %v7336_v45  ;;  %v7391_v5 = vmul.f32 %v7336_v45, %v3762_v27 }
 0x2d3   : > { %v3973_v52 = vmul.f32 %v5714_v26, %v3938_v28  ;;  %v3967_v43 = vmul.f32 %v5712_v18, %v3966_v20  ;;  %vm3979_vm8 = vweird.f32 %v5714_v26 }
 0x2d4   : > { %4166 = vst [vmem:[%s7384_s11] sm:$0xff] %v4150_v51  ;;  %v3891_v46 = vsub.f32 %v3859_v35, %v3875_v16  ;;  %v3876_v36 = vmul.f32 %v7391_v5, %v7391_v5  ;;  %vm3980_vm10 = vmor %vm3978_vm9, %vm3979_vm8 }
 0x2d5   : > { %v3974_v19 = vmul.f32 %v5714_v26, %v3973_v52  ;;  %v3971_v9 = vsel %vm3970_vm7, %v5712_v18, %v3967_v43  ;;  %v3923_v52 = vsub.f32 %v7269_v13, %v7377_v55 }
 0x2d6   : > { %v3907_v33 = vmax.f32 %v3891_v46, 0.0  ;;  %v4113_v58 = vmul.f32 %v3971_v9, %v3921_v44 }
 0x2d7   : > { %v3975_v3 = vmul.f32 0.5, %v3974_v19 }
 0x2d8   : > { %v3939_v39 = vadd.f32 1e-05, %v3907_v33  ;;  %v4132_v50 = vmul.f32 %v7367_v21, %v4113_v58 }
 0x2d9   : > { %v3976_v49 = vsub.f32 1.5, %v3975_v3  ;;  %v3833_v4 = vpop.xlane.xlu2 %3832 }
 0x2da   : > { %5715 = vrsqrt.f32 %v3939_v39  ;;  %v3860_v61 = vmul.f32 %v3833_v4, %v7336_v45  ;;  %v4151_v22 = vadd.f32 %v7372_v40, %v4132_v50  ;;  %vm3988_vm12 = vweird.f32 %v3939_v39 }
 0x2db   : > { %v3977_v0 = vmul.f32 %v5714_v26, %v3976_v49  ;;  %v3835_v37 = vpop.xlane.xlu0 %3834 }
 0x2dc   : > { %v3892_v17 = vsub.f32 %v3860_v61, %v3876_v36  ;;  %4167 = vst [vmem:[%s7384_s11 + $0x8] sm:$0xff] %v4151_v22  ;;  %v3861_v63 = vmul.f32 %v3835_v37, %v7336_v45  ;;  %v3924_v37 = vsub.f32 %v7273_v48, %v7391_v5 }
 0x2dd   : > { %v3981_v56 = vsel %vm3980_vm10, %v5714_v26, %v3977_v0 }
 0x2de   : > { %v4114_v60 = vmul.f32 %v3981_v56, %v3922_v32  ;;  %v3908_v24 = vmax.f32 %v3892_v17, 0.0 }
 0x2e0   : > { %v5716_v30 = vpop.eup %5715  ;;  %v4133_v42 = vmul.f32 %v7367_v21, %v4114_v60  ;;  %v3940_v47 = vadd.f32 1e-05, %v3908_v24 }
 0x2e1   : > { %v3983_v59 = vmul.f32 %v5716_v30, %v3939_v39  ;;  %v3764_v18 = vpop.xlane.xlu2 %3763  ;;  %vm3989_vm11 = vweird.f32 %v5716_v30 }
 0x2e2   : > { %v4152_v12 = vadd.f32 %v7372_v40, %v4133_v42  ;;  %5717 = vrsqrt.f32 %v3940_v47  ;;  %v7404_v28 = vmul.f32 %v7336_v45, %v3764_v18  ;;  %vm3990_vm13 = vmor %vm3988_vm12, %vm3989_vm11  ;;  %vm3998_vm15 = vweird.f32 %v3940_v47 }
 0x2e3   : > { %v3984_v31 = vmul.f32 %v5716_v30, %v3983_v59  ;;  %v3766_v29 = vpop.xlane.xlu0 %3765  ;;  %v3837_v57 = vpop.xlane.xlu1 %3836 }
 0x2e4   : > { %4168 = vst [vmem:[%s7384_s11 + $0x10] sm:$0xff] %v4152_v12  ;;  %v3877_v6 = vmul.f32 %v7404_v28, %v7404_v28  ;;  %v7411_v8 = vmul.f32 %v7336_v45, %v3766_v29  ;;  %v3862_v27 = vmul.f32 %v3837_v57, %v7336_v45 }
 0x2e5   : > { %v3985_v1 = vmul.f32 0.5, %v3984_v31 }
 0x2e6   : > { %v3893_v25 = vsub.f32 %v3861_v63, %v3877_v6  ;;  %v3878_v62 = vmul.f32 %v7411_v8, %v7411_v8 }
 0x2e7   : > { %v3986_v2 = vsub.f32 1.5, %v3985_v1 }
 0x2e8   : > { %v5718_v26 = vpop.eup %5717  ;;  %v3909_v51 = vmax.f32 %v3893_v25, 0.0  ;;  %v3894_v20 = vsub.f32 %v3862_v27, %v3878_v62 }
 0x2e9   : > { %v3987_v16 = vmul.f32 %v5716_v30, %v3986_v2  ;;  %v3993_v35 = vmul.f32 %v5718_v26, %v3940_v47  ;;  %vm3999_vm14 = vweird.f32 %v5718_v26 }
 0x2ea   : > { %v3941_v43 = vadd.f32 1e-05, %v3909_v51  ;;  %v3910_v46 = vmax.f32 %v3894_v20, 0.0  ;;  %vm4000_vm0 = vmor %vm3998_vm15, %vm3999_vm14  ;;  %v3925_v20 = vsub.f32 %v7279_v34, %v7404_v28 }
 0x2eb   : > { %v3991_v44 = vsel %vm3990_vm13, %v5716_v30, %v3987_v16  ;;  %v3994_v19 = vmul.f32 %v5718_v26, %v3993_v35  ;;  %v3839_v9 = vpop.xlane.xlu2 %3838  ;;  %v3768_v33 = vpop.xlane.xlu1 %3767 }
 0x2ec   : > { %v4115_v58 = vmul.f32 %v3991_v44, %v3923_v52  ;;  %5719 = vrsqrt.f32 %v3941_v43  ;;  %v3942_v3 = vadd.f32 1e-05, %v3910_v46  ;;  %v7419_v49 = vmul.f32 %v7336_v45, %v3768_v33 }
 0x2ed   : > { %v3995_v50 = vmul.f32 0.5, %v3994_v19  ;;  %v3863_v13 = vmul.f32 %v3839_v9, %v7336_v45  ;;  %vm4008_vm2 = vweird.f32 %v3941_v43 }
 0x2ee   : > { %v4134_v39 = vmul.f32 %v7367_v21, %v4115_v58  ;;  %5721 = vrsqrt.f32 %v3942_v3  ;;  %v3879_v55 = vmul.f32 %v7419_v49, %v7419_v49  ;;  %vm4018_vm5 = vweird.f32 %v3942_v3 }
 0x2ef   : > { %v3996_v4 = vsub.f32 1.5, %v3995_v50 }
 0x2f0   : > { %v4153_v36 = vadd.f32 %v7372_v40, %v4134_v39  ;;  %v3895_v22 = vsub.f32 %v3863_v13, %v3879_v55 }
 0x2f1   : > { %v3997_v61 = vmul.f32 %v5718_v26, %v3996_v4 }
 0x2f2   : > { %v5720_v0 = vpop.eup %5719  ;;  %4169 = vst [vmem:[%s7384_s11 + $0x18] sm:$0xff] %v4153_v36  ;;  %v3911_v56 = vmax.f32 %v3895_v22, 0.0 }
 0x2f3   : > { %v4001_v32 = vsel %vm4000_vm0, %v5718_v26, %v3997_v61  ;;  %v4003_v17 = vmul.f32 %v5720_v0, %v3941_v43  ;;  %v3770_v60 = vpop.xlane.xlu2 %3769  ;;  %v3841_v24 = vpop.xlane.xlu0 %3840  ;;  %vm4009_vm1 = vweird.f32 %v5720_v0  ;;  %v3926_v43 = vsub.f32 %v7286_v15, %v7411_v8 }
 0x2f4   : > { %v5722_v30 = vpop.eup %5721  ;;  %v4116_v42 = vmul.f32 %v4001_v32, %v3924_v37  ;;  %v7430_v59 = vmul.f32 %v7336_v45, %v3770_v60  ;;  %v3943_v12 = vadd.f32 1e-05, %v3911_v56  ;;  %v3864_v5 = vmul.f32 %v3841_v24, %v7336_v45  ;;  %vm4010_vm4 = vmor %vm4008_vm2, %vm4009_vm1 }
 0x2f5   : > { %v4004_v18 = vmul.f32 %v5720_v0, %v4003_v17  ;;  %v4013_v47 = vmul.f32 %v5722_v30, %v3942_v3  ;;  %vm4019_vm3 = vweird.f32 %v5722_v30 }
 0x2f6   : > { %v4135_v31 = vmul.f32 %v7367_v21, %v4116_v42  ;;  %v3880_v48 = vmul.f32 %v7430_v59, %v7430_v59  ;;  %5723 = vrsqrt.f32 %v3943_v12  ;;  %vm4020_vm6 = vmor %vm4018_vm5, %vm4019_vm3  ;;  %vm4028_vm8 = vweird.f32 %v3943_v12 }
 0x2f7   : > { %v4005_v29 = vmul.f32 0.5, %v4004_v18  ;;  %v4014_v57 = vmul.f32 %v5722_v30, %v4013_v47 }
 0x2f8   : > { %v4154_v63 = vadd.f32 %v7372_v40, %v4135_v31  ;;  %v3896_v6 = vsub.f32 %v3864_v5, %v3880_v48 }
 0x2f9   : > { %v4006_v1 = vsub.f32 1.5, %v4005_v29  ;;  %v4015_v25 = vmul.f32 0.5, %v4014_v57 }
 0x2fa   : > { %4170 = vst [vmem:[%s7384_s11 + $0x20] sm:$0xff] %v4154_v63  ;;  %v3912_v62 = vmax.f32 %v3896_v6, 0.0 }
 0x2fb   : > { %v4007_v27 = vmul.f32 %v5720_v0, %v4006_v1  ;;  %v4016_v2 = vsub.f32 1.5, %v4015_v25  ;;  %v3772_v26 = vpop.xlane.xlu0 %3771  ;;  %v3843_v51 = vpop.xlane.xlu1 %3842 }
 0x2fc   : > { %v3944_v16 = vadd.f32 1e-05, %v3912_v62  ;;  %v7441_v35 = vmul.f32 %v7336_v45, %v3772_v26  ;;  %v5724_v52 = vpop.eup %5723  ;;  %v3865_v28 = vmul.f32 %v3843_v51, %v7336_v45  ;;  %v3928_v62 = vsub.f32 %v7299_v53, %v7430_v59 }
 0x2fd   : > { %v4011_v46 = vsel %vm4010_vm4, %v5720_v0, %v4007_v27  ;;  %v4017_v44 = vmul.f32 %v5722_v30, %v4016_v2  ;;  %v4023_v9 = vmul.f32 %v5724_v52, %v3943_v12  ;;  %vm4029_vm7 = vweird.f32 %v5724_v52 }
 0x2fe   : > { %v4117_v19 = vmul.f32 %v4011_v46, %v3925_v20  ;;  %5725 = vrsqrt.f32 %v3944_v16  ;;  %v3881_v34 = vmul.f32 %v7441_v35, %v7441_v35  ;;  %vm4030_vm9 = vmor %vm4028_vm8, %vm4029_vm7  ;;  %vm4038_vm11 = vweird.f32 %v3944_v16 }
 0x2ff   : > { %v4021_v33 = vsel %vm4020_vm6, %v5722_v30, %v4017_v44  ;;  %v4024_v39 = vmul.f32 %v5724_v52, %v4023_v9  ;;  %v3927_v30 = vsub.f32 %v7293_v38, %v7419_v49 }
 0x300   : > { %v4136_v58 = vmul.f32 %v7367_v21, %v4117_v19  ;;  %v4118_v50 = vmul.f32 %v4021_v33, %v3926_v43  ;;  %v3897_v3 = vsub.f32 %v3865_v28, %v3881_v34 }
 0x301   : > { %v4025_v8 = vmul.f32 0.5, %v4024_v39 }
 0x302   : > { %v4155_v4 = vadd.f32 %v7372_v40, %v4136_v58  ;;  %v4137_v15 = vmul.f32 %v7367_v21, %v4118_v50  ;;  %v3913_v13 = vmax.f32 %v3897_v3, 0.0 }
 0x303   : > { %v3845_v55 = vpop.xlane.xlu2 %3844  ;;  %v3774_v36 = vpop.xlane.xlu1 %3773  ;;  %v4026_v0 = vsub.f32 1.5, %v4025_v8 }
 0x304   : > { %v5726_v61 = vpop.eup %5725  ;;  %4171 = vst [vmem:[%s7384_s11 + $0x28] sm:$0xff] %v4155_v4  ;;  %v4156_v22 = vadd.f32 %v7372_v40, %v4137_v15  ;;  %v7454_v37 = vmul.f32 %v7336_v45, %v3774_v36  ;;  %v3945_v17 = vadd.f32 1e-05, %v3913_v13  ;;  %v3866_v60 = vmul.f32 %v3845_v55, %v7336_v45 }
 0x305   : > { %v4033_v32 = vmul.f32 %v5726_v61, %v3944_v16  ;;  %v4027_v56 = vmul.f32 %v5724_v52, %v4026_v0  ;;  %vm4039_vm10 = vweird.f32 %v5726_v61  ;;  %v3929_v4 = vsub.f32 %v7305_v41, %v7441_v35 }
 0x306   : > { %4172 = vst [vmem:[%s7384_s11 + $0x30] sm:$0xff] %v4156_v22  ;;  %v3882_v24 = vmul.f32 %v7454_v37, %v7454_v37  ;;  %5727 = vrsqrt.f32 %v3945_v17  ;;  %vm4040_vm12 = vmor %vm4038_vm11, %vm4039_vm10  ;;  %vm4048_vm14 = vweird.f32 %v3945_v17  ;;  %v3930_v41 = vsub.f32 %v7311_v14, %v7454_v37 }
 0x307   : > { %v4034_v42 = vmul.f32 %v5726_v61, %v4033_v32  ;;  %v4031_v18 = vsel %vm4030_vm9, %v5724_v52, %v4027_v56 }
 0x308   : > { %v3898_v47 = vsub.f32 %v3866_v60, %v3882_v24  ;;  %v4119_v31 = vmul.f32 %v4031_v18, %v3927_v30 }
 0x309   : > { %v4035_v48 = vmul.f32 0.5, %v4034_v42 }
 0x30a   : > { %v3914_v5 = vmax.f32 %v3898_v47, 0.0  ;;  %v4138_v29 = vmul.f32 %v7367_v21, %v4119_v31 }
 0x30b   : > { %v4036_v12 = vsub.f32 1.5, %v4035_v48  ;;  %v3776_v57 = vpop.xlane.xlu2 %3775  ;;  %v3847_v63 = vpop.xlane.xlu0 %3846 }
 0x30c   : > { %v3946_v6 = vadd.f32 1e-05, %v3914_v5  ;;  %v7464_v1 = vmul.f32 %v7336_v45, %v3776_v57  ;;  %v5728_v38 = vpop.eup %5727  ;;  %v4157_v49 = vadd.f32 %v7372_v40, %v4138_v29  ;;  %v3867_v51 = vmul.f32 %v3847_v63, %v7336_v45 }
 0x30d   : > { %v4037_v25 = vmul.f32 %v5726_v61, %v4036_v12  ;;  %v4043_v27 = vmul.f32 %v5728_v38, %v3945_v17  ;;  %vm4049_vm13 = vweird.f32 %v5728_v38 }
 0x30e   : > { %5729 = vrsqrt.f32 %v3946_v6  ;;  %4173 = vst [vmem:[%s7384_s11 + $0x38] sm:$0xff] %v4157_v49  ;;  %v3883_v26 = vmul.f32 %v7464_v1, %v7464_v1  ;;  %vm4050_vm15 = vmor %vm4048_vm14, %vm4049_vm13  ;;  %vm4058_vm1 = vweird.f32 %v3946_v6  ;;  %v3931_v63 = vsub.f32 %v7317_v7, %v7464_v1 }
 0x30f   : > { %v4041_v2 = vsel %vm4040_vm12, %v5726_v61, %v4037_v25  ;;  %v4044_v52 = vmul.f32 %v5728_v38, %v4043_v27 }
 0x310   : > { %v4120_v20 = vmul.f32 %v4041_v2, %v3928_v62  ;;  %v3899_v46 = vsub.f32 %v3867_v51, %v3883_v26 }
 0x311   : > { %v4045_v16 = vmul.f32 0.5, %v4044_v52 }
 0x312   : > { %v4139_v44 = vmul.f32 %v7367_v21, %v4120_v20  ;;  %v3915_v19 = vmax.f32 %v3899_v46, 0.0 }
 0x313   : > { %v3778_v43 = vpop.xlane.xlu0 %3777  ;;  %v3849_v53 = vpop.xlane.xlu1 %3848  ;;  %v4046_v33 = vsub.f32 1.5, %v4045_v16 }
 0x314   : > { %v5730_v59 = vpop.eup %5729  ;;  %v4158_v9 = vadd.f32 %v7372_v40, %v4139_v44  ;;  %v7476_v34 = vmul.f32 %v7336_v45, %v3778_v43  ;;  %v3947_v58 = vadd.f32 1e-05, %v3915_v19  ;;  %v3868_v3 = vmul.f32 %v3849_v53, %v7336_v45 }
 0x315   : > { %v4053_v28 = vmul.f32 %v5730_v59, %v3946_v6  ;;  %v4047_v50 = vmul.f32 %v5728_v38, %v4046_v33  ;;  %vm4059_vm0 = vweird.f32 %v5730_v59 }
 0x316   : > { %4174 = vst [vmem:[%s7384_s11 + $0x40] sm:$0xff] %v4158_v9  ;;  %v3884_v39 = vmul.f32 %v7476_v34, %v7476_v34  ;;  %5731 = vrsqrt.f32 %v3947_v58  ;;  %vm4060_vm2 = vmor %vm4058_vm1, %vm4059_vm0  ;;  %vm4068_vm4 = vweird.f32 %v3947_v58  ;;  %v3932_v43 = vsub.f32 %v7323_v10, %v7476_v34 }
 0x317   : > { %v4054_v15 = vmul.f32 %v5730_v59, %v4053_v28  ;;  %v4051_v8 = vsel %vm4050_vm15, %v5728_v38, %v4047_v50 }
 0x318   : > { %v3900_v13 = vsub.f32 %v3868_v3, %v3884_v39  ;;  %v4121_v55 = vmul.f32 %v4051_v8, %v3929_v4 }
 0x319   : > { %v4055_v36 = vmul.f32 0.5, %v4054_v15 }
 0x31a   : > { %v3916_v61 = vmax.f32 %v3900_v13, 0.0  ;;  %v4140_v22 = vmul.f32 %v7367_v21, %v4121_v55 }
 0x31b   : > { %v4056_v0 = vsub.f32 1.5, %v4055_v36  ;;  %v3780_v48 = vpop.xlane.xlu1 %3779 }
 0x31c   : > { %v3948_v32 = vadd.f32 1e-05, %v3916_v61  ;;  %v5732_v17 = vpop.eup %5731  ;;  %v4159_v56 = vadd.f32 %v7372_v40, %v4140_v22  ;;  %v7493_v37 = vmul.f32 %v7336_v45, %v3780_v48 }
 0x31d   : > { %v4057_v60 = vmul.f32 %v5730_v59, %v4056_v0  ;;  %v4063_v35 = vmul.f32 %v5732_v17, %v3947_v58  ;;  %vm4069_vm3 = vweird.f32 %v5732_v17 }
 0x31e   : > { %5733 = vrsqrt.f32 %v3948_v32  ;;  %4175 = vst [vmem:[%s7384_s11 + $0x48] sm:$0xff] %v4159_v56  ;;  %vm4070_vm5 = vmor %vm4068_vm4, %vm4069_vm3  ;;  %v3885_v2 = vmul.f32 %v7493_v37, %v7493_v37  ;;  %vm4078_vm7 = vweird.f32 %v3948_v32 }
 0x31f   : > { %v4061_v24 = vsel %vm4060_vm2, %v5730_v59, %v4057_v60  ;;  %v4064_v42 = vmul.f32 %v5732_v17, %v4063_v35 }
 0x320   : > { %v4122_v30 = vmul.f32 %v4061_v24, %v3930_v41 }
 0x321   : > { %v3782_v18 = vpop.xlane.xlu2 %3781  ;;  %v4065_v31 = vmul.f32 0.5, %v4064_v42 }
 0x322   : > { %v4141_v47 = vmul.f32 %v7367_v21, %v4122_v30  ;;  %v3806_v33 = vmul.f32 %v7336_v45, %v3782_v18  ;;  %v3933_v30 = vsub.f32 %v7329_v11, %v7493_v37 }
 0x323   : > { %v4066_v12 = vsub.f32 1.5, %v4065_v31 }
 0x324   : > { %v5734_v5 = vpop.eup %5733  ;;  %v4160_v29 = vadd.f32 %v7372_v40, %v4141_v47  ;;  %v3886_v15 = vmul.f32 %v3806_v33, %v3806_v33 }
 0x325   : > { %v4073_v57 = vmul.f32 %v5734_v5, %v3948_v32  ;;  %v4067_v14 = vmul.f32 %v5732_v17, %v4066_v12  ;;  %vm4079_vm6 = vweird.f32 %v5734_v5 }
 0x326   : > { %4176 = vst [vmem:[%s7384_s11 + $0x50] sm:$0xff] %v4160_v29  ;;  %vm4080_vm8 = vmor %vm4078_vm7, %vm4079_vm6 }
 0x327   : > { %v4074_v6 = vmul.f32 %v5734_v5, %v4073_v57  ;;  %v4071_v38 = vsel %vm4070_vm5, %v5732_v17, %v4067_v14 }
 0x328   : > { %v4123_v49 = vmul.f32 %v4071_v38, %v3931_v63  ;;  %v3934_v38 = vsub.f32 %v7333_v54, %v3806_v33 }
 0x329   : > { %v4075_v25 = vmul.f32 0.5, %v4074_v6  ;;  %v3851_v62 = vpop.xlane.xlu2 %3850  ;;  %v3784_v27 = vpop.xlane.xlu0 %3783 }
 0x32a   : > { %v3869_v26 = vmul.f32 %v3851_v62, %v7336_v45  ;;  %v3807_v51 = vmul.f32 %v7336_v45, %v3784_v27  ;;  %v4142_v20 = vmul.f32 %v7367_v21, %v4123_v49 }
 0x32b   : > { %v4076_v52 = vsub.f32 1.5, %v4075_v25  ;;  %v3855_v7 = vpop.xlane.xlu1 %3854 }
 0x32c   : > { %v3901_v1 = vsub.f32 %v3869_v26, %v3885_v2  ;;  %v3887_v46 = vmul.f32 %v3807_v51, %v3807_v51  ;;  %v3871_v44 = vmul.f32 %v3855_v7, %v7336_v45  ;;  %v4161_v16 = vadd.f32 %v7372_v40, %v4142_v20 }
 0x32d   : > { %v4077_v19 = vmul.f32 %v5734_v5, %v4076_v52  ;;  %v3935_v48 = vsub.f32 %v7340_v23, %v3807_v51 }
 0x32e   : > { %v3917_v53 = vmax.f32 %v3901_v1, 0.0  ;;  %v3903_v59 = vsub.f32 %v3871_v44, %v3887_v46  ;;  %4177 = vst [vmem:[%s7384_s11 + $0x58] sm:$0xff] %v4161_v16 }
 0x32f   : > { %v4081_v9 = vsel %vm4080_vm8, %v5734_v5, %v4077_v19 }
 0x330   : > { %v4124_v28 = vmul.f32 %v4081_v9, %v3932_v43  ;;  %v3949_v58 = vadd.f32 1e-05, %v3917_v53  ;;  %v3919_v50 = vmax.f32 %v3903_v59, 0.0 }
 0x331   : > { %v3853_v39 = vpop.xlane.xlu0 %3852 }
 0x332   : > { %v4143_v3 = vmul.f32 %v7367_v21, %v4124_v28  ;;  %5735 = vrsqrt.f32 %v3949_v58  ;;  %v3951_v4 = vadd.f32 1e-05, %v3919_v50  ;;  %v3870_v8 = vmul.f32 %v3853_v39, %v7336_v45 }
 0x333   : > { %vm4088_vm10 = vweird.f32 %v3949_v58 }
 0x334   : > { %v4162_v10 = vadd.f32 %v7372_v40, %v4143_v3  ;;  %5737 = vrsqrt.f32 %v3951_v4  ;;  %v3902_v34 = vsub.f32 %v3870_v8, %v3886_v15  ;;  %vm4108_vm13 = vweird.f32 %v3951_v4 }
 0x336   : > { %4178 = vst [vmem:[%s7384_s11 + $0x60] sm:$0xff] %v4162_v10  ;;  %v3918_v13 = vmax.f32 %v3902_v34, 0.0 }
 0x338   : > { %v5736_v55 = vpop.eup %5735  ;;  %v3950_v61 = vadd.f32 1e-05, %v3918_v13 }
 0x339   : > { %v4083_v36 = vmul.f32 %v5736_v55, %v3949_v58  ;;  %vm4089_vm9 = vweird.f32 %v5736_v55 }
 0x33a   : > { %v5738_v22 = vpop.eup %5737  ;;  %5739 = vrsqrt.f32 %v3950_v61  ;;  %vm4090_vm12 = vmor %vm4088_vm10, %vm4089_vm9  ;;  %vm4098_vm0 = vweird.f32 %v3950_v61 }
 0x33b   : > { %v4084_v0 = vmul.f32 %v5736_v55, %v4083_v36  ;;  %v4103_v32 = vmul.f32 %v5738_v22, %v3951_v4  ;;  %vm4109_vm11 = vweird.f32 %v5738_v22 }
 0x33c   : > { %vm4110_vm14 = vmor %vm4108_vm13, %vm4109_vm11 }
 0x33d   : > { %v4085_v17 = vmul.f32 0.5, %v4084_v0  ;;  %v4104_v56 = vmul.f32 %v5738_v22, %v4103_v32 }
 0x33f   : > { %v4086_v60 = vsub.f32 1.5, %v4085_v17  ;;  %v4105_v41 = vmul.f32 0.5, %v4104_v56 }
 0x340   : > { %v5740_v35 = vpop.eup %5739 }
 0x341   : > { %v4087_v45 = vmul.f32 %v5736_v55, %v4086_v60  ;;  %v4106_v24 = vsub.f32 1.5, %v4105_v41  ;;  %v4093_v42 = vmul.f32 %v5740_v35, %v3950_v61  ;;  %vm4099_vm15 = vweird.f32 %v5740_v35 }
 0x342   : > { %vm4100_vm1 = vmor %vm4098_vm0, %vm4099_vm15 }
 0x343   : > { %v4091_v18 = vsel %vm4090_vm12, %v5736_v55, %v4087_v45  ;;  %v4107_v47 = vmul.f32 %v5738_v22, %v4106_v24  ;;  %v4094_v5 = vmul.f32 %v5740_v35, %v4093_v42 }
 0x344   : > { %v4125_v31 = vmul.f32 %v4091_v18, %v3933_v30 }
 0x345   : > { %v4111_v29 = vsel %vm4110_vm14, %v5738_v22, %v4107_v47  ;;  %v4095_v14 = vmul.f32 0.5, %v4094_v5 }
 0x346   : > { %v4144_v12 = vmul.f32 %v7367_v21, %v4125_v31  ;;  %v4127_v57 = vmul.f32 %v4111_v29, %v3935_v48 }
 0x347   : > { %v4096_v63 = vsub.f32 1.5, %v4095_v14 }
 0x348   : > { %v4163_v11 = vadd.f32 %v7372_v40, %v4144_v12  ;;  %v4146_v37 = vmul.f32 %v7367_v21, %v4127_v57 }
 0x349   : > { %v4097_v6 = vmul.f32 %v5740_v35, %v4096_v63 }
 0x34a   : > { %4179 = vst [vmem:[%s7384_s11 + $0x68] sm:$0xff] %v4163_v11  ;;  %v4165_v23 = vadd.f32 %v7372_v40, %v4146_v37 }
 0x34b   : > { %v4101_v49 = vsel %vm4100_vm1, %v5740_v35, %v4097_v6 }
 0x34c   : > { %4181 = vst [vmem:[%s7384_s11 + $0x78] sm:$0xff] %v4165_v23  ;;  %v4126_v25 = vmul.f32 %v4101_v49, %v3934_v38 }
 0x34e   : > { %v4145_v62 = vmul.f32 %v7367_v21, %v4126_v25 }
 0x350   : > { %v4164_v27 = vadd.f32 %v7372_v40, %v4145_v62 }
 0x352   : > { %4180 = vst [vmem:[%s7384_s11 + $0x70] sm:$0xff] %v4164_v27 }
 0x353   : > { %5768 = shalt.err (!%p5765_p3)
}
 0x354   : > { %s5806_s9 = smov 128   ;;  %s5807_s10 = smov 8  }
 0x355   : > { %5151 = dma.vmem_to_hbm [thread:$0]  (%p5876_p5), %s4196_s22, 2048, %s4198_s17, %s4183_s15, %s5806_s9, %s5806_s9, %s5807_s10  }
 0x356 PF: > { %p5157_p4 = scmp.ge.s32.totalorder %s5803_s21, 2  ;;  %s4212_s11 = sand.u32 1, %s5791_s18  }
 0x357   : > { %s4213_s12 = scalar_lea.sflag [#allocation3], %s4212_s11 }
 0x358   : > { %p5154_p7 = pnand %p5157_p4, %p5880_p6 }
 0x35a   : > { %p5155_p8 = pneg %p5154_p7 }
 0x35c   : > { %5786 = dma.done.wait (%p5155_p8), %s4213_s12, 2048  }
 0x35d   : > { %5788 = vsyncadd (%p5155_p8), %s4213_s12, 4294965248  ;;  %p15_p9 = scmp.ge.s32.totalorder %s5863_s24, 6   ;;  %s7933_s18 = smov %s5795_s19 }
 0x35e   : > { %s7934_s19 = smov %s5799_s20  ;;  %s7935_s20 = smov %s5874_s27 }
 0x35f   : > { %s7936_s21 = smov %s5863_s24  ;;  %17 = sbr.rel (!%p15_p9) target bundleno = 3 (0x3), region = 85 }
 0x364   :  { %4219 = vsyncpa [#allocation3], 1 }
 0x365   :  { %4221 = vsyncpa [#allocation3 + $0x1], 1 }

</bundles_post_ra>
